<compile_context>
chip_gen: v7x
topology: tpu7x:2x2x1
jax: 0.10.0
libtpu: 0.0.40
codegen_flags: <defaults>
</compile_context>

<pallas_src>
import jax
import jax.numpy as jnp
from jax.experimental import pallas as pl
from jax.experimental.pallas import tpu as pltpu


BATCH_TILE = 128   # preferred rows per tile (MXU-friendly); min effective 16.


def _round_up(n, m):
    return ((n + m - 1) // m) * m


def lstm_qnet_kernel(x_ref, wih_ref, whh_ref, b_ref,
                     w1_ref, b1_ref, w2_ref, b2_ref, out_ref, xz_ref):
    """Whole forward pass (LSTM over time + fc1 + relu + fc2) for one batch tile.

    x_ref:   (T*Bt, D)   f32   time-major, pre-flattened input slab
    wih_ref: (D, 4H)     bf16  transposed weight_ih_l0, gate order [i,f,o,g]
    whh_ref: (H, 4H)     bf16  transposed weight_hh_l0, gate order [i,f,o,g]
    b_ref:   (1, 4H)     f32   bias_ih + bias_hh, gate order [i,f,o,g]
    w1_ref:  (H, 128)    bf16   b1_ref: (1, 128)   f32
    w2_ref:  (128, Opad) bf16   b2_ref: (1, Opad)  f32   (lane-padded fc2)
    out_ref: (Bt, Opad)  f32
    xz_ref:  (T*Bt, 4H)  f32   VMEM scratch for the hoisted input projection
    """
    TB, _ = x_ref.shape
    H = whh_ref.shape[0]
    Bt = out_ref.shape[0]
    T = TB // Bt

    # --- Hoisted input projection: one big MXU matmul, parked in VMEM. ------
    xz_ref[...] = jnp.dot(x_ref[...].astype(jnp.bfloat16), wih_ref[...],
                          preferred_element_type=jnp.float32) + b_ref[...]

    h = jnp.zeros((Bt, H), jnp.float32)
    c = jnp.zeros((Bt, H), jnp.float32)

    # --- Recurrence, fully unrolled (static T). -----------------------------
    for t in range(T):
        # NOTE: re-read W_hh from VMEM each step (no long-lived vreg pin);
        # weight-stationary MXU driving intentionally omitted for portability.
        z = xz_ref[t * Bt:(t + 1) * Bt, :] + jnp.dot(
            h.astype(jnp.bfloat16), whh_ref[...],
            preferred_element_type=jnp.float32)                      # (Bt, 4H)
        # Gate columns are [i, f, o, g]: one sigmoid over the contiguous
        # [i,f,o] slab, one tanh for g.  Cell/hidden math stays f32.
        ifo = jax.nn.sigmoid(z[:, :3 * H])
        g_g = jnp.tanh(z[:, 3 * H:])
        i_g = ifo[:, 0 * H:1 * H]
        f_g = ifo[:, 1 * H:2 * H]
        o_g = ifo[:, 2 * H:3 * H]
        c = f_g * c + i_g * g_g
        h = o_g * jnp.tanh(c)

    # --- fc1 -> ReLU -> fc2 on the last hidden state (lane-dense output). ---
    y = jnp.dot(h.astype(jnp.bfloat16), w1_ref[...],
                preferred_element_type=jnp.float32) + b1_ref[...]
    y = jnp.maximum(y, 0.0)
    out = jnp.dot(y.astype(jnp.bfloat16), w2_ref[...],
                  preferred_element_type=jnp.float32) + b2_ref[...]
    out_ref[...] = out.astype(out_ref.dtype)


def lstm_qnetwork_forward(x, params, output_dim):
    """x: (B, T, D) batch_first, like the PyTorch module. Returns (B, output_dim) f32."""
    B, T, D = x.shape
    H = params["whh_t"].shape[0]
    O_pad = params["w2_t"].shape[1]

    # Large batches get 128-row tiles; small batches get a 16-row-aligned tile.
    bt = min(BATCH_TILE, _round_up(B, 16))
    b_pad = _round_up(B, bt)
    if b_pad != B:
        x = jnp.pad(x, ((0, b_pad - B), (0, 0), (0, 0)))
    n_tiles = b_pad // bt

    # Per-tile, time-major, pre-flattened (T*bt, D) slab (wrapper-side layout
    # plumbing — removes the in-kernel sublane-merging reshape).
    x_slab = (x.reshape(n_tiles, bt, T, D)
               .transpose(0, 2, 1, 3)
               .reshape(n_tiles, T * bt, D))

    def const(arr):
        return pl.BlockSpec(arr.shape, lambda i, s=arr.shape: tuple(0 for _ in s))

    out = pl.pallas_call(
        lstm_qnet_kernel,
        out_shape=jax.ShapeDtypeStruct((b_pad, O_pad), jnp.float32),
        grid_spec=pltpu.PrefetchScalarGridSpec(
            num_scalar_prefetch=0,
            grid=(n_tiles,),
            in_specs=[
                pl.BlockSpec((None, T * bt, D), lambda i: (i, 0, 0)),
                const(params["wih_t"]),
                const(params["whh_t"]),
                const(params["b_lstm"]),
                const(params["w1_t"]),
                const(params["b1"]),
                const(params["w2_t"]),
                const(params["b2"]),
            ],
            out_specs=pl.BlockSpec((bt, O_pad), lambda i: (i, 0)),
            scratch_shapes=[pltpu.VMEM((T * bt, 4 * H), jnp.float32)],
        ),
        compiler_params=pltpu.CompilerParams(
            dimension_semantics=("parallel",)),
    )(x_slab, params["wih_t"], params["whh_t"], params["b_lstm"],
      params["w1_t"], params["b1"], params["w2_t"], params["b2"])
    return out[:B, :output_dim]


def init_params(key, input_dim, output_dim, hidden_size=128):
    """Raw PyTorch-layout params, uniform(-1/sqrt(H), 1/sqrt(H)) like nn.LSTM/Linear."""
    H = hidden_size
    ks = jax.random.split(key, 8)
    s_lstm = 1.0 / jnp.sqrt(H)
    s_fc1 = 1.0 / jnp.sqrt(H)
    s_fc2 = 1.0 / jnp.sqrt(128)
    u = lambda k, shape, s: jax.random.uniform(k, shape, jnp.float32, -s, s)
    return {
        "w_ih": u(ks[0], (4 * H, input_dim), s_lstm),   # weight_ih_l0 [i,f,g,o]
        "w_hh": u(ks[1], (4 * H, H), s_lstm),           # weight_hh_l0 [i,f,g,o]
        "b_ih": u(ks[2], (4 * H,), s_lstm),
        "b_hh": u(ks[3], (4 * H,), s_lstm),
        "w1": u(ks[4], (128, H), s_fc1),                # fc1.weight
        "b1": u(ks[5], (128,), s_fc1),
        "w2": u(ks[6], (output_dim, 128), s_fc2),       # fc2.weight
        "b2": u(ks[7], (output_dim,), s_fc2),
    }


def prepare_params(raw, hidden_size=128):
    """Kernel layout: gate reorder [i,f,g,o]->[i,f,o,g], transpose, bf16 weights,
    and lane-pad fc2 to a multiple of 128 output columns."""
    H = hidden_size

    def reorder(w):  # along the leading 4H axis
        return jnp.concatenate([w[:2 * H], w[3 * H:4 * H], w[2 * H:3 * H]], axis=0)

    b_lstm = reorder(raw["b_ih"] + raw["b_hh"]).reshape(1, 4 * H)

    O = raw["w2"].shape[0]
    O_pad = _round_up(O, 128)
    w2_t = raw["w2"].T                                   # (128, O)
    w2_t = jnp.pad(w2_t, ((0, 0), (0, O_pad - O)))
    b2 = jnp.pad(raw["b2"].reshape(1, -1), ((0, 0), (0, O_pad - O)))

    return {
        "wih_t": reorder(raw["w_ih"]).T.astype(jnp.bfloat16),   # (D, 4H)
        "whh_t": reorder(raw["w_hh"]).T.astype(jnp.bfloat16),   # (H, 4H)
        "b_lstm": b_lstm.astype(jnp.float32),                   # (1, 4H)
        "w1_t": raw["w1"].T.astype(jnp.bfloat16),               # (H, 128)
        "b1": raw["b1"].reshape(1, -1).astype(jnp.float32),
        "w2_t": w2_t.astype(jnp.bfloat16),                      # (128, O_pad)
        "b2": b2.astype(jnp.float32),                           # (1, O_pad)
    }


def reference_forward(x, raw):
    """Independent pure-fp32 JAX reference using raw PyTorch-layout params."""
    H = raw["w_hh"].shape[1]
    B, T, D = x.shape
    bias = raw["b_ih"] + raw["b_hh"]
    h = jnp.zeros((B, H), jnp.float32)
    c = jnp.zeros((B, H), jnp.float32)
    for t in range(T):
        z = x[:, t, :] @ raw["w_ih"].T + h @ raw["w_hh"].T + bias
        i = jax.nn.sigmoid(z[:, 0 * H:1 * H])
        f = jax.nn.sigmoid(z[:, 1 * H:2 * H])
        g = jnp.tanh(z[:, 2 * H:3 * H])
        o = jax.nn.sigmoid(z[:, 3 * H:4 * H])
        c = f * c + i * g
        h = o * jnp.tanh(c)
    y = jnp.maximum(h @ raw["w1"].T + raw["b1"], 0.0)
    return y @ raw["w2"].T + raw["b2"]


if __name__ == "__main__":
    # batch=256 (two full 128-row MXU tiles -> grid=2), seq=8, input_dim=32,
    # hidden=128, out=4.  Total input is only ~256 KB.
    B, T, D, O, H = 256, 8, 32, 4, 128

    key = jax.random.PRNGKey(0)
    k_x, k_p = jax.random.split(key)
    x = jax.random.normal(k_x, (B, T, D), jnp.float32)
    raw = init_params(k_p, input_dim=D, output_dim=O, hidden_size=H)
    params = prepare_params(raw, hidden_size=H)

    fwd = jax.jit(lstm_qnetwork_forward, static_argnames=("output_dim",))
    out = jax.block_until_ready(fwd(x, params, output_dim=O))
    ref = jax.block_until_ready(reference_forward(x, raw))

    assert out.shape == (B, O)
    # bf16 MXU operands (fp32 accumulation) => loosened tolerance vs fp32 ref.
    assert jnp.allclose(out, ref, atol=5e-2, rtol=5e-2), \
        float(jnp.max(jnp.abs(out - ref)))
    print("KERNEL_OK")
</pallas_src>

<mosaic_0001>
module attributes {stable_mosaic.version = 11 : i64} {
  func.func @lstm_qnet_kernel(%arg0: i32, %arg1: memref<1x1024x32xf32, #tpu.memory_space<vmem>>, %arg2: memref<32x512xbf16, #tpu.memory_space<vmem>>, %arg3: memref<128x512xbf16, #tpu.memory_space<vmem>>, %arg4: memref<1x512xf32, #tpu.memory_space<vmem>>, %arg5: memref<128x128xbf16, #tpu.memory_space<vmem>>, %arg6: memref<1x128xf32, #tpu.memory_space<vmem>>, %arg7: memref<128x128xbf16, #tpu.memory_space<vmem>>, %arg8: memref<1x128xf32, #tpu.memory_space<vmem>>, %arg9: memref<128x128xf32, #tpu.memory_space<vmem>>, %arg10: memref<1024x512xf32, #tpu.memory_space<vmem>>) attributes {dimension_semantics = [#tpu.dimension_semantics<parallel>], iteration_bounds = array<i64: 2>, scalar_prefetch = 0 : i64, scratch_operands = 1 : i64, tpu.core_type = #tpu.core_type<tc>, window_params = [{transform_indices = @transform_0, window_bounds = array<i64: 1, 1024, 32>}, {pipeline_mode = #tpu.pipeline_mode<synchronous>, transform_indices = @transform_1, window_bounds = array<i64: 32, 512>}, {pipeline_mode = #tpu.pipeline_mode<synchronous>, transform_indices = @transform_2, window_bounds = array<i64: 128, 512>}, {pipeline_mode = #tpu.pipeline_mode<synchronous>, transform_indices = @transform_3, window_bounds = array<i64: 1, 512>}, {pipeline_mode = #tpu.pipeline_mode<synchronous>, transform_indices = @transform_4, window_bounds = array<i64: 128, 128>}, {pipeline_mode = #tpu.pipeline_mode<synchronous>, transform_indices = @transform_5, window_bounds = array<i64: 1, 128>}, {pipeline_mode = #tpu.pipeline_mode<synchronous>, transform_indices = @transform_6, window_bounds = array<i64: 128, 128>}, {pipeline_mode = #tpu.pipeline_mode<synchronous>, transform_indices = @transform_7, window_bounds = array<i64: 1, 128>}, {transform_indices = @transform_8, window_bounds = array<i64: 128, 128>}]} {
    %c0 = arith.constant 0 : index
    %c0_0 = arith.constant 0 : index
    %c0_1 = arith.constant 0 : index
    %0 = vector.load %arg1[%c0, %c0_0, %c0_1] : memref<1x1024x32xf32, #tpu.memory_space<vmem>>, vector<1x1024x32xf32>
    %1 = vector.shape_cast %0 : vector<1x1024x32xf32> to vector<1024x32xf32>
    %2 = arith.truncf %1 : vector<1024x32xf32> to vector<1024x32xbf16>
    %c0_2 = arith.constant 0 : index
    %c0_3 = arith.constant 0 : index
    %3 = vector.load %arg2[%c0_2, %c0_3] : memref<32x512xbf16, #tpu.memory_space<vmem>>, vector<32x512xbf16>
    %cst = arith.constant dense<0.000000e+00> : vector<1024x512xf32>
    %4 = tpu.matmul %2, %3, %cst {dimension_numbers = #tpu.dot_dimension_numbers<[1], [0], [0], [1], [0, 0, 1, 1], [], []>} : vector<1024x32xbf16>, vector<32x512xbf16>, vector<1024x512xf32> -> vector<1024x512xf32>
    %c0_4 = arith.constant 0 : index
    %c0_5 = arith.constant 0 : index
    %5 = vector.load %arg4[%c0_4, %c0_5] : memref<1x512xf32, #tpu.memory_space<vmem>>, vector<1x512xf32>
    %6 = vector.broadcast %5 : vector<1x512xf32> to vector<1024x512xf32>
    %7 = arith.addf %4, %6 : vector<1024x512xf32>
    %c0_6 = arith.constant 0 : index
    %c0_7 = arith.constant 0 : index
    %8 = vector.load %arg10[%c0_6, %c0_7] : memref<1024x512xf32, #tpu.memory_space<vmem>>, vector<1024x512xf32>
    tpu.vector_store %arg10[%c0_6, %c0_7], %7 {strides = array<i32>} : memref<1024x512xf32, #tpu.memory_space<vmem>>, vector<1024x512xf32>,
    %cst_8 = arith.constant 0.000000e+00 : f32
    %9 = vector.broadcast %cst_8 : f32 to vector<128x128xf32>
    %cst_9 = arith.constant 0.000000e+00 : f32
    %10 = vector.broadcast %cst_9 : f32 to vector<128x128xf32>
    %c0_10 = arith.constant 0 : index
    %c0_11 = arith.constant 0 : index
    %11 = vector.load %arg10[%c0_10, %c0_11] : memref<1024x512xf32, #tpu.memory_space<vmem>>, vector<128x512xf32>
    %12 = arith.truncf %9 : vector<128x128xf32> to vector<128x128xbf16>
    %c0_12 = arith.constant 0 : index
    %c0_13 = arith.constant 0 : index
    %13 = vector.load %arg3[%c0_12, %c0_13] : memref<128x512xbf16, #tpu.memory_space<vmem>>, vector<128x512xbf16>
    %cst_14 = arith.constant dense<0.000000e+00> : vector<128x512xf32>
    %14 = tpu.matmul %12, %13, %cst_14 {dimension_numbers = #tpu.dot_dimension_numbers<[1], [0], [0], [1], [0, 0, 1, 1], [], []>} : vector<128x128xbf16>, vector<128x512xbf16>, vector<128x512xf32> -> vector<128x512xf32>
    %15 = arith.addf %11, %14 : vector<128x512xf32>
    %16 = vector.extract_strided_slice %15 {offsets = [0, 0], sizes = [128, 384], strides = [1, 1]} : vector<128x512xf32> to vector<128x384xf32>
    %17 = arith.negf %16 : vector<128x384xf32>
    %18 = math.exp %17 : vector<128x384xf32>
    %cst_15 = arith.constant 1.000000e+00 : f32
    %19 = vector.broadcast %cst_15 : f32 to vector<128x384xf32>
    %20 = arith.addf %19, %18 : vector<128x384xf32>
    %21 = arith.divf %19, %20 : vector<128x384xf32>
    %22 = vector.extract_strided_slice %15 {offsets = [0, 384], sizes = [128, 128], strides = [1, 1]} : vector<128x512xf32> to vector<128x128xf32>
    %23 = math.tanh %22 : vector<128x128xf32>
    %24 = vector.extract_strided_slice %21 {offsets = [0, 0], sizes = [128, 128], strides = [1, 1]} : vector<128x384xf32> to vector<128x128xf32>
    %25 = vector.extract_strided_slice %21 {offsets = [0, 128], sizes = [128, 128], strides = [1, 1]} : vector<128x384xf32> to vector<128x128xf32>
    %26 = vector.extract_strided_slice %21 {offsets = [0, 256], sizes = [128, 128], strides = [1, 1]} : vector<128x384xf32> to vector<128x128xf32>
    %27 = arith.mulf %25, %10 : vector<128x128xf32>
    %28 = arith.mulf %24, %23 : vector<128x128xf32>
    %29 = arith.addf %27, %28 : vector<128x128xf32>
    %30 = math.tanh %29 : vector<128x128xf32>
    %31 = arith.mulf %26, %30 : vector<128x128xf32>
    %c128 = arith.constant 128 : index
    %c0_16 = arith.constant 0 : index
    %32 = vector.load %arg10[%c128, %c0_16] : memref<1024x512xf32, #tpu.memory_space<vmem>>, vector<128x512xf32>
    %33 = arith.truncf %31 : vector<128x128xf32> to vector<128x128xbf16>
    %c0_17 = arith.constant 0 : index
    %c0_18 = arith.constant 0 : index
    %34 = vector.load %arg3[%c0_17, %c0_18] : memref<128x512xbf16, #tpu.memory_space<vmem>>, vector<128x512xbf16>
    %cst_19 = arith.constant dense<0.000000e+00> : vector<128x512xf32>
    %35 = tpu.matmul %33, %34, %cst_19 {dimension_numbers = #tpu.dot_dimension_numbers<[1], [0], [0], [1], [0, 0, 1, 1], [], []>} : vector<128x128xbf16>, vector<128x512xbf16>, vector<128x512xf32> -> vector<128x512xf32>
    %36 = arith.addf %32, %35 : vector<128x512xf32>
    %37 = vector.extract_strided_slice %36 {offsets = [0, 0], sizes = [128, 384], strides = [1, 1]} : vector<128x512xf32> to vector<128x384xf32>
    %38 = arith.negf %37 : vector<128x384xf32>
    %39 = math.exp %38 : vector<128x384xf32>
    %cst_20 = arith.constant 1.000000e+00 : f32
    %40 = vector.broadcast %cst_20 : f32 to vector<128x384xf32>
    %41 = arith.addf %40, %39 : vector<128x384xf32>
    %42 = arith.divf %40, %41 : vector<128x384xf32>
    %43 = vector.extract_strided_slice %36 {offsets = [0, 384], sizes = [128, 128], strides = [1, 1]} : vector<128x512xf32> to vector<128x128xf32>
    %44 = math.tanh %43 : vector<128x128xf32>
    %45 = vector.extract_strided_slice %42 {offsets = [0, 0], sizes = [128, 128], strides = [1, 1]} : vector<128x384xf32> to vector<128x128xf32>
    %46 = vector.extract_strided_slice %42 {offsets = [0, 128], sizes = [128, 128], strides = [1, 1]} : vector<128x384xf32> to vector<128x128xf32>
    %47 = vector.extract_strided_slice %42 {offsets = [0, 256], sizes = [128, 128], strides = [1, 1]} : vector<128x384xf32> to vector<128x128xf32>
    %48 = arith.mulf %46, %29 : vector<128x128xf32>
    %49 = arith.mulf %45, %44 : vector<128x128xf32>
    %50 = arith.addf %48, %49 : vector<128x128xf32>
    %51 = math.tanh %50 : vector<128x128xf32>
    %52 = arith.mulf %47, %51 : vector<128x128xf32>
    %c256 = arith.constant 256 : index
    %c0_21 = arith.constant 0 : index
    %53 = vector.load %arg10[%c256, %c0_21] : memref<1024x512xf32, #tpu.memory_space<vmem>>, vector<128x512xf32>
    %54 = arith.truncf %52 : vector<128x128xf32> to vector<128x128xbf16>
    %c0_22 = arith.constant 0 : index
    %c0_23 = arith.constant 0 : index
    %55 = vector.load %arg3[%c0_22, %c0_23] : memref<128x512xbf16, #tpu.memory_space<vmem>>, vector<128x512xbf16>
    %cst_24 = arith.constant dense<0.000000e+00> : vector<128x512xf32>
    %56 = tpu.matmul %54, %55, %cst_24 {dimension_numbers = #tpu.dot_dimension_numbers<[1], [0], [0], [1], [0, 0, 1, 1], [], []>} : vector<128x128xbf16>, vector<128x512xbf16>, vector<128x512xf32> -> vector<128x512xf32>
    %57 = arith.addf %53, %56 : vector<128x512xf32>
    %58 = vector.extract_strided_slice %57 {offsets = [0, 0], sizes = [128, 384], strides = [1, 1]} : vector<128x512xf32> to vector<128x384xf32>
    %59 = arith.negf %58 : vector<128x384xf32>
    %60 = math.exp %59 : vector<128x384xf32>
    %cst_25 = arith.constant 1.000000e+00 : f32
    %61 = vector.broadcast %cst_25 : f32 to vector<128x384xf32>
    %62 = arith.addf %61, %60 : vector<128x384xf32>
    %63 = arith.divf %61, %62 : vector<128x384xf32>
    %64 = vector.extract_strided_slice %57 {offsets = [0, 384], sizes = [128, 128], strides = [1, 1]} : vector<128x512xf32> to vector<128x128xf32>
    %65 = math.tanh %64 : vector<128x128xf32>
    %66 = vector.extract_strided_slice %63 {offsets = [0, 0], sizes = [128, 128], strides = [1, 1]} : vector<128x384xf32> to vector<128x128xf32>
    %67 = vector.extract_strided_slice %63 {offsets = [0, 128], sizes = [128, 128], strides = [1, 1]} : vector<128x384xf32> to vector<128x128xf32>
    %68 = vector.extract_strided_slice %63 {offsets = [0, 256], sizes = [128, 128], strides = [1, 1]} : vector<128x384xf32> to vector<128x128xf32>
    %69 = arith.mulf %67, %50 : vector<128x128xf32>
    %70 = arith.mulf %66, %65 : vector<128x128xf32>
    %71 = arith.addf %69, %70 : vector<128x128xf32>
    %72 = math.tanh %71 : vector<128x128xf32>
    %73 = arith.mulf %68, %72 : vector<128x128xf32>
    %c384 = arith.constant 384 : index
    %c0_26 = arith.constant 0 : index
    %74 = vector.load %arg10[%c384, %c0_26] : memref<1024x512xf32, #tpu.memory_space<vmem>>, vector<128x512xf32>
    %75 = arith.truncf %73 : vector<128x128xf32> to vector<128x128xbf16>
    %c0_27 = arith.constant 0 : index
    %c0_28 = arith.constant 0 : index
    %76 = vector.load %arg3[%c0_27, %c0_28] : memref<128x512xbf16, #tpu.memory_space<vmem>>, vector<128x512xbf16>
    %cst_29 = arith.constant dense<0.000000e+00> : vector<128x512xf32>
    %77 = tpu.matmul %75, %76, %cst_29 {dimension_numbers = #tpu.dot_dimension_numbers<[1], [0], [0], [1], [0, 0, 1, 1], [], []>} : vector<128x128xbf16>, vector<128x512xbf16>, vector<128x512xf32> -> vector<128x512xf32>
    %78 = arith.addf %74, %77 : vector<128x512xf32>
    %79 = vector.extract_strided_slice %78 {offsets = [0, 0], sizes = [128, 384], strides = [1, 1]} : vector<128x512xf32> to vector<128x384xf32>
    %80 = arith.negf %79 : vector<128x384xf32>
    %81 = math.exp %80 : vector<128x384xf32>
    %cst_30 = arith.constant 1.000000e+00 : f32
    %82 = vector.broadcast %cst_30 : f32 to vector<128x384xf32>
    %83 = arith.addf %82, %81 : vector<128x384xf32>
    %84 = arith.divf %82, %83 : vector<128x384xf32>
    %85 = vector.extract_strided_slice %78 {offsets = [0, 384], sizes = [128, 128], strides = [1, 1]} : vector<128x512xf32> to vector<128x128xf32>
    %86 = math.tanh %85 : vector<128x128xf32>
    %87 = vector.extract_strided_slice %84 {offsets = [0, 0], sizes = [128, 128], strides = [1, 1]} : vector<128x384xf32> to vector<128x128xf32>
    %88 = vector.extract_strided_slice %84 {offsets = [0, 128], sizes = [128, 128], strides = [1, 1]} : vector<128x384xf32> to vector<128x128xf32>
    %89 = vector.extract_strided_slice %84 {offsets = [0, 256], sizes = [128, 128], strides = [1, 1]} : vector<128x384xf32> to vector<128x128xf32>
    %90 = arith.mulf %88, %71 : vector<128x128xf32>
    %91 = arith.mulf %87, %86 : vector<128x128xf32>
    %92 = arith.addf %90, %91 : vector<128x128xf32>
    %93 = math.tanh %92 : vector<128x128xf32>
    %94 = arith.mulf %89, %93 : vector<128x128xf32>
    %c512 = arith.constant 512 : index
    %c0_31 = arith.constant 0 : index
    %95 = vector.load %arg10[%c512, %c0_31] : memref<1024x512xf32, #tpu.memory_space<vmem>>, vector<128x512xf32>
    %96 = arith.truncf %94 : vector<128x128xf32> to vector<128x128xbf16>
    %c0_32 = arith.constant 0 : index
    %c0_33 = arith.constant 0 : index
    %97 = vector.load %arg3[%c0_32, %c0_33] : memref<128x512xbf16, #tpu.memory_space<vmem>>, vector<128x512xbf16>
    %cst_34 = arith.constant dense<0.000000e+00> : vector<128x512xf32>
    %98 = tpu.matmul %96, %97, %cst_34 {dimension_numbers = #tpu.dot_dimension_numbers<[1], [0], [0], [1], [0, 0, 1, 1], [], []>} : vector<128x128xbf16>, vector<128x512xbf16>, vector<128x512xf32> -> vector<128x512xf32>
    %99 = arith.addf %95, %98 : vector<128x512xf32>
    %100 = vector.extract_strided_slice %99 {offsets = [0, 0], sizes = [128, 384], strides = [1, 1]} : vector<128x512xf32> to vector<128x384xf32>
    %101 = arith.negf %100 : vector<128x384xf32>
    %102 = math.exp %101 : vector<128x384xf32>
    %cst_35 = arith.constant 1.000000e+00 : f32
    %103 = vector.broadcast %cst_35 : f32 to vector<128x384xf32>
    %104 = arith.addf %103, %102 : vector<128x384xf32>
    %105 = arith.divf %103, %104 : vector<128x384xf32>
    %106 = vector.extract_strided_slice %99 {offsets = [0, 384], sizes = [128, 128], strides = [1, 1]} : vector<128x512xf32> to vector<128x128xf32>
    %107 = math.tanh %106 : vector<128x128xf32>
    %108 = vector.extract_strided_slice %105 {offsets = [0, 0], sizes = [128, 128], strides = [1, 1]} : vector<128x384xf32> to vector<128x128xf32>
    %109 = vector.extract_strided_slice %105 {offsets = [0, 128], sizes = [128, 128], strides = [1, 1]} : vector<128x384xf32> to vector<128x128xf32>
    %110 = vector.extract_strided_slice %105 {offsets = [0, 256], sizes = [128, 128], strides = [1, 1]} : vector<128x384xf32> to vector<128x128xf32>
    %111 = arith.mulf %109, %92 : vector<128x128xf32>
    %112 = arith.mulf %108, %107 : vector<128x128xf32>
    %113 = arith.addf %111, %112 : vector<128x128xf32>
    %114 = math.tanh %113 : vector<128x128xf32>
    %115 = arith.mulf %110, %114 : vector<128x128xf32>
    %c640 = arith.constant 640 : index
    %c0_36 = arith.constant 0 : index
    %116 = vector.load %arg10[%c640, %c0_36] : memref<1024x512xf32, #tpu.memory_space<vmem>>, vector<128x512xf32>
    %117 = arith.truncf %115 : vector<128x128xf32> to vector<128x128xbf16>
    %c0_37 = arith.constant 0 : index
    %c0_38 = arith.constant 0 : index
    %118 = vector.load %arg3[%c0_37, %c0_38] : memref<128x512xbf16, #tpu.memory_space<vmem>>, vector<128x512xbf16>
    %cst_39 = arith.constant dense<0.000000e+00> : vector<128x512xf32>
    %119 = tpu.matmul %117, %118, %cst_39 {dimension_numbers = #tpu.dot_dimension_numbers<[1], [0], [0], [1], [0, 0, 1, 1], [], []>} : vector<128x128xbf16>, vector<128x512xbf16>, vector<128x512xf32> -> vector<128x512xf32>
    %120 = arith.addf %116, %119 : vector<128x512xf32>
    %121 = vector.extract_strided_slice %120 {offsets = [0, 0], sizes = [128, 384], strides = [1, 1]} : vector<128x512xf32> to vector<128x384xf32>
    %122 = arith.negf %121 : vector<128x384xf32>
    %123 = math.exp %122 : vector<128x384xf32>
    %cst_40 = arith.constant 1.000000e+00 : f32
    %124 = vector.broadcast %cst_40 : f32 to vector<128x384xf32>
    %125 = arith.addf %124, %123 : vector<128x384xf32>
    %126 = arith.divf %124, %125 : vector<128x384xf32>
    %127 = vector.extract_strided_slice %120 {offsets = [0, 384], sizes = [128, 128], strides = [1, 1]} : vector<128x512xf32> to vector<128x128xf32>
    %128 = math.tanh %127 : vector<128x128xf32>
    %129 = vector.extract_strided_slice %126 {offsets = [0, 0], sizes = [128, 128], strides = [1, 1]} : vector<128x384xf32> to vector<128x128xf32>
    %130 = vector.extract_strided_slice %126 {offsets = [0, 128], sizes = [128, 128], strides = [1, 1]} : vector<128x384xf32> to vector<128x128xf32>
    %131 = vector.extract_strided_slice %126 {offsets = [0, 256], sizes = [128, 128], strides = [1, 1]} : vector<128x384xf32> to vector<128x128xf32>
    %132 = arith.mulf %130, %113 : vector<128x128xf32>
    %133 = arith.mulf %129, %128 : vector<128x128xf32>
    %134 = arith.addf %132, %133 : vector<128x128xf32>
    %135 = math.tanh %134 : vector<128x128xf32>
    %136 = arith.mulf %131, %135 : vector<128x128xf32>
    %c768 = arith.constant 768 : index
    %c0_41 = arith.constant 0 : index
    %137 = vector.load %arg10[%c768, %c0_41] : memref<1024x512xf32, #tpu.memory_space<vmem>>, vector<128x512xf32>
    %138 = arith.truncf %136 : vector<128x128xf32> to vector<128x128xbf16>
    %c0_42 = arith.constant 0 : index
    %c0_43 = arith.constant 0 : index
    %139 = vector.load %arg3[%c0_42, %c0_43] : memref<128x512xbf16, #tpu.memory_space<vmem>>, vector<128x512xbf16>
    %cst_44 = arith.constant dense<0.000000e+00> : vector<128x512xf32>
    %140 = tpu.matmul %138, %139, %cst_44 {dimension_numbers = #tpu.dot_dimension_numbers<[1], [0], [0], [1], [0, 0, 1, 1], [], []>} : vector<128x128xbf16>, vector<128x512xbf16>, vector<128x512xf32> -> vector<128x512xf32>
    %141 = arith.addf %137, %140 : vector<128x512xf32>
    %142 = vector.extract_strided_slice %141 {offsets = [0, 0], sizes = [128, 384], strides = [1, 1]} : vector<128x512xf32> to vector<128x384xf32>
    %143 = arith.negf %142 : vector<128x384xf32>
    %144 = math.exp %143 : vector<128x384xf32>
    %cst_45 = arith.constant 1.000000e+00 : f32
    %145 = vector.broadcast %cst_45 : f32 to vector<128x384xf32>
    %146 = arith.addf %145, %144 : vector<128x384xf32>
    %147 = arith.divf %145, %146 : vector<128x384xf32>
    %148 = vector.extract_strided_slice %141 {offsets = [0, 384], sizes = [128, 128], strides = [1, 1]} : vector<128x512xf32> to vector<128x128xf32>
    %149 = math.tanh %148 : vector<128x128xf32>
    %150 = vector.extract_strided_slice %147 {offsets = [0, 0], sizes = [128, 128], strides = [1, 1]} : vector<128x384xf32> to vector<128x128xf32>
    %151 = vector.extract_strided_slice %147 {offsets = [0, 128], sizes = [128, 128], strides = [1, 1]} : vector<128x384xf32> to vector<128x128xf32>
    %152 = vector.extract_strided_slice %147 {offsets = [0, 256], sizes = [128, 128], strides = [1, 1]} : vector<128x384xf32> to vector<128x128xf32>
    %153 = arith.mulf %151, %134 : vector<128x128xf32>
    %154 = arith.mulf %150, %149 : vector<128x128xf32>
    %155 = arith.addf %153, %154 : vector<128x128xf32>
    %156 = math.tanh %155 : vector<128x128xf32>
    %157 = arith.mulf %152, %156 : vector<128x128xf32>
    %c896 = arith.constant 896 : index
    %c0_46 = arith.constant 0 : index
    %158 = vector.load %arg10[%c896, %c0_46] : memref<1024x512xf32, #tpu.memory_space<vmem>>, vector<128x512xf32>
    %159 = arith.truncf %157 : vector<128x128xf32> to vector<128x128xbf16>
    %c0_47 = arith.constant 0 : index
    %c0_48 = arith.constant 0 : index
    %160 = vector.load %arg3[%c0_47, %c0_48] : memref<128x512xbf16, #tpu.memory_space<vmem>>, vector<128x512xbf16>
    %cst_49 = arith.constant dense<0.000000e+00> : vector<128x512xf32>
    %161 = tpu.matmul %159, %160, %cst_49 {dimension_numbers = #tpu.dot_dimension_numbers<[1], [0], [0], [1], [0, 0, 1, 1], [], []>} : vector<128x128xbf16>, vector<128x512xbf16>, vector<128x512xf32> -> vector<128x512xf32>
    %162 = arith.addf %158, %161 : vector<128x512xf32>
    %163 = vector.extract_strided_slice %162 {offsets = [0, 0], sizes = [128, 384], strides = [1, 1]} : vector<128x512xf32> to vector<128x384xf32>
    %164 = arith.negf %163 : vector<128x384xf32>
    %165 = math.exp %164 : vector<128x384xf32>
    %cst_50 = arith.constant 1.000000e+00 : f32
    %166 = vector.broadcast %cst_50 : f32 to vector<128x384xf32>
    %167 = arith.addf %166, %165 : vector<128x384xf32>
    %168 = arith.divf %166, %167 : vector<128x384xf32>
    %169 = vector.extract_strided_slice %162 {offsets = [0, 384], sizes = [128, 128], strides = [1, 1]} : vector<128x512xf32> to vector<128x128xf32>
    %170 = math.tanh %169 : vector<128x128xf32>
    %171 = vector.extract_strided_slice %168 {offsets = [0, 0], sizes = [128, 128], strides = [1, 1]} : vector<128x384xf32> to vector<128x128xf32>
    %172 = vector.extract_strided_slice %168 {offsets = [0, 128], sizes = [128, 128], strides = [1, 1]} : vector<128x384xf32> to vector<128x128xf32>
    %173 = vector.extract_strided_slice %168 {offsets = [0, 256], sizes = [128, 128], strides = [1, 1]} : vector<128x384xf32> to vector<128x128xf32>
    %174 = arith.mulf %172, %155 : vector<128x128xf32>
    %175 = arith.mulf %171, %170 : vector<128x128xf32>
    %176 = arith.addf %174, %175 : vector<128x128xf32>
    %177 = math.tanh %176 : vector<128x128xf32>
    %178 = arith.mulf %173, %177 : vector<128x128xf32>
    %179 = arith.truncf %178 : vector<128x128xf32> to vector<128x128xbf16>
    %c0_51 = arith.constant 0 : index
    %c0_52 = arith.constant 0 : index
    %180 = vector.load %arg5[%c0_51, %c0_52] : memref<128x128xbf16, #tpu.memory_space<vmem>>, vector<128x128xbf16>
    %cst_53 = arith.constant dense<0.000000e+00> : vector<128x128xf32>
    %181 = tpu.matmul %179, %180, %cst_53 {dimension_numbers = #tpu.dot_dimension_numbers<[1], [0], [0], [1], [0, 0, 1, 1], [], []>} : vector<128x128xbf16>, vector<128x128xbf16>, vector<128x128xf32> -> vector<128x128xf32>
    %c0_54 = arith.constant 0 : index
    %c0_55 = arith.constant 0 : index
    %182 = vector.load %arg6[%c0_54, %c0_55] : memref<1x128xf32, #tpu.memory_space<vmem>>, vector<1x128xf32>
    %183 = vector.broadcast %182 : vector<1x128xf32> to vector<128x128xf32>
    %184 = arith.addf %181, %183 : vector<128x128xf32>
    %cst_56 = arith.constant 0.000000e+00 : f32
    %185 = vector.broadcast %cst_56 : f32 to vector<128x128xf32>
    %186 = arith.maximumf %184, %185 : vector<128x128xf32>
    %187 = arith.truncf %186 : vector<128x128xf32> to vector<128x128xbf16>
    %c0_57 = arith.constant 0 : index
    %c0_58 = arith.constant 0 : index
    %188 = vector.load %arg7[%c0_57, %c0_58] : memref<128x128xbf16, #tpu.memory_space<vmem>>, vector<128x128xbf16>
    %cst_59 = arith.constant dense<0.000000e+00> : vector<128x128xf32>
    %189 = tpu.matmul %187, %188, %cst_59 {dimension_numbers = #tpu.dot_dimension_numbers<[1], [0], [0], [1], [0, 0, 1, 1], [], []>} : vector<128x128xbf16>, vector<128x128xbf16>, vector<128x128xf32> -> vector<128x128xf32>
    %c0_60 = arith.constant 0 : index
    %c0_61 = arith.constant 0 : index
    %190 = vector.load %arg8[%c0_60, %c0_61] : memref<1x128xf32, #tpu.memory_space<vmem>>, vector<1x128xf32>
    %191 = vector.broadcast %190 : vector<1x128xf32> to vector<128x128xf32>
    %192 = arith.addf %189, %191 : vector<128x128xf32>
    %c0_62 = arith.constant 0 : index
    %c0_63 = arith.constant 0 : index
    %193 = vector.load %arg9[%c0_62, %c0_63] : memref<128x128xf32, #tpu.memory_space<vmem>>, vector<128x128xf32>
    tpu.vector_store %arg9[%c0_62, %c0_63], %192 {strides = array<i32>} : memref<128x128xf32, #tpu.memory_space<vmem>>, vector<128x128xf32>,
    return
  }
  func.func @transform_0(%arg0: i32) -> (i32, i32, i32) {
    %c0_i32 = arith.constant 0 : i32
    %c0_i32_0 = arith.constant 0 : i32
    %c0_i32_1 = arith.constant 0 : i32
    return %arg0, %c0_i32, %c0_i32_0 : i32, i32, i32
  }
  func.func @transform_1(%arg0: i32) -> (i32, i32) {
    %c0_i32 = arith.constant 0 : i32
    %c0_i32_0 = arith.constant 0 : i32
    %c0_i32_1 = arith.constant 0 : i32
    return %c0_i32, %c0_i32_0 : i32, i32
  }
  func.func @transform_2(%arg0: i32) -> (i32, i32) {
    %c0_i32 = arith.constant 0 : i32
    %c0_i32_0 = arith.constant 0 : i32
    %c0_i32_1 = arith.constant 0 : i32
    return %c0_i32, %c0_i32_0 : i32, i32
  }
  func.func @transform_3(%arg0: i32) -> (i32, i32) {
    %c0_i32 = arith.constant 0 : i32
    %c0_i32_0 = arith.constant 0 : i32
    %c0_i32_1 = arith.constant 0 : i32
    return %c0_i32, %c0_i32_0 : i32, i32
  }
  func.func @transform_4(%arg0: i32) -> (i32, i32) {
    %c0_i32 = arith.constant 0 : i32
    %c0_i32_0 = arith.constant 0 : i32
    %c0_i32_1 = arith.constant 0 : i32
    return %c0_i32, %c0_i32_0 : i32, i32
  }
  func.func @transform_5(%arg0: i32) -> (i32, i32) {
    %c0_i32 = arith.constant 0 : i32
    %c0_i32_0 = arith.constant 0 : i32
    %c0_i32_1 = arith.constant 0 : i32
    return %c0_i32, %c0_i32_0 : i32, i32
  }
  func.func @transform_6(%arg0: i32) -> (i32, i32) {
    %c0_i32 = arith.constant 0 : i32
    %c0_i32_0 = arith.constant 0 : i32
    %c0_i32_1 = arith.constant 0 : i32
    return %c0_i32, %c0_i32_0 : i32, i32
  }
  func.func @transform_7(%arg0: i32) -> (i32, i32) {
    %c0_i32 = arith.constant 0 : i32
    %c0_i32_0 = arith.constant 0 : i32
    %c0_i32_1 = arith.constant 0 : i32
    return %c0_i32, %c0_i32_0 : i32, i32
  }
  func.func @transform_8(%arg0: i32) -> (i32, i32) {
    %c0_i32 = arith.constant 0 : i32
    %c0_i32_0 = arith.constant 0 : i32
    return %arg0, %c0_i32 : i32, i32
  }
}

</mosaic_0001>

<bundles_post_ra>
// kernel: lstm_qnetwork_forward.1
= control target key start
LH: loop header
LB: loop body
LE: loop exit
PB: predicated region body
PF: predicated region fallthrough
CT: control target
= control target key end

     0   :  { %s13272_s27 = smov 0   ;;  %s16027_s0 = inlined_call_operand.vmem [shape: f32[2,1024,32], index: 0, kind: input, shape index: {}]   ;;  %s16028_s1 = inlined_call_operand.vmem [shape: bf16[32,512], index: 1, kind: input, shape index: {}]   ;;  %s16029_s2 = inlined_call_operand.vmem [shape: bf16[128,512], index: 2, kind: input, shape index: {}]   ;;  %s16030_s3 = inlined_call_operand.vmem [shape: f32[1,512], index: 3, kind: input, shape index: {}]   ;;  %s16031_s4 = inlined_call_operand.vmem [shape: bf16[128,128], index: 4, kind: input, shape index: {}]   ;;  %s16032_s5 = inlined_call_operand.vmem [shape: f32[1,128], index: 5, kind: input, shape index: {}]   ;;  %s16033_s6 = inlined_call_operand.vmem [shape: bf16[128,128], index: 6, kind: input, shape index: {}]   ;;  %s16034_s7 = inlined_call_operand.vmem [shape: f32[1,128], index: 7, kind: input, shape index: {}]   ;;  %s16035_s8 = inlined_call_operand.vmem [shape: f32[256,128], index: 8, kind: output, shape index: {}]  }
   0x1 LB: > { %s13278_s28 = sadd.s32 4294967295, %s13224_s27   ;;  %p9217_p0 = scmp.ge.s32.totalorder %s13224_s27, 1  ;;  %s13224_s27 = sphi %s13272_s27, %s18_s27  }
   0x2   : > { %p262_p1 = scmp.lt.s32.totalorder %s13224_s27, 3 }
   0x4   : > { %p263_p2 = pnand %p9217_p0, %p262_p1 }
   0x6   : > { %266 = sbr.rel (%p263_p2) target bundleno = 3321 (0xcf9), region = 52 }
   0xd   : > { %v10924_v0 = vld [vmem:[%s16028_s1 + $0x4] ss:$16 sps:$4 sm:$0xff]   ;;  %p296_p3 = scmp.lt.s32.totalorder %s13278_s28, 1  ;;  %v10926_v1 = vld [vmem:[%s16028_s1 + $0xc] ss:$16 sps:$4 sm:$0xff]   ;;  %v16036_v2 = vmov 0  }
   0xe   : > { %795 = vmatprep.mubr.bf16.mxu0 %v16036_v2  ;;  %1468 = vmatprep.mubr.bf16.mxu1 %v16036_v2  ;;  %v10928_v3 = vld [vmem:[%s16028_s1] ss:$16 sps:$4 sm:$0xff]   ;;  %v10929_v4 = vld [vmem:[%s16028_s1 + $0x8] ss:$16 sps:$4 sm:$0xff]   ;;  %v10930_v5 = vld [vmem:[%s16028_s1 + $0x24] ss:$16 sps:$4 sm:$0xff]  }
   0xf   : > { %763 = vmatprep.subr.bf16.mxu0 %v10924_v0  ;;  %s297_s15 = scalar_select %p296_p3, %s13278_s28, 1  ;;  %1436 = vmatprep.subr.bf16.mxu1 %v10926_v1  ;;  %v10932_v6 = vld [vmem:[%s16028_s1 + $0x2c] ss:$16 sps:$4 sm:$0xff]   ;;  %v10934_v7 = vld [vmem:[%s16028_s1 + $0x20] ss:$16 sps:$4 sm:$0xff]   ;;  %vm570_vm0 = vcmask 261120  }
  0x10   : > { %764 = vmatpush1.bf16.msra.mxu0 %v10928_v3  ;;  %1437 = vmatpush1.bf16.msra.mxu1 %v10929_v4  ;;  %v10935_v8 = vld [vmem:[%s16028_s1 + $0x28] ss:$16 sps:$4 sm:$0xff]   ;;  %v13320_v11 = vld [vmem:[%s16029_s2 + $0x4] ss:$16 sps:$4 sm:$0xff]   ;;  %v10938_v13 = vld [vmem:[%s16029_s2] ss:$16 sps:$4 sm:$0xff]  }
  0x11   : > { %s9794_s22 = sshll.u32 %s297_s15, 10  ;;  %765 = vmatprep.subr.bf16.mxu0 %v10930_v5  ;;  %1438 = vmatprep.subr.bf16.mxu1 %v10932_v6  ;;  %v13328_v14 = vld [vmem:[%s16029_s2 + $0xc] ss:$16 sps:$4 sm:$0xff]   ;;  %v10941_v15 = vld [vmem:[%s16029_s2 + $0x8] ss:$16 sps:$4 sm:$0xff]   ;;  %s9220_s11 = sshll.u32 %s13278_s28, 4 }
  0x12   : > { %s13313_s29 = scalar_lea.vmem %s16027_s0, %s9794_s22  ;;  %v10942_v18 = vld [vmem:[%s16029_s2 + $0x24] ss:$16 sps:$4 sm:$0xff]   ;;  %v10944_v20 = vld [vmem:[%s16029_s2 + $0x20] ss:$16 sps:$4 sm:$0xff]   ;;  %v10945_v21 = vld [vmem:[%s16029_s2 + $0x2c] ss:$16 sps:$4 sm:$0xff]  }
  0x13   : > { %v308_v9 = vld [vmem:[%s13313_s29] sm:$0xff]  ;;  %v309_v10 = vld [vmem:[%s13313_s29 + $0x8] sm:$0xff]  ;;  %v310_v16 = vld [vmem:[%s13313_s29 + $0x10] sm:$0xff]  ;;  %p302_p4 = scmp.lt.s32.totalorder %s9220_s11, 31 }
  0x14   : > { %v436_v12 = vpack.c.bf16 %v309_v10, %v308_v9  ;;  %766 = vmatpush1.bf16.msra.mxu0 %v10934_v7  ;;  %1439 = vmatpush1.bf16.msra.mxu1 %v10935_v8  ;;  %v311_v17 = vld [vmem:[%s13313_s29 + $0x18] sm:$0xff]  ;;  %v312_v23 = vld [vmem:[%s13313_s29 + $0x20] sm:$0xff]  ;;  %v313_v24 = vld [vmem:[%s13313_s29 + $0x28] sm:$0xff] }
  0x15   : > { %2877 = vmatprep.subr.bf16.mxu0 %v13320_v11  ;;  %2990 = vmatprep.subr.bf16.mxu1 %v13328_v14  ;;  %v437_v19 = vpack.c.bf16 %v311_v17, %v310_v16  ;;  %v10947_v22 = vld [vmem:[%s16029_s2 + $0x28] ss:$16 sps:$4 sm:$0xff]   ;;  %v10948_v25 = vld [vmem:[%s16029_s2 + $0x44] ss:$16 sps:$4 sm:$0xff]   ;;  %v438_v26 = vpack.c.bf16 %v313_v24, %v312_v23  ;;  %v10950_v27 = vld [vmem:[%s16029_s2 + $0x40] ss:$16 sps:$4 sm:$0xff]  }
  0x16   : > { %v10951_v28 = vld [vmem:[%s16029_s2 + $0x4c] ss:$16 sps:$4 sm:$0xff]   ;;  %v10953_v29 = vld [vmem:[%s16029_s2 + $0x48] ss:$16 sps:$4 sm:$0xff]   ;;  %v314_v30 = vld [vmem:[%s13313_s29 + $0x30] sm:$0xff]  ;;  %s16080_s11 = smov (!%p302_p4, %s9220_s11), 31 }
  0x17   : > { %9230 = vmatmul.mubr.msk.bf16.vlgmr.msra.gmra.mrb[0].mxu0 %vm570_vm0, %v436_v12  ;;  %9294 = vmatmul.mubr.msk.bf16.vlgmr.msra.gmra.mrb[0].mxu1 %vm570_vm0, %v436_v12  ;;  %v315_v31 = vld [vmem:[%s13313_s29 + $0x38] sm:$0xff]  ;;  %v316_v33 = vld [vmem:[%s13313_s29 + $0x40] sm:$0xff]  ;;  %v317_v34 = vld [vmem:[%s13313_s29 + $0x48] sm:$0xff]  ;;  %s9221_s12 = sshll.u32 %s16080_s11, 3 }
  0x18   : > { %2878 = vmatpush1.bf16.msra.mxu0 %v10938_v13  ;;  %805 = vmatprep.mubr.bf16.mxu0 %v16036_v2  ;;  %v439_v32 = vpack.c.bf16 %v315_v31, %v314_v30  ;;  %v440_v35 = vpack.c.bf16 %v317_v34, %v316_v33  ;;  %v318_v36 = vld [vmem:[%s13313_s29 + $0x50] sm:$0xff]  ;;  %v319_v37 = vld [vmem:[%s13313_s29 + $0x58] sm:$0xff]  ;;  %v320_v39 = vld [vmem:[%s13313_s29 + $0x60] sm:$0xff] }
  0x19   : > { %1478 = vmatprep.mubr.bf16.mxu1 %v16036_v2  ;;  %2991 = vmatpush1.bf16.msra.mxu1 %v10941_v15  ;;  %v441_v38 = vpack.c.bf16 %v319_v37, %v318_v36  ;;  %v321_v40 = vld [vmem:[%s13313_s29 + $0x68] sm:$0xff]  ;;  %v322_v42 = vld [vmem:[%s13313_s29 + $0x70] sm:$0xff]  ;;  %v323_v43 = vld [vmem:[%s13313_s29 + $0x78] sm:$0xff] }
  0x1a   : > { %2879 = vmatprep.subr.bf16.mxu0 %v10942_v18  ;;  %2992 = vmatprep.subr.bf16.mxu1 %v10945_v21  ;;  %v442_v41 = vpack.c.bf16 %v321_v40, %v320_v39  ;;  %v443_v44 = vpack.c.bf16 %v323_v43, %v322_v42  ;;  %v324_v45 = vld [vmem:[%s13313_s29 + $0x80] sm:$0xff]  ;;  %v325_v46 = vld [vmem:[%s13313_s29 + $0x88] sm:$0xff]  ;;  %v326_v50 = vld [vmem:[%s13313_s29 + $0x90] sm:$0xff] }
  0x1b   : > { %v444_v47 = vpack.c.bf16 %v325_v46, %v324_v45  ;;  %v13412_v48 = vld [vmem:[%s16029_s2 + $0x64] ss:$16 sps:$4 sm:$0xff]   ;;  %v13417_v49 = vld [vmem:[%s16029_s2 + $0x60] ss:$16 sps:$4 sm:$0xff]   ;;  %v327_v51 = vld [vmem:[%s13313_s29 + $0x98] sm:$0xff] }
  0x1c   : > { %2880 = vmatpush1.bf16.msra.mxu0 %v10944_v20  ;;  %v445_v52 = vpack.c.bf16 %v327_v51, %v326_v50  ;;  %v328_v53 = vld [vmem:[%s13313_s29 + $0xa0] sm:$0xff]  ;;  %v329_v54 = vld [vmem:[%s13313_s29 + $0xa8] sm:$0xff]  ;;  %v330_v58 = vld [vmem:[%s13313_s29 + $0xb0] sm:$0xff] }
  0x1d   : > { %2993 = vmatpush1.bf16.msra.mxu1 %v10947_v22  ;;  %2881 = vmatprep.subr.bf16.mxu0 %v10948_v25  ;;  %v13434_v55 = vld [vmem:[%s16029_s2 + $0x6c] ss:$16 sps:$4 sm:$0xff]   ;;  %v446_v56 = vpack.c.bf16 %v329_v54, %v328_v53  ;;  %v13442_v57 = vld [vmem:[%s16029_s2 + $0x68] ss:$16 sps:$4 sm:$0xff]   ;;  %v332_v61 = vld [vmem:[%s13313_s29 + $0xc0] sm:$0xff] }
  0x1e   : > { %2994 = vmatprep.subr.bf16.mxu1 %v10951_v28  ;;  %v331_v59 = vld [vmem:[%s13313_s29 + $0xb8] sm:$0xff]  ;;  %v333_v62 = vld [vmem:[%s13313_s29 + $0xc8] sm:$0xff]  ;;  %v334_v0 = vld [vmem:[%s13313_s29 + $0xd0] sm:$0xff] }
  0x1f   : > { %9231 = vmatmul.mubr.msk.bf16.gmra.mrb[4].mxu0 %vm570_vm0, %v437_v19  ;;  %9295 = vmatmul.mubr.msk.bf16.gmra.mrb[4].mxu1 %vm570_vm0, %v437_v19  ;;  %v447_v60 = vpack.c.bf16 %v331_v59, %v330_v58  ;;  %v448_v63 = vpack.c.bf16 %v333_v62, %v332_v61  ;;  %v335_v1 = vld [vmem:[%s13313_s29 + $0xd8] sm:$0xff]  ;;  %v336_v4 = vld [vmem:[%s13313_s29 + $0xe0] sm:$0xff]  ;;  %v337_v5 = vld [vmem:[%s13313_s29 + $0xe8] sm:$0xff] }
  0x20   : > { %815 = vmatprep.mubr.bf16.mxu0 %v16036_v2  ;;  %1488 = vmatprep.mubr.bf16.mxu1 %v16036_v2  ;;  %v449_v3 = vpack.c.bf16 %v335_v1, %v334_v0  ;;  %v450_v6 = vpack.c.bf16 %v337_v5, %v336_v4  ;;  %v338_v7 = vld [vmem:[%s13313_s29 + $0xf0] sm:$0xff]  ;;  %v339_v8 = vld [vmem:[%s13313_s29 + $0xf8] sm:$0xff]  ;;  %v340_v10 = vld [vmem:[%s13313_s29 + $0x100] sm:$0xff] }
  0x21   : > { %2882 = vmatpush1.bf16.msra.mxu0 %v10950_v27  ;;  %2995 = vmatpush1.bf16.msra.mxu1 %v10953_v29  ;;  %v451_v9 = vpack.c.bf16 %v339_v8, %v338_v7  ;;  %v341_v12 = vld [vmem:[%s13313_s29 + $0x108] sm:$0xff]  ;;  %v13484_v15 = vld [vmem:[%s16029_s2 + $0x84] ss:$16 sps:$4 sm:$0xff]   ;;  %v13489_v16 = vld [vmem:[%s16029_s2 + $0x80] ss:$16 sps:$4 sm:$0xff]  }
  0x22   : > { %2883 = vmatprep.subr.bf16.mxu0 %v13412_v48  ;;  %2996 = vmatprep.subr.bf16.mxu1 %v13434_v55  ;;  %v452_v13 = vpack.c.bf16 %v341_v12, %v340_v10  ;;  %v342_v17 = vld [vmem:[%s13313_s29 + $0x110] sm:$0xff]  ;;  %v343_v18 = vld [vmem:[%s13313_s29 + $0x118] sm:$0xff]  ;;  %v344_v20 = vld [vmem:[%s13313_s29 + $0x120] sm:$0xff] }
  0x23   : > { %v453_v19 = vpack.c.bf16 %v343_v18, %v342_v17  ;;  %v345_v21 = vld [vmem:[%s13313_s29 + $0x128] sm:$0xff]  ;;  %v346_v25 = vld [vmem:[%s13313_s29 + $0x130] sm:$0xff]  ;;  %v348_v28 = vld [vmem:[%s13313_s29 + $0x140] sm:$0xff] }
  0x24   : > { %v13506_v22 = vld [vmem:[%s16029_s2 + $0x8c] ss:$16 sps:$4 sm:$0xff]   ;;  %v454_v23 = vpack.c.bf16 %v345_v21, %v344_v20  ;;  %v13514_v24 = vld [vmem:[%s16029_s2 + $0x88] ss:$16 sps:$4 sm:$0xff]   ;;  %v350_v31 = vld [vmem:[%s13313_s29 + $0x150] sm:$0xff] }
  0x25   : > { %2884 = vmatpush1.bf16.msra.mxu0 %v13417_v49  ;;  %2997 = vmatpush1.bf16.msra.mxu1 %v13442_v57  ;;  %v349_v29 = vld [vmem:[%s13313_s29 + $0x148] sm:$0xff]  ;;  %v352_v34 = vld [vmem:[%s13313_s29 + $0x160] sm:$0xff]  ;;  %v354_v37 = vld [vmem:[%s13313_s29 + $0x170] sm:$0xff] }
  0x26   : > { %2885 = vmatprep.subr.bf16.mxu0 %v13484_v15  ;;  %2998 = vmatprep.subr.bf16.mxu1 %v13506_v22  ;;  %v456_v30 = vpack.c.bf16 %v349_v29, %v348_v28  ;;  %v356_v40 = vld [vmem:[%s13313_s29 + $0x180] sm:$0xff]  ;;  %v358_v45 = vld [vmem:[%s13313_s29 + $0x190] sm:$0xff]  ;;  %v359_v46 = vld [vmem:[%s13313_s29 + $0x198] sm:$0xff] }
  0x27   : > { %9232 = vmatmul.mubr.msk.bf16.gmra.mrb[8].mxu0 %vm570_vm0, %v438_v26  ;;  %9296 = vmatmul.mubr.msk.bf16.gmra.mrb[8].mxu1 %vm570_vm0, %v438_v26  ;;  %v347_v26 = vld [vmem:[%s13313_s29 + $0x138] sm:$0xff]  ;;  %v13556_v43 = vld [vmem:[%s16029_s2 + $0xa4] ss:$16 sps:$4 sm:$0xff]   ;;  %v361_v51 = vld [vmem:[%s13313_s29 + $0x1a8] sm:$0xff] }
  0x28   : > { %825 = vmatprep.mubr.bf16.mxu0 %v16036_v2  ;;  %1498 = vmatprep.mubr.bf16.mxu1 %v16036_v2  ;;  %v455_v27 = vpack.c.bf16 %v347_v26, %v346_v25  ;;  %v360_v50 = vld [vmem:[%s13313_s29 + $0x1a0] sm:$0xff]  ;;  %v13586_v54 = vld [vmem:[%s16029_s2 + $0xa8] ss:$16 sps:$4 sm:$0xff]   ;;  %v374_v18 = vld [vmem:[%s13313_s29 + $0x210] sm:$0xff] }
  0x29   : > { %2886 = vmatpush1.bf16.msra.mxu0 %v13489_v16  ;;  %2999 = vmatpush1.bf16.msra.mxu1 %v13514_v24  ;;  %v462_v53 = vpack.c.bf16 %v361_v51, %v360_v50  ;;  %v363_v58 = vld [vmem:[%s13313_s29 + $0x1b8] sm:$0xff]  ;;  %v365_v61 = vld [vmem:[%s13313_s29 + $0x1c8] sm:$0xff]  ;;  %v13633_v17 = vld [vmem:[%s16029_s2 + $0xc0] ss:$16 sps:$4 sm:$0xff]  }
  0x2a   : > { %2887 = vmatprep.subr.bf16.mxu0 %v13556_v43  ;;  %v367_v0 = vld [vmem:[%s13313_s29 + $0x1d8] sm:$0xff]  ;;  %v369_v4 = vld [vmem:[%s13313_s29 + $0x1e8] sm:$0xff]  ;;  %v376_v21 = vld [vmem:[%s13313_s29 + $0x220] sm:$0xff] }
  0x2b   : > { %v371_v7 = vld [vmem:[%s13313_s29 + $0x1f8] sm:$0xff]  ;;  %v373_v10 = vld [vmem:[%s13313_s29 + $0x208] sm:$0xff]  ;;  %v378_v28 = vld [vmem:[%s13313_s29 + $0x230] sm:$0xff] }
  0x2c   : > { %v13650_v25 = vld [vmem:[%s16029_s2 + $0xcc] ss:$16 sps:$4 sm:$0xff]   ;;  %v13700_v50 = vld [vmem:[%s16029_s2 + $0xe4] ss:$16 sps:$4 sm:$0xff]   ;;  %v13705_v51 = vld [vmem:[%s16029_s2 + $0xe0] ss:$16 sps:$4 sm:$0xff]  }
  0x2d   : > { %v379_v29 = vld [vmem:[%s13313_s29 + $0x238] sm:$0xff] }
  0x2f   : > { %9233 = vmatmul.mubr.msk.bf16.gmra.mrb[12].mxu0 %vm570_vm0, %v439_v32  ;;  %9297 = vmatmul.mubr.msk.bf16.gmra.mrb[12].mxu1 %vm570_vm0, %v439_v32  ;;  %v351_v32 = vld [vmem:[%s13313_s29 + $0x158] sm:$0xff] }
  0x30   : > { %835 = vmatprep.mubr.bf16.mxu0 %v16036_v2  ;;  %1508 = vmatprep.mubr.bf16.mxu1 %v16036_v2  ;;  %v457_v33 = vpack.c.bf16 %v351_v32, %v350_v31  ;;  %v380_v31 = vld [vmem:[%s13313_s29 + $0x240] sm:$0xff]  ;;  %v381_v32 = vld [vmem:[%s13313_s29 + $0x248] sm:$0xff] }
  0x37   : > { %9234 = vmatmul.mubr.msk.bf16.gmra.mrb[16].mxu0 %vm570_vm0, %v440_v35  ;;  %9298 = vmatmul.mubr.msk.bf16.gmra.mrb[16].mxu1 %vm570_vm0, %v440_v35  ;;  %v353_v35 = vld [vmem:[%s13313_s29 + $0x168] sm:$0xff] }
  0x38   : > { %845 = vmatprep.mubr.bf16.mxu0 %v16036_v2  ;;  %1518 = vmatprep.mubr.bf16.mxu1 %v16036_v2  ;;  %v458_v36 = vpack.c.bf16 %v353_v35, %v352_v34  ;;  %v382_v34 = vld [vmem:[%s13313_s29 + $0x250] sm:$0xff]  ;;  %v383_v35 = vld [vmem:[%s13313_s29 + $0x258] sm:$0xff] }
  0x3f   : > { %9235 = vmatmul.mubr.msk.bf16.gmra.mrb[20].mxu0 %vm570_vm0, %v441_v38  ;;  %9299 = vmatmul.mubr.msk.bf16.gmra.mrb[20].mxu1 %vm570_vm0, %v441_v38  ;;  %v355_v38 = vld [vmem:[%s13313_s29 + $0x178] sm:$0xff] }
  0x40   : > { %855 = vmatprep.mubr.bf16.mxu0 %v16036_v2  ;;  %1528 = vmatprep.mubr.bf16.mxu1 %v16036_v2  ;;  %v459_v39 = vpack.c.bf16 %v355_v38, %v354_v37  ;;  %v384_v37 = vld [vmem:[%s13313_s29 + $0x260] sm:$0xff]  ;;  %v385_v38 = vld [vmem:[%s13313_s29 + $0x268] sm:$0xff] }
  0x47   : > { %9236 = vmatmul.mubr.msk.bf16.gmra.mrb[24].mxu0 %vm570_vm0, %v442_v41  ;;  %9300 = vmatmul.mubr.msk.bf16.gmra.mrb[24].mxu1 %vm570_vm0, %v442_v41  ;;  %v357_v41 = vld [vmem:[%s13313_s29 + $0x188] sm:$0xff] }
  0x48   : > { %865 = vmatprep.mubr.bf16.mxu0 %v16036_v2  ;;  %1538 = vmatprep.mubr.bf16.mxu1 %v16036_v2  ;;  %v460_v42 = vpack.c.bf16 %v357_v41, %v356_v40  ;;  %v386_v40 = vld [vmem:[%s13313_s29 + $0x270] sm:$0xff]  ;;  %v387_v41 = vld [vmem:[%s13313_s29 + $0x278] sm:$0xff] }
  0x4f   : > { %9237 = vmatmul.mubr.msk.bf16.gmra.mrb[28].mxu0 %vm570_vm0, %v443_v44  ;;  %9301 = vmatmul.mubr.msk.bf16.gmra.mrb[28].mxu1 %vm570_vm0, %v443_v44  ;;  %v13561_v44 = vld [vmem:[%s16029_s2 + $0xa0] ss:$16 sps:$4 sm:$0xff]  }
  0x50   : > { %875 = vmatprep.mubr.bf16.mxu0 %v16036_v2  ;;  %1548 = vmatprep.mubr.bf16.mxu1 %v16036_v2 }
  0x51   : > { %2888 = vmatpush1.bf16.msra.mxu0 %v13561_v44 }
  0x57   : > { %9238 = vmatmul.mubr.msk.bf16.gmra.mrb[32].mxu0 %vm570_vm0, %v444_v47  ;;  %9302 = vmatmul.mubr.msk.bf16.gmra.mrb[32].mxu1 %vm570_vm0, %v444_v47  ;;  %v461_v47 = vpack.c.bf16 %v359_v46, %v358_v45  ;;  %v388_v45 = vld [vmem:[%s13313_s29 + $0x280] sm:$0xff]  ;;  %v389_v46 = vld [vmem:[%s13313_s29 + $0x288] sm:$0xff] }
  0x58   : > { %885 = vmatprep.mubr.bf16.mxu0 %v16036_v2  ;;  %1558 = vmatprep.mubr.bf16.mxu1 %v16036_v2 }
  0x5f   : > { %9239 = vmatmul.mubr.msk.bf16.gmra.mrb[36].mxu0 %vm570_vm0, %v445_v52  ;;  %9303 = vmatmul.mubr.msk.bf16.gmra.mrb[36].mxu1 %vm570_vm0, %v445_v52  ;;  %v13578_v52 = vld [vmem:[%s16029_s2 + $0xac] ss:$16 sps:$4 sm:$0xff]  }
  0x60   : > { %895 = vmatprep.mubr.bf16.mxu0 %v16036_v2  ;;  %1568 = vmatprep.mubr.bf16.mxu1 %v16036_v2 }
  0x61   : > { %3000 = vmatprep.subr.bf16.mxu1 %v13578_v52 }
  0x62   : > { %3001 = vmatpush1.bf16.msra.mxu1 %v13586_v54 }
  0x63   : > { %3002 = vmatprep.subr.bf16.mxu1 %v13650_v25 }
  0x67   : > { %9240 = vmatmul.mubr.msk.bf16.gmra.mrb[40].mxu0 %vm570_vm0, %v446_v56  ;;  %9304 = vmatmul.mubr.msk.bf16.gmra.mrb[40].mxu1 %vm570_vm0, %v446_v56  ;;  %v362_v56 = vld [vmem:[%s13313_s29 + $0x1b0] sm:$0xff] }
  0x68   : > { %905 = vmatprep.mubr.bf16.mxu0 %v16036_v2  ;;  %1578 = vmatprep.mubr.bf16.mxu1 %v16036_v2  ;;  %v463_v59 = vpack.c.bf16 %v363_v58, %v362_v56  ;;  %v391_v56 = vld [vmem:[%s13313_s29 + $0x298] sm:$0xff] }
  0x6f   : > { %9241 = vmatmul.mubr.msk.bf16.gmra.mrb[44].mxu0 %vm570_vm0, %v447_v60  ;;  %9305 = vmatmul.mubr.msk.bf16.gmra.mrb[44].mxu1 %vm570_vm0, %v447_v60  ;;  %v364_v60 = vld [vmem:[%s13313_s29 + $0x1c0] sm:$0xff] }
  0x70   : > { %915 = vmatprep.mubr.bf16.mxu0 %v16036_v2  ;;  %1588 = vmatprep.mubr.bf16.mxu1 %v16036_v2  ;;  %v464_v62 = vpack.c.bf16 %v365_v61, %v364_v60  ;;  %v393_v60 = vld [vmem:[%s13313_s29 + $0x2a8] sm:$0xff] }
  0x71   : > { %v13723_v61 = vld [vmem:[%s16029_s2 + $0xec] ss:$16 sps:$4 sm:$0xff]  }
  0x77   : > { %9242 = vmatmul.mubr.msk.bf16.gmra.mrb[48].mxu0 %vm570_vm0, %v448_v63  ;;  %9306 = vmatmul.mubr.msk.bf16.gmra.mrb[48].mxu1 %vm570_vm0, %v448_v63  ;;  %v366_v63 = vld [vmem:[%s13313_s29 + $0x1d0] sm:$0xff] }
  0x78   : > { %925 = vmatprep.mubr.bf16.mxu0 %v16036_v2  ;;  %1598 = vmatprep.mubr.bf16.mxu1 %v16036_v2  ;;  %v465_v1 = vpack.c.bf16 %v367_v0, %v366_v63  ;;  %v394_v63 = vld [vmem:[%s13313_s29 + $0x2b0] sm:$0xff]  ;;  %v395_v0 = vld [vmem:[%s13313_s29 + $0x2b8] sm:$0xff] }
  0x7f   : > { %9243 = vmatmul.mubr.msk.bf16.gmra.mrb[52].mxu0 %vm570_vm0, %v449_v3  ;;  %9307 = vmatmul.mubr.msk.bf16.gmra.mrb[52].mxu1 %vm570_vm0, %v449_v3  ;;  %v368_v3 = vld [vmem:[%s13313_s29 + $0x1e0] sm:$0xff] }
  0x80   : > { %935 = vmatprep.mubr.bf16.mxu0 %v16036_v2  ;;  %1608 = vmatprep.mubr.bf16.mxu1 %v16036_v2  ;;  %v466_v5 = vpack.c.bf16 %v369_v4, %v368_v3  ;;  %v396_v3 = vld [vmem:[%s13313_s29 + $0x2c0] sm:$0xff]  ;;  %v397_v4 = vld [vmem:[%s13313_s29 + $0x2c8] sm:$0xff] }
  0x87   : > { %9244 = vmatmul.mubr.msk.bf16.gmra.mrb[56].mxu0 %vm570_vm0, %v450_v6  ;;  %9308 = vmatmul.mubr.msk.bf16.gmra.mrb[56].mxu1 %vm570_vm0, %v450_v6  ;;  %v370_v6 = vld [vmem:[%s13313_s29 + $0x1f0] sm:$0xff] }
  0x88   : > { %945 = vmatprep.mubr.bf16.mxu0 %v16036_v2  ;;  %1618 = vmatprep.mubr.bf16.mxu1 %v16036_v2  ;;  %v467_v8 = vpack.c.bf16 %v371_v7, %v370_v6  ;;  %v399_v6 = vld [vmem:[%s13313_s29 + $0x2d8] sm:$0xff] }
  0x8f   : > { %9245 = vmatmul.mubr.msk.bf16.gmra.mrb[60].mxu0 %vm570_vm0, %v451_v9  ;;  %9309 = vmatmul.mubr.msk.bf16.gmra.mrb[60].mxu1 %vm570_vm0, %v451_v9  ;;  %v372_v9 = vld [vmem:[%s13313_s29 + $0x200] sm:$0xff] }
  0x90   : > { %955 = vmatprep.mubr.bf16.mxu0 %v16036_v2  ;;  %1628 = vmatprep.mubr.bf16.mxu1 %v16036_v2  ;;  %v468_v12 = vpack.c.bf16 %v373_v10, %v372_v9  ;;  %v401_v9 = vld [vmem:[%s13313_s29 + $0x2e8] sm:$0xff] }
  0x97   : > { %9246 = vmatmul.mubr.msk.bf16.gmra.mrb[64].mxu0 %vm570_vm0, %v452_v13  ;;  %9310 = vmatmul.mubr.msk.bf16.gmra.mrb[64].mxu1 %vm570_vm0, %v452_v13  ;;  %v13628_v13 = vld [vmem:[%s16029_s2 + $0xc4] ss:$16 sps:$4 sm:$0xff]  }
  0x98   : > { %965 = vmatprep.mubr.bf16.mxu0 %v16036_v2  ;;  %1638 = vmatprep.mubr.bf16.mxu1 %v16036_v2 }
  0x99   : > { %2889 = vmatprep.subr.bf16.mxu0 %v13628_v13 }
  0x9a   : > { %2890 = vmatpush1.bf16.msra.mxu0 %v13633_v17 }
  0x9b   : > { %2891 = vmatprep.subr.bf16.mxu0 %v13700_v50 }
  0x9e   : > { %2892 = vmatpush1.bf16.msra.mxu0 %v13705_v51 }
  0x9f   : > { %9247 = vmatmul.mubr.msk.bf16.gmra.mrb[68].mxu0 %vm570_vm0, %v453_v19  ;;  %9311 = vmatmul.mubr.msk.bf16.gmra.mrb[68].mxu1 %vm570_vm0, %v453_v19  ;;  %v375_v19 = vld [vmem:[%s13313_s29 + $0x218] sm:$0xff] }
  0xa0   : > { %975 = vmatprep.mubr.bf16.mxu0 %v16036_v2  ;;  %1648 = vmatprep.mubr.bf16.mxu1 %v16036_v2  ;;  %v469_v20 = vpack.c.bf16 %v375_v19, %v374_v18  ;;  %v403_v18 = vld [vmem:[%s13313_s29 + $0x2f8] sm:$0xff] }
  0xa1   : > { %3623 = vmatprep.subr.bf16.mxu0 %v13320_v11 }
  0xa7   : > { %9248 = vmatmul.mubr.msk.bf16.gmra.mrb[72].mxu0 %vm570_vm0, %v454_v23  ;;  %9312 = vmatmul.mubr.msk.bf16.gmra.mrb[72].mxu1 %vm570_vm0, %v454_v23  ;;  %v377_v23 = vld [vmem:[%s13313_s29 + $0x228] sm:$0xff] }
  0xa8   : > { %985 = vmatprep.mubr.bf16.mxu0 %v16036_v2  ;;  %1658 = vmatprep.mubr.bf16.mxu1 %v16036_v2  ;;  %v470_v26 = vpack.c.bf16 %v377_v23, %v376_v21  ;;  %v405_v21 = vld [vmem:[%s13313_s29 + $0x308] sm:$0xff] }
  0xaf   : > { %9249 = vmatmul.mubr.msk.bf16.gmra.mrb[76].mxu0 %vm570_vm0, %v455_v27  ;;  %9313 = vmatmul.mubr.msk.bf16.gmra.mrb[76].mxu1 %vm570_vm0, %v455_v27  ;;  %v13658_v27 = vld [vmem:[%s16029_s2 + $0xc8] ss:$16 sps:$4 sm:$0xff]  }
  0xb0   : > { %995 = vmatprep.mubr.bf16.mxu0 %v16036_v2  ;;  %1668 = vmatprep.mubr.bf16.mxu1 %v16036_v2 }
  0xb1   : > { %3003 = vmatpush1.bf16.msra.mxu1 %v13658_v27 }
  0xb2   : > { %3004 = vmatprep.subr.bf16.mxu1 %v13723_v61 }
  0xb7   : > { %9250 = vmatmul.mubr.msk.bf16.gmra.mrb[80].mxu0 %vm570_vm0, %v456_v30  ;;  %9314 = vmatmul.mubr.msk.bf16.gmra.mrb[80].mxu1 %vm570_vm0, %v456_v30  ;;  %v471_v30 = vpack.c.bf16 %v379_v29, %v378_v28  ;;  %v407_v28 = vld [vmem:[%s13313_s29 + $0x318] sm:$0xff] }
  0xb8   : > { %1005 = vmatprep.mubr.bf16.mxu0 %v16036_v2  ;;  %1678 = vmatprep.mubr.bf16.mxu1 %v16036_v2 }
  0xbf   : > { %9251 = vmatmul.mubr.msk.bf16.gmra.mrb[84].mxu0 %vm570_vm0, %v457_v33  ;;  %9315 = vmatmul.mubr.msk.bf16.gmra.mrb[84].mxu1 %vm570_vm0, %v457_v33  ;;  %v472_v33 = vpack.c.bf16 %v381_v32, %v380_v31  ;;  %v409_v31 = vld [vmem:[%s13313_s29 + $0x328] sm:$0xff] }
  0xc0   : > { %1015 = vmatprep.mubr.bf16.mxu0 %v16036_v2  ;;  %1688 = vmatprep.mubr.bf16.mxu1 %v16036_v2 }
  0xc7   : > { %9252 = vmatmul.mubr.msk.bf16.gmra.mrb[88].mxu0 %vm570_vm0, %v458_v36  ;;  %9316 = vmatmul.mubr.msk.bf16.gmra.mrb[88].mxu1 %vm570_vm0, %v458_v36  ;;  %v473_v36 = vpack.c.bf16 %v383_v35, %v382_v34  ;;  %v411_v34 = vld [vmem:[%s13313_s29 + $0x338] sm:$0xff] }
  0xc8   : > { %1025 = vmatprep.mubr.bf16.mxu0 %v16036_v2  ;;  %1698 = vmatprep.mubr.bf16.mxu1 %v16036_v2 }
  0xcf   : > { %9253 = vmatmul.mubr.msk.bf16.gmra.mrb[92].mxu0 %vm570_vm0, %v459_v39  ;;  %9317 = vmatmul.mubr.msk.bf16.gmra.mrb[92].mxu1 %vm570_vm0, %v459_v39  ;;  %v474_v39 = vpack.c.bf16 %v385_v38, %v384_v37  ;;  %v413_v37 = vld [vmem:[%s13313_s29 + $0x348] sm:$0xff] }
  0xd0   : > { %1035 = vmatprep.mubr.bf16.mxu0 %v16036_v2  ;;  %1708 = vmatprep.mubr.bf16.mxu1 %v16036_v2 }
  0xd7   : > { %9254 = vmatmul.mubr.msk.bf16.gmra.mrb[96].mxu0 %vm570_vm0, %v460_v42  ;;  %9318 = vmatmul.mubr.msk.bf16.gmra.mrb[96].mxu1 %vm570_vm0, %v460_v42  ;;  %v475_v42 = vpack.c.bf16 %v387_v41, %v386_v40  ;;  %v415_v40 = vld [vmem:[%s13313_s29 + $0x358] sm:$0xff] }
  0xd8   : > { %1045 = vmatprep.mubr.bf16.mxu0 %v16036_v2  ;;  %1718 = vmatprep.mubr.bf16.mxu1 %v16036_v2 }
  0xdf   : > { %9255 = vmatmul.mubr.msk.bf16.gmra.mrb[100].mxu0 %vm570_vm0, %v461_v47  ;;  %9319 = vmatmul.mubr.msk.bf16.gmra.mrb[100].mxu1 %vm570_vm0, %v461_v47  ;;  %v476_v47 = vpack.c.bf16 %v389_v46, %v388_v45  ;;  %v417_v45 = vld [vmem:[%s13313_s29 + $0x368] sm:$0xff] }
  0xe0   : > { %1055 = vmatprep.mubr.bf16.mxu0 %v16036_v2  ;;  %1728 = vmatprep.mubr.bf16.mxu1 %v16036_v2 }
  0xe7   : > { %9256 = vmatmul.mubr.msk.bf16.gmra.mrb[104].mxu0 %vm570_vm0, %v462_v53  ;;  %9320 = vmatmul.mubr.msk.bf16.gmra.mrb[104].mxu1 %vm570_vm0, %v462_v53  ;;  %v390_v53 = vld [vmem:[%s13313_s29 + $0x290] sm:$0xff] }
  0xe8   : > { %1065 = vmatprep.mubr.bf16.mxu0 %v16036_v2  ;;  %1738 = vmatprep.mubr.bf16.mxu1 %v16036_v2  ;;  %v477_v58 = vpack.c.bf16 %v391_v56, %v390_v53  ;;  %v419_v53 = vld [vmem:[%s13313_s29 + $0x378] sm:$0xff] }
  0xef   : > { %9257 = vmatmul.mubr.msk.bf16.gmra.mrb[108].mxu0 %vm570_vm0, %v463_v59  ;;  %9321 = vmatmul.mubr.msk.bf16.gmra.mrb[108].mxu1 %vm570_vm0, %v463_v59  ;;  %v392_v59 = vld [vmem:[%s13313_s29 + $0x2a0] sm:$0xff] }
  0xf0   : > { %1075 = vmatprep.mubr.bf16.mxu0 %v16036_v2  ;;  %1748 = vmatprep.mubr.bf16.mxu1 %v16036_v2  ;;  %v478_v11 = vpack.c.bf16 %v393_v60, %v392_v59  ;;  %v421_v59 = vld [vmem:[%s13313_s29 + $0x388] sm:$0xff] }
  0xf7   : > { %9258 = vmatmul.mubr.msk.bf16.gmra.mrb[112].mxu0 %vm570_vm0, %v464_v62  ;;  %9322 = vmatmul.mubr.msk.bf16.gmra.mrb[112].mxu1 %vm570_vm0, %v464_v62  ;;  %v13731_v62 = vld [vmem:[%s16029_s2 + $0xe8] ss:$16 sps:$4 sm:$0xff]  }
  0xf8   : > { %1085 = vmatprep.mubr.bf16.mxu0 %v16036_v2  ;;  %1758 = vmatprep.mubr.bf16.mxu1 %v16036_v2 }
  0xf9   : > { %3005 = vmatpush1.bf16.msra.mxu1 %v13731_v62 }
  0xfa   : > { %3736 = vmatprep.subr.bf16.mxu1 %v13328_v14  ;;  %v398_v14 = vld [vmem:[%s13313_s29 + $0x2d0] sm:$0xff] }
  0xfb   : > { %v481_v7 = vpack.c.bf16 %v399_v6, %v398_v14  ;;  %v427_v14 = vld [vmem:[%s13313_s29 + $0x3b8] sm:$0xff] }
  0xff   : > { %9259 = vmatmul.mubr.msk.bf16.gmra.mrb[116].mxu0 %vm570_vm0, %v465_v1  ;;  %9323 = vmatmul.mubr.msk.bf16.gmra.mrb[116].mxu1 %vm570_vm0, %v465_v1  ;;  %v479_v1 = vpack.c.bf16 %v395_v0, %v394_v63  ;;  %v423_v63 = vld [vmem:[%s13313_s29 + $0x398] sm:$0xff] }
 0x100   : > { %1095 = vmatprep.mubr.bf16.mxu0 %v16036_v2  ;;  %1768 = vmatprep.mubr.bf16.mxu1 %v16036_v2 }
 0x107   : > { %9260 = vmatmul.mubr.msk.bf16.gmra.mrb[120].mxu0 %vm570_vm0, %v466_v5  ;;  %9324 = vmatmul.mubr.msk.bf16.gmra.mrb[120].mxu1 %vm570_vm0, %v466_v5  ;;  %v480_v5 = vpack.c.bf16 %v397_v4, %v396_v3  ;;  %v425_v3 = vld [vmem:[%s13313_s29 + $0x3a8] sm:$0xff] }
 0x108   : > { %1105 = vmatprep.mubr.bf16.mxu0 %v16036_v2  ;;  %1778 = vmatprep.mubr.bf16.mxu1 %v16036_v2 }
 0x10f   : > { %9261 = vmatmul.mubr.msk.bf16.gmra.mrb[124].mxu0 %vm570_vm0, %v467_v8  ;;  %9325 = vmatmul.mubr.msk.bf16.gmra.mrb[124].mxu1 %vm570_vm0, %v467_v8  ;;  %v400_v8 = vld [vmem:[%s13313_s29 + $0x2e0] sm:$0xff] }
 0x110   : > { %1115 = vmatprep.mubr.bf16.mxu0 %v16036_v2  ;;  %1788 = vmatprep.mubr.bf16.mxu1 %v16036_v2  ;;  %v482_v10 = vpack.c.bf16 %v401_v9, %v400_v8  ;;  %v429_v8 = vld [vmem:[%s13313_s29 + $0x3c8] sm:$0xff] }
 0x117   : > { %9262 = vmatmul.mubr.msk.bf16.gmra.mrb[128].mxu0 %vm570_vm0, %v468_v12  ;;  %9326 = vmatmul.mubr.msk.bf16.gmra.mrb[128].mxu1 %vm570_vm0, %v468_v12  ;;  %v402_v12 = vld [vmem:[%s13313_s29 + $0x2f0] sm:$0xff] }
 0x118   : > { %1125 = vmatprep.mubr.bf16.mxu0 %v16036_v2  ;;  %1798 = vmatprep.mubr.bf16.mxu1 %v16036_v2  ;;  %v483_v19 = vpack.c.bf16 %v403_v18, %v402_v12  ;;  %v431_v12 = vld [vmem:[%s13313_s29 + $0x3d8] sm:$0xff] }
 0x11f   : > { %9263 = vmatmul.mubr.msk.bf16.gmra.mrb[132].mxu0 %vm570_vm0, %v469_v20  ;;  %9327 = vmatmul.mubr.msk.bf16.gmra.mrb[132].mxu1 %vm570_vm0, %v469_v20  ;;  %v404_v20 = vld [vmem:[%s13313_s29 + $0x300] sm:$0xff] }
 0x120   : > { %1135 = vmatprep.mubr.bf16.mxu0 %v16036_v2  ;;  %1808 = vmatprep.mubr.bf16.mxu1 %v16036_v2  ;;  %v484_v23 = vpack.c.bf16 %v405_v21, %v404_v20  ;;  %v433_v20 = vld [vmem:[%s13313_s29 + $0x3e8] sm:$0xff] }
 0x127   : > { %9264 = vmatmul.mubr.msk.bf16.gmra.mrb[136].mxu0 %vm570_vm0, %v470_v26  ;;  %9328 = vmatmul.mubr.msk.bf16.gmra.mrb[136].mxu1 %vm570_vm0, %v470_v26  ;;  %v406_v26 = vld [vmem:[%s13313_s29 + $0x310] sm:$0xff] }
 0x128   : > { %1145 = vmatprep.mubr.bf16.mxu0 %v16036_v2  ;;  %1818 = vmatprep.mubr.bf16.mxu1 %v16036_v2  ;;  %v485_v29 = vpack.c.bf16 %v407_v28, %v406_v26  ;;  %v435_v26 = vld [vmem:[%s13313_s29 + $0x3f8] sm:$0xff] }
 0x12f   : > { %9265 = vmatmul.mubr.msk.bf16.gmra.mrb[140].mxu0 %vm570_vm0, %v471_v30  ;;  %9329 = vmatmul.mubr.msk.bf16.gmra.mrb[140].mxu1 %vm570_vm0, %v471_v30  ;;  %v408_v30 = vld [vmem:[%s13313_s29 + $0x320] sm:$0xff] }
 0x130   : > { %1155 = vmatprep.mubr.bf16.mxu0 %v16036_v2  ;;  %1828 = vmatprep.mubr.bf16.mxu1 %v16036_v2  ;;  %v486_v32 = vpack.c.bf16 %v409_v31, %v408_v30  ;;  %v13876_v30 = vld [vmem:[%s16029_s2 + $0x8] ss:$16 sps:$4 sm:$0xff]   ;;  %v13882_v31 = vld [vmem:[%s16029_s2 + $0x24] ss:$16 sps:$4 sm:$0xff]  }
 0x137   : > { %9266 = vmatmul.mubr.msk.bf16.gmra.mrb[144].mxu0 %vm570_vm0, %v472_v33  ;;  %9330 = vmatmul.mubr.msk.bf16.gmra.mrb[144].mxu1 %vm570_vm0, %v472_v33  ;;  %v410_v33 = vld [vmem:[%s13313_s29 + $0x330] sm:$0xff] }
 0x138   : > { %1165 = vmatprep.mubr.bf16.mxu0 %v16036_v2  ;;  %1838 = vmatprep.mubr.bf16.mxu1 %v16036_v2  ;;  %v487_v35 = vpack.c.bf16 %v411_v34, %v410_v33  ;;  %v13894_v33 = vld [vmem:[%s16029_s2 + $0x20] ss:$16 sps:$4 sm:$0xff]   ;;  %v13900_v34 = vld [vmem:[%s16029_s2 + $0x28] ss:$16 sps:$4 sm:$0xff]  }
 0x13f   : > { %9267 = vmatmul.mubr.msk.bf16.gmra.mrb[148].mxu0 %vm570_vm0, %v473_v36  ;;  %9331 = vmatmul.mubr.msk.bf16.gmra.mrb[148].mxu1 %vm570_vm0, %v473_v36  ;;  %v412_v36 = vld [vmem:[%s13313_s29 + $0x340] sm:$0xff] }
 0x140   : > { %1175 = vmatprep.mubr.bf16.mxu0 %v16036_v2  ;;  %1848 = vmatprep.mubr.bf16.mxu1 %v16036_v2  ;;  %v488_v38 = vpack.c.bf16 %v413_v37, %v412_v36  ;;  %v13912_v36 = vld [vmem:[%s16029_s2 + $0x4c] ss:$16 sps:$4 sm:$0xff]   ;;  %v13922_v37 = vld [vmem:[%s16029_s2 + $0x40] ss:$16 sps:$4 sm:$0xff]  }
 0x147   : > { %9268 = vmatmul.mubr.msk.bf16.gmra.mrb[152].mxu0 %vm570_vm0, %v474_v39  ;;  %9332 = vmatmul.mubr.msk.bf16.gmra.mrb[152].mxu1 %vm570_vm0, %v474_v39  ;;  %v414_v39 = vld [vmem:[%s13313_s29 + $0x350] sm:$0xff] }
 0x148   : > { %1185 = vmatprep.mubr.bf16.mxu0 %v16036_v2  ;;  %1858 = vmatprep.mubr.bf16.mxu1 %v16036_v2  ;;  %v489_v41 = vpack.c.bf16 %v415_v40, %v414_v39 }
 0x14f   : > { %9269 = vmatmul.mubr.msk.bf16.gmra.mrb[156].mxu0 %vm570_vm0, %v475_v42  ;;  %9333 = vmatmul.mubr.msk.bf16.gmra.mrb[156].mxu1 %vm570_vm0, %v475_v42  ;;  %v416_v42 = vld [vmem:[%s13313_s29 + $0x360] sm:$0xff] }
 0x150   : > { %1195 = vmatprep.mubr.bf16.mxu0 %v16036_v2  ;;  %1868 = vmatprep.mubr.bf16.mxu1 %v16036_v2  ;;  %v490_v46 = vpack.c.bf16 %v417_v45, %v416_v42 }
 0x157   : > { %9270 = vmatmul.mubr.msk.bf16.gmra.mrb[160].mxu0 %vm570_vm0, %v476_v47  ;;  %9334 = vmatmul.mubr.msk.bf16.gmra.mrb[160].mxu1 %vm570_vm0, %v476_v47  ;;  %v418_v47 = vld [vmem:[%s13313_s29 + $0x370] sm:$0xff] }
 0x158   : > { %1205 = vmatprep.mubr.bf16.mxu0 %v16036_v2  ;;  %1878 = vmatprep.mubr.bf16.mxu1 %v16036_v2  ;;  %v491_v56 = vpack.c.bf16 %v419_v53, %v418_v47 }
 0x15f   : > { %9271 = vmatmul.mubr.msk.bf16.gmra.mrb[164].mxu0 %vm570_vm0, %v477_v58  ;;  %9335 = vmatmul.mubr.msk.bf16.gmra.mrb[164].mxu1 %vm570_vm0, %v477_v58  ;;  %v420_v58 = vld [vmem:[%s13313_s29 + $0x380] sm:$0xff] }
 0x160   : > { %1215 = vmatprep.mubr.bf16.mxu0 %v16036_v2  ;;  %1888 = vmatprep.mubr.bf16.mxu1 %v16036_v2  ;;  %v492_v60 = vpack.c.bf16 %v421_v59, %v420_v58 }
 0x167   : > { %9272 = vmatmul.mubr.msk.bf16.gmra.mrb[168].mxu0 %vm570_vm0, %v478_v11  ;;  %9336 = vmatmul.mubr.msk.bf16.gmra.mrb[168].mxu1 %vm570_vm0, %v478_v11  ;;  %v422_v11 = vld [vmem:[%s13313_s29 + $0x390] sm:$0xff] }
 0x168   : > { %1225 = vmatprep.mubr.bf16.mxu0 %v16036_v2  ;;  %1898 = vmatprep.mubr.bf16.mxu1 %v16036_v2  ;;  %v493_v0 = vpack.c.bf16 %v423_v63, %v422_v11 }
 0x16f   : > { %9273 = vmatmul.mubr.msk.bf16.gmra.mrb[172].mxu0 %vm570_vm0, %v479_v1  ;;  %9337 = vmatmul.mubr.msk.bf16.gmra.mrb[172].mxu1 %vm570_vm0, %v479_v1  ;;  %v424_v1 = vld [vmem:[%s13313_s29 + $0x3a0] sm:$0xff] }
 0x170   : > { %1235 = vmatprep.mubr.bf16.mxu0 %v16036_v2  ;;  %1908 = vmatprep.mubr.bf16.mxu1 %v16036_v2  ;;  %v494_v4 = vpack.c.bf16 %v425_v3, %v424_v1 }
 0x177   : > { %9274 = vmatmul.mubr.msk.bf16.gmra.mrb[176].mxu0 %vm570_vm0, %v480_v5  ;;  %9338 = vmatmul.mubr.msk.bf16.gmra.mrb[176].mxu1 %vm570_vm0, %v480_v5  ;;  %v426_v5 = vld [vmem:[%s13313_s29 + $0x3b0] sm:$0xff] }
 0x178   : > { %1245 = vmatprep.mubr.bf16.mxu0 %v16036_v2  ;;  %1918 = vmatprep.mubr.bf16.mxu1 %v16036_v2  ;;  %v495_v6 = vpack.c.bf16 %v427_v14, %v426_v5 }
 0x17f   : > { %9275 = vmatmul.mubr.msk.bf16.gmra.mrb[180].mxu0 %vm570_vm0, %v481_v7  ;;  %9339 = vmatmul.mubr.msk.bf16.gmra.mrb[180].mxu1 %vm570_vm0, %v481_v7  ;;  %v428_v7 = vld [vmem:[%s13313_s29 + $0x3c0] sm:$0xff] }
 0x180   : > { %1255 = vmatprep.mubr.bf16.mxu0 %v16036_v2  ;;  %1928 = vmatprep.mubr.bf16.mxu1 %v16036_v2  ;;  %v496_v9 = vpack.c.bf16 %v429_v8, %v428_v7 }
 0x187   : > { %9276 = vmatmul.mubr.msk.bf16.gmra.mrb[184].mxu0 %vm570_vm0, %v482_v10  ;;  %9340 = vmatmul.mubr.msk.bf16.gmra.mrb[184].mxu1 %vm570_vm0, %v482_v10  ;;  %v430_v10 = vld [vmem:[%s13313_s29 + $0x3d0] sm:$0xff] }
 0x188   : > { %1265 = vmatprep.mubr.bf16.mxu0 %v16036_v2  ;;  %1938 = vmatprep.mubr.bf16.mxu1 %v16036_v2  ;;  %v497_v18 = vpack.c.bf16 %v431_v12, %v430_v10 }
 0x18f   : > { %9277 = vmatmul.mubr.msk.bf16.gmra.mrb[188].mxu0 %vm570_vm0, %v483_v19  ;;  %9341 = vmatmul.mubr.msk.bf16.gmra.mrb[188].mxu1 %vm570_vm0, %v483_v19  ;;  %v432_v19 = vld [vmem:[%s13313_s29 + $0x3e0] sm:$0xff] }
 0x190   : > { %1275 = vmatprep.mubr.bf16.mxu0 %v16036_v2  ;;  %1948 = vmatprep.mubr.bf16.mxu1 %v16036_v2  ;;  %v498_v21 = vpack.c.bf16 %v433_v20, %v432_v19 }
 0x197   : > { %9278 = vmatmul.mubr.msk.bf16.gmra.mrb[192].mxu0 %vm570_vm0, %v484_v23  ;;  %9342 = vmatmul.mubr.msk.bf16.gmra.mrb[192].mxu1 %vm570_vm0, %v484_v23  ;;  %v434_v23 = vld [vmem:[%s13313_s29 + $0x3f0] sm:$0xff]  ;;  %s16006_s29 = scalar_lea.vmem %s16035_s8, %s9221_s12 }
 0x198   : > { %1285 = vmatprep.mubr.bf16.mxu0 %v16036_v2  ;;  %1958 = vmatprep.mubr.bf16.mxu1 %v16036_v2  ;;  %v499_v28 = vpack.c.bf16 %v435_v26, %v434_v23 }
 0x19f   : > { %9279 = vmatmul.mubr.msk.bf16.gmra.mrb[196].mxu0 %vm570_vm0, %v485_v29  ;;  %9343 = vmatmul.mubr.msk.bf16.gmra.mrb[196].mxu1 %vm570_vm0, %v485_v29  ;;  %v13870_v29 = vld [vmem:[%s16029_s2] ss:$16 sps:$4 sm:$0xff]  }
 0x1a0   : > { %1295 = vmatprep.mubr.bf16.mxu0 %v16036_v2  ;;  %1968 = vmatprep.mubr.bf16.mxu1 %v16036_v2 }
 0x1a7   : > { %9280 = vmatmul.mubr.msk.bf16.gmra.mrb[200].mxu0 %vm570_vm0, %v486_v32  ;;  %9344 = vmatmul.mubr.msk.bf16.gmra.mrb[200].mxu1 %vm570_vm0, %v486_v32  ;;  %v13888_v32 = vld [vmem:[%s16029_s2 + $0x2c] ss:$16 sps:$4 sm:$0xff]  }
 0x1a8   : > { %1305 = vmatprep.mubr.bf16.mxu0 %v16036_v2  ;;  %1978 = vmatprep.mubr.bf16.mxu1 %v16036_v2 }
 0x1af   : > { %9281 = vmatmul.mubr.msk.bf16.gmra.mrb[204].mxu0 %vm570_vm0, %v487_v35  ;;  %9345 = vmatmul.mubr.msk.bf16.gmra.mrb[204].mxu1 %vm570_vm0, %v487_v35  ;;  %v13906_v35 = vld [vmem:[%s16029_s2 + $0x44] ss:$16 sps:$4 sm:$0xff]  }
 0x1b0   : > { %1315 = vmatprep.mubr.bf16.mxu0 %v16036_v2  ;;  %1988 = vmatprep.mubr.bf16.mxu1 %v16036_v2 }
 0x1b7   : > { %9282 = vmatmul.mubr.msk.bf16.gmra.mrb[208].mxu0 %vm570_vm0, %v488_v38  ;;  %9346 = vmatmul.mubr.msk.bf16.gmra.mrb[208].mxu1 %vm570_vm0, %v488_v38  ;;  %v13928_v38 = vld [vmem:[%s16029_s2 + $0x48] ss:$16 sps:$4 sm:$0xff]  }
 0x1b8   : > { %1325 = vmatprep.mubr.bf16.mxu0 %v16036_v2  ;;  %1998 = vmatprep.mubr.bf16.mxu1 %v16036_v2 }
 0x1bf   : > { %9283 = vmatmul.mubr.msk.bf16.gmra.mrb[212].mxu0 %vm570_vm0, %v489_v41  ;;  %9347 = vmatmul.mubr.msk.bf16.gmra.mrb[212].mxu1 %vm570_vm0, %v489_v41 }
 0x1c0   : > { %1335 = vmatprep.mubr.bf16.mxu0 %v16036_v2  ;;  %2008 = vmatprep.mubr.bf16.mxu1 %v16036_v2 }
 0x1c7   : > { %9284 = vmatmul.mubr.msk.bf16.gmra.mrb[216].mxu0 %vm570_vm0, %v490_v46  ;;  %9348 = vmatmul.mubr.msk.bf16.gmra.mrb[216].mxu1 %vm570_vm0, %v490_v46 }
 0x1c8   : > { %1345 = vmatprep.mubr.bf16.mxu0 %v16036_v2  ;;  %2018 = vmatprep.mubr.bf16.mxu1 %v16036_v2 }
 0x1cf   : > { %9285 = vmatmul.mubr.msk.bf16.gmra.mrb[220].mxu0 %vm570_vm0, %v491_v56  ;;  %9349 = vmatmul.mubr.msk.bf16.gmra.mrb[220].mxu1 %vm570_vm0, %v491_v56 }
 0x1d0   : > { %1355 = vmatprep.mubr.bf16.mxu0 %v16036_v2  ;;  %2028 = vmatprep.mubr.bf16.mxu1 %v16036_v2 }
 0x1d7   : > { %9286 = vmatmul.mubr.msk.bf16.gmra.mrb[224].mxu0 %vm570_vm0, %v492_v60  ;;  %9350 = vmatmul.mubr.msk.bf16.gmra.mrb[224].mxu1 %vm570_vm0, %v492_v60 }
 0x1d8   : > { %1365 = vmatprep.mubr.bf16.mxu0 %v16036_v2  ;;  %2038 = vmatprep.mubr.bf16.mxu1 %v16036_v2 }
 0x1df   : > { %9287 = vmatmul.mubr.msk.bf16.gmra.mrb[228].mxu0 %vm570_vm0, %v493_v0  ;;  %9351 = vmatmul.mubr.msk.bf16.gmra.mrb[228].mxu1 %vm570_vm0, %v493_v0 }
 0x1e0   : > { %1375 = vmatprep.mubr.bf16.mxu0 %v16036_v2  ;;  %2048 = vmatprep.mubr.bf16.mxu1 %v16036_v2 }
 0x1e7   : > { %9288 = vmatmul.mubr.msk.bf16.gmra.mrb[232].mxu0 %vm570_vm0, %v494_v4  ;;  %9352 = vmatmul.mubr.msk.bf16.gmra.mrb[232].mxu1 %vm570_vm0, %v494_v4 }
 0x1e8   : > { %1385 = vmatprep.mubr.bf16.mxu0 %v16036_v2  ;;  %2058 = vmatprep.mubr.bf16.mxu1 %v16036_v2 }
 0x1ef   : > { %9289 = vmatmul.mubr.msk.bf16.gmra.mrb[236].mxu0 %vm570_vm0, %v495_v6  ;;  %9353 = vmatmul.mubr.msk.bf16.gmra.mrb[236].mxu1 %vm570_vm0, %v495_v6 }
 0x1f0   : > { %1395 = vmatprep.mubr.bf16.mxu0 %v16036_v2  ;;  %2068 = vmatprep.mubr.bf16.mxu1 %v16036_v2 }
 0x1f7   : > { %9290 = vmatmul.mubr.msk.bf16.gmra.mrb[240].mxu0 %vm570_vm0, %v496_v9  ;;  %9354 = vmatmul.mubr.msk.bf16.gmra.mrb[240].mxu1 %vm570_vm0, %v496_v9 }
 0x1f8   : > { %1405 = vmatprep.mubr.bf16.mxu0 %v16036_v2  ;;  %2078 = vmatprep.mubr.bf16.mxu1 %v16036_v2 }
 0x1ff   : > { %9291 = vmatmul.mubr.msk.bf16.gmra.mrb[244].mxu0 %vm570_vm0, %v497_v18  ;;  %9355 = vmatmul.mubr.msk.bf16.gmra.mrb[244].mxu1 %vm570_vm0, %v497_v18 }
 0x200   : > { %1415 = vmatprep.mubr.bf16.mxu0 %v16036_v2  ;;  %2088 = vmatprep.mubr.bf16.mxu1 %v16036_v2 }
 0x207   : > { %9292 = vmatmul.mubr.msk.bf16.gmra.mrb[248].mxu0 %vm570_vm0, %v498_v21  ;;  %9356 = vmatmul.mubr.msk.bf16.gmra.mrb[248].mxu1 %vm570_vm0, %v498_v21 }
 0x208   : > { %1425 = vmatprep.mubr.bf16.mxu0 %v16036_v2  ;;  %2098 = vmatprep.mubr.bf16.mxu1 %v16036_v2 }
 0x20f   : > { %9293 = vmatmul.mubr.msk.bf16.gmra.mrb[252].mxu0 %vm570_vm0, %v499_v28  ;;  %9357 = vmatmul.mubr.msk.bf16.gmra.mrb[252].mxu1 %vm570_vm0, %v499_v28 }
 0x210   : > { %2909 = vmatprep.mubr.bf16.mxu0 %v16036_v2  ;;  %3022 = vmatprep.mubr.bf16.mxu1 %v16036_v2 }
 0x217   : > { %2910 = vmatmul.mubr.bf16.vlgmr.msra.gmra.mrb[0].mxu0 %v16036_v2  ;;  %3023 = vmatmul.mubr.bf16.vlgmr.msra.gmra.mrb[0].mxu1 %v16036_v2 }
 0x218   : > { %2919 = vmatprep.mubr.bf16.mxu0 %v16036_v2  ;;  %3032 = vmatprep.mubr.bf16.mxu1 %v16036_v2 }
 0x219   : > { %3624 = vmatpush1.bf16.msra.mxu0 %v13870_v29  ;;  %3737 = vmatpush1.bf16.msra.mxu1 %v13876_v30 }
 0x21a   : > { %3625 = vmatprep.subr.bf16.mxu0 %v13882_v31  ;;  %3738 = vmatprep.subr.bf16.mxu1 %v13888_v32 }
 0x21d   : > { %3626 = vmatpush1.bf16.msra.mxu0 %v13894_v33  ;;  %3739 = vmatpush1.bf16.msra.mxu1 %v13900_v34 }
 0x21e   : > { %3627 = vmatprep.subr.bf16.mxu0 %v13906_v35  ;;  %3740 = vmatprep.subr.bf16.mxu1 %v13912_v36 }
 0x21f   : > { %2920 = vmatmul.mubr.bf16.gmra.mrb[4].mxu0 %v16036_v2  ;;  %3033 = vmatmul.mubr.bf16.gmra.mrb[4].mxu1 %v16036_v2 }
 0x220   : > { %2929 = vmatprep.mubr.bf16.mxu0 %v16036_v2  ;;  %3042 = vmatprep.mubr.bf16.mxu1 %v16036_v2 }
 0x221   : > { %3628 = vmatpush1.bf16.msra.mxu0 %v13922_v37  ;;  %3741 = vmatpush1.bf16.msra.mxu1 %v13928_v38 }
 0x222   : > { %3629 = vmatprep.subr.bf16.mxu0 %v13412_v48  ;;  %3742 = vmatprep.subr.bf16.mxu1 %v13434_v55  ;;  %v13962_v48 = vld [vmem:[%s16029_s2 + $0x4] ss:$16 sps:$4 sm:$0xff]   ;;  %v510_v55 = vlaneseq }
 0x225   : > { %3630 = vmatpush1.bf16.msra.mxu0 %v13417_v49  ;;  %3743 = vmatpush1.bf16.msra.mxu1 %v13442_v57  ;;  %v13968_v49 = vld [vmem:[%s16029_s2 + $0xc] ss:$16 sps:$4 sm:$0xff]   ;;  %v511_v57 = vshrl.u32 %v510_v55, 7 }
 0x226   : > { %3631 = vmatprep.subr.bf16.mxu0 %v13484_v15  ;;  %3744 = vmatprep.subr.bf16.mxu1 %v13506_v22  ;;  %v508_v22 = vld [vmem:[%s16030_s3] sm:$0xf] }
 0x227   : > { %2930 = vmatmul.mubr.bf16.gmra.mrb[8].mxu0 %v16036_v2  ;;  %3043 = vmatmul.mubr.bf16.gmra.mrb[8].mxu1 %v16036_v2  ;;  %v512_v15 = vsub.s32 0, %v511_v57 }
 0x228   : > { %2939 = vmatprep.mubr.bf16.mxu0 %v16036_v2  ;;  %3052 = vmatprep.mubr.bf16.mxu1 %v16036_v2 }
 0x229   : > { %3632 = vmatpush1.bf16.msra.mxu0 %v13489_v16  ;;  %3745 = vmatpush1.bf16.msra.mxu1 %v13514_v24  ;;  %v520_v16 = vsub.s32 2, %v511_v57  ;;  %v516_v24 = vsub.s32 1, %v511_v57 }
 0x22a   : > { %3633 = vmatprep.subr.bf16.mxu0 %v13556_v43  ;;  %3746 = vmatprep.subr.bf16.mxu1 %v13578_v52  ;;  %v13990_v43 = vrot.slane %v508_v22, %v512_v15 }
 0x22b   : > { %v13994_v52 = vrot.slane %v508_v22, %v516_v24 }
 0x22d   : > { %3634 = vmatpush1.bf16.msra.mxu0 %v13561_v44  ;;  %3747 = vmatpush1.bf16.msra.mxu1 %v13586_v54  ;;  %v13992_v44 = vrot.slane %v508_v22, %v520_v16  ;;  %v524_v54 = vsub.s32 3, %v511_v57 }
 0x22e   : > { %3635 = vmatprep.subr.bf16.mxu0 %v13628_v13  ;;  %3748 = vmatprep.subr.bf16.mxu1 %v13650_v25 }
 0x22f   : > { %2940 = vmatmul.mubr.bf16.gmra.mrb[12].mxu0 %v16036_v2  ;;  %3053 = vmatmul.mubr.bf16.gmra.mrb[12].mxu1 %v16036_v2  ;;  %v13999_v42 = vrot.slane %v508_v22, %v524_v54 }
 0x230   : > { %2949 = vmatprep.mubr.bf16.mxu0 %v16036_v2  ;;  %3062 = vmatprep.mubr.bf16.mxu1 %v16036_v2 }
 0x231   : > { %3636 = vmatpush1.bf16.msra.mxu0 %v13633_v17  ;;  %3749 = vmatpush1.bf16.msra.mxu1 %v13658_v27 }
 0x232   : > { %3637 = vmatprep.subr.bf16.mxu0 %v13700_v50  ;;  %3750 = vmatprep.subr.bf16.mxu1 %v13723_v61 }
 0x235   : > { %3638 = vmatpush1.bf16.msra.mxu0 %v13705_v51  ;;  %3751 = vmatpush1.bf16.msra.mxu1 %v13731_v62 }
 0x236   : > { %4369 = vmatprep.subr.bf16.mxu0 %v13962_v48  ;;  %4482 = vmatprep.subr.bf16.mxu1 %v13968_v49 }
 0x237   : > { %2950 = vmatmul.mubr.bf16.gmra.mrb[16].mxu0 %v16036_v2  ;;  %3063 = vmatmul.mubr.bf16.gmra.mrb[16].mxu1 %v16036_v2 }
 0x238   : > { %2959 = vmatprep.mubr.bf16.mxu0 %v16036_v2  ;;  %3072 = vmatprep.mubr.bf16.mxu1 %v16036_v2 }
 0x23f   : > { %2960 = vmatmul.mubr.bf16.gmra.mrb[20].mxu0 %v16036_v2  ;;  %3073 = vmatmul.mubr.bf16.gmra.mrb[20].mxu1 %v16036_v2 }
 0x240   : > { %2969 = vmatprep.mubr.bf16.mxu0 %v16036_v2  ;;  %3082 = vmatprep.mubr.bf16.mxu1 %v16036_v2 }
 0x247   : > { %2970 = vmatmul.mubr.bf16.gmra.mrb[24].mxu0 %v16036_v2  ;;  %3083 = vmatmul.mubr.bf16.gmra.mrb[24].mxu1 %v16036_v2 }
 0x248   : > { %2979 = vmatprep.mubr.bf16.mxu0 %v16036_v2  ;;  %3092 = vmatprep.mubr.bf16.mxu1 %v16036_v2 }
 0x24f   : > { %2980 = vmatmul.mubr.bf16.gmra.mrb[28].mxu0 %v16036_v2  ;;  %3093 = vmatmul.mubr.bf16.gmra.mrb[28].mxu1 %v16036_v2 }
 0x250   : > { %3655 = vmatprep.mubr.bf16.mxu0 %v16036_v2  ;;  %3768 = vmatprep.mubr.bf16.mxu1 %v16036_v2 }
 0x2ea   : > { %v2911_v13 = vpop.f32.mrb[0].mxu0  ;;  %v3024_v17 = vpop.f32.mrb[0].mxu1 }
 0x2eb   : > { %v9891_v25 = vadd.f32 %v2911_v13, %v13990_v43  ;;  %v10147_v27 = vadd.f32 %v3024_v17, %v13992_v44  ;;  %v2913_v50 = vpop.f32.mrb[1].mxu0  ;;  %v3026_v51 = vpop.f32.mrb[1].mxu1 }
 0x2ec   : > { %v9892_v61 = vadd.f32 %v2913_v50, %v13994_v52  ;;  %v2915_v62 = vpop.f32.mrb[2].mxu0  ;;  %v3028_v39 = vpop.f32.mrb[2].mxu1  ;;  %v10148_v11 = vadd.f32 %v3026_v51, %v13999_v42 }
 0x2ed   : > { %v9390_v40 = vmul.f32 -1.442695, %v9891_v25  ;;  %v9392_v41 = vmul.f32 -1.442695, %v10147_v27  ;;  %v9893_v45 = vadd.f32 %v2915_v62, %v13990_v43  ;;  %v2917_v46 = vpop.f32.mrb[3].mxu0  ;;  %v3030_v47 = vpop.f32.mrb[3].mxu1  ;;  %v10149_v56 = vadd.f32 %v3028_v39, %v13992_v44 }
 0x2ee   : > { %v9391_v53 = vmul.f32 -1.442695, %v9892_v61  ;;  %v9894_v58 = vadd.f32 %v2917_v46, %v13994_v52  ;;  %v10150_v55 = vadd.f32 %v3030_v47, %v13999_v42 }
 0x2ef   : > { %11000 = vpow2.f32 %v9390_v40  ;;  %v9393_v59 = vmul.f32 -1.442695, %v9893_v45  ;;  %v9395_v63 = vmul.f32 -1.442695, %v10149_v56 }
 0x2f0   : > { %11002 = vpow2.f32 %v9392_v41  ;;  %v9394_v60 = vmul.f32 -1.442695, %v9894_v58 }
 0x2f1   : > { %11004 = vpow2.f32 %v9391_v53 }
 0x2f2   : > { %11006 = vpow2.f32 %v9393_v59  ;;  %v2921_v0 = vpop.f32.mrb[4].mxu0  ;;  %v3034_v1 = vpop.f32.mrb[4].mxu1 }
 0x2f3   : > { %v9895_v3 = vadd.f32 %v2921_v0, %v13990_v43  ;;  %v10151_v4 = vadd.f32 %v3034_v1, %v13992_v44  ;;  %v2923_v5 = vpop.f32.mrb[5].mxu0  ;;  %v3036_v14 = vpop.f32.mrb[5].mxu1  ;;  %11008 = vpow2.f32 %v9394_v60 }
 0x2f4   : > { %v9896_v6 = vadd.f32 %v2923_v5, %v13994_v52  ;;  %v2925_v7 = vpop.f32.mrb[6].mxu0  ;;  %v3038_v8 = vpop.f32.mrb[6].mxu1  ;;  %11010 = vtanh.f32 %v10148_v11  ;;  %v10152_v50 = vadd.f32 %v3036_v14, %v13999_v42 }
 0x2f5   : > { %v9396_v9 = vmul.f32 -1.442695, %v9895_v3  ;;  %v9398_v10 = vmul.f32 -1.442695, %v10151_v4  ;;  %v9897_v12 = vadd.f32 %v2925_v7, %v13990_v43  ;;  %v2927_v18 = vpop.f32.mrb[7].mxu0  ;;  %v3040_v19 = vpop.f32.mrb[7].mxu1  ;;  %11012 = vpow2.f32 %v9395_v63 }
 0x2f6   : > { %v9397_v20 = vmul.f32 -1.442695, %v9896_v6  ;;  %v10153_v21 = vadd.f32 %v3038_v8, %v13992_v44  ;;  %v9898_v16 = vadd.f32 %v2927_v18, %v13994_v52  ;;  %v10154_v59 = vadd.f32 %v3040_v19, %v13999_v42 }
 0x2f7   : > { %11014 = vpow2.f32 %v9396_v9  ;;  %v9399_v23 = vmul.f32 -1.442695, %v9897_v12 }
 0x2f8   : > { %11016 = vpow2.f32 %v9398_v10  ;;  %v9401_v26 = vmul.f32 -1.442695, %v10153_v21  ;;  %v9400_v41 = vmul.f32 -1.442695, %v9898_v16 }
 0x2f9   : > { %v11001_v28 = vpop.eup %11000  ;;  %11018 = vpow2.f32 %v9397_v20 }
 0x2fa   : > { %v11003_v57 = vpop.eup %11002  ;;  %v3311_v15 = vadd.f32 1.0, %v11001_v28  ;;  %11020 = vpow2.f32 %v9399_v23  ;;  %v2931_v22 = vpop.f32.mrb[8].mxu0 }
 0x2fb   : > { %v3044_v24 = vpop.f32.mrb[8].mxu1  ;;  %v11005_v54 = vpop.eup %11004  ;;  %11022 = vpow2.f32 %v9401_v26  ;;  %v3313_v47 = vadd.f32 1.0, %v11003_v57  ;;  %v9899_v60 = vadd.f32 %v2931_v22, %v13990_v43 }
 0x2fc   : > { %v2933_v13 = vpop.f32.mrb[9].mxu0  ;;  %v14012_v17 = vpop.f32.mrb[9].mxu1  ;;  %11024 = vrcp.f32 %v3311_v15  ;;  %v3312_v27 = vadd.f32 1.0, %v11005_v54  ;;  %v10155_v20 = vadd.f32 %v3044_v24, %v13992_v44 }
 0x2fd   : > { %v11007_v25 = vpop.eup %11006  ;;  %v2935_v51 = vpop.f32.mrb[10].mxu0  ;;  %11026 = vtanh.f32 %v10150_v55  ;;  %v9900_v4 = vadd.f32 %v2933_v13, %v13994_v52  ;;  %v9402_v19 = vmul.f32 -1.442695, %v9899_v60 }
 0x2fe   : > { %v3048_v61 = vpop.f32.mrb[10].mxu1  ;;  %v3314_v62 = vadd.f32 1.0, %v11007_v25  ;;  %v2937_v39 = vpop.f32.mrb[11].mxu0  ;;  %11028 = vrcp.f32 %v3312_v27  ;;  %v9901_v28 = vadd.f32 %v2935_v51, %v13990_v43  ;;  %v9404_v24 = vmul.f32 -1.442695, %v10155_v20 }
 0x2ff   : > { %v11009_v40 = vpop.eup %11008  ;;  %v14015_v45 = vpop.f32.mrb[11].mxu1  ;;  %v9403_v16 = vmul.f32 -1.442695, %v9900_v4  ;;  %v10157_v27 = vadd.f32 %v3048_v61, %v13992_v44  ;;  %v9902_v51 = vadd.f32 %v2937_v39, %v13994_v52 }
 0x300   : > { %v11011_v46 = vpop.eup %11010  ;;  %11030 = vrcp.f32 %v3314_v62  ;;  %v3315_v53 = vadd.f32 1.0, %v11009_v40  ;;  %v9405_v40 = vmul.f32 -1.442695, %v9901_v28 }
 0x301   : > { %v11013_v56 = vpop.eup %11012  ;;  %11032 = vtanh.f32 %v10152_v50  ;;  %v9407_v4 = vmul.f32 -1.442695, %v10157_v27 }
 0x302   : > { %v11015_v58 = vpop.eup %11014  ;;  %11034 = vrcp.f32 %v3315_v53  ;;  %v2941_v0 = vpop.f32.mrb[12].mxu0  ;;  %v3316_v7 = vadd.f32 1.0, %v11013_v56 }
 0x303   : > { %v11017_v11 = vpop.eup %11016  ;;  %v3317_v63 = vadd.f32 1.0, %v11015_v58  ;;  %11036 = vpow2.f32 %v9400_v41  ;;  %v14019_v1 = vpop.f32.mrb[12].mxu1  ;;  %v9903_v60 = vadd.f32 %v2941_v0, %v13990_v43 }
 0x304   : > { %v11019_v3 = vpop.eup %11018  ;;  %11038 = vrcp.f32 %v3313_v47  ;;  %v14022_v5 = vpop.f32.mrb[13].mxu0  ;;  %v3319_v26 = vadd.f32 1.0, %v11017_v11  ;;  %v10159_v20 = vadd.f32 %v14019_v1, %v13992_v44 }
 0x305   : > { %v14024_v14 = vpop.f32.mrb[13].mxu1  ;;  %v11021_v6 = vpop.eup %11020  ;;  %11040 = vrcp.f32 %v3317_v63  ;;  %v3318_v8 = vadd.f32 1.0, %v11019_v3 }
 0x306   : > { %v14026_v9 = vpop.f32.mrb[14].mxu0  ;;  %v14028_v10 = vpop.f32.mrb[14].mxu1  ;;  %v3320_v18 = vadd.f32 1.0, %v11021_v6  ;;  %11042 = vtanh.f32 %v10154_v59  ;;  %v9410_v27 = vmul.f32 -1.442695, %v10159_v20 }
 0x307   : > { %v11023_v12 = vpop.eup %11022  ;;  %v14031_v21 = vpop.f32.mrb[15].mxu0  ;;  %11044 = vrcp.f32 %v3318_v8 }
 0x308   : > { %v11025_v23 = vpop.eup %11024  ;;  %v14034_v55 = vpop.f32.mrb[15].mxu1  ;;  %11046 = vrcp.f32 %v3320_v18  ;;  %v3322_v54 = vadd.f32 1.0, %v11023_v12  ;;  %v9406_v12 = vmul.f32 -1.442695, %v9902_v51 }
 0x309   : > { %v11027_v57 = vpop.eup %11026  ;;  %v3487_v15 = vmul.f32 %v11025_v23, %v11011_v46  ;;  %11048 = vrcp.f32 %v3316_v7 }
 0x30a   : > { %v11029_v22 = vpop.eup %11028  ;;  %11050 = vpow2.f32 %v9402_v19  ;;  %v14038_v41 = vpop.f32.mrb[16].mxu0 }
 0x30b   : > { %v11031_v13 = vpop.eup %11030  ;;  %v3471_v25 = vmul.f32 0.0, %v11029_v22  ;;  %11052 = vrcp.f32 %v3319_v26  ;;  %v14040_v46 = vpop.f32.mrb[16].mxu1  ;;  %v9408_v26 = vmul.f32 -1.442695, %v9903_v60 }
 0x30c   : > { %v11033_v50 = vpop.eup %11032  ;;  %v3488_v62 = vmul.f32 %v11031_v13, %v11027_v57  ;;  %11054 = vpow2.f32 %v9403_v16  ;;  %v14044_v56 = vpop.f32.mrb[17].mxu0  ;;  %v9904_v16 = vadd.f32 %v14022_v5, %v13994_v52 }
 0x30d   : > { %v11035_v47 = vpop.eup %11034  ;;  %v14042_v53 = vadd.f32 %v3487_v15, %v3471_v25  ;;  %v14046_v58 = vpop.f32.mrb[17].mxu1  ;;  %11056 = vrcp.f32 %v3322_v54  ;;  %v10156_v15 = vadd.f32 %v14012_v17, %v13999_v42 }
 0x30e   : > { %v11037_v59 = vpop.eup %11036  ;;  %v3472_v61 = vmul.f32 0.0, %v11035_v47  ;;  %v14049_v11 = vpop.f32.mrb[18].mxu0  ;;  %11058 = vpow2.f32 %v9404_v24 }
 0x30f   : > { %16050 = vst [vmem:[#allocation3_spill] sm:$0xff] %v14042_v53  ;;  %v14051_v39 = vpop.f32.mrb[18].mxu1  ;;  %v14053_v63 = vpop.eup %11038  ;;  %v3321_v3 = vadd.f32 1.0, %v11037_v59  ;;  %11060 = vpow2.f32 %v9405_v40  ;;  %v9905_v40 = vadd.f32 %v14026_v9, %v13990_v43 }
 0x310   : > { %v14055_v6 = vpop.f32.mrb[19].mxu0  ;;  %v11041_v7 = vpop.eup %11040  ;;  %v14057_v8 = vadd.f32 %v3488_v62, %v3472_v61  ;;  %v9409_v61 = vmul.f32 -1.442695, %v9904_v16 }
 0x311   : > { %v14059_v18 = vpop.f32.mrb[19].mxu1  ;;  %v11043_v19 = vpop.eup %11042  ;;  %v3489_v0 = vmul.f32 %v11041_v7, %v11033_v50  ;;  %11062 = vrcp.f32 %v3321_v3  ;;  %v10158_v7 = vadd.f32 %v14015_v45, %v13999_v42  ;;  %v9411_v20 = vmul.f32 -1.442695, %v9905_v40 }
 0x312   : > { %16051 = vst [vmem:[#allocation4_spill] sm:$0xff] %v14057_v8  ;;  %v11045_v23 = vpop.eup %11044  ;;  %11064 = vtanh.f32 %v14057_v8  ;;  %v14070_v13 = vpop.f32.mrb[20].mxu0 }
 0x313   : > { %v11047_v28 = vpop.eup %11046  ;;  %v3473_v57 = vmul.f32 0.0, %v11045_v23  ;;  %11066 = vpow2.f32 %v9407_v4  ;;  %v14072_v1 = vpop.f32.mrb[20].mxu1  ;;  %v9906_v23 = vadd.f32 %v14031_v21, %v13994_v52 }
 0x314   : > { %v14068_v22 = vpop.eup %11048  ;;  %v3490_v54 = vmul.f32 %v11047_v28, %v11043_v19  ;;  %11068 = vpow2.f32 %v9406_v12  ;;  %v14077_v50 = vpop.f32.mrb[21].mxu0  ;;  %v10161_v12 = vadd.f32 %v14028_v10, %v13992_v44 }
 0x315   : > { %v11051_v25 = vpop.eup %11050  ;;  %11070 = vtanh.f32 %v14042_v53  ;;  %v14075_v24 = vadd.f32 %v3489_v0, %v3473_v57  ;;  %v14079_v17 = vpop.f32.mrb[21].mxu1  ;;  %v10160_v57 = vadd.f32 %v14024_v14, %v13999_v42  ;;  %v9907_v14 = vadd.f32 %v14038_v41, %v13990_v43 }
 0x316   : > { %v14081_v62 = vpop.eup %11052  ;;  %v3323_v5 = vadd.f32 1.0, %v11051_v25  ;;  %11072 = vpow2.f32 %v9408_v26  ;;  %v14085_v51 = vpop.f32.mrb[22].mxu0  ;;  %v9413_v10 = vmul.f32 -1.442695, %v10161_v12 }
 0x317   : > { %16052 = vst [vmem:[#allocation5_spill] sm:$0xff] %v14081_v62  ;;  %v14087_v47 = vpop.f32.mrb[22].mxu1  ;;  %v11055_v59 = vpop.eup %11054  ;;  %11074 = vtanh.f32 %v10156_v15  ;;  %v9414_v53 = vmul.f32 -1.442695, %v9907_v14 }
 0x318   : > { %v14089_v60 = vpop.f32.mrb[23].mxu0  ;;  %v14091_v3 = vpop.eup %11056  ;;  %11076 = vrcp.f32 %v3323_v5  ;;  %v3324_v4 = vadd.f32 1.0, %v11055_v59 }
 0x319   : > { %16053 = vst [vmem:[#allocation6_spill] sm:$0xff] %v14091_v3  ;;  %v14097_v9 = vpop.f32.mrb[23].mxu1  ;;  %v11059_v19 = vpop.eup %11058  ;;  %11078 = vpow2.f32 %v9410_v27 }
 0x31a   : > { %v11061_v0 = vpop.eup %11060  ;;  %11080 = vrcp.f32 %v3324_v4  ;;  %v14103_v16 = vpop.f32.mrb[24].mxu0 }
 0x31b   : > { %v11063_v26 = vpop.eup %11062  ;;  %v3326_v28 = vadd.f32 1.0, %v11061_v0  ;;  %11082 = vpow2.f32 %v9409_v61  ;;  %v14105_v25 = vpop.f32.mrb[24].mxu1  ;;  %v9412_v61 = vmul.f32 -1.442695, %v9906_v23 }
 0x31c   : > { %v11065_v45 = vpop.eup %11064  ;;  %v3474_v15 = vmul.f32 0.0, %v11063_v26  ;;  %11084 = vtanh.f32 %v10158_v7  ;;  %v14107_v5 = vpop.f32.mrb[25].mxu0  ;;  %v10163_v26 = vadd.f32 %v14040_v46, %v13992_v44 }
 0x31d   : > { %v11067_v27 = vpop.eup %11066  ;;  %11086 = vrcp.f32 %v3326_v28  ;;  %v14109_v40 = vpop.f32.mrb[25].mxu1  ;;  %v3536_v23 = vmul.f32 %v11065_v45, %v14068_v22 }
 0x31e   : > { %v11069_v21 = vpop.eup %11068  ;;  %v14111_v59 = vadd.f32 %v3490_v54, %v3474_v15  ;;  %11088 = vpow2.f32 %v9411_v20  ;;  %v14115_v4 = vpop.f32.mrb[26].mxu0  ;;  %v3325_v54 = vadd.f32 1.0, %v11059_v19  ;;  %v3328_v15 = vadd.f32 1.0, %v11067_v27 }
 0x31f   : > { %v14117_v7 = vpop.f32.mrb[26].mxu1  ;;  %v11071_v12 = vpop.eup %11070  ;;  %v3327_v0 = vadd.f32 1.0, %v11069_v21  ;;  %11090 = vtanh.f32 %v10160_v57  ;;  %v9908_v21 = vadd.f32 %v14044_v56, %v13994_v52  ;;  %v9416_v19 = vmul.f32 -1.442695, %v10163_v26 }
 0x320   : > { %16054 = vst [vmem:[#allocation7_spill] sm:$0xff] %v14111_v59  ;;  %v14121_v28 = vpop.f32.mrb[27].mxu0  ;;  %v11073_v2 = vpop.eup %11072  ;;  %11092 = vpow2.f32 %v9413_v10  ;;  %v3535_v46 = vmul.f32 %v11071_v12, %v14053_v63 }
 0x321   : > { %v14123_v20 = vpop.f32.mrb[27].mxu1  ;;  %v11075_v41 = vpop.eup %11074  ;;  %11094 = vrcp.f32 %v3327_v0  ;;  %v3329_v8 = vadd.f32 1.0, %v11073_v2  ;;  %v9415_v56 = vmul.f32 -1.442695, %v9908_v21  ;;  %v10162_v0 = vadd.f32 %v14034_v55, %v13999_v42 }
 0x322   : > { %v11077_v57 = vpop.eup %11076  ;;  %11096 = vpow2.f32 %v9412_v61  ;;  %v3615_v59 = vpack.c.bf16 %v3536_v23, %v3535_v46  ;;  %v14129_v22 = vpop.f32.mrb[28].mxu0  ;;  %v9909_v61 = vadd.f32 %v14049_v11, %v13990_v43  ;;  %v16055_v11 = vmov 0  }
 0x323   : > { %v11079_v3 = vpop.eup %11078  ;;  %v3491_v62 = vmul.f32 %v11077_v57, %v11075_v41  ;;  %11098 = vrcp.f32 %v3329_v8  ;;  %v14131_v45 = vpop.f32.mrb[28].mxu1 }
 0x324   : > { %v11081_v10 = vpop.eup %11080  ;;  %11100 = vrcp.f32 %v3325_v54  ;;  %v14135_v14 = vpop.f32.mrb[29].mxu0  ;;  %3656 = vmatmul.mubr.bf16.vlgmr.msra.gmra.mrb[32].mxu0 %v3615_v59  ;;  %3769 = vmatmul.mubr.bf16.vlgmr.msra.gmra.mrb[32].mxu1 %v3615_v59  ;;  %v3331_v57 = vadd.f32 1.0, %v11079_v3  ;;  %v9910_v59 = vadd.f32 %v14055_v6, %v13994_v52  ;;  %v10164_v6 = vadd.f32 %v14046_v58, %v13999_v42 }
 0x325   : > { %v11083_v2 = vpop.eup %11082  ;;  %v3475_v27 = vmul.f32 0.0, %v11081_v10  ;;  %11102 = vrcp.f32 %v3328_v15  ;;  %v14137_v63 = vpop.f32.mrb[29].mxu1  ;;  %3665 = vmatprep.mubr.bf16.mxu0 %v16055_v11  ;;  %3778 = vmatprep.mubr.bf16.mxu1 %v16055_v11  ;;  %v10165_v10 = vadd.f32 %v14051_v39, %v13992_v44 }
 0x326   : > { %v11085_v8 = vpop.eup %11084  ;;  %v3330_v12 = vadd.f32 1.0, %v11083_v2  ;;  %11104 = vpow2.f32 %v9414_v53  ;;  %v14141_v26 = vpop.f32.mrb[30].mxu0  ;;  %4370 = vmatpush1.bf16.msra.mxu0 %v13870_v29  ;;  %4483 = vmatpush1.bf16.msra.mxu1 %v13876_v30  ;;  %v9911_v29 = vadd.f32 %v14070_v13, %v13990_v43 }
 0x327   : > { %v14143_v54 = vpop.f32.mrb[30].mxu1  ;;  %v11087_v23 = vpop.eup %11086  ;;  %v14145_v41 = vadd.f32 %v3491_v62, %v3475_v27  ;;  %11106 = vpow2.f32 %v9416_v19  ;;  %v9417_v19 = vmul.f32 -1.442695, %v9909_v61  ;;  %4371 = vmatprep.subr.bf16.mxu0 %v13882_v31  ;;  %4484 = vmatprep.subr.bf16.mxu1 %v13888_v32  ;;  %v9419_v39 = vmul.f32 -1.442695, %v10165_v10 }
 0x328   : > { %v14149_v15 = vpop.f32.mrb[31].mxu0  ;;  %v14151_v21 = vpop.f32.mrb[31].mxu1  ;;  %v3492_v53 = vmul.f32 %v11087_v23, %v11085_v8  ;;  %11108 = vrcp.f32 %v3330_v12  ;;  %v9420_v8 = vmul.f32 -1.442695, %v9911_v29  ;;  %v10166_v23 = vadd.f32 %v14059_v18, %v13999_v42  ;;  %v14206_v10 = vld [vmem:[%s16029_s2 + $0x68] ss:$16 sps:$4 sm:$0xff]  }
 0x329   : > { %v11089_v55 = vpop.eup %11088  ;;  %11110 = vpow2.f32 %v9415_v56  ;;  %v9418_v56 = vmul.f32 -1.442695, %v9910_v59  ;;  %v14214_v29 = vld [vmem:[%s16029_s2 + $0x84] ss:$16 sps:$4 sm:$0xff]  }
 0x32a   : > { %v11091_v62 = vpop.eup %11090  ;;  %v3332_v46 = vadd.f32 1.0, %v11089_v55  ;;  %11112 = vtanh.f32 %v10162_v0  ;;  %4372 = vmatpush1.bf16.msra.mxu0 %v13894_v33  ;;  %4485 = vmatpush1.bf16.msra.mxu1 %v13900_v34  ;;  %v9912_v33 = vadd.f32 %v14077_v50, %v13994_v52  ;;  %v9913_v55 = vadd.f32 %v14085_v51, %v13990_v43  ;;  %v14186_v50 = vld [vmem:[%s16029_s2 + $0x64] ss:$16 sps:$4 sm:$0xff]  }
 0x32b   : > { %v11093_v3 = vpop.eup %11092  ;;  %4373 = vmatprep.subr.bf16.mxu0 %v13906_v35  ;;  %4486 = vmatprep.subr.bf16.mxu1 %v13912_v36  ;;  %v10167_v51 = vadd.f32 %v14072_v1, %v13992_v44 }
 0x32c   : > { %v11095_v30 = vpop.eup %11094  ;;  %11114 = vrcp.f32 %v3332_v46  ;;  %v3334_v0 = vadd.f32 1.0, %v11093_v3 }
 0x32d   : > { %v11097_v2 = vpop.eup %11096  ;;  %v3476_v27 = vmul.f32 0.0, %v11095_v30  ;;  %11116 = vrcp.f32 %v3331_v57  ;;  %v9421_v57 = vmul.f32 -1.442695, %v9912_v33  ;;  %v14220_v30 = vld [vmem:[%s16029_s2 + $0x8c] ss:$16 sps:$4 sm:$0xff]   ;;  %v10169_v33 = vadd.f32 %v14087_v47, %v13992_v44 }
 0x32e   : > { %v11099_v31 = vpop.eup %11098  ;;  %v3333_v32 = vadd.f32 1.0, %v11097_v2  ;;  %11118 = vpow2.f32 %v9417_v19  ;;  %4374 = vmatpush1.bf16.msra.mxu0 %v13922_v37  ;;  %4487 = vmatpush1.bf16.msra.mxu1 %v13928_v38  ;;  %v14192_v37 = vld [vmem:[%s16029_s2 + $0x6c] ss:$16 sps:$4 sm:$0xff]   ;;  %v14200_v19 = vld [vmem:[%s16029_s2 + $0x60] ss:$16 sps:$4 sm:$0xff]  }
 0x32f   : > { %v14169_v58 = vpop.eup %11100  ;;  %v14171_v13 = vadd.f32 %v3492_v53, %v3476_v27  ;;  %v3493_v61 = vmul.f32 %v11099_v31, %v11091_v62  ;;  %11120 = vtanh.f32 %v10164_v6  ;;  %4375 = vmatprep.subr.bf16.mxu0 %v14186_v50  ;;  %4488 = vmatprep.subr.bf16.mxu1 %v14192_v37  ;;  %v9423_v6 = vmul.f32 -1.442695, %v9913_v55  ;;  %v14248_v47 = vld [vmem:[%s16029_s2 + $0xa4] ss:$16 sps:$4 sm:$0xff]  }
 0x330   : > { %v14173_v12 = vpop.eup %11102  ;;  %11122 = vrcp.f32 %v3333_v32  ;;  %v9422_v32 = vmul.f32 -1.442695, %v10167_v51 }
 0x331   : > { %v11105_v34 = vpop.eup %11104  ;;  %11124 = vpow2.f32 %v9418_v56  ;;  %v9914_v56 = vadd.f32 %v14089_v60, %v13994_v52  ;;  %v14240_v60 = vld [vmem:[%s16029_s2 + $0x88] ss:$16 sps:$4 sm:$0xff]  }
 0x332   : > { %v11107_v35 = vpop.eup %11106  ;;  %v3335_v36 = vadd.f32 1.0, %v11105_v34  ;;  %11126 = vpow2.f32 %v9419_v39  ;;  %4376 = vmatpush1.bf16.msra.mxu0 %v14200_v19  ;;  %4489 = vmatpush1.bf16.msra.mxu1 %v14206_v10  ;;  %v14234_v34 = vld [vmem:[%s16029_s2 + $0x80] ss:$16 sps:$4 sm:$0xff]  }
 0x333   : > { %v11109_v38 = vpop.eup %11108  ;;  %11128 = vpow2.f32 %v9420_v8  ;;  %v3337_v62 = vadd.f32 1.0, %v11107_v35  ;;  %4377 = vmatprep.subr.bf16.mxu0 %v14214_v29  ;;  %4490 = vmatprep.subr.bf16.mxu1 %v14220_v30  ;;  %v10168_v8 = vadd.f32 %v14079_v17, %v13999_v42  ;;  %v9915_v17 = vadd.f32 %v14103_v16, %v13990_v43  ;;  %v14254_v35 = vld [vmem:[%s16029_s2 + $0xac] ss:$16 sps:$4 sm:$0xff]  }
 0x334   : > { %v11111_v18 = vpop.eup %11110  ;;  %v3477_v53 = vmul.f32 0.0, %v11109_v38  ;;  %11130 = vrcp.f32 %v3335_v36  ;;  %v9424_v55 = vmul.f32 -1.442695, %v9914_v56 }
 0x335   : > { %v11113_v59 = vpop.eup %11112  ;;  %11132 = vrcp.f32 %v3334_v0  ;;  %v3336_v46 = vadd.f32 1.0, %v11111_v18  ;;  %v10171_v18 = vadd.f32 %v14105_v25, %v13992_v44 }
 0x336   : > { %v11115_v1 = vpop.eup %11114  ;;  %v14209_v3 = vadd.f32 %v3493_v61, %v3477_v53  ;;  %11134 = vtanh.f32 %v10166_v23  ;;  %4378 = vmatpush1.bf16.msra.mxu0 %v14234_v34  ;;  %4491 = vmatpush1.bf16.msra.mxu1 %v14240_v60 }
 0x337   : > { %v14223_v2 = vpop.eup %11116  ;;  %v3494_v27 = vmul.f32 %v11115_v1, %v11113_v59  ;;  %11136 = vrcp.f32 %v3336_v46  ;;  %4379 = vmatprep.subr.bf16.mxu0 %v14248_v47  ;;  %4492 = vmatprep.subr.bf16.mxu1 %v14254_v35  ;;  %v14264_v59 = vld [vmem:[%s16029_s2 + $0xa0] ss:$16 sps:$4 sm:$0xff]   ;;  %v9426_v1 = vmul.f32 -1.442695, %v9915_v17 }
 0x338   : > { %v11119_v31 = vpop.eup %11118  ;;  %11138 = vpow2.f32 %v9421_v57  ;;  %v9425_v57 = vmul.f32 -1.442695, %v10169_v33  ;;  %v9916_v33 = vadd.f32 %v14107_v5, %v13994_v52  ;;  %v14292_v17 = vld [vmem:[%s16029_s2 + $0xc0] ss:$16 sps:$4 sm:$0xff]   ;;  %v10170_v5 = vadd.f32 %v14097_v9, %v13999_v42 }
 0x339   : > { %v11121_v39 = vpop.eup %11120  ;;  %11140 = vrcp.f32 %v3337_v62  ;;  %v3338_v61 = vadd.f32 1.0, %v11119_v31  ;;  %v14270_v62 = vld [vmem:[%s16029_s2 + $0xa8] ss:$16 sps:$4 sm:$0xff]   ;;  %v9917_v9 = vadd.f32 %v14115_v4, %v13990_v43 }
 0x33a   : > { %v11123_v0 = vpop.eup %11122  ;;  %11142 = vpow2.f32 %v9423_v6  ;;  %4380 = vmatpush1.bf16.msra.mxu0 %v14264_v59  ;;  %4493 = vmatpush1.bf16.msra.mxu1 %v14270_v62  ;;  %v14276_v6 = vld [vmem:[%s16029_s2 + $0xc4] ss:$16 sps:$4 sm:$0xff]  }
 0x33b   : > { %v11125_v36 = vpop.eup %11124  ;;  %v3478_v23 = vmul.f32 0.0, %v11123_v0  ;;  %11144 = vrcp.f32 %v3338_v61  ;;  %4381 = vmatprep.subr.bf16.mxu0 %v14276_v6 }
 0x33c   : > { %v11127_v38 = vpop.eup %11126  ;;  %v3339_v16 = vadd.f32 1.0, %v11125_v36  ;;  %11146 = vpow2.f32 %v9422_v32 }
 0x33d   : > { %v11129_v53 = vpop.eup %11128  ;;  %v14259_v51 = vadd.f32 %v3494_v27, %v3478_v23  ;;  %11148 = vtanh.f32 %v10168_v8  ;;  %v14282_v27 = vld [vmem:[%s16029_s2 + $0xcc] ss:$16 sps:$4 sm:$0xff]   ;;  %v3340_v32 = vadd.f32 1.0, %v11127_v38  ;;  %v9428_v8 = vmul.f32 -1.442695, %v10171_v18 }
 0x33e   : > { %v11131_v25 = vpop.eup %11130  ;;  %11150 = vrcp.f32 %v3339_v16  ;;  %v3341_v46 = vadd.f32 1.0, %v11129_v53  ;;  %4494 = vmatprep.subr.bf16.mxu1 %v14282_v27  ;;  %4382 = vmatpush1.bf16.msra.mxu0 %v14292_v17  ;;  %v14312_v38 = vld [vmem:[%s16029_s2 + $0xec] ss:$16 sps:$4 sm:$0xff]  }
 0x33f   : > { %v14285_v56 = vpop.eup %11132  ;;  %v3495_v31 = vmul.f32 %v11131_v25, %v11121_v39  ;;  %11152 = vpow2.f32 %v9424_v55  ;;  %v14298_v39 = vld [vmem:[%s16029_s2 + $0xc8] ss:$16 sps:$4 sm:$0xff]   ;;  %v14306_v55 = vld [vmem:[%s16029_s2 + $0xe4] ss:$16 sps:$4 sm:$0xff]   ;;  %v9427_v25 = vmul.f32 -1.442695, %v9916_v33  ;;  %v10173_v33 = vadd.f32 %v14117_v7, %v13992_v44 }
 0x340   : > { %v11135_v61 = vpop.eup %11134  ;;  %11154 = vrcp.f32 %v3341_v46  ;;  %4495 = vmatpush1.bf16.msra.mxu1 %v14298_v39  ;;  %4383 = vmatprep.subr.bf16.mxu0 %v14306_v55 }
 0x341   : > { %v11137_v0 = vpop.eup %11136  ;;  %11156 = vpow2.f32 %v9425_v57  ;;  %4496 = vmatprep.subr.bf16.mxu1 %v14312_v38  ;;  %v9431_v7 = vmul.f32 -1.442695, %v10173_v33  ;;  %v9920_v33 = vadd.f32 %v14135_v14, %v13994_v52 }
 0x342   : > { %v11139_v36 = vpop.eup %11138  ;;  %v3479_v23 = vmul.f32 0.0, %v11137_v0  ;;  %11158 = vpow2.f32 %v9426_v1  ;;  %v14324_v0 = vld [vmem:[%s16029_s2 + $0xe0] ss:$16 sps:$4 sm:$0xff]  }
 0x343   : > { %v14315_v16 = vpop.eup %11140  ;;  %11160 = vrcp.f32 %v3340_v32  ;;  %v3342_v18 = vadd.f32 1.0, %v11139_v36  ;;  %16057 = vst [vmem:[#allocation9_spill] sm:$0xff] %v14324_v0  ;;  %4384 = vmatpush1.bf16.msra.mxu0 %v14324_v0  ;;  %v14330_v32 = vld [vmem:[%s16029_s2 + $0xe8] ss:$16 sps:$4 sm:$0xff]   ;;  %v9433_v14 = vmul.f32 -1.442695, %v9920_v33 }
 0x344   : > { %v11143_v53 = vpop.eup %11142  ;;  %v14319_v57 = vadd.f32 %v3495_v31, %v3479_v23  ;;  %11162 = vpow2.f32 %v9428_v8  ;;  %16058 = vst [vmem:[#allocation10_spill] sm:$0xff] %v14330_v32  ;;  %4497 = vmatpush1.bf16.msra.mxu1 %v14330_v32  ;;  %v10172_v8 = vadd.f32 %v14109_v40, %v13999_v42  ;;  %5115 = vmatprep.subr.bf16.mxu0 %v13962_v48  ;;  %v9429_v23 = vmul.f32 -1.442695, %v9917_v9 }
 0x345   : > { %v11145_v46 = vpop.eup %11144  ;;  %11164 = vrcp.f32 %v3342_v18  ;;  %v3344_v1 = vadd.f32 1.0, %v11143_v53  ;;  %5228 = vmatprep.subr.bf16.mxu1 %v13968_v49  ;;  %v9918_v53 = vadd.f32 %v14121_v28, %v13994_v52  ;;  %v9919_v9 = vadd.f32 %v14129_v22, %v13990_v43 }
 0x346   : > { %16056 = vst [vmem:[#allocation8_spill] sm:$0xff] %v14319_v57  ;;  %v11147_v4 = vpop.eup %11146  ;;  %v3496_v31 = vmul.f32 %v11145_v46, %v11135_v61  ;;  %11166 = vtanh.f32 %v10170_v5 }
 0x347   : > { %v11149_v36 = vpop.eup %11148  ;;  %11168 = vrcp.f32 %v3344_v1  ;;  %v9430_v1 = vmul.f32 -1.442695, %v9918_v53  ;;  %v10174_v53 = vadd.f32 %v14123_v20, %v13999_v42 }
 0x348   : > { %v11151_v18 = vpop.eup %11150  ;;  %11170 = vpow2.f32 %v9427_v25 }
 0x349   : > { %v11153_v61 = vpop.eup %11152  ;;  %11172 = vtanh.f32 %v14319_v57  ;;  %v3480_v5 = vmul.f32 0.0, %v11151_v18  ;;  %v3343_v57 = vadd.f32 1.0, %v11147_v4 }
 0x34a   : > { %v11155_v40 = vpop.eup %11154  ;;  %v3345_v46 = vadd.f32 1.0, %v11153_v61  ;;  %11174 = vtanh.f32 %v10172_v8 }
 0x34b   : > { %v11157_v32 = vpop.eup %11156  ;;  %v14342_v48 = vadd.f32 %v3496_v31, %v3480_v5  ;;  %v3497_v49 = vmul.f32 %v11155_v40, %v11149_v36  ;;  %11176 = vpow2.f32 %v9429_v23  ;;  %v9432_v31 = vmul.f32 -1.442695, %v9919_v9 }
 0x34c   : > { %v11159_v25 = vpop.eup %11158  ;;  %11178 = vrcp.f32 %v3345_v46  ;;  %v3346_v61 = vadd.f32 1.0, %v11157_v32  ;;  %v9921_v46 = vadd.f32 %v14141_v26, %v13990_v43  ;;  %v9922_v26 = vadd.f32 %v14149_v15, %v13994_v52 }
 0x34d   : > { %v11161_v28 = vpop.eup %11160  ;;  %11180 = vtanh.f32 %v14342_v48  ;;  %v3347_v18 = vadd.f32 1.0, %v11159_v25  ;;  %v10177_v15 = vadd.f32 %v14143_v54, %v13992_v44  ;;  %v10178_v54 = vadd.f32 %v14151_v21, %v13999_v42 }
 0x34e   : > { %v11163_v0 = vpop.eup %11162  ;;  %11182 = vpow2.f32 %v9431_v7 }
 0x34f   : > { %v11165_v8 = vpop.eup %11164  ;;  %11184 = vrcp.f32 %v3347_v18  ;;  %v3349_v22 = vadd.f32 1.0, %v11163_v0 }
 0x350   : > { %v11167_v36 = vpop.eup %11166  ;;  %v3481_v23 = vmul.f32 0.0, %v11165_v8  ;;  %11186 = vpow2.f32 %v9430_v1 }
 0x351   : > { %v11169_v5 = vpop.eup %11168  ;;  %11188 = vrcp.f32 %v3343_v57  ;;  %v10175_v57 = vadd.f32 %v14131_v45, %v13992_v44 }
 0x352   : > { %v11171_v4 = vpop.eup %11170  ;;  %v14351_v40 = vadd.f32 %v3497_v49, %v3481_v23  ;;  %11190 = vrcp.f32 %v3346_v61  ;;  %v3498_v32 = vmul.f32 %v11169_v5, %v11167_v36  ;;  %v9435_v49 = vmul.f32 -1.442695, %v9921_v46 }
 0x353   : > { %v11173_v7 = vpop.eup %11172  ;;  %v3348_v9 = vadd.f32 1.0, %v11171_v4  ;;  %11192 = vpow2.f32 %v9432_v31  ;;  %v9434_v31 = vmul.f32 -1.442695, %v10175_v57 }
 0x354   : > { %v11175_v25 = vpop.eup %11174  ;;  %11194 = vrcp.f32 %v3349_v22  ;;  %v3543_v33 = vmul.f32 %v11173_v7, %v14315_v16  ;;  %v10176_v22 = vadd.f32 %v14137_v63, %v13999_v42 }
 0x355   : > { %v11177_v0 = vpop.eup %11176  ;;  %11196 = vrcp.f32 %v3348_v9 }
 0x356   : > { %v11179_v20 = vpop.eup %11178  ;;  %v3350_v1 = vadd.f32 1.0, %v11177_v0  ;;  %11198 = vtanh.f32 %v10174_v53 }
 0x357   : > { %v11181_v18 = vpop.eup %11180  ;;  %v3482_v61 = vmul.f32 0.0, %v11179_v20  ;;  %11200 = vpow2.f32 %v9433_v14 }
 0x358   : > { %v11183_v8 = vpop.eup %11182  ;;  %11202 = vrcp.f32 %v3350_v1  ;;  %v3544_v36 = vmul.f32 %v11181_v18, %v11161_v28  ;;  %v9436_v28 = vmul.f32 -1.442695, %v9922_v26 }
 0x359   : > { %v11185_v23 = vpop.eup %11184  ;;  %11204 = vtanh.f32 %v14351_v40  ;;  %v14361_v45 = vadd.f32 %v3498_v32, %v3482_v61  ;;  %v3352_v9 = vadd.f32 1.0, %v11183_v8 }
 0x35a   : > { %v11187_v5 = vpop.eup %11186  ;;  %v3499_v53 = vmul.f32 %v11185_v23, %v11175_v25  ;;  %11206 = vpow2.f32 %v9435_v49  ;;  %v14367_v4 = vpack.c.bf16 %v3544_v36, %v3543_v33  ;;  %v9437_v25 = vmul.f32 -1.442695, %v10177_v15  ;;  %v16059_v23 = vld [vmem:[#allocation7_spill] sm:$0xff] }
 0x35b   : > { %v11189_v46 = vpop.eup %11188  ;;  %11208 = vtanh.f32 %v14361_v45  ;;  %v3351_v16 = vadd.f32 1.0, %v11187_v5 }
 0x35c   : > { %v11191_v7 = vpop.eup %11190  ;;  %11210 = vpow2.f32 %v9434_v31 }
 0x35d   : > { %v11193_v32 = vpop.eup %11192  ;;  %11212 = vrcp.f32 %v3351_v16 }
 0x35e   : > { %v14370_v14 = vpop.eup %11194  ;;  %v3353_v63 = vadd.f32 1.0, %v11193_v32  ;;  %11214 = vtanh.f32 %v10176_v22 }
 0x35f   : > { %v11197_v57 = vpop.eup %11196  ;;  %11216 = vpow2.f32 %v9436_v28 }
 0x360   : > { %v11199_v0 = vpop.eup %11198  ;;  %v3483_v20 = vmul.f32 0.0, %v11197_v57  ;;  %11218 = vrcp.f32 %v3353_v63 }
 0x361   : > { %v11201_v1 = vpop.eup %11200  ;;  %11220 = vrcp.f32 %v3352_v9 }
 0x362   : > { %v11203_v49 = vpop.eup %11202  ;;  %v14374_v18 = vadd.f32 %v3499_v53, %v3483_v20  ;;  %v3354_v61 = vadd.f32 1.0, %v11201_v1  ;;  %11222 = vpow2.f32 %v9437_v25 }
 0x363   : > { %v11205_v26 = vpop.eup %11204  ;;  %v3500_v8 = vmul.f32 %v11203_v49, %v11199_v0  ;;  %11224 = vtanh.f32 %v10178_v54 }
 0x364   : > { %v11207_v31 = vpop.eup %11206  ;;  %11226 = vtanh.f32 %v14075_v24  ;;  %v3545_v22 = vmul.f32 %v11205_v26, %v11189_v46  ;;  %v16061_v26 = vld [vmem:[#allocation5_spill] sm:$0xff] }
 0x365   : > { %v11209_v33 = vpop.eup %11208  ;;  %11228 = vrcp.f32 %v3354_v61  ;;  %v3356_v36 = vadd.f32 1.0, %v11207_v31  ;;  %v16062_v31 = vld [vmem:[#allocation6_spill] sm:$0xff] }
 0x366   : > { %v11211_v21 = vpop.eup %11210  ;;  %11230 = vtanh.f32 %v16059_v23  ;;  %v3546_v5 = vmul.f32 %v11209_v33, %v11191_v7 }
 0x367   : > { %v11213_v15 = vpop.eup %11212  ;;  %11232 = vrcp.f32 %v3356_v36 }
 0x368   : > { %v11215_v53 = vpop.eup %11214  ;;  %v3484_v16 = vmul.f32 0.0, %v11213_v15  ;;  %11234 = vtanh.f32 %v14145_v41  ;;  %v14379_v28 = vpack.c.bf16 %v3546_v5, %v3545_v22 }
 0x369   : > { %v11217_v32 = vpop.eup %11216  ;;  %11236 = vtanh.f32 %v14171_v13 }
 0x36a   : > { %v11219_v9 = vpop.eup %11218  ;;  %11238 = vtanh.f32 %v14374_v18  ;;  %v14383_v63 = vadd.f32 %v3500_v8, %v3484_v16  ;;  %v3357_v25 = vadd.f32 1.0, %v11217_v32 }
 0x36b   : > { %v11221_v57 = vpop.eup %11220  ;;  %v3501_v46 = vmul.f32 %v11219_v9, %v11215_v53  ;;  %11240 = vtanh.f32 %v14209_v3 }
 0x36c   : > { %16060 = vst [vmem:[#allocation7_spill] sm:$0xff] %v14383_v63  ;;  %v11223_v7 = vpop.eup %11222  ;;  %11242 = vtanh.f32 %v14383_v63  ;;  %v3355_v63 = vadd.f32 1.0, %v11211_v21 }
 0x36d   : > { %v11225_v54 = vpop.eup %11224  ;;  %11244 = vrcp.f32 %v3357_v25 }
 0x36e   : > { %v11227_v0 = vpop.eup %11226  ;;  %11246 = vtanh.f32 %v14259_v51 }
 0x36f   : > { %v11229_v20 = vpop.eup %11228  ;;  %v3537_v8 = vmul.f32 %v11227_v0, %v16061_v26  ;;  %11248 = vrcp.f32 %v3355_v63 }
 0x370   : > { %v11231_v1 = vpop.eup %11230  ;;  %v3485_v49 = vmul.f32 0.0, %v11229_v20 }
 0x371   : > { %v11233_v61 = vpop.eup %11232  ;;  %v3538_v33 = vmul.f32 %v11231_v1, %v16062_v31  ;;  %v3358_v1 = vadd.f32 1.0, %v11223_v7 }
 0x372   : > { %v11235_v36 = vpop.eup %11234  ;;  %v14390_v22 = vadd.f32 %v3501_v46, %v3485_v49  ;;  %v3502_v5 = vmul.f32 %v11233_v61, %v11225_v54 }
 0x373   : > { %v11237_v15 = vpop.eup %11236  ;;  %v3616_v53 = vpack.c.bf16 %v3538_v33, %v3537_v8  ;;  %v3539_v32 = vmul.f32 %v11235_v36, %v14169_v58 }
 0x374   : > { %v11239_v16 = vpop.eup %11238  ;;  %v3540_v9 = vmul.f32 %v11237_v15, %v14173_v12  ;;  %11250 = vtanh.f32 %v14390_v22 }
 0x375   : > { %v11241_v25 = vpop.eup %11240  ;;  %3666 = vmatmul.mubr.bf16.gmra.mrb[36].mxu0 %v3616_v53  ;;  %3779 = vmatmul.mubr.bf16.gmra.mrb[36].mxu1 %v3616_v53  ;;  %v3547_v54 = vmul.f32 %v11239_v16, %v14370_v14  ;;  %11252 = vrcp.f32 %v3358_v1 }
 0x376   : > { %v11243_v20 = vpop.eup %11242  ;;  %3675 = vmatprep.mubr.bf16.mxu0 %v16055_v11  ;;  %3788 = vmatprep.mubr.bf16.mxu1 %v16055_v11  ;;  %v3617_v0 = vpack.c.bf16 %v3540_v9, %v3539_v32  ;;  %v3541_v58 = vmul.f32 %v11241_v25, %v14223_v2 }
 0x377   : > { %v11245_v46 = vpop.eup %11244  ;;  %v3548_v49 = vmul.f32 %v11243_v20, %v11221_v57 }
 0x378   : > { %v11247_v61 = vpop.eup %11246  ;;  %v3486_v26 = vmul.f32 0.0, %v11245_v46 }
 0x379   : > { %v3542_v12 = vmul.f32 %v11247_v61, %v14285_v56  ;;  %v3621_v21 = vpack.c.bf16 %v3548_v49, %v3547_v54  ;;  %v11249_v14 = vpop.eup %11248 }
 0x37a   : > { %v14400_v8 = vadd.f32 %v3502_v5, %v3486_v26 }
 0x37b   : > { %v3618_v31 = vpack.c.bf16 %v3542_v12, %v3541_v58 }
 0x37c   : > { %11254 = vtanh.f32 %v14400_v8 }
 0x37d   : > { %3676 = vmatmul.mubr.bf16.gmra.mrb[40].mxu0 %v3617_v0  ;;  %3789 = vmatmul.mubr.bf16.gmra.mrb[40].mxu1 %v3617_v0 }
 0x37e   : > { %3685 = vmatprep.mubr.bf16.mxu0 %v16055_v11  ;;  %3798 = vmatprep.mubr.bf16.mxu1 %v16055_v11  ;;  %v11251_v63 = vpop.eup %11250 }
 0x37f   : > { %v11253_v2 = vpop.eup %11252  ;;  %v3549_v57 = vmul.f32 %v11251_v63, %v11249_v14 }
 0x385   : > { %3686 = vmatmul.mubr.bf16.gmra.mrb[44].mxu0 %v3618_v31  ;;  %3799 = vmatmul.mubr.bf16.gmra.mrb[44].mxu1 %v3618_v31 }
 0x386   : > { %v11255_v56 = vpop.eup %11254  ;;  %3695 = vmatprep.mubr.bf16.mxu0 %v16055_v11  ;;  %3808 = vmatprep.mubr.bf16.mxu1 %v16055_v11 }
 0x387   : > { %v3550_v7 = vmul.f32 %v11255_v56, %v11253_v2 }
 0x389   : > { %v3622_v33 = vpack.c.bf16 %v3550_v7, %v3549_v57 }
 0x38d   : > { %3696 = vmatmul.mubr.bf16.gmra.mrb[48].mxu0 %v14367_v4  ;;  %3809 = vmatmul.mubr.bf16.gmra.mrb[48].mxu1 %v14367_v4 }
 0x38e   : > { %3705 = vmatprep.mubr.bf16.mxu0 %v16055_v11  ;;  %3818 = vmatprep.mubr.bf16.mxu1 %v16055_v11 }
 0x395   : > { %3706 = vmatmul.mubr.bf16.gmra.mrb[52].mxu0 %v14379_v28  ;;  %3819 = vmatmul.mubr.bf16.gmra.mrb[52].mxu1 %v14379_v28 }
 0x396   : > { %3715 = vmatprep.mubr.bf16.mxu0 %v16055_v11  ;;  %3828 = vmatprep.mubr.bf16.mxu1 %v16055_v11 }
 0x39d   : > { %3716 = vmatmul.mubr.bf16.gmra.mrb[56].mxu0 %v3621_v21  ;;  %3829 = vmatmul.mubr.bf16.gmra.mrb[56].mxu1 %v3621_v21 }
 0x39e   : > { %3725 = vmatprep.mubr.bf16.mxu0 %v16055_v11  ;;  %3838 = vmatprep.mubr.bf16.mxu1 %v16055_v11 }
 0x3a5   : > { %3726 = vmatmul.mubr.bf16.gmra.mrb[60].mxu0 %v3622_v33  ;;  %3839 = vmatmul.mubr.bf16.gmra.mrb[60].mxu1 %v3622_v33 }
 0x3a6   : > { %4401 = vmatprep.mubr.bf16.mxu0 %v16055_v11  ;;  %4514 = vmatprep.mubr.bf16.mxu1 %v16055_v11 }
 0x3f7   : > { %v3657_v4 = vpop.f32.mrb[32].mxu0  ;;  %v3770_v36 = vpop.f32.mrb[32].mxu1 }
 0x3f8   : > { %v9923_v28 = vadd.f32 %v3657_v4, %v13990_v43  ;;  %v3659_v5 = vpop.f32.mrb[33].mxu0  ;;  %v3772_v15 = vpop.f32.mrb[33].mxu1  ;;  %v10179_v61 = vadd.f32 %v3770_v36, %v13992_v44 }
 0x3f9   : > { %v9924_v53 = vadd.f32 %v3659_v5, %v13994_v52  ;;  %v3661_v16 = vpop.f32.mrb[34].mxu0  ;;  %v3774_v32 = vpop.f32.mrb[34].mxu1  ;;  %v10180_v58 = vadd.f32 %v3772_v15, %v13999_v42 }
 0x3fa   : > { %v9438_v9 = vmul.f32 -1.442695, %v9923_v28  ;;  %v9925_v25 = vadd.f32 %v3661_v16, %v13990_v43  ;;  %v3663_v20 = vpop.f32.mrb[35].mxu0  ;;  %v3776_v0 = vpop.f32.mrb[35].mxu1  ;;  %v10181_v26 = vadd.f32 %v3774_v32, %v13992_v44  ;;  %v9440_v12 = vmul.f32 -1.442695, %v10179_v61 }
 0x3fb   : > { %v9439_v46 = vmul.f32 -1.442695, %v9924_v53  ;;  %v9926_v1 = vadd.f32 %v3663_v20, %v13994_v52  ;;  %v10182_v14 = vadd.f32 %v3776_v0, %v13999_v42  ;;  %v16063_v20 = vld [vmem:[#allocation3_spill] sm:$0xff]  ;;  %v16064_v61 = vld [vmem:[#allocation4_spill] sm:$0xff] }
 0x3fc   : > { %11256 = vpow2.f32 %v9438_v9  ;;  %v9441_v54 = vmul.f32 -1.442695, %v9925_v25  ;;  %v9443_v21 = vmul.f32 -1.442695, %v10181_v26 }
 0x3fd   : > { %v9442_v49 = vmul.f32 -1.442695, %v9926_v1  ;;  %11258 = vpow2.f32 %v9439_v46 }
 0x3fe   : > { %11260 = vpow2.f32 %v9441_v54 }
 0x3ff   : > { %11262 = vpow2.f32 %v9442_v49 }
 0x400   : > { %11264 = vtanh.f32 %v10180_v58 }
 0x401   : > { %11266 = vpow2.f32 %v9440_v12 }
 0x402   : > { %11268 = vpow2.f32 %v9443_v21 }
 0x406   : > { %v11257_v31 = vpop.eup %11256 }
 0x407   : > { %v4057_v63 = vadd.f32 1.0, %v11257_v31  ;;  %v11259_v2 = vpop.eup %11258 }
 0x408   : > { %v11261_v56 = vpop.eup %11260  ;;  %v4058_v57 = vadd.f32 1.0, %v11259_v2 }
 0x409   : > { %11270 = vrcp.f32 %v4057_v63  ;;  %v4060_v7 = vadd.f32 1.0, %v11261_v56  ;;  %v11263_v33 = vpop.eup %11262 }
 0x40a   : > { %11272 = vtanh.f32 %v10182_v14  ;;  %v4061_v4 = vadd.f32 1.0, %v11263_v33  ;;  %v11265_v36 = vpop.eup %11264  ;;  %v13082_v33 = vld [vmem:[%s16029_s2 + $0x24] ss:$16 sps:$4 sm:$0xff]  }
 0x40b   : > { %11274 = vrcp.f32 %v4058_v57  ;;  %v11267_v28 = vpop.eup %11266  ;;  %v13080_v57 = vld [vmem:[%s16029_s2] ss:$16 sps:$4 sm:$0xff]  }
 0x40c   : > { %11276 = vrcp.f32 %v4060_v7  ;;  %v11269_v5 = vpop.eup %11268  ;;  %v4059_v25 = vadd.f32 1.0, %v11267_v28  ;;  %v13081_v7 = vld [vmem:[%s16029_s2 + $0x8] ss:$16 sps:$4 sm:$0xff]  }
 0x40d   : > { %11278 = vrcp.f32 %v4061_v4  ;;  %v4062_v49 = vadd.f32 1.0, %v11269_v5  ;;  %v13083_v4 = vld [vmem:[%s16029_s2 + $0x2c] ss:$16 sps:$4 sm:$0xff]   ;;  %v13085_v28 = vld [vmem:[%s16029_s2 + $0x28] ss:$16 sps:$4 sm:$0xff]  }
 0x40e   : > { %11280 = vrcp.f32 %v4059_v25  ;;  %v13086_v5 = vld [vmem:[%s16029_s2 + $0x44] ss:$16 sps:$4 sm:$0xff]  }
 0x413   : > { %v11271_v15 = vpop.eup %11270 }
 0x414   : > { %v11273_v53 = vpop.eup %11272  ;;  %v4233_v16 = vmul.f32 %v11271_v15, %v11265_v36  ;;  %v13084_v36 = vld [vmem:[%s16029_s2 + $0x20] ss:$16 sps:$4 sm:$0xff]   ;;  %v13087_v15 = vld [vmem:[%s16029_s2 + $0x4c] ss:$16 sps:$4 sm:$0xff]  }
 0x415   : > { %v11275_v32 = vpop.eup %11274 }
 0x416   : > { %v11277_v9 = vpop.eup %11276  ;;  %v4217_v0 = vmul.f32 %v11275_v32, %v16063_v20  ;;  %v16066_v32 = vld [vmem:[#allocation9_spill] sm:$0xff]  ;;  %v13091_v20 = vld [vmem:[%s16029_s2 + $0xc] ss:$16 sps:$4 sm:$0xff]  }
 0x417   : > { %v4234_v46 = vmul.f32 %v11277_v9, %v11273_v53  ;;  %v11279_v1 = vpop.eup %11278  ;;  %v13088_v53 = vld [vmem:[%s16029_s2 + $0x40] ss:$16 sps:$4 sm:$0xff]   ;;  %v16067_v9 = vld [vmem:[#allocation10_spill] sm:$0xff] }
 0x418   : > { %v14428_v54 = vadd.f32 %v4233_v16, %v4217_v0  ;;  %v4218_v26 = vmul.f32 %v11279_v1, %v16064_v61  ;;  %v11281_v12 = vpop.eup %11280  ;;  %v13089_v16 = vld [vmem:[%s16029_s2 + $0x48] ss:$16 sps:$4 sm:$0xff]  }
 0x41a   : > { %11282 = vtanh.f32 %v14428_v54  ;;  %v14432_v58 = vadd.f32 %v4234_v46, %v4218_v26 }
 0x41b   : > { %11284 = vrcp.f32 %v4062_v49 }
 0x41c   : > { %16065 = vst [vmem:[#allocation5_spill] sm:$0xff] %v14432_v58  ;;  %11286 = vtanh.f32 %v14432_v58 }
 0x424   : > { %v11283_v21 = vpop.eup %11282 }
 0x425   : > { %v11285_v31 = vpop.eup %11284  ;;  %v4281_v63 = vmul.f32 %v11283_v21, %v11281_v12 }
 0x426   : > { %v11287_v14 = vpop.eup %11286 }
 0x427   : > { %v4282_v2 = vmul.f32 %v11287_v14, %v11285_v31 }
 0x429   : > { %v4361_v56 = vpack.c.bf16 %v4282_v2, %v4281_v63 }
 0x42b   : > { %4402 = vmatmul.mubr.bf16.vlgmr.msra.gmra.mrb[64].mxu0 %v4361_v56  ;;  %4515 = vmatmul.mubr.bf16.vlgmr.msra.gmra.mrb[64].mxu1 %v4361_v56 }
 0x42c   : > { %4411 = vmatprep.mubr.bf16.mxu0 %v16055_v11  ;;  %4524 = vmatprep.mubr.bf16.mxu1 %v16055_v11 }
 0x42d   : > { %5116 = vmatpush1.bf16.msra.mxu0 %v13080_v57  ;;  %5229 = vmatpush1.bf16.msra.mxu1 %v13081_v7 }
 0x42e   : > { %5117 = vmatprep.subr.bf16.mxu0 %v13082_v33  ;;  %5230 = vmatprep.subr.bf16.mxu1 %v13083_v4 }
 0x431   : > { %5118 = vmatpush1.bf16.msra.mxu0 %v13084_v36  ;;  %5231 = vmatpush1.bf16.msra.mxu1 %v13085_v28 }
 0x432   : > { %5119 = vmatprep.subr.bf16.mxu0 %v13086_v5  ;;  %5232 = vmatprep.subr.bf16.mxu1 %v13087_v15 }
 0x435   : > { %5120 = vmatpush1.bf16.msra.mxu0 %v13088_v53  ;;  %5233 = vmatpush1.bf16.msra.mxu1 %v13089_v16 }
 0x436   : > { %5121 = vmatprep.subr.bf16.mxu0 %v14186_v50  ;;  %5234 = vmatprep.subr.bf16.mxu1 %v14192_v37 }
 0x439   : > { %5122 = vmatpush1.bf16.msra.mxu0 %v14200_v19  ;;  %5235 = vmatpush1.bf16.msra.mxu1 %v14206_v10 }
 0x43a   : > { %5123 = vmatprep.subr.bf16.mxu0 %v14214_v29  ;;  %5236 = vmatprep.subr.bf16.mxu1 %v14220_v30 }
 0x43d   : > { %5124 = vmatpush1.bf16.msra.mxu0 %v14234_v34  ;;  %5237 = vmatpush1.bf16.msra.mxu1 %v14240_v60 }
 0x43e   : > { %5125 = vmatprep.subr.bf16.mxu0 %v14248_v47  ;;  %5238 = vmatprep.subr.bf16.mxu1 %v14254_v35 }
 0x441   : > { %5126 = vmatpush1.bf16.msra.mxu0 %v14264_v59  ;;  %5239 = vmatpush1.bf16.msra.mxu1 %v14270_v62 }
 0x442   : > { %5127 = vmatprep.subr.bf16.mxu0 %v14276_v6  ;;  %5240 = vmatprep.subr.bf16.mxu1 %v14282_v27 }
 0x445   : > { %5128 = vmatpush1.bf16.msra.mxu0 %v14292_v17  ;;  %5241 = vmatpush1.bf16.msra.mxu1 %v14298_v39 }
 0x446   : > { %5129 = vmatprep.subr.bf16.mxu0 %v14306_v55  ;;  %5242 = vmatprep.subr.bf16.mxu1 %v14312_v38  ;;  %v13090_v38 = vld [vmem:[%s16029_s2 + $0x4] ss:$16 sps:$4 sm:$0xff]  }
 0x448   : > { %v3667_v50 = vpop.f32.mrb[36].mxu0  ;;  %v3780_v37 = vpop.f32.mrb[36].mxu1 }
 0x449   : > { %v9927_v19 = vadd.f32 %v3667_v50, %v13990_v43  ;;  %v3669_v10 = vpop.f32.mrb[37].mxu0  ;;  %v3782_v29 = vpop.f32.mrb[37].mxu1  ;;  %v10183_v6 = vadd.f32 %v3780_v37, %v13992_v44  ;;  %5130 = vmatpush1.bf16.msra.mxu0 %v16066_v32  ;;  %5243 = vmatpush1.bf16.msra.mxu1 %v16067_v9 }
 0x44a   : > { %v9928_v30 = vadd.f32 %v3669_v10, %v13994_v52  ;;  %v3671_v34 = vpop.f32.mrb[38].mxu0  ;;  %v3784_v60 = vpop.f32.mrb[38].mxu1  ;;  %5861 = vmatprep.subr.bf16.mxu0 %v13090_v38  ;;  %5974 = vmatprep.subr.bf16.mxu1 %v13091_v20  ;;  %v10184_v0 = vadd.f32 %v3782_v29, %v13999_v42 }
 0x44b   : > { %v9444_v47 = vmul.f32 -1.442695, %v9927_v19  ;;  %v9929_v35 = vadd.f32 %v3671_v34, %v13990_v43  ;;  %v3673_v59 = vpop.f32.mrb[39].mxu0  ;;  %v3786_v62 = vpop.f32.mrb[39].mxu1  ;;  %v10185_v55 = vadd.f32 %v3784_v60, %v13992_v44  ;;  %v9446_v46 = vmul.f32 -1.442695, %v10183_v6 }
 0x44c   : > { %v9445_v27 = vmul.f32 -1.442695, %v9928_v30  ;;  %v9930_v17 = vadd.f32 %v3673_v59, %v13994_v52  ;;  %v10186_v15 = vadd.f32 %v3786_v62, %v13999_v42 }
 0x44d   : > { %11288 = vpow2.f32 %v9444_v47  ;;  %v9447_v39 = vmul.f32 -1.442695, %v9929_v35  ;;  %v9449_v31 = vmul.f32 -1.442695, %v10185_v55 }
 0x44e   : > { %v9448_v25 = vmul.f32 -1.442695, %v9930_v17  ;;  %11290 = vpow2.f32 %v9445_v27 }
 0x44f   : > { %11292 = vpow2.f32 %v9447_v39 }
 0x450   : > { %v3677_v1 = vpop.f32.mrb[40].mxu0  ;;  %v3790_v49 = vpop.f32.mrb[40].mxu1  ;;  %11294 = vpow2.f32 %v9448_v25 }
 0x451   : > { %v9931_v61 = vadd.f32 %v3677_v1, %v13990_v43  ;;  %v10187_v26 = vadd.f32 %v3790_v49, %v13992_v44  ;;  %v3679_v12 = vpop.f32.mrb[41].mxu0  ;;  %v3792_v21 = vpop.f32.mrb[41].mxu1  ;;  %11296 = vtanh.f32 %v10184_v0 }
 0x452   : > { %v9932_v14 = vadd.f32 %v3679_v12, %v13994_v52  ;;  %v3681_v63 = vpop.f32.mrb[42].mxu0  ;;  %v3794_v2 = vpop.f32.mrb[42].mxu1  ;;  %11298 = vpow2.f32 %v9446_v46  ;;  %v10188_v47 = vadd.f32 %v3792_v21, %v13999_v42 }
 0x453   : > { %v9450_v56 = vmul.f32 -1.442695, %v9931_v61  ;;  %v9933_v57 = vadd.f32 %v3681_v63, %v13990_v43  ;;  %v3683_v7 = vpop.f32.mrb[43].mxu0  ;;  %v3796_v33 = vpop.f32.mrb[43].mxu1  ;;  %v9452_v36 = vmul.f32 -1.442695, %v10187_v26  ;;  %v10189_v10 = vadd.f32 %v3794_v2, %v13992_v44 }
 0x454   : > { %v9451_v4 = vmul.f32 -1.442695, %v9932_v14  ;;  %v9934_v16 = vadd.f32 %v3683_v7, %v13994_v52  ;;  %v10190_v20 = vadd.f32 %v3796_v33, %v13999_v42 }
 0x455   : > { %11300 = vpow2.f32 %v9450_v56  ;;  %v9453_v28 = vmul.f32 -1.442695, %v9933_v57  ;;  %v9455_v55 = vmul.f32 -1.442695, %v10189_v10 }
 0x456   : > { %11302 = vpow2.f32 %v9449_v31  ;;  %v9454_v17 = vmul.f32 -1.442695, %v9934_v16 }
 0x457   : > { %v11289_v5 = vpop.eup %11288  ;;  %11304 = vpow2.f32 %v9451_v4 }
 0x458   : > { %v4063_v53 = vadd.f32 1.0, %v11289_v5  ;;  %11306 = vpow2.f32 %v9453_v28  ;;  %v3687_v50 = vpop.f32.mrb[44].mxu0  ;;  %v3800_v37 = vpop.f32.mrb[44].mxu1 }
 0x459   : > { %v11291_v19 = vpop.eup %11290  ;;  %11308 = vpow2.f32 %v9452_v36  ;;  %v3689_v29 = vpop.f32.mrb[45].mxu0  ;;  %v9935_v0 = vadd.f32 %v3687_v50, %v13990_v43  ;;  %v10191_v36 = vadd.f32 %v3800_v37, %v13992_v44 }
 0x45a   : > { %v14507_v30 = vpop.f32.mrb[45].mxu1  ;;  %v11293_v34 = vpop.eup %11292  ;;  %11310 = vrcp.f32 %v4063_v53  ;;  %v4064_v60 = vadd.f32 1.0, %v11291_v19  ;;  %v9936_v12 = vadd.f32 %v3689_v29, %v13994_v52 }
 0x45b   : > { %v3691_v35 = vpop.f32.mrb[46].mxu0  ;;  %v14510_v59 = vpop.f32.mrb[46].mxu1  ;;  %v4066_v62 = vadd.f32 1.0, %v11293_v34  ;;  %11312 = vtanh.f32 %v10186_v15  ;;  %v9456_v4 = vmul.f32 -1.442695, %v9935_v0 }
 0x45c   : > { %v3693_v6 = vpop.f32.mrb[47].mxu0  ;;  %v11295_v27 = vpop.eup %11294  ;;  %11314 = vrcp.f32 %v4064_v60  ;;  %v9937_v53 = vadd.f32 %v3691_v35, %v13990_v43  ;;  %v9457_v10 = vmul.f32 -1.442695, %v9936_v12  ;;  %v9458_v37 = vmul.f32 -1.442695, %v10191_v36 }
 0x45d   : > { %v14512_v39 = vpop.f32.mrb[47].mxu1  ;;  %v11297_v32 = vpop.eup %11296  ;;  %11316 = vrcp.f32 %v4066_v62  ;;  %v4067_v9 = vadd.f32 1.0, %v11295_v27  ;;  %v9938_v35 = vadd.f32 %v3693_v6, %v13994_v52  ;;  %v10192_v36 = vadd.f32 %v14507_v30, %v13999_v42 }
 0x45e   : > { %v11299_v25 = vpop.eup %11298  ;;  %11318 = vtanh.f32 %v10188_v47 }
 0x45f   : > { %v11301_v38 = vpop.eup %11300  ;;  %11320 = vrcp.f32 %v4067_v9  ;;  %v4065_v63 = vadd.f32 1.0, %v11299_v25 }
 0x460   : > { %v11303_v46 = vpop.eup %11302  ;;  %v4069_v1 = vadd.f32 1.0, %v11301_v38  ;;  %11322 = vpow2.f32 %v9454_v17  ;;  %v3697_v49 = vpop.f32.mrb[48].mxu0  ;;  %v9459_v17 = vmul.f32 -1.442695, %v9937_v53 }
 0x461   : > { %v14516_v61 = vpop.f32.mrb[48].mxu1  ;;  %v11305_v26 = vpop.eup %11304  ;;  %11324 = vpow2.f32 %v9455_v55  ;;  %v4068_v15 = vadd.f32 1.0, %v11303_v46  ;;  %v9939_v46 = vadd.f32 %v3697_v49, %v13990_v43 }
 0x462   : > { %v14519_v21 = vpop.f32.mrb[49].mxu0  ;;  %v14521_v31 = vpop.f32.mrb[49].mxu1  ;;  %11326 = vrcp.f32 %v4069_v1  ;;  %v4070_v2 = vadd.f32 1.0, %v11305_v26 }
 0x463   : > { %v11307_v14 = vpop.eup %11306  ;;  %v14523_v56 = vpop.f32.mrb[50].mxu0  ;;  %11328 = vtanh.f32 %v10190_v20 }
 0x464   : > { %v14525_v57 = vpop.f32.mrb[50].mxu1  ;;  %v11309_v7 = vpop.eup %11308  ;;  %v4072_v33 = vadd.f32 1.0, %v11307_v14  ;;  %11330 = vrcp.f32 %v4070_v2  ;;  %v10193_v14 = vadd.f32 %v14510_v59, %v13992_v44 }
 0x465   : > { %v14528_v28 = vpop.f32.mrb[51].mxu0  ;;  %v11311_v5 = vpop.eup %11310  ;;  %v4071_v34 = vadd.f32 1.0, %v11309_v7 }
 0x466   : > { %v14531_v16 = vpop.f32.mrb[51].mxu1  ;;  %v11313_v50 = vpop.eup %11312  ;;  %v4235_v19 = vmul.f32 %v11311_v5, %v11297_v32  ;;  %11332 = vrcp.f32 %v4072_v33 }
 0x467   : > { %v11315_v29 = vpop.eup %11314  ;;  %11334 = vrcp.f32 %v4065_v63 }
 0x468   : > { %v11317_v60 = vpop.eup %11316  ;;  %v4219_v47 = vmul.f32 %v11315_v29, %v14075_v24  ;;  %11336 = vpow2.f32 %v9456_v4  ;;  %v14535_v9 = vpop.f32.mrb[52].mxu0  ;;  %v9940_v29 = vadd.f32 %v14519_v21, %v13994_v52 }
 0x469   : > { %v11319_v62 = vpop.eup %11318  ;;  %11338 = vrcp.f32 %v4068_v15  ;;  %v4236_v27 = vmul.f32 %v11317_v60, %v11313_v50  ;;  %v14537_v55 = vpop.f32.mrb[52].mxu1  ;;  %v9462_v15 = vmul.f32 -1.442695, %v9939_v46  ;;  %v9461_v50 = vmul.f32 -1.442695, %v10193_v14 }
 0x46a   : > { %v11321_v32 = vpop.eup %11320  ;;  %v14539_v25 = vadd.f32 %v4235_v19, %v4219_v47  ;;  %11340 = vpow2.f32 %v9457_v10  ;;  %v14541_v38 = vpop.f32.mrb[53].mxu0  ;;  %v9463_v14 = vmul.f32 -1.442695, %v9940_v29  ;;  %v9942_v29 = vadd.f32 %v14528_v28, %v13994_v52 }
 0x46b   : > { %v14543_v20 = vpop.f32.mrb[53].mxu1  ;;  %v11323_v24 = vpop.eup %11322  ;;  %v4220_v0 = vmul.f32 %v11321_v32, %v16059_v23  ;;  %11342 = vrcp.f32 %v4071_v34  ;;  %v9460_v23 = vmul.f32 -1.442695, %v9938_v35  ;;  %v9943_v28 = vadd.f32 %v14535_v9, %v13990_v43 }
 0x46c   : > { %16068 = vst [vmem:[#allocation6_spill] sm:$0xff] %v14539_v25  ;;  %v14547_v1 = vpop.f32.mrb[54].mxu0  ;;  %v14549_v6 = vpop.f32.mrb[54].mxu1  ;;  %v4073_v12 = vadd.f32 1.0, %v11323_v24  ;;  %11344 = vpow2.f32 %v9458_v37  ;;  %v10194_v24 = vadd.f32 %v14512_v39, %v13999_v42 }
 0x46d   : > { %v11325_v26 = vpop.eup %11324  ;;  %v14553_v63 = vpop.f32.mrb[55].mxu0  ;;  %v14555_v7 = vadd.f32 %v4236_v27, %v4220_v0  ;;  %11346 = vpow2.f32 %v9459_v17  ;;  %v9941_v0 = vadd.f32 %v14523_v56, %v13990_v43  ;;  %v9468_v58 = vmul.f32 -1.442695, %v9943_v28 }
 0x46e   : > { %v11327_v2 = vpop.eup %11326  ;;  %v14557_v33 = vpop.f32.mrb[55].mxu1  ;;  %11348 = vrcp.f32 %v4073_v12  ;;  %v4074_v37 = vadd.f32 1.0, %v11325_v26 }
 0x46f   : > { %16069 = vst [vmem:[#allocation3_spill] sm:$0xff] %v14555_v7  ;;  %v11329_v49 = vpop.eup %11328  ;;  %v4237_v4 = vmul.f32 %v11327_v2, %v11319_v62  ;;  %11350 = vtanh.f32 %v14555_v7  ;;  %v9465_v39 = vmul.f32 -1.442695, %v9941_v0 }
 0x470   : > { %v11331_v5 = vpop.eup %11330  ;;  %11352 = vtanh.f32 %v14539_v25  ;;  %v14566_v34 = vpop.f32.mrb[56].mxu0 }
 0x471   : > { %v11333_v59 = vpop.eup %11332  ;;  %v4221_v53 = vmul.f32 %v11331_v5, %v14145_v41  ;;  %11354 = vpow2.f32 %v9460_v23  ;;  %v14568_v60 = vpop.f32.mrb[56].mxu1 }
 0x472   : > { %v11335_v19 = vpop.eup %11334  ;;  %v4238_v10 = vmul.f32 %v11333_v59, %v11329_v49  ;;  %11356 = vtanh.f32 %v10192_v36  ;;  %v14572_v62 = vpop.f32.mrb[57].mxu0 }
 0x473   : > { %v11337_v30 = vpop.eup %11336  ;;  %v14570_v47 = vadd.f32 %v4237_v4, %v4221_v53  ;;  %v14574_v27 = vpop.f32.mrb[57].mxu1  ;;  %11358 = vpow2.f32 %v9462_v15 }
 0x474   : > { %v11339_v41 = vpop.eup %11338  ;;  %v4075_v17 = vadd.f32 1.0, %v11337_v30  ;;  %v14576_v35 = vpop.f32.mrb[58].mxu0  ;;  %11360 = vpow2.f32 %v9461_v50  ;;  %v10196_v50 = vadd.f32 %v14521_v31, %v13999_v42 }
 0x475   : > { %16070 = vst [vmem:[#allocation4_spill] sm:$0xff] %v14570_v47  ;;  %v14578_v32 = vpop.f32.mrb[58].mxu1  ;;  %v11341_v21 = vpop.eup %11340 }
 0x476   : > { %v14584_v46 = vpop.f32.mrb[59].mxu0  ;;  %v14586_v26 = vpop.eup %11342  ;;  %11362 = vrcp.f32 %v4075_v17  ;;  %v4076_v12 = vadd.f32 1.0, %v11341_v21  ;;  %v10195_v21 = vadd.f32 %v14516_v61, %v13992_v44 }
 0x477   : > { %v14588_v2 = vpop.f32.mrb[59].mxu1  ;;  %v11345_v23 = vpop.eup %11344  ;;  %11364 = vrcp.f32 %v4074_v37 }
 0x478   : > { %v11347_v49 = vpop.eup %11346  ;;  %11366 = vrcp.f32 %v4076_v12  ;;  %v14591_v15 = vpop.f32.mrb[60].mxu0 }
 0x479   : > { %v11349_v4 = vpop.eup %11348  ;;  %v4078_v36 = vadd.f32 1.0, %v11347_v49  ;;  %11368 = vtanh.f32 %v10194_v24  ;;  %v14593_v59 = vpop.f32.mrb[60].mxu1 }
 0x47a   : > { %v11351_v5 = vpop.eup %11350  ;;  %v4222_v56 = vmul.f32 %v11349_v4, %v14171_v13  ;;  %11370 = vpow2.f32 %v9463_v14  ;;  %v14599_v30 = vpop.f32.mrb[61].mxu0 }
 0x47b   : > { %v11353_v53 = vpop.eup %11352  ;;  %11372 = vrcp.f32 %v4078_v36  ;;  %v14601_v37 = vpop.f32.mrb[61].mxu1  ;;  %v4284_v31 = vmul.f32 %v11351_v5, %v11339_v41  ;;  %v10197_v41 = vadd.f32 %v14525_v57, %v13992_v44  ;;  %v9466_v5 = vmul.f32 -1.442695, %v9942_v29 }
 0x47c   : > { %v11355_v17 = vpop.eup %11354  ;;  %11374 = vtanh.f32 %v14570_v47  ;;  %v14604_v13 = vadd.f32 %v4238_v10, %v4222_v56  ;;  %v14608_v24 = vpop.f32.mrb[62].mxu0  ;;  %v4077_v10 = vadd.f32 1.0, %v11345_v23  ;;  %v4283_v61 = vmul.f32 %v11353_v53, %v11335_v19 }
 0x47d   : > { %v14610_v0 = vpop.f32.mrb[62].mxu1  ;;  %v11357_v12 = vpop.eup %11356  ;;  %v4079_v14 = vadd.f32 1.0, %v11355_v17  ;;  %11376 = vpow2.f32 %v9465_v39  ;;  %v9464_v17 = vmul.f32 -1.442695, %v10195_v21  ;;  %v9944_v57 = vadd.f32 %v14541_v38, %v13994_v52 }
 0x47e   : > { %16071 = vst [vmem:[#allocation9_spill] sm:$0xff] %v14604_v13  ;;  %v14614_v49 = vpop.f32.mrb[63].mxu0  ;;  %v11359_v4 = vpop.eup %11358  ;;  %11378 = vtanh.f32 %v14604_v13  ;;  %v4362_v9 = vpack.c.bf16 %v4284_v31, %v4283_v61 }
 0x47f   : > { %v14617_v36 = vpop.f32.mrb[63].mxu1  ;;  %v11361_v56 = vpop.eup %11360  ;;  %v4081_v47 = vadd.f32 1.0, %v11359_v4  ;;  %11380 = vtanh.f32 %v10196_v50  ;;  %v9467_v50 = vmul.f32 -1.442695, %v10197_v41  ;;  %v9469_v4 = vmul.f32 -1.442695, %v9944_v57 }
 0x480   : > { %v11363_v39 = vpop.eup %11362  ;;  %11382 = vrcp.f32 %v4079_v14  ;;  %v4080_v23 = vadd.f32 1.0, %v11361_v56  ;;  %4412 = vmatmul.mubr.bf16.gmra.mrb[68].mxu0 %v4362_v9  ;;  %4525 = vmatmul.mubr.bf16.gmra.mrb[68].mxu1 %v4362_v9  ;;  %v10199_v14 = vadd.f32 %v14537_v55, %v13992_v44  ;;  %v9946_v55 = vadd.f32 %v14553_v63, %v13994_v52 }
 0x481   : > { %v11365_v7 = vpop.eup %11364  ;;  %v4239_v25 = vmul.f32 %v11363_v39, %v11357_v12  ;;  %11384 = vrcp.f32 %v4081_v47  ;;  %4421 = vmatprep.mubr.bf16.mxu0 %v16055_v11  ;;  %4534 = vmatprep.mubr.bf16.mxu1 %v16055_v11  ;;  %v10198_v47 = vadd.f32 %v14531_v16, %v13999_v42  ;;  %v10201_v63 = vadd.f32 %v14549_v6, %v13992_v44  ;;  %v16072_v6 = vld [vmem:[#allocation8_spill] sm:$0xff] }
 0x482   : > { %v11367_v13 = vpop.eup %11366  ;;  %11386 = vrcp.f32 %v4077_v10  ;;  %v9472_v57 = vmul.f32 -1.442695, %v9946_v55 }
 0x483   : > { %v11369_v19 = vpop.eup %11368  ;;  %v4223_v53 = vmul.f32 %v11367_v13, %v14209_v3  ;;  %11388 = vpow2.f32 %v9466_v5  ;;  %v9945_v3 = vadd.f32 %v14547_v1, %v13990_v43  ;;  %v9470_v1 = vmul.f32 -1.442695, %v10199_v14 }
 0x484   : > { %v11371_v29 = vpop.eup %11370  ;;  %11390 = vpow2.f32 %v9464_v17 }
 0x485   : > { %v11373_v21 = vpop.eup %11372  ;;  %v14628_v31 = vadd.f32 %v4239_v25, %v4223_v53  ;;  %v4082_v12 = vadd.f32 1.0, %v11371_v29  ;;  %11392 = vpow2.f32 %v9468_v58  ;;  %v9471_v25 = vmul.f32 -1.442695, %v9945_v3 }
 0x486   : > { %v11375_v13 = vpop.eup %11374  ;;  %11394 = vrcp.f32 %v4080_v23  ;;  %v4240_v38 = vmul.f32 %v11373_v21, %v11369_v19  ;;  %v10200_v19 = vadd.f32 %v14543_v20, %v13999_v42  ;;  %v9947_v53 = vadd.f32 %v14566_v34, %v13990_v43 }
 0x487   : > { %v11377_v28 = vpop.eup %11376  ;;  %11396 = vpow2.f32 %v9467_v50  ;;  %v4285_v58 = vmul.f32 %v11375_v13, %v14586_v26  ;;  %v9473_v3 = vmul.f32 -1.442695, %v10201_v63 }
 0x488   : > { %v11379_v10 = vpop.eup %11378  ;;  %11398 = vrcp.f32 %v4082_v12  ;;  %v4084_v16 = vadd.f32 1.0, %v11377_v28  ;;  %v9474_v21 = vmul.f32 -1.442695, %v9947_v53 }
 0x489   : > { %v11381_v61 = vpop.eup %11380  ;;  %11400 = vtanh.f32 %v10198_v47  ;;  %v4286_v56 = vmul.f32 %v11379_v10, %v11365_v7 }
 0x48a   : > { %v11383_v41 = vpop.eup %11382  ;;  %11402 = vrcp.f32 %v4084_v16 }
 0x48b   : > { %v11385_v5 = vpop.eup %11384  ;;  %v4224_v39 = vmul.f32 %v11383_v41, %v14259_v51  ;;  %11404 = vpow2.f32 %v9469_v4  ;;  %v4363_v17 = vpack.c.bf16 %v4286_v56, %v4285_v58  ;;  %v9948_v4 = vadd.f32 %v14572_v62, %v13994_v52 }
 0x48c   : > { %v11387_v9 = vpop.eup %11386  ;;  %11406 = vtanh.f32 %v14628_v31  ;;  %v4241_v23 = vmul.f32 %v11385_v5, %v11381_v61  ;;  %v9949_v41 = vadd.f32 %v14576_v35, %v13990_v43  ;;  %v9950_v35 = vadd.f32 %v14584_v46, %v13994_v52 }
 0x48d   : > { %v11389_v26 = vpop.eup %11388  ;;  %v14641_v7 = vadd.f32 %v4240_v38, %v4224_v39  ;;  %11408 = vpow2.f32 %v9471_v25  ;;  %4422 = vmatmul.mubr.bf16.gmra.mrb[72].mxu0 %v4363_v17  ;;  %4535 = vmatmul.mubr.bf16.gmra.mrb[72].mxu1 %v4363_v17  ;;  %v10202_v25 = vadd.f32 %v14557_v33, %v13999_v42  ;;  %v9475_v55 = vmul.f32 -1.442695, %v9948_v4 }
 0x48e   : > { %v11391_v51 = vpop.eup %11390  ;;  %v4085_v50 = vadd.f32 1.0, %v11389_v26  ;;  %11410 = vpow2.f32 %v9470_v1  ;;  %4431 = vmatprep.mubr.bf16.mxu0 %v16055_v11  ;;  %4544 = vmatprep.mubr.bf16.mxu1 %v16055_v11 }
 0x48f   : > { %v11393_v20 = vpop.eup %11392  ;;  %11412 = vtanh.f32 %v14641_v7  ;;  %v4083_v38 = vadd.f32 1.0, %v11391_v51  ;;  %v10204_v51 = vadd.f32 %v14574_v27, %v13999_v42  ;;  %v10203_v27 = vadd.f32 %v14568_v60, %v13992_v44 }
 0x490   : > { %v11395_v29 = vpop.eup %11394  ;;  %v4087_v47 = vadd.f32 1.0, %v11393_v20  ;;  %11414 = vtanh.f32 %v10200_v19  ;;  %v9477_v19 = vmul.f32 -1.442695, %v9949_v41 }
 0x491   : > { %v11397_v34 = vpop.eup %11396  ;;  %11416 = vrcp.f32 %v4085_v50  ;;  %v9476_v60 = vmul.f32 -1.442695, %v10203_v27 }
 0x492   : > { %v11399_v12 = vpop.eup %11398  ;;  %11418 = vrcp.f32 %v4087_v47  ;;  %v4086_v5 = vadd.f32 1.0, %v11397_v34 }
 0x493   : > { %v11401_v13 = vpop.eup %11400  ;;  %v4225_v14 = vmul.f32 %v11399_v12, %v16072_v6  ;;  %11420 = vpow2.f32 %v9472_v57  ;;  %v9952_v6 = vadd.f32 %v14599_v30, %v13994_v52 }
 0x494   : > { %v11403_v28 = vpop.eup %11402  ;;  %11422 = vpow2.f32 %v9474_v21 }
 0x495   : > { %v11405_v10 = vpop.eup %11404  ;;  %v14653_v16 = vadd.f32 %v4241_v23, %v4225_v14  ;;  %v4242_v61 = vmul.f32 %v11403_v28, %v11401_v13  ;;  %11424 = vpow2.f32 %v9473_v3  ;;  %v9481_v30 = vmul.f32 -1.442695, %v9952_v6 }
 0x496   : > { %v11407_v58 = vpop.eup %11406  ;;  %v4088_v56 = vadd.f32 1.0, %v11405_v10  ;;  %11426 = vrcp.f32 %v4083_v38 }
 0x497   : > { %v11409_v1 = vpop.eup %11408  ;;  %v4287_v33 = vmul.f32 %v11407_v58, %v11387_v9  ;;  %v9951_v9 = vadd.f32 %v14591_v15, %v13990_v43 }
 0x498   : > { %v11411_v39 = vpop.eup %11410  ;;  %11428 = vrcp.f32 %v4088_v56  ;;  %v4090_v62 = vadd.f32 1.0, %v11409_v1 }
 0x499   : > { %v11413_v17 = vpop.eup %11412  ;;  %11430 = vtanh.f32 %v10202_v25  ;;  %v4089_v15 = vadd.f32 1.0, %v11411_v39  ;;  %v9480_v13 = vmul.f32 -1.442695, %v9951_v9  ;;  %v10206_v25 = vadd.f32 %v14588_v2, %v13999_v42 }
 0x49a   : > { %v11415_v23 = vpop.eup %11414  ;;  %11432 = vrcp.f32 %v4090_v62  ;;  %v4288_v26 = vmul.f32 %v11413_v17, %v11395_v29 }
 0x49b   : > { %v11417_v53 = vpop.eup %11416  ;;  %11434 = vrcp.f32 %v4086_v5 }
 0x49c   : > { %v11419_v50 = vpop.eup %11418  ;;  %v4226_v63 = vmul.f32 %v11417_v53, %v14342_v48  ;;  %11436 = vpow2.f32 %v9475_v55  ;;  %v4364_v20 = vpack.c.bf16 %v4288_v26, %v4287_v33  ;;  %v9478_v48 = vmul.f32 -1.442695, %v9950_v35 }
 0x49d   : > { %v11421_v57 = vpop.eup %11420  ;;  %11438 = vtanh.f32 %v14653_v16  ;;  %v4243_v47 = vmul.f32 %v11419_v50, %v11415_v23  ;;  %v10208_v23 = vadd.f32 %v14601_v37, %v13999_v42 }
 0x49e   : > { %v14667_v29 = vadd.f32 %v4242_v61, %v4226_v63  ;;  %v4091_v34 = vadd.f32 1.0, %v11421_v57  ;;  %11440 = vpow2.f32 %v9477_v19  ;;  %4432 = vmatmul.mubr.bf16.gmra.mrb[76].mxu0 %v4364_v20  ;;  %4545 = vmatmul.mubr.bf16.gmra.mrb[76].mxu1 %v4364_v20  ;;  %v11423_v46 = vpop.eup %11422  ;;  %v10205_v61 = vadd.f32 %v14578_v32, %v13992_v44 }
 0x49f   : > { %11442 = vtanh.f32 %v10204_v51  ;;  %4441 = vmatprep.mubr.bf16.mxu0 %v16055_v11  ;;  %4554 = vmatprep.mubr.bf16.mxu1 %v16055_v11  ;;  %v11425_v21 = vpop.eup %11424  ;;  %v4093_v12 = vadd.f32 1.0, %v11423_v46 }
 0x4a0   : > { %11444 = vtanh.f32 %v14667_v29  ;;  %v11427_v3 = vpop.eup %11426  ;;  %v4092_v4 = vadd.f32 1.0, %v11425_v21  ;;  %v9479_v55 = vmul.f32 -1.442695, %v10205_v61 }
 0x4a1   : > { %11446 = vrcp.f32 %v4091_v34 }
 0x4a2   : > { %v11429_v38 = vpop.eup %11428  ;;  %11448 = vrcp.f32 %v4093_v12  ;;  %v10207_v12 = vadd.f32 %v14593_v59, %v13992_v44 }
 0x4a3   : > { %v11431_v14 = vpop.eup %11430  ;;  %v4227_v28 = vmul.f32 %v11429_v38, %v14351_v40  ;;  %11450 = vpow2.f32 %v9478_v48  ;;  %v9953_v40 = vadd.f32 %v14608_v24, %v13990_v43  ;;  %v9954_v24 = vadd.f32 %v14614_v49, %v13994_v52 }
 0x4a4   : > { %v11433_v10 = vpop.eup %11432  ;;  %11452 = vrcp.f32 %v4089_v15 }
 0x4a5   : > { %v11435_v58 = vpop.eup %11434  ;;  %v14681_v56 = vadd.f32 %v4243_v47, %v4227_v28  ;;  %v4244_v41 = vmul.f32 %v11433_v10, %v11431_v14  ;;  %11454 = vpow2.f32 %v9480_v13  ;;  %v9483_v19 = vmul.f32 -1.442695, %v9953_v40 }
 0x4a6   : > { %v11437_v1 = vpop.eup %11436  ;;  %11456 = vpow2.f32 %v9476_v60  ;;  %v9484_v34 = vmul.f32 -1.442695, %v9954_v24  ;;  %v10209_v60 = vadd.f32 %v14610_v0, %v13992_v44 }
 0x4a7   : > { %v11439_v5 = vpop.eup %11438  ;;  %11458 = vrcp.f32 %v4092_v4  ;;  %v4094_v39 = vadd.f32 1.0, %v11437_v1  ;;  %v10210_v4 = vadd.f32 %v14617_v36, %v13999_v42 }
 0x4a8   : > { %v11441_v62 = vpop.eup %11440  ;;  %11460 = vtanh.f32 %v10206_v25  ;;  %v4289_v26 = vmul.f32 %v11439_v5, %v11427_v3 }
 0x4a9   : > { %v11443_v32 = vpop.eup %11442  ;;  %11462 = vrcp.f32 %v4094_v39  ;;  %v4096_v2 = vadd.f32 1.0, %v11441_v62  ;;  %v16073_v39 = vld [vmem:[#allocation7_spill] sm:$0xff] }
 0x4aa   : > { %v11445_v17 = vpop.eup %11444  ;;  %11464 = vpow2.f32 %v9481_v30 }
 0x4ab   : > { %v11447_v33 = vpop.eup %11446  ;;  %11466 = vrcp.f32 %v4096_v2  ;;  %v4290_v53 = vmul.f32 %v11445_v17, %v11435_v58  ;;  %v9485_v58 = vmul.f32 -1.442695, %v10209_v60 }
 0x4ac   : > { %v11449_v51 = vpop.eup %11448  ;;  %v4228_v35 = vmul.f32 %v11447_v33, %v14361_v45  ;;  %11468 = vpow2.f32 %v9479_v55 }
 0x4ad   : > { %v11451_v50 = vpop.eup %11450  ;;  %11470 = vtanh.f32 %v14681_v56  ;;  %v4245_v63 = vmul.f32 %v11449_v51, %v11443_v32  ;;  %v4365_v20 = vpack.c.bf16 %v4290_v53, %v4289_v26 }
 0x4ae   : > { %v11453_v57 = vpop.eup %11452  ;;  %v14691_v47 = vadd.f32 %v4244_v41, %v4228_v35  ;;  %v4097_v37 = vadd.f32 1.0, %v11451_v50  ;;  %11472 = vpow2.f32 %v9483_v19 }
 0x4af   : > { %v11455_v9 = vpop.eup %11454  ;;  %11474 = vtanh.f32 %v10208_v23  ;;  %4442 = vmatmul.mubr.bf16.gmra.mrb[80].mxu0 %v4365_v20  ;;  %4555 = vmatmul.mubr.bf16.gmra.mrb[80].mxu1 %v4365_v20 }
 0x4b0   : > { %v11457_v49 = vpop.eup %11456  ;;  %11476 = vtanh.f32 %v14691_v47  ;;  %v4099_v45 = vadd.f32 1.0, %v11455_v9  ;;  %4451 = vmatprep.mubr.bf16.mxu0 %v16055_v11  ;;  %4564 = vmatprep.mubr.bf16.mxu1 %v16055_v11 }
 0x4b1   : > { %v11459_v27 = vpop.eup %11458  ;;  %11478 = vrcp.f32 %v4097_v37  ;;  %v4095_v13 = vadd.f32 1.0, %v11457_v49 }
 0x4b2   : > { %v11461_v46 = vpop.eup %11460  ;;  %11480 = vrcp.f32 %v4099_v45 }
 0x4b3   : > { %v11463_v48 = vpop.eup %11462  ;;  %11482 = vpow2.f32 %v9484_v34 }
 0x4b4   : > { %v11465_v21 = vpop.eup %11464  ;;  %v4229_v15 = vmul.f32 %v11463_v48, %v14374_v18  ;;  %v9482_v18 = vmul.f32 -1.442695, %v10207_v12 }
 0x4b5   : > { %v11467_v3 = vpop.eup %11466  ;;  %v4100_v38 = vadd.f32 1.0, %v11465_v21 }
 0x4b6   : > { %v11469_v6 = vpop.eup %11468  ;;  %v14701_v14 = vadd.f32 %v4245_v63, %v4229_v15  ;;  %v4246_v28 = vmul.f32 %v11467_v3, %v11461_v46 }
 0x4b7   : > { %v11471_v10 = vpop.eup %11470  ;;  %11484 = vrcp.f32 %v4100_v38  ;;  %v4098_v30 = vadd.f32 1.0, %v11469_v6 }
 0x4b8   : > { %v11473_v61 = vpop.eup %11472  ;;  %11486 = vrcp.f32 %v4095_v13  ;;  %v4291_v0 = vmul.f32 %v11471_v10, %v11453_v57 }
 0x4b9   : > { %v11475_v25 = vpop.eup %11474  ;;  %v4102_v59 = vadd.f32 1.0, %v11473_v61  ;;  %11488 = vtanh.f32 %v10210_v4 }
 0x4ba   : > { %v11477_v41 = vpop.eup %11476 }
 0x4bb   : > { %v11479_v1 = vpop.eup %11478  ;;  %11490 = vrcp.f32 %v4102_v59  ;;  %v4292_v40 = vmul.f32 %v11477_v41, %v11459_v27 }
 0x4bc   : > { %v11481_v5 = vpop.eup %11480  ;;  %v4230_v62 = vmul.f32 %v11479_v1, %v16073_v39  ;;  %11492 = vpow2.f32 %v9482_v18 }
 0x4bd   : > { %v11483_v36 = vpop.eup %11482  ;;  %v4247_v55 = vmul.f32 %v11481_v5, %v11475_v25  ;;  %11494 = vpow2.f32 %v9485_v58  ;;  %v4366_v32 = vpack.c.bf16 %v4292_v40, %v4291_v0 }
 0x4be   : > { %11496 = vtanh.f32 %v14701_v14  ;;  %v14707_v2 = vadd.f32 %v4246_v28, %v4230_v62  ;;  %v4103_v17 = vadd.f32 1.0, %v11483_v36 }
 0x4bf   : > { %11498 = vrcp.f32 %v4098_v30  ;;  %4452 = vmatmul.mubr.bf16.gmra.mrb[84].mxu0 %v4366_v32  ;;  %4565 = vmatmul.mubr.bf16.gmra.mrb[84].mxu1 %v4366_v32 }
 0x4c0   : > { %11500 = vtanh.f32 %v14707_v2  ;;  %4461 = vmatprep.mubr.bf16.mxu0 %v16055_v11  ;;  %4574 = vmatprep.mubr.bf16.mxu1 %v16055_v11 }
 0x4c1   : > { %v11485_v23 = vpop.eup %11484  ;;  %11502 = vrcp.f32 %v4103_v17 }
 0x4c2   : > { %v4231_v19 = vmul.f32 %v11485_v23, %v14390_v22  ;;  %v11487_v33 = vpop.eup %11486 }
 0x4c3   : > { %v11489_v24 = vpop.eup %11488 }
 0x4c4   : > { %v14713_v26 = vadd.f32 %v4247_v55, %v4231_v19 }
 0x4c5   : > { %v11491_v53 = vpop.eup %11490 }
 0x4c6   : > { %v11493_v51 = vpop.eup %11492  ;;  %v4248_v35 = vmul.f32 %v11491_v53, %v11489_v24 }
 0x4c7   : > { %v11495_v50 = vpop.eup %11494  ;;  %v4101_v57 = vadd.f32 1.0, %v11493_v51 }
 0x4c8   : > { %v11497_v63 = vpop.eup %11496  ;;  %v4104_v34 = vadd.f32 1.0, %v11495_v50 }
 0x4c9   : > { %v11499_v20 = vpop.eup %11498  ;;  %v4293_v49 = vmul.f32 %v11497_v63, %v11487_v33  ;;  %11504 = vrcp.f32 %v4101_v57 }
 0x4ca   : > { %v11501_v37 = vpop.eup %11500  ;;  %11506 = vtanh.f32 %v14713_v26 }
 0x4cb   : > { %v11503_v9 = vpop.eup %11502  ;;  %v4294_v45 = vmul.f32 %v11501_v37, %v11499_v20  ;;  %11508 = vrcp.f32 %v4104_v34 }
 0x4cc   : > { %v4232_v27 = vmul.f32 %v11503_v9, %v14400_v8 }
 0x4cd   : > { %v4367_v22 = vpack.c.bf16 %v4294_v45, %v4293_v49 }
 0x4ce   : > { %v14717_v46 = vadd.f32 %v4248_v35, %v4232_v27 }
 0x4cf   : > { %4462 = vmatmul.mubr.bf16.gmra.mrb[88].mxu0 %v4367_v22  ;;  %4575 = vmatmul.mubr.bf16.gmra.mrb[88].mxu1 %v4367_v22 }
 0x4d0   : > { %11510 = vtanh.f32 %v14717_v46  ;;  %4471 = vmatprep.mubr.bf16.mxu0 %v16055_v11  ;;  %4584 = vmatprep.mubr.bf16.mxu1 %v16055_v11 }
 0x4d3   : > { %v11505_v48 = vpop.eup %11504 }
 0x4d4   : > { %v11507_v21 = vpop.eup %11506 }
 0x4d5   : > { %v11509_v15 = vpop.eup %11508  ;;  %v4295_v8 = vmul.f32 %v11507_v21, %v11505_v48 }
 0x4da   : > { %v11511_v12 = vpop.eup %11510 }
 0x4db   : > { %v4296_v3 = vmul.f32 %v11511_v12, %v11509_v15  ;;  %v16074_v12 = vld [vmem:[#allocation5_spill] sm:$0xff] }
 0x4dd   : > { %v4368_v13 = vpack.c.bf16 %v4296_v3, %v4295_v8 }
 0x4df   : > { %4472 = vmatmul.mubr.bf16.gmra.mrb[92].mxu0 %v4368_v13  ;;  %4585 = vmatmul.mubr.bf16.gmra.mrb[92].mxu1 %v4368_v13 }
 0x4e0   : > { %5147 = vmatprep.mubr.bf16.mxu0 %v16055_v11  ;;  %5260 = vmatprep.mubr.bf16.mxu1 %v16055_v11 }
 0x4fe   : > { %v4403_v38 = vpop.f32.mrb[64].mxu0  ;;  %v4516_v60 = vpop.f32.mrb[64].mxu1 }
 0x4ff   : > { %v9955_v6 = vadd.f32 %v4403_v38, %v13990_v43  ;;  %v4405_v28 = vpop.f32.mrb[65].mxu0  ;;  %v4518_v4 = vpop.f32.mrb[65].mxu1  ;;  %v10211_v5 = vadd.f32 %v4516_v60, %v13992_v44 }
 0x500   : > { %v9956_v10 = vadd.f32 %v4405_v28, %v13994_v52  ;;  %v4407_v61 = vpop.f32.mrb[66].mxu0  ;;  %v4520_v18 = vpop.f32.mrb[66].mxu1  ;;  %v10212_v62 = vadd.f32 %v4518_v4, %v13999_v42 }
 0x501   : > { %v9486_v25 = vmul.f32 -1.442695, %v9955_v6  ;;  %v9957_v59 = vadd.f32 %v4407_v61, %v13990_v43  ;;  %v4409_v58 = vpop.f32.mrb[67].mxu0  ;;  %v4522_v41 = vpop.f32.mrb[67].mxu1  ;;  %v10213_v39 = vadd.f32 %v4520_v18, %v13992_v44  ;;  %v9488_v36 = vmul.f32 -1.442695, %v10211_v5 }
 0x502   : > { %v9487_v1 = vmul.f32 -1.442695, %v9956_v10  ;;  %v9958_v30 = vadd.f32 %v4409_v58, %v13994_v52  ;;  %v10214_v17 = vadd.f32 %v4522_v41, %v13999_v42  ;;  %v13092_v10 = vld [vmem:[%s16029_s2] ss:$16 sps:$4 sm:$0xff]   ;;  %v13093_v61 = vld [vmem:[%s16029_s2 + $0x8] ss:$16 sps:$4 sm:$0xff]  }
 0x503   : > { %11512 = vpow2.f32 %v9486_v25  ;;  %v9489_v0 = vmul.f32 -1.442695, %v9957_v59  ;;  %v9491_v55 = vmul.f32 -1.442695, %v10213_v39  ;;  %v13094_v18 = vld [vmem:[%s16029_s2 + $0x24] ss:$16 sps:$4 sm:$0xff]  }
 0x504   : > { %v9490_v40 = vmul.f32 -1.442695, %v9958_v30  ;;  %11514 = vpow2.f32 %v9487_v1  ;;  %v13095_v25 = vld [vmem:[%s16029_s2 + $0x2c] ss:$16 sps:$4 sm:$0xff]   ;;  %v13096_v59 = vld [vmem:[%s16029_s2 + $0x20] ss:$16 sps:$4 sm:$0xff]  }
 0x505   : > { %11516 = vpow2.f32 %v9489_v0  ;;  %v13097_v58 = vld [vmem:[%s16029_s2 + $0x28] ss:$16 sps:$4 sm:$0xff]   ;;  %v13098_v41 = vld [vmem:[%s16029_s2 + $0x44] ss:$16 sps:$4 sm:$0xff]   ;;  %v13099_v1 = vld [vmem:[%s16029_s2 + $0x4c] ss:$16 sps:$4 sm:$0xff]  }
 0x506   : > { %11518 = vpow2.f32 %v9490_v40  ;;  %v13100_v30 = vld [vmem:[%s16029_s2 + $0x40] ss:$16 sps:$4 sm:$0xff]   ;;  %v13101_v0 = vld [vmem:[%s16029_s2 + $0x48] ss:$16 sps:$4 sm:$0xff]   ;;  %v13102_v40 = vld [vmem:[%s16029_s2 + $0x64] ss:$16 sps:$4 sm:$0xff]  }
 0x507   : > { %11520 = vtanh.f32 %v10212_v62  ;;  %v13103_v5 = vld [vmem:[%s16029_s2 + $0x6c] ss:$16 sps:$4 sm:$0xff]   ;;  %v13104_v39 = vld [vmem:[%s16029_s2 + $0x60] ss:$16 sps:$4 sm:$0xff]   ;;  %v13105_v62 = vld [vmem:[%s16029_s2 + $0x68] ss:$16 sps:$4 sm:$0xff]  }
 0x508   : > { %11522 = vpow2.f32 %v9488_v36  ;;  %v13106_v36 = vld [vmem:[%s16029_s2 + $0x84] ss:$16 sps:$4 sm:$0xff]  }
 0x509   : > { %11524 = vpow2.f32 %v9491_v55  ;;  %v13107_v55 = vld [vmem:[%s16029_s2 + $0x8c] ss:$16 sps:$4 sm:$0xff]  }
 0x50d   : > { %v11513_v32 = vpop.eup %11512 }
 0x50e   : > { %v4803_v23 = vadd.f32 1.0, %v11513_v32  ;;  %v11515_v19 = vpop.eup %11514  ;;  %v13108_v32 = vld [vmem:[%s16029_s2 + $0x80] ss:$16 sps:$4 sm:$0xff]  }
 0x50f   : > { %v11517_v33 = vpop.eup %11516  ;;  %v4804_v24 = vadd.f32 1.0, %v11515_v19  ;;  %v13111_v19 = vld [vmem:[%s16029_s2 + $0xac] ss:$16 sps:$4 sm:$0xff]  }
 0x510   : > { %11526 = vrcp.f32 %v4803_v23  ;;  %v4806_v53 = vadd.f32 1.0, %v11517_v33  ;;  %v11519_v51 = vpop.eup %11518  ;;  %v13110_v23 = vld [vmem:[%s16029_s2 + $0xa4] ss:$16 sps:$4 sm:$0xff]   ;;  %v13112_v33 = vld [vmem:[%s16029_s2 + $0xa0] ss:$16 sps:$4 sm:$0xff]  }
 0x511   : > { %11528 = vtanh.f32 %v10214_v17  ;;  %v4807_v35 = vadd.f32 1.0, %v11519_v51  ;;  %v11521_v50 = vpop.eup %11520  ;;  %v13109_v17 = vld [vmem:[%s16029_s2 + $0x88] ss:$16 sps:$4 sm:$0xff]   ;;  %v13115_v51 = vld [vmem:[%s16029_s2 + $0xcc] ss:$16 sps:$4 sm:$0xff]  }
 0x512   : > { %11530 = vrcp.f32 %v4804_v24  ;;  %v11523_v63 = vpop.eup %11522  ;;  %v13113_v24 = vld [vmem:[%s16029_s2 + $0xa8] ss:$16 sps:$4 sm:$0xff]  }
 0x513   : > { %11532 = vrcp.f32 %v4806_v53  ;;  %v11525_v20 = vpop.eup %11524  ;;  %v4805_v45 = vadd.f32 1.0, %v11523_v63  ;;  %v13114_v53 = vld [vmem:[%s16029_s2 + $0xc4] ss:$16 sps:$4 sm:$0xff]  }
 0x514   : > { %11534 = vrcp.f32 %v4807_v35  ;;  %v4808_v15 = vadd.f32 1.0, %v11525_v20  ;;  %v13116_v35 = vld [vmem:[%s16029_s2 + $0xc0] ss:$16 sps:$4 sm:$0xff]   ;;  %v13118_v63 = vld [vmem:[%s16029_s2 + $0xe4] ss:$16 sps:$4 sm:$0xff]  }
 0x515   : > { %11536 = vrcp.f32 %v4805_v45  ;;  %v13119_v20 = vld [vmem:[%s16029_s2 + $0xec] ss:$16 sps:$4 sm:$0xff]  }
 0x51a   : > { %v11527_v57 = vpop.eup %11526 }
 0x51b   : > { %v11529_v37 = vpop.eup %11528  ;;  %v4979_v9 = vmul.f32 %v11527_v57, %v11521_v50  ;;  %v13117_v50 = vld [vmem:[%s16029_s2 + $0xc8] ss:$16 sps:$4 sm:$0xff]  }
 0x51c   : > { %v11531_v34 = vpop.eup %11530 }
 0x51d   : > { %v11533_v49 = vpop.eup %11532  ;;  %v4963_v27 = vmul.f32 %v11531_v34, %v14428_v54 }
 0x51e   : > { %v4980_v22 = vmul.f32 %v11533_v49, %v11529_v37  ;;  %v11535_v48 = vpop.eup %11534 }
 0x51f   : > { %v14733_v21 = vadd.f32 %v4979_v9, %v4963_v27  ;;  %v4964_v8 = vmul.f32 %v11535_v48, %v16074_v12  ;;  %v11537_v13 = vpop.eup %11536  ;;  %v13120_v48 = vld [vmem:[%s16029_s2 + $0xe0] ss:$16 sps:$4 sm:$0xff]  }
 0x521   : > { %11538 = vtanh.f32 %v14733_v21  ;;  %v14737_v3 = vadd.f32 %v4980_v22, %v4964_v8 }
 0x522   : > { %11540 = vrcp.f32 %v4808_v15  ;;  %v13121_v15 = vld [vmem:[%s16029_s2 + $0xe8] ss:$16 sps:$4 sm:$0xff]  }
 0x523   : > { %11542 = vtanh.f32 %v14737_v3 }
 0x52b   : > { %v11539_v38 = vpop.eup %11538 }
 0x52c   : > { %v11541_v60 = vpop.eup %11540  ;;  %v5027_v54 = vmul.f32 %v11539_v38, %v11537_v13 }
 0x52d   : > { %v11543_v6 = vpop.eup %11542 }
 0x52e   : > { %v5028_v28 = vmul.f32 %v11543_v6, %v11541_v60  ;;  %v13122_v60 = vld [vmem:[%s16029_s2 + $0x4] ss:$16 sps:$4 sm:$0xff]   ;;  %v13123_v6 = vld [vmem:[%s16029_s2 + $0xc] ss:$16 sps:$4 sm:$0xff]  }
 0x530   : > { %v5107_v4 = vpack.c.bf16 %v5028_v28, %v5027_v54 }
 0x532   : > { %5148 = vmatmul.mubr.bf16.vlgmr.msra.gmra.mrb[96].mxu0 %v5107_v4  ;;  %5261 = vmatmul.mubr.bf16.vlgmr.msra.gmra.mrb[96].mxu1 %v5107_v4 }
 0x533   : > { %5157 = vmatprep.mubr.bf16.mxu0 %v16055_v11  ;;  %5270 = vmatprep.mubr.bf16.mxu1 %v16055_v11 }
 0x534   : > { %5862 = vmatpush1.bf16.msra.mxu0 %v13092_v10  ;;  %5975 = vmatpush1.bf16.msra.mxu1 %v13093_v61 }
 0x535   : > { %5863 = vmatprep.subr.bf16.mxu0 %v13094_v18  ;;  %5976 = vmatprep.subr.bf16.mxu1 %v13095_v25 }
 0x538   : > { %5864 = vmatpush1.bf16.msra.mxu0 %v13096_v59  ;;  %5977 = vmatpush1.bf16.msra.mxu1 %v13097_v58 }
 0x539   : > { %5865 = vmatprep.subr.bf16.mxu0 %v13098_v41  ;;  %5978 = vmatprep.subr.bf16.mxu1 %v13099_v1 }
 0x53c   : > { %5866 = vmatpush1.bf16.msra.mxu0 %v13100_v30  ;;  %5979 = vmatpush1.bf16.msra.mxu1 %v13101_v0 }
 0x53d   : > { %5867 = vmatprep.subr.bf16.mxu0 %v13102_v40  ;;  %5980 = vmatprep.subr.bf16.mxu1 %v13103_v5 }
 0x540   : > { %5868 = vmatpush1.bf16.msra.mxu0 %v13104_v39  ;;  %5981 = vmatpush1.bf16.msra.mxu1 %v13105_v62 }
 0x541   : > { %5869 = vmatprep.subr.bf16.mxu0 %v13106_v36  ;;  %5982 = vmatprep.subr.bf16.mxu1 %v13107_v55 }
 0x544   : > { %5870 = vmatpush1.bf16.msra.mxu0 %v13108_v32  ;;  %5983 = vmatpush1.bf16.msra.mxu1 %v13109_v17 }
 0x545   : > { %5871 = vmatprep.subr.bf16.mxu0 %v13110_v23  ;;  %5984 = vmatprep.subr.bf16.mxu1 %v13111_v19 }
 0x548   : > { %5872 = vmatpush1.bf16.msra.mxu0 %v13112_v33  ;;  %5985 = vmatpush1.bf16.msra.mxu1 %v13113_v24 }
 0x549   : > { %5873 = vmatprep.subr.bf16.mxu0 %v13114_v53  ;;  %5986 = vmatprep.subr.bf16.mxu1 %v13115_v51 }
 0x54c   : > { %5874 = vmatpush1.bf16.msra.mxu0 %v13116_v35  ;;  %5987 = vmatpush1.bf16.msra.mxu1 %v13117_v50 }
 0x54d   : > { %5875 = vmatprep.subr.bf16.mxu0 %v13118_v63  ;;  %5988 = vmatprep.subr.bf16.mxu1 %v13119_v20 }
 0x550   : > { %5876 = vmatpush1.bf16.msra.mxu0 %v13120_v48  ;;  %5989 = vmatpush1.bf16.msra.mxu1 %v13121_v15 }
 0x551   : > { %6607 = vmatprep.subr.bf16.mxu0 %v13122_v60  ;;  %6720 = vmatprep.subr.bf16.mxu1 %v13123_v6 }
 0x553   : > { %v4413_v57 = vpop.f32.mrb[68].mxu0  ;;  %v4526_v37 = vpop.f32.mrb[68].mxu1 }
 0x554   : > { %v9959_v9 = vadd.f32 %v4413_v57, %v13990_v43  ;;  %v4415_v34 = vpop.f32.mrb[69].mxu0  ;;  %v4528_v49 = vpop.f32.mrb[69].mxu1  ;;  %v10215_v4 = vadd.f32 %v4526_v37, %v13992_v44 }
 0x555   : > { %v9960_v45 = vadd.f32 %v4415_v34, %v13994_v52  ;;  %v4417_v27 = vpop.f32.mrb[70].mxu0  ;;  %v4530_v22 = vpop.f32.mrb[70].mxu1  ;;  %v10216_v40 = vadd.f32 %v4528_v49, %v13999_v42 }
 0x556   : > { %v9492_v12 = vmul.f32 -1.442695, %v9959_v9  ;;  %v9961_v8 = vadd.f32 %v4417_v27, %v13990_v43  ;;  %v4419_v13 = vpop.f32.mrb[71].mxu0  ;;  %v4532_v38 = vpop.f32.mrb[71].mxu1  ;;  %v10217_v18 = vadd.f32 %v4530_v22, %v13992_v44  ;;  %v9494_v25 = vmul.f32 -1.442695, %v10215_v4 }
 0x557   : > { %v9493_v54 = vmul.f32 -1.442695, %v9960_v45  ;;  %v9962_v28 = vadd.f32 %v4419_v13, %v13994_v52  ;;  %v10218_v17 = vadd.f32 %v4532_v38, %v13999_v42 }
 0x558   : > { %11544 = vpow2.f32 %v9492_v12  ;;  %v9495_v10 = vmul.f32 -1.442695, %v9961_v8  ;;  %v9497_v59 = vmul.f32 -1.442695, %v10217_v18 }
 0x559   : > { %v9496_v61 = vmul.f32 -1.442695, %v9962_v28  ;;  %11546 = vpow2.f32 %v9493_v54 }
 0x55a   : > { %11548 = vpow2.f32 %v9495_v10 }
 0x55b   : > { %11550 = vpow2.f32 %v9496_v61 }
 0x55c   : > { %11552 = vpow2.f32 %v9494_v25 }
 0x55d   : > { %11554 = vpow2.f32 %v9497_v59 }
 0x560   : > { %v4423_v58 = vpop.f32.mrb[72].mxu0  ;;  %v4536_v41 = vpop.f32.mrb[72].mxu1 }
 0x561   : > { %v9963_v1 = vadd.f32 %v4423_v58, %v13990_v43  ;;  %v4425_v30 = vpop.f32.mrb[73].mxu0  ;;  %v4538_v0 = vpop.f32.mrb[73].mxu1  ;;  %v10219_v35 = vadd.f32 %v4536_v41, %v13992_v44 }
 0x562   : > { %v4427_v5 = vpop.f32.mrb[74].mxu0  ;;  %v4540_v39 = vpop.f32.mrb[74].mxu1  ;;  %v9964_v19 = vadd.f32 %v4425_v30, %v13994_v52  ;;  %v10220_v22 = vadd.f32 %v4538_v0, %v13999_v42 }
 0x563   : > { %v9498_v62 = vmul.f32 -1.442695, %v9963_v1  ;;  %v4429_v36 = vpop.f32.mrb[75].mxu0  ;;  %v4542_v55 = vpop.f32.mrb[75].mxu1  ;;  %v9965_v24 = vadd.f32 %v4427_v5, %v13990_v43  ;;  %v9500_v34 = vmul.f32 -1.442695, %v10219_v35  ;;  %v10221_v45 = vadd.f32 %v4540_v39, %v13992_v44 }
 0x564   : > { %v11545_v32 = vpop.eup %11544  ;;  %v9966_v63 = vadd.f32 %v4429_v36, %v13994_v52  ;;  %v9499_v57 = vmul.f32 -1.442695, %v9964_v19  ;;  %v10222_v58 = vadd.f32 %v4542_v55, %v13999_v42 }
 0x565   : > { %v4809_v23 = vadd.f32 1.0, %v11545_v32  ;;  %11556 = vpow2.f32 %v9498_v62  ;;  %v11547_v33 = vpop.eup %11546  ;;  %v9501_v9 = vmul.f32 -1.442695, %v9965_v24  ;;  %v9503_v38 = vmul.f32 -1.442695, %v10221_v45  ;;  %v16076_v24 = vld [vmem:[#allocation3_spill] sm:$0xff] }
 0x566   : > { %11558 = vtanh.f32 %v10216_v40  ;;  %v11549_v53 = vpop.eup %11548  ;;  %v4810_v51 = vadd.f32 1.0, %v11547_v33  ;;  %v9502_v27 = vmul.f32 -1.442695, %v9966_v63  ;;  %v16075_v40 = vld [vmem:[#allocation6_spill] sm:$0xff] }
 0x567   : > { %11560 = vrcp.f32 %v4809_v23  ;;  %v4812_v50 = vadd.f32 1.0, %v11549_v53  ;;  %v11551_v20 = vpop.eup %11550 }
 0x568   : > { %11562 = vtanh.f32 %v10218_v17  ;;  %v4813_v37 = vadd.f32 1.0, %v11551_v20  ;;  %v11553_v49 = vpop.eup %11552 }
 0x569   : > { %11564 = vrcp.f32 %v4810_v51  ;;  %v11555_v48 = vpop.eup %11554  ;;  %v4811_v12 = vadd.f32 1.0, %v11553_v49 }
 0x56a   : > { %11566 = vrcp.f32 %v4812_v50  ;;  %v4814_v6 = vadd.f32 1.0, %v11555_v48 }
 0x56b   : > { %11568 = vrcp.f32 %v4813_v37 }
 0x56c   : > { %11570 = vpow2.f32 %v9499_v57 }
 0x56d   : > { %11572 = vpow2.f32 %v9501_v9 }
 0x56e   : > { %11574 = vpow2.f32 %v9500_v34 }
 0x56f   : > { %v11557_v15 = vpop.eup %11556  ;;  %11576 = vpow2.f32 %v9502_v27 }
 0x570   : > { %v11559_v8 = vpop.eup %11558  ;;  %v4815_v13 = vadd.f32 1.0, %v11557_v15  ;;  %11578 = vtanh.f32 %v10220_v22 }
 0x571   : > { %v11561_v60 = vpop.eup %11560  ;;  %v4433_v54 = vpop.f32.mrb[76].mxu0 }
 0x572   : > { %v4546_v28 = vpop.f32.mrb[76].mxu1  ;;  %v11563_v4 = vpop.eup %11562  ;;  %v4981_v10 = vmul.f32 %v11561_v60, %v11559_v8  ;;  %11580 = vrcp.f32 %v4815_v13  ;;  %v9967_v61 = vadd.f32 %v4433_v54, %v13990_v43 }
 0x573   : > { %v4435_v18 = vpop.f32.mrb[77].mxu0  ;;  %v4548_v25 = vpop.f32.mrb[77].mxu1  ;;  %11582 = vrcp.f32 %v4811_v12  ;;  %v10223_v62 = vadd.f32 %v4546_v28, %v13992_v44 }
 0x574   : > { %v11565_v59 = vpop.eup %11564  ;;  %v9968_v41 = vadd.f32 %v4435_v18, %v13994_v52  ;;  %v4437_v1 = vpop.f32.mrb[78].mxu0  ;;  %11584 = vpow2.f32 %v9503_v38  ;;  %v9504_v39 = vmul.f32 -1.442695, %v9967_v61  ;;  %v10224_v60 = vadd.f32 %v4548_v25, %v13999_v42 }
 0x575   : > { %v4550_v30 = vpop.f32.mrb[78].mxu1  ;;  %v11567_v0 = vpop.eup %11566  ;;  %v4965_v5 = vmul.f32 %v11565_v59, %v16075_v40  ;;  %11586 = vrcp.f32 %v4814_v6  ;;  %v9969_v51 = vadd.f32 %v4437_v1, %v13990_v43  ;;  %v9506_v63 = vmul.f32 -1.442695, %v10223_v62 }
 0x576   : > { %v4439_v36 = vpop.f32.mrb[79].mxu0  ;;  %v4552_v32 = vpop.f32.mrb[79].mxu1  ;;  %v4982_v17 = vmul.f32 %v11567_v0, %v11563_v4  ;;  %v9505_v23 = vmul.f32 -1.442695, %v9968_v41  ;;  %11588 = vpow2.f32 %v9504_v39  ;;  %v10225_v15 = vadd.f32 %v4550_v30, %v13992_v44 }
 0x577   : > { %v11569_v19 = vpop.eup %11568  ;;  %v14858_v33 = vadd.f32 %v4981_v10, %v4965_v5  ;;  %11590 = vtanh.f32 %v10222_v58  ;;  %v9970_v9 = vadd.f32 %v4439_v36, %v13994_v52  ;;  %v9507_v27 = vmul.f32 -1.442695, %v9969_v51 }
 0x578   : > { %v11571_v55 = vpop.eup %11570  ;;  %v4966_v53 = vmul.f32 %v11569_v19, %v16076_v24  ;;  %v9509_v28 = vmul.f32 -1.442695, %v10225_v15  ;;  %v10226_v5 = vadd.f32 %v4552_v32, %v13999_v42 }
 0x579   : > { %v11573_v35 = vpop.eup %11572  ;;  %11592 = vtanh.f32 %v14858_v33  ;;  %v4816_v50 = vadd.f32 1.0, %v11571_v55  ;;  %v9508_v13 = vmul.f32 -1.442695, %v9970_v9 }
 0x57a   : > { %v11575_v20 = vpop.eup %11574  ;;  %v14863_v57 = vadd.f32 %v4982_v17, %v4966_v53  ;;  %v4818_v37 = vadd.f32 1.0, %v11573_v35  ;;  %11594 = vpow2.f32 %v9505_v23  ;;  %v16077_v23 = vld [vmem:[#allocation4_spill] sm:$0xff] }
 0x57b   : > { %v11577_v34 = vpop.eup %11576  ;;  %11596 = vrcp.f32 %v4816_v50  ;;  %v4817_v48 = vadd.f32 1.0, %v11575_v20 }
 0x57c   : > { %v11579_v49 = vpop.eup %11578  ;;  %11598 = vtanh.f32 %v14863_v57  ;;  %v4819_v45 = vadd.f32 1.0, %v11577_v34  ;;  %v16078_v34 = vld [vmem:[#allocation9_spill] sm:$0xff] }
 0x57d   : > { %v11581_v22 = vpop.eup %11580  ;;  %11600 = vrcp.f32 %v4818_v37 }
 0x57e   : > { %v11583_v12 = vpop.eup %11582  ;;  %v4983_v8 = vmul.f32 %v11581_v22, %v11579_v49  ;;  %11602 = vpow2.f32 %v9506_v63 }
 0x57f   : > { %v11585_v38 = vpop.eup %11584  ;;  %11604 = vrcp.f32 %v4819_v45 }
 0x580   : > { %v11587_v6 = vpop.eup %11586  ;;  %11606 = vpow2.f32 %v9507_v27  ;;  %v4820_v10 = vadd.f32 1.0, %v11585_v38 }
 0x581   : > { %v11589_v54 = vpop.eup %11588  ;;  %11608 = vrcp.f32 %v4817_v48 }
 0x582   : > { %v11591_v4 = vpop.eup %11590  ;;  %v4821_v61 = vadd.f32 1.0, %v11589_v54  ;;  %11610 = vpow2.f32 %v9508_v13  ;;  %v4443_v59 = vpop.f32.mrb[80].mxu0 }
 0x583   : > { %v11593_v18 = vpop.eup %11592  ;;  %11612 = vtanh.f32 %v10224_v60  ;;  %v4556_v58 = vpop.f32.mrb[80].mxu1  ;;  %v9971_v1 = vadd.f32 %v4443_v59, %v13990_v43 }
 0x584   : > { %v11595_v41 = vpop.eup %11594  ;;  %11614 = vrcp.f32 %v4821_v61  ;;  %v4445_v30 = vpop.f32.mrb[81].mxu0  ;;  %v10227_v45 = vadd.f32 %v4556_v58, %v13992_v44  ;;  %v5029_v27 = vmul.f32 %v11593_v18, %v11583_v12 }
 0x585   : > { %v4558_v0 = vpop.f32.mrb[81].mxu1  ;;  %v11597_v25 = vpop.eup %11596  ;;  %v4822_v40 = vadd.f32 1.0, %v11595_v41  ;;  %11616 = vpow2.f32 %v9509_v28  ;;  %v9972_v39 = vadd.f32 %v4445_v30, %v13994_v52  ;;  %v9510_v55 = vmul.f32 -1.442695, %v9971_v1 }
 0x586   : > { %v4447_v62 = vpop.f32.mrb[82].mxu0  ;;  %v4560_v36 = vpop.f32.mrb[82].mxu1  ;;  %v4967_v19 = vmul.f32 %v11597_v25, %v16077_v23  ;;  %11618 = vrcp.f32 %v4820_v10  ;;  %v9512_v12 = vmul.f32 -1.442695, %v10227_v45  ;;  %v10228_v1 = vadd.f32 %v4558_v0, %v13999_v42 }
 0x587   : > { %v11599_v17 = vpop.eup %11598  ;;  %v4449_v24 = vpop.f32.mrb[83].mxu0  ;;  %11620 = vrcp.f32 %v4822_v40  ;;  %v9511_v35 = vmul.f32 -1.442695, %v9972_v39  ;;  %v9973_v37 = vadd.f32 %v4447_v62, %v13990_v43  ;;  %v10229_v59 = vadd.f32 %v4560_v36, %v13992_v44 }
 0x588   : > { %v14873_v53 = vpop.f32.mrb[83].mxu1  ;;  %v11601_v51 = vpop.eup %11600  ;;  %v14875_v63 = vadd.f32 %v4983_v8, %v4967_v19  ;;  %11622 = vpow2.f32 %v9510_v55  ;;  %v5030_v22 = vmul.f32 %v11599_v17, %v11587_v6  ;;  %v9974_v8 = vadd.f32 %v4449_v24, %v13994_v52 }
 0x589   : > { %v11603_v50 = vpop.eup %11602  ;;  %v4984_v20 = vmul.f32 %v11601_v51, %v11591_v4  ;;  %11624 = vtanh.f32 %v10226_v5  ;;  %v9513_v10 = vmul.f32 -1.442695, %v9973_v37  ;;  %v9515_v17 = vmul.f32 -1.442695, %v10229_v59 }
 0x58a   : > { %v11605_v32 = vpop.eup %11604  ;;  %v4823_v15 = vadd.f32 1.0, %v11603_v50  ;;  %11626 = vpow2.f32 %v9511_v35  ;;  %v5108_v54 = vpack.c.bf16 %v5030_v22, %v5029_v27  ;;  %v9514_v58 = vmul.f32 -1.442695, %v9974_v8 }
 0x58b   : > { %v11607_v9 = vpop.eup %11606  ;;  %v4968_v49 = vmul.f32 %v11605_v32, %v16078_v34  ;;  %11628 = vtanh.f32 %v14875_v63 }
 0x58c   : > { %v14880_v48 = vpop.eup %11608  ;;  %v4824_v13 = vadd.f32 1.0, %v11607_v9  ;;  %5158 = vmatmul.mubr.bf16.gmra.mrb[100].mxu0 %v5108_v54  ;;  %5271 = vmatmul.mubr.bf16.gmra.mrb[100].mxu1 %v5108_v54 }
 0x58d   : > { %v11611_v38 = vpop.eup %11610  ;;  %v14884_v60 = vadd.f32 %v4984_v20, %v4968_v49  ;;  %5167 = vmatprep.mubr.bf16.mxu0 %v16055_v11  ;;  %5280 = vmatprep.mubr.bf16.mxu1 %v16055_v11 }
 0x58e   : > { %v11613_v28 = vpop.eup %11612  ;;  %11630 = vrcp.f32 %v4824_v13  ;;  %v4825_v4 = vadd.f32 1.0, %v11611_v38 }
 0x58f   : > { %v11615_v61 = vpop.eup %11614  ;;  %11632 = vtanh.f32 %v14884_v60 }
 0x590   : > { %v11617_v6 = vpop.eup %11616  ;;  %11634 = vrcp.f32 %v4823_v15  ;;  %v4985_v18 = vmul.f32 %v11615_v61, %v11613_v28 }
 0x591   : > { %v11619_v41 = vpop.eup %11618  ;;  %11636 = vrcp.f32 %v4825_v4  ;;  %v4826_v5 = vadd.f32 1.0, %v11617_v6 }
 0x592   : > { %v11621_v30 = vpop.eup %11620  ;;  %11638 = vpow2.f32 %v9513_v10  ;;  %v4453_v36 = vpop.f32.mrb[84].mxu0 }
 0x593   : > { %v11623_v25 = vpop.eup %11622  ;;  %v4969_v40 = vmul.f32 %v11621_v30, %v14628_v31  ;;  %11640 = vpow2.f32 %v9512_v12  ;;  %v4566_v23 = vpop.f32.mrb[84].mxu1  ;;  %v9975_v55 = vadd.f32 %v4453_v36, %v13990_v43  ;;  %v10230_v31 = vadd.f32 %v14873_v53, %v13999_v42 }
 0x594   : > { %v11625_v39 = vpop.eup %11624  ;;  %v4827_v62 = vadd.f32 1.0, %v11623_v25  ;;  %11642 = vpow2.f32 %v9514_v58  ;;  %v4455_v24 = vpop.f32.mrb[85].mxu0  ;;  %v10231_v54 = vadd.f32 %v4566_v23, %v13992_v44 }
 0x595   : > { %v14892_v19 = vadd.f32 %v4985_v18, %v4969_v40  ;;  %11644 = vtanh.f32 %v10228_v1  ;;  %v4568_v0 = vpop.f32.mrb[85].mxu1  ;;  %v11627_v51 = vpop.eup %11626  ;;  %v9976_v35 = vadd.f32 %v4455_v24, %v13994_v52  ;;  %v9516_v9 = vmul.f32 -1.442695, %v9975_v55 }
 0x596   : > { %11646 = vrcp.f32 %v4827_v62  ;;  %v4457_v50 = vpop.f32.mrb[86].mxu0  ;;  %v4570_v20 = vpop.f32.mrb[86].mxu1  ;;  %v4828_v37 = vadd.f32 1.0, %v11627_v51  ;;  %v10232_v62 = vadd.f32 %v4568_v0, %v13999_v42 }
 0x597   : > { %v11629_v32 = vpop.eup %11628  ;;  %11648 = vrcp.f32 %v4826_v5  ;;  %v9977_v34 = vadd.f32 %v4457_v50, %v13990_v43  ;;  %v4459_v49 = vpop.f32.mrb[87].mxu0  ;;  %v9517_v22 = vmul.f32 -1.442695, %v9976_v35  ;;  %v10233_v30 = vadd.f32 %v4570_v20, %v13992_v44 }
 0x598   : > { %v4572_v45 = vpop.f32.mrb[87].mxu1  ;;  %v11631_v27 = vpop.eup %11630  ;;  %11650 = vpow2.f32 %v9515_v17  ;;  %v5031_v28 = vmul.f32 %v11629_v32, %v14880_v48  ;;  %v9978_v12 = vadd.f32 %v4459_v49, %v13994_v52 }
 0x599   : > { %v11633_v15 = vpop.eup %11632  ;;  %v4986_v13 = vmul.f32 %v11631_v27, %v11625_v39  ;;  %11652 = vrcp.f32 %v4828_v37  ;;  %v9519_v53 = vmul.f32 -1.442695, %v9977_v34  ;;  %v9521_v36 = vmul.f32 -1.442695, %v10233_v30 }
 0x59a   : > { %v14899_v8 = vpop.eup %11634  ;;  %11654 = vpow2.f32 %v9516_v9  ;;  %v5032_v4 = vmul.f32 %v11633_v15, %v11619_v41  ;;  %v9518_v41 = vmul.f32 -1.442695, %v10231_v54  ;;  %v9520_v40 = vmul.f32 -1.442695, %v9978_v12 }
 0x59b   : > { %v11637_v38 = vpop.eup %11636  ;;  %11656 = vtanh.f32 %v10230_v31  ;;  %v10234_v20 = vadd.f32 %v4572_v45, %v13999_v42 }
 0x59c   : > { %v11639_v10 = vpop.eup %11638  ;;  %v4970_v61 = vmul.f32 %v11637_v38, %v14641_v7  ;;  %11658 = vpow2.f32 %v9517_v22  ;;  %v5109_v59 = vpack.c.bf16 %v5032_v4, %v5031_v28 }
 0x59d   : > { %v11641_v6 = vpop.eup %11640  ;;  %11660 = vtanh.f32 %v14892_v19  ;;  %v4830_v18 = vadd.f32 1.0, %v11639_v10 }
 0x59e   : > { %v11643_v58 = vpop.eup %11642  ;;  %v14906_v1 = vadd.f32 %v4986_v13, %v4970_v61  ;;  %11662 = vpow2.f32 %v9519_v53  ;;  %5168 = vmatmul.mubr.bf16.gmra.mrb[104].mxu0 %v5109_v59  ;;  %5281 = vmatmul.mubr.bf16.gmra.mrb[104].mxu1 %v5109_v59  ;;  %v4829_v28 = vadd.f32 1.0, %v11641_v6 }
 0x59f   : > { %v11645_v25 = vpop.eup %11644  ;;  %11664 = vrcp.f32 %v4830_v18  ;;  %v4831_v48 = vadd.f32 1.0, %v11643_v58  ;;  %5177 = vmatprep.mubr.bf16.mxu0 %v16055_v11  ;;  %5290 = vmatprep.mubr.bf16.mxu1 %v16055_v11 }
 0x5a0   : > { %v11647_v7 = vpop.eup %11646  ;;  %11666 = vtanh.f32 %v14906_v1 }
 0x5a1   : > { %v11649_v5 = vpop.eup %11648  ;;  %v4987_v39 = vmul.f32 %v11647_v7, %v11645_v25  ;;  %11668 = vrcp.f32 %v4831_v48 }
 0x5a2   : > { %v11651_v17 = vpop.eup %11650  ;;  %11670 = vpow2.f32 %v9518_v41  ;;  %v4463_v51 = vpop.f32.mrb[88].mxu0 }
 0x5a3   : > { %v11653_v23 = vpop.eup %11652  ;;  %11672 = vpow2.f32 %v9520_v40  ;;  %v4576_v31 = vpop.f32.mrb[88].mxu1  ;;  %v9979_v32 = vadd.f32 %v4463_v51, %v13990_v43  ;;  %v4832_v25 = vadd.f32 1.0, %v11651_v17 }
 0x5a4   : > { %v11655_v55 = vpop.eup %11654  ;;  %v4971_v24 = vmul.f32 %v11653_v23, %v14653_v16  ;;  %11674 = vtanh.f32 %v10232_v62  ;;  %v4465_v37 = vpop.f32.mrb[89].mxu0 }
 0x5a5   : > { %v11657_v35 = vpop.eup %11656  ;;  %v4833_v50 = vadd.f32 1.0, %v11655_v55  ;;  %v4578_v0 = vpop.f32.mrb[89].mxu1  ;;  %11676 = vpow2.f32 %v9521_v36  ;;  %v9980_v49 = vadd.f32 %v4465_v37, %v13994_v52  ;;  %v9522_v38 = vmul.f32 -1.442695, %v9979_v32 }
 0x5a6   : > { %v11659_v9 = vpop.eup %11658  ;;  %v14916_v34 = vadd.f32 %v4987_v39, %v4971_v24  ;;  %v4467_v27 = vpop.f32.mrb[90].mxu0  ;;  %v10235_v39 = vadd.f32 %v4576_v31, %v13992_v44 }
 0x5a7   : > { %v4580_v16 = vpop.f32.mrb[90].mxu1  ;;  %v11661_v22 = vpop.eup %11660  ;;  %11678 = vrcp.f32 %v4833_v50  ;;  %v4834_v15 = vadd.f32 1.0, %v11659_v9  ;;  %v9523_v12 = vmul.f32 -1.442695, %v9980_v49  ;;  %v9981_v18 = vadd.f32 %v4467_v27, %v13990_v43 }
 0x5a8   : > { %v4469_v13 = vpop.f32.mrb[91].mxu0  ;;  %v11663_v53 = vpop.eup %11662  ;;  %11680 = vtanh.f32 %v10234_v20  ;;  %v5033_v59 = vmul.f32 %v11661_v22, %v14899_v8  ;;  %v10237_v55 = vadd.f32 %v4580_v16, %v13992_v44  ;;  %v9524_v31 = vmul.f32 -1.442695, %v10235_v39 }
 0x5a9   : > { %v4582_v54 = vpop.f32.mrb[91].mxu1  ;;  %v11665_v45 = vpop.eup %11664  ;;  %v4836_v4 = vadd.f32 1.0, %v11663_v53  ;;  %11682 = vrcp.f32 %v4834_v15  ;;  %v9982_v6 = vadd.f32 %v4469_v13, %v13994_v52  ;;  %v10236_v50 = vadd.f32 %v4578_v0, %v13999_v42 }
 0x5aa   : > { %v11667_v10 = vpop.eup %11666  ;;  %v4988_v61 = vmul.f32 %v11665_v45, %v11657_v35  ;;  %v9527_v22 = vmul.f32 -1.442695, %v10237_v55  ;;  %v10238_v0 = vadd.f32 %v4582_v54, %v13999_v42 }
 0x5ab   : > { %11684 = vrcp.f32 %v4836_v4  ;;  %v5034_v58 = vmul.f32 %v11667_v10, %v11649_v5  ;;  %v11669_v30 = vpop.eup %11668  ;;  %v9525_v5 = vmul.f32 -1.442695, %v9981_v18  ;;  %v9526_v24 = vmul.f32 -1.442695, %v9982_v6 }
 0x5ac   : > { %11686 = vpow2.f32 %v9522_v38  ;;  %v11671_v48 = vpop.eup %11670  ;;  %v4972_v41 = vmul.f32 %v11669_v30, %v14667_v29 }
 0x5ad   : > { %11688 = vrcp.f32 %v4829_v28  ;;  %v5110_v7 = vpack.c.bf16 %v5034_v58, %v5033_v59  ;;  %v11673_v40 = vpop.eup %11672  ;;  %v4835_v23 = vadd.f32 1.0, %v11671_v48 }
 0x5ae   : > { %11690 = vpow2.f32 %v9523_v12  ;;  %v11675_v62 = vpop.eup %11674  ;;  %v14925_v36 = vadd.f32 %v4988_v61, %v4972_v41  ;;  %v4837_v8 = vadd.f32 1.0, %v11673_v40 }
 0x5af   : > { %11692 = vtanh.f32 %v14916_v34  ;;  %5178 = vmatmul.mubr.bf16.gmra.mrb[108].mxu0 %v5110_v7  ;;  %5291 = vmatmul.mubr.bf16.gmra.mrb[108].mxu1 %v5110_v7  ;;  %v11677_v17 = vpop.eup %11676 }
 0x5b0   : > { %11694 = vrcp.f32 %v4832_v25  ;;  %5187 = vmatprep.mubr.bf16.mxu0 %v16055_v11  ;;  %5300 = vmatprep.mubr.bf16.mxu1 %v16055_v11  ;;  %v4838_v32 = vadd.f32 1.0, %v11677_v17 }
 0x5b1   : > { %v11679_v29 = vpop.eup %11678  ;;  %11696 = vtanh.f32 %v14925_v36 }
 0x5b2   : > { %v4989_v51 = vmul.f32 %v11679_v29, %v11675_v62  ;;  %11698 = vrcp.f32 %v4837_v8  ;;  %v11681_v35 = vpop.eup %11680  ;;  %v4473_v37 = vpop.f32.mrb[92].mxu0 }
 0x5b3   : > { %11700 = vpow2.f32 %v9525_v5  ;;  %v11683_v20 = vpop.eup %11682  ;;  %v4586_v9 = vpop.f32.mrb[92].mxu1  ;;  %v9983_v16 = vadd.f32 %v4473_v37, %v13990_v43 }
 0x5b4   : > { %11702 = vrcp.f32 %v4835_v23  ;;  %v4973_v27 = vmul.f32 %v11683_v20, %v14681_v56  ;;  %v4475_v15 = vpop.f32.mrb[93].mxu0  ;;  %v4588_v13 = vpop.f32.mrb[93].mxu1  ;;  %v10239_v37 = vadd.f32 %v4586_v9, %v13992_v44 }
 0x5b5   : > { %v11685_v49 = vpop.eup %11684  ;;  %11704 = vpow2.f32 %v9526_v24  ;;  %v4477_v45 = vpop.f32.mrb[94].mxu0  ;;  %v9984_v56 = vadd.f32 %v4475_v15, %v13994_v52  ;;  %v9528_v25 = vmul.f32 -1.442695, %v9983_v16 }
 0x5b6   : > { %v11687_v53 = vpop.eup %11686  ;;  %v4990_v38 = vmul.f32 %v11685_v49, %v11681_v35  ;;  %11706 = vpow2.f32 %v9524_v31  ;;  %v4590_v28 = vpop.f32.mrb[94].mxu1  ;;  %v14935_v10 = vadd.f32 %v4989_v51, %v4973_v27  ;;  %v9985_v7 = vadd.f32 %v4477_v45, %v13990_v43 }
 0x5b7   : > { %v11689_v4 = vpop.eup %11688  ;;  %v4839_v61 = vadd.f32 1.0, %v11687_v53  ;;  %11708 = vtanh.f32 %v10236_v50  ;;  %v4479_v12 = vpop.f32.mrb[95].mxu0  ;;  %v9529_v41 = vmul.f32 -1.442695, %v9984_v56  ;;  %v10240_v27 = vadd.f32 %v4588_v13, %v13999_v42 }
 0x5b8   : > { %v11691_v18 = vpop.eup %11690  ;;  %11710 = vrcp.f32 %v4838_v32  ;;  %v14938_v59 = vpop.f32.mrb[95].mxu1  ;;  %v9986_v23 = vadd.f32 %v4479_v12, %v13994_v52  ;;  %v9531_v35 = vmul.f32 -1.442695, %v9985_v7 }
 0x5b9   : > { %v11693_v58 = vpop.eup %11692  ;;  %v4840_v30 = vadd.f32 1.0, %v11691_v18  ;;  %11712 = vpow2.f32 %v9527_v22 }
 0x5ba   : > { %v11695_v48 = vpop.eup %11694  ;;  %11714 = vrcp.f32 %v4839_v61  ;;  %v5035_v40 = vmul.f32 %v11693_v58, %v11689_v4  ;;  %v9532_v20 = vmul.f32 -1.442695, %v9986_v23  ;;  %v9530_v4 = vmul.f32 -1.442695, %v10239_v37 }
 0x5bb   : > { %v11697_v54 = vpop.eup %11696  ;;  %11716 = vtanh.f32 %v10238_v0 }
 0x5bc   : > { %v11699_v6 = vpop.eup %11698  ;;  %11718 = vrcp.f32 %v4840_v30  ;;  %v5036_v39 = vmul.f32 %v11697_v54, %v11695_v48 }
 0x5bd   : > { %v11701_v62 = vpop.eup %11700  ;;  %v4974_v8 = vmul.f32 %v11699_v6, %v14691_v47  ;;  %11720 = vpow2.f32 %v9528_v25 }
 0x5be   : > { %v11703_v5 = vpop.eup %11702  ;;  %11722 = vtanh.f32 %v14935_v10  ;;  %v4842_v17 = vadd.f32 1.0, %v11701_v62  ;;  %v5111_v29 = vpack.c.bf16 %v5036_v39, %v5035_v40 }
 0x5bf   : > { %v11705_v55 = vpop.eup %11704  ;;  %v14944_v24 = vadd.f32 %v4990_v38, %v4974_v8  ;;  %11724 = vpow2.f32 %v9529_v41  ;;  %v10241_v38 = vadd.f32 %v4590_v28, %v13992_v44  ;;  %v10242_v28 = vadd.f32 %v14938_v59, %v13999_v42 }
 0x5c0   : > { %v11707_v51 = vpop.eup %11706  ;;  %11726 = vrcp.f32 %v4842_v17  ;;  %v4843_v31 = vadd.f32 1.0, %v11705_v55  ;;  %5188 = vmatmul.mubr.bf16.gmra.mrb[112].mxu0 %v5111_v29  ;;  %5301 = vmatmul.mubr.bf16.gmra.mrb[112].mxu1 %v5111_v29 }
 0x5c1   : > { %v11709_v50 = vpop.eup %11708  ;;  %11728 = vtanh.f32 %v14944_v24  ;;  %5197 = vmatprep.mubr.bf16.mxu0 %v16055_v11  ;;  %5310 = vmatprep.mubr.bf16.mxu1 %v16055_v11  ;;  %v4841_v16 = vadd.f32 1.0, %v11707_v51  ;;  %v9533_v30 = vmul.f32 -1.442695, %v10241_v38 }
 0x5c2   : > { %v11711_v47 = vpop.eup %11710  ;;  %11730 = vrcp.f32 %v4843_v31 }
 0x5c3   : > { %v11713_v32 = vpop.eup %11712  ;;  %11732 = vpow2.f32 %v9531_v35 }
 0x5c4   : > { %v11715_v49 = vpop.eup %11714  ;;  %11734 = vpow2.f32 %v9532_v20  ;;  %v4844_v56 = vadd.f32 1.0, %v11713_v32 }
 0x5c5   : > { %v11717_v22 = vpop.eup %11716  ;;  %v4991_v15 = vmul.f32 %v11715_v49, %v11709_v50  ;;  %11736 = vtanh.f32 %v10240_v27 }
 0x5c6   : > { %v11719_v53 = vpop.eup %11718  ;;  %11738 = vrcp.f32 %v4841_v16 }
 0x5c7   : > { %v11721_v0 = vpop.eup %11720  ;;  %v4975_v45 = vmul.f32 %v11719_v53, %v14701_v14 }
 0x5c8   : > { %v11723_v61 = vpop.eup %11722  ;;  %v4845_v12 = vadd.f32 1.0, %v11721_v0 }
 0x5c9   : > { %v11725_v9 = vpop.eup %11724  ;;  %v14953_v18 = vadd.f32 %v4991_v15, %v4975_v45  ;;  %v5037_v14 = vmul.f32 %v11723_v61, %v11703_v5 }
 0x5ca   : > { %v11727_v13 = vpop.eup %11726  ;;  %11740 = vrcp.f32 %v4845_v12  ;;  %v4846_v58 = vadd.f32 1.0, %v11725_v9 }
 0x5cb   : > { %v11729_v25 = vpop.eup %11728  ;;  %v4992_v48 = vmul.f32 %v11727_v13, %v11717_v22  ;;  %11742 = vpow2.f32 %v9530_v4 }
 0x5cc   : > { %11744 = vrcp.f32 %v4844_v56  ;;  %v5038_v54 = vmul.f32 %v11729_v25, %v11711_v47  ;;  %v11731_v41 = vpop.eup %11730 }
 0x5cd   : > { %11746 = vrcp.f32 %v4846_v58  ;;  %v11733_v6 = vpop.eup %11732  ;;  %v4976_v7 = vmul.f32 %v11731_v41, %v14707_v2 }
 0x5ce   : > { %11748 = vpow2.f32 %v9533_v30  ;;  %v5112_v40 = vpack.c.bf16 %v5038_v54, %v5037_v14  ;;  %v4848_v39 = vadd.f32 1.0, %v11733_v6  ;;  %v11735_v62 = vpop.eup %11734 }
 0x5cf   : > { %11750 = vtanh.f32 %v10242_v28  ;;  %v14959_v8 = vadd.f32 %v4992_v48, %v4976_v7  ;;  %v4849_v59 = vadd.f32 1.0, %v11735_v62  ;;  %v11737_v5 = vpop.eup %11736 }
 0x5d0   : > { %11752 = vtanh.f32 %v14953_v18  ;;  %5198 = vmatmul.mubr.bf16.gmra.mrb[116].mxu0 %v5112_v40  ;;  %5311 = vmatmul.mubr.bf16.gmra.mrb[116].mxu1 %v5112_v40  ;;  %v11739_v2 = vpop.eup %11738 }
 0x5d1   : > { %11754 = vrcp.f32 %v4848_v39  ;;  %5207 = vmatprep.mubr.bf16.mxu0 %v16055_v11  ;;  %5320 = vmatprep.mubr.bf16.mxu1 %v16055_v11 }
 0x5d2   : > { %11756 = vtanh.f32 %v14959_v8 }
 0x5d3   : > { %11758 = vrcp.f32 %v4849_v59 }
 0x5d4   : > { %v11741_v17 = vpop.eup %11740 }
 0x5d5   : > { %v11743_v23 = vpop.eup %11742  ;;  %v4993_v29 = vmul.f32 %v11741_v17, %v11737_v5 }
 0x5d6   : > { %v11745_v55 = vpop.eup %11744  ;;  %v4847_v49 = vadd.f32 1.0, %v11743_v23 }
 0x5d7   : > { %v11747_v51 = vpop.eup %11746 }
 0x5d8   : > { %v11749_v31 = vpop.eup %11748  ;;  %v4977_v35 = vmul.f32 %v11747_v51, %v14713_v26  ;;  %11760 = vrcp.f32 %v4847_v49 }
 0x5d9   : > { %v11751_v50 = vpop.eup %11750  ;;  %v4850_v53 = vadd.f32 1.0, %v11749_v31 }
 0x5da   : > { %v11753_v47 = vpop.eup %11752  ;;  %v14965_v20 = vadd.f32 %v4993_v29, %v4977_v35 }
 0x5db   : > { %v11755_v32 = vpop.eup %11754  ;;  %v5039_v22 = vmul.f32 %v11753_v47, %v11739_v2 }
 0x5dc   : > { %v11757_v37 = vpop.eup %11756  ;;  %v4994_v27 = vmul.f32 %v11755_v32, %v11751_v50  ;;  %11762 = vtanh.f32 %v14965_v20 }
 0x5dd   : > { %v5040_v16 = vmul.f32 %v11757_v37, %v11745_v55  ;;  %v11759_v15 = vpop.eup %11758  ;;  %11764 = vrcp.f32 %v4850_v53 }
 0x5de   : > { %v4978_v38 = vmul.f32 %v11759_v15, %v14717_v46 }
 0x5df   : > { %v5113_v0 = vpack.c.bf16 %v5040_v16, %v5039_v22 }
 0x5e0   : > { %v14969_v45 = vadd.f32 %v4994_v27, %v4978_v38 }
 0x5e1   : > { %5208 = vmatmul.mubr.bf16.gmra.mrb[120].mxu0 %v5113_v0  ;;  %5321 = vmatmul.mubr.bf16.gmra.mrb[120].mxu1 %v5113_v0 }
 0x5e2   : > { %5217 = vmatprep.mubr.bf16.mxu0 %v16055_v11  ;;  %5330 = vmatprep.mubr.bf16.mxu1 %v16055_v11  ;;  %11766 = vtanh.f32 %v14969_v45  ;;  %v11761_v26 = vpop.eup %11760 }
 0x5e6   : > { %v11763_v4 = vpop.eup %11762 }
 0x5e7   : > { %v11765_v61 = vpop.eup %11764  ;;  %v5041_v46 = vmul.f32 %v11763_v4, %v11761_v26 }
 0x5ec   : > { %v11767_v56 = vpop.eup %11766 }
 0x5ed   : > { %v5042_v12 = vmul.f32 %v11767_v56, %v11765_v61 }
 0x5ef   : > { %v5114_v9 = vpack.c.bf16 %v5042_v12, %v5041_v46 }
 0x5f1   : > { %5218 = vmatmul.mubr.bf16.gmra.mrb[124].mxu0 %v5114_v9  ;;  %5331 = vmatmul.mubr.bf16.gmra.mrb[124].mxu1 %v5114_v9 }
 0x5f2   : > { %5893 = vmatprep.mubr.bf16.mxu0 %v16055_v11  ;;  %6006 = vmatprep.mubr.bf16.mxu1 %v16055_v11 }
 0x605   : > { %v5149_v13 = vpop.f32.mrb[96].mxu0  ;;  %v5262_v58 = vpop.f32.mrb[96].mxu1 }
 0x606   : > { %v9987_v30 = vadd.f32 %v5149_v13, %v13990_v43  ;;  %v5151_v25 = vpop.f32.mrb[97].mxu0  ;;  %v5264_v48 = vpop.f32.mrb[97].mxu1  ;;  %v10243_v2 = vadd.f32 %v5262_v58, %v13992_v44 }
 0x607   : > { %v9988_v28 = vadd.f32 %v5151_v25, %v13994_v52  ;;  %v5153_v14 = vpop.f32.mrb[98].mxu0  ;;  %v5266_v54 = vpop.f32.mrb[98].mxu1  ;;  %v10244_v23 = vadd.f32 %v5264_v48, %v13999_v42 }
 0x608   : > { %v9534_v41 = vmul.f32 -1.442695, %v9987_v30  ;;  %v9989_v6 = vadd.f32 %v5153_v14, %v13990_v43  ;;  %v5155_v7 = vpop.f32.mrb[99].mxu0  ;;  %v5268_v40 = vpop.f32.mrb[99].mxu1  ;;  %v10245_v17 = vadd.f32 %v5266_v54, %v13992_v44  ;;  %v9536_v29 = vmul.f32 -1.442695, %v10243_v2 }
 0x609   : > { %v9535_v39 = vmul.f32 -1.442695, %v9988_v28  ;;  %v9990_v62 = vadd.f32 %v5155_v7, %v13994_v52  ;;  %v10246_v31 = vadd.f32 %v5268_v40, %v13999_v42  ;;  %v13126_v7 = vld [vmem:[%s16029_s2 + $0x24] ss:$16 sps:$4 sm:$0xff]   ;;  %v13127_v40 = vld [vmem:[%s16029_s2 + $0x2c] ss:$16 sps:$4 sm:$0xff]  }
 0x60a   : > { %11768 = vpow2.f32 %v9534_v41  ;;  %v9537_v59 = vmul.f32 -1.442695, %v9989_v6  ;;  %v9539_v55 = vmul.f32 -1.442695, %v10245_v17  ;;  %v13125_v6 = vld [vmem:[%s16029_s2 + $0x8] ss:$16 sps:$4 sm:$0xff]  }
 0x60b   : > { %v9538_v5 = vmul.f32 -1.442695, %v9990_v62  ;;  %11770 = vpow2.f32 %v9535_v39  ;;  %v13128_v39 = vld [vmem:[%s16029_s2 + $0x20] ss:$16 sps:$4 sm:$0xff]   ;;  %v13129_v62 = vld [vmem:[%s16029_s2 + $0x28] ss:$16 sps:$4 sm:$0xff]  }
 0x60c   : > { %11772 = vpow2.f32 %v9537_v59  ;;  %v13130_v59 = vld [vmem:[%s16029_s2 + $0x44] ss:$16 sps:$4 sm:$0xff]   ;;  %v13132_v2 = vld [vmem:[%s16029_s2 + $0x40] ss:$16 sps:$4 sm:$0xff]   ;;  %v13133_v17 = vld [vmem:[%s16029_s2 + $0x48] ss:$16 sps:$4 sm:$0xff]  }
 0x60d   : > { %11774 = vpow2.f32 %v9538_v5  ;;  %v13131_v5 = vld [vmem:[%s16029_s2 + $0x4c] ss:$16 sps:$4 sm:$0xff]  }
 0x60e   : > { %11776 = vtanh.f32 %v10244_v23  ;;  %v13134_v23 = vld [vmem:[%s16029_s2 + $0x64] ss:$16 sps:$4 sm:$0xff]  }
 0x60f   : > { %11778 = vpow2.f32 %v9536_v29  ;;  %v13135_v29 = vld [vmem:[%s16029_s2 + $0x6c] ss:$16 sps:$4 sm:$0xff]  }
 0x610   : > { %11780 = vpow2.f32 %v9539_v55  ;;  %v13136_v55 = vld [vmem:[%s16029_s2 + $0x60] ss:$16 sps:$4 sm:$0xff]  }
 0x614   : > { %v11769_v51 = vpop.eup %11768 }
 0x615   : > { %v5549_v35 = vadd.f32 1.0, %v11769_v51  ;;  %v11771_v50 = vpop.eup %11770  ;;  %v13137_v51 = vld [vmem:[%s16029_s2 + $0x68] ss:$16 sps:$4 sm:$0xff]  }
 0x616   : > { %v11773_v47 = vpop.eup %11772  ;;  %v5550_v32 = vadd.f32 1.0, %v11771_v50  ;;  %v13140_v50 = vld [vmem:[%s16029_s2 + $0x80] ss:$16 sps:$4 sm:$0xff]  }
 0x617   : > { %11782 = vrcp.f32 %v5549_v35  ;;  %v5552_v37 = vadd.f32 1.0, %v11773_v47  ;;  %v11775_v49 = vpop.eup %11774  ;;  %v13139_v35 = vld [vmem:[%s16029_s2 + $0x8c] ss:$16 sps:$4 sm:$0xff]   ;;  %v13141_v47 = vld [vmem:[%s16029_s2 + $0x88] ss:$16 sps:$4 sm:$0xff]  }
 0x618   : > { %11784 = vtanh.f32 %v10246_v31  ;;  %v5553_v27 = vadd.f32 1.0, %v11775_v49  ;;  %v11777_v22 = vpop.eup %11776  ;;  %v13138_v31 = vld [vmem:[%s16029_s2 + $0x84] ss:$16 sps:$4 sm:$0xff]   ;;  %v13144_v49 = vld [vmem:[%s16029_s2 + $0xa0] ss:$16 sps:$4 sm:$0xff]  }
 0x619   : > { %11786 = vrcp.f32 %v5550_v32  ;;  %v11779_v16 = vpop.eup %11778  ;;  %v13142_v32 = vld [vmem:[%s16029_s2 + $0xa4] ss:$16 sps:$4 sm:$0xff]  }
 0x61a   : > { %11788 = vrcp.f32 %v5552_v37  ;;  %v11781_v15 = vpop.eup %11780  ;;  %v5551_v61 = vadd.f32 1.0, %v11779_v16  ;;  %v13143_v37 = vld [vmem:[%s16029_s2 + $0xac] ss:$16 sps:$4 sm:$0xff]  }
 0x61b   : > { %11790 = vrcp.f32 %v5553_v27  ;;  %v5554_v13 = vadd.f32 1.0, %v11781_v15  ;;  %v13145_v27 = vld [vmem:[%s16029_s2 + $0xa8] ss:$16 sps:$4 sm:$0xff]   ;;  %v13147_v16 = vld [vmem:[%s16029_s2 + $0xcc] ss:$16 sps:$4 sm:$0xff]  }
 0x61c   : > { %11792 = vrcp.f32 %v5551_v61  ;;  %v13148_v15 = vld [vmem:[%s16029_s2 + $0xc0] ss:$16 sps:$4 sm:$0xff]  }
 0x621   : > { %v11783_v53 = vpop.eup %11782 }
 0x622   : > { %v11785_v38 = vpop.eup %11784  ;;  %v5725_v0 = vmul.f32 %v11783_v53, %v11777_v22  ;;  %v13146_v22 = vld [vmem:[%s16029_s2 + $0xc4] ss:$16 sps:$4 sm:$0xff]   ;;  %v13149_v53 = vld [vmem:[%s16029_s2 + $0xc8] ss:$16 sps:$4 sm:$0xff]  }
 0x623   : > { %v11787_v26 = vpop.eup %11786 }
 0x624   : > { %v11789_v4 = vpop.eup %11788  ;;  %v5709_v56 = vmul.f32 %v11787_v26, %v14733_v21  ;;  %v13152_v26 = vld [vmem:[%s16029_s2 + $0xe0] ss:$16 sps:$4 sm:$0xff]  }
 0x625   : > { %v5726_v46 = vmul.f32 %v11789_v4, %v11785_v38  ;;  %v11791_v12 = vpop.eup %11790  ;;  %v13150_v38 = vld [vmem:[%s16029_s2 + $0xe4] ss:$16 sps:$4 sm:$0xff]   ;;  %v13153_v4 = vld [vmem:[%s16029_s2 + $0xe8] ss:$16 sps:$4 sm:$0xff]  }
 0x626   : > { %v14985_v9 = vadd.f32 %v5725_v0, %v5709_v56  ;;  %v5710_v58 = vmul.f32 %v11791_v12, %v14737_v3  ;;  %v11793_v25 = vpop.eup %11792  ;;  %v13124_v3 = vld [vmem:[%s16029_s2] ss:$16 sps:$4 sm:$0xff]   ;;  %v13151_v0 = vld [vmem:[%s16029_s2 + $0xec] ss:$16 sps:$4 sm:$0xff]  }
 0x627   : > { %v13155_v12 = vld [vmem:[%s16029_s2 + $0xc] ss:$16 sps:$4 sm:$0xff]  }
 0x628   : > { %11794 = vtanh.f32 %v14985_v9  ;;  %v14989_v30 = vadd.f32 %v5726_v46, %v5710_v58  ;;  %v13154_v46 = vld [vmem:[%s16029_s2 + $0x4] ss:$16 sps:$4 sm:$0xff]  }
 0x629   : > { %11796 = vrcp.f32 %v5554_v13 }
 0x62a   : > { %11798 = vtanh.f32 %v14989_v30 }
 0x632   : > { %v11795_v48 = vpop.eup %11794 }
 0x633   : > { %v11797_v28 = vpop.eup %11796  ;;  %v5773_v21 = vmul.f32 %v11795_v48, %v11793_v25 }
 0x634   : > { %v11799_v14 = vpop.eup %11798 }
 0x635   : > { %v5774_v54 = vmul.f32 %v11799_v14, %v11797_v28 }
 0x637   : > { %v5853_v41 = vpack.c.bf16 %v5774_v54, %v5773_v21 }
 0x639   : > { %5894 = vmatmul.mubr.bf16.vlgmr.msra.gmra.mrb[128].mxu0 %v5853_v41  ;;  %6007 = vmatmul.mubr.bf16.vlgmr.msra.gmra.mrb[128].mxu1 %v5853_v41 }
 0x63a   : > { %5903 = vmatprep.mubr.bf16.mxu0 %v16055_v11  ;;  %6016 = vmatprep.mubr.bf16.mxu1 %v16055_v11 }
 0x63b   : > { %6608 = vmatpush1.bf16.msra.mxu0 %v13124_v3  ;;  %6721 = vmatpush1.bf16.msra.mxu1 %v13125_v6 }
 0x63c   : > { %6609 = vmatprep.subr.bf16.mxu0 %v13126_v7  ;;  %6722 = vmatprep.subr.bf16.mxu1 %v13127_v40 }
 0x63f   : > { %6610 = vmatpush1.bf16.msra.mxu0 %v13128_v39  ;;  %6723 = vmatpush1.bf16.msra.mxu1 %v13129_v62 }
 0x640   : > { %6611 = vmatprep.subr.bf16.mxu0 %v13130_v59  ;;  %6724 = vmatprep.subr.bf16.mxu1 %v13131_v5 }
 0x643   : > { %6612 = vmatpush1.bf16.msra.mxu0 %v13132_v2  ;;  %6725 = vmatpush1.bf16.msra.mxu1 %v13133_v17 }
 0x644   : > { %6613 = vmatprep.subr.bf16.mxu0 %v13134_v23  ;;  %6726 = vmatprep.subr.bf16.mxu1 %v13135_v29 }
 0x647   : > { %6614 = vmatpush1.bf16.msra.mxu0 %v13136_v55  ;;  %6727 = vmatpush1.bf16.msra.mxu1 %v13137_v51 }
 0x648   : > { %6615 = vmatprep.subr.bf16.mxu0 %v13138_v31  ;;  %6728 = vmatprep.subr.bf16.mxu1 %v13139_v35 }
 0x64b   : > { %6616 = vmatpush1.bf16.msra.mxu0 %v13140_v50  ;;  %6729 = vmatpush1.bf16.msra.mxu1 %v13141_v47 }
 0x64c   : > { %6617 = vmatprep.subr.bf16.mxu0 %v13142_v32  ;;  %6730 = vmatprep.subr.bf16.mxu1 %v13143_v37 }
 0x64f   : > { %6618 = vmatpush1.bf16.msra.mxu0 %v13144_v49  ;;  %6731 = vmatpush1.bf16.msra.mxu1 %v13145_v27 }
 0x650   : > { %6619 = vmatprep.subr.bf16.mxu0 %v13146_v22  ;;  %6732 = vmatprep.subr.bf16.mxu1 %v13147_v16 }
 0x653   : > { %6620 = vmatpush1.bf16.msra.mxu0 %v13148_v15  ;;  %6733 = vmatpush1.bf16.msra.mxu1 %v13149_v53 }
 0x654   : > { %6621 = vmatprep.subr.bf16.mxu0 %v13150_v38  ;;  %6734 = vmatprep.subr.bf16.mxu1 %v13151_v0 }
 0x657   : > { %6622 = vmatpush1.bf16.msra.mxu0 %v13152_v26  ;;  %6735 = vmatpush1.bf16.msra.mxu1 %v13153_v4 }
 0x658   : > { %7353 = vmatprep.subr.bf16.mxu0 %v13154_v46  ;;  %7466 = vmatprep.subr.bf16.mxu1 %v13155_v12 }
 0x65f   : > { %v5159_v61 = vpop.f32.mrb[100].mxu0  ;;  %v5272_v56 = vpop.f32.mrb[100].mxu1 }
 0x660   : > { %v9991_v13 = vadd.f32 %v5159_v61, %v13990_v43  ;;  %v5161_v58 = vpop.f32.mrb[101].mxu0  ;;  %v5274_v25 = vpop.f32.mrb[101].mxu1  ;;  %v10247_v39 = vadd.f32 %v5272_v56, %v13992_v44 }
 0x661   : > { %v9992_v48 = vadd.f32 %v5161_v58, %v13994_v52  ;;  %v5163_v28 = vpop.f32.mrb[102].mxu0  ;;  %v5276_v14 = vpop.f32.mrb[102].mxu1  ;;  %v10248_v17 = vadd.f32 %v5274_v25, %v13999_v42 }
 0x662   : > { %v9540_v21 = vmul.f32 -1.442695, %v9991_v13  ;;  %v9993_v54 = vadd.f32 %v5163_v28, %v13990_v43  ;;  %v5165_v41 = vpop.f32.mrb[103].mxu0  ;;  %v5278_v3 = vpop.f32.mrb[103].mxu1  ;;  %v10249_v59 = vadd.f32 %v5276_v14, %v13992_v44  ;;  %v9542_v5 = vmul.f32 -1.442695, %v10247_v39 }
 0x663   : > { %v9541_v6 = vmul.f32 -1.442695, %v9992_v48  ;;  %v9994_v7 = vadd.f32 %v5165_v41, %v13994_v52  ;;  %v10250_v29 = vadd.f32 %v5278_v3, %v13999_v42 }
 0x664   : > { %11800 = vpow2.f32 %v9540_v21  ;;  %v9543_v40 = vmul.f32 -1.442695, %v9993_v54  ;;  %v9545_v2 = vmul.f32 -1.442695, %v10249_v59 }
 0x665   : > { %v9544_v62 = vmul.f32 -1.442695, %v9994_v7  ;;  %11802 = vpow2.f32 %v9541_v6 }
 0x666   : > { %11804 = vpow2.f32 %v9543_v40 }
 0x667   : > { %11806 = vpow2.f32 %v9544_v62 }
 0x668   : > { %11808 = vpow2.f32 %v9542_v5 }
 0x669   : > { %11810 = vpow2.f32 %v9545_v2 }
 0x66a   : > { %11812 = vtanh.f32 %v10248_v17 }
 0x66e   : > { %v11801_v23 = vpop.eup %11800 }
 0x66f   : > { %v5555_v55 = vadd.f32 1.0, %v11801_v23  ;;  %v11803_v35 = vpop.eup %11802 }
 0x670   : > { %v11805_v37 = vpop.eup %11804  ;;  %v5556_v49 = vadd.f32 1.0, %v11803_v35 }
 0x671   : > { %v5169_v51 = vpop.f32.mrb[104].mxu0  ;;  %v5282_v31 = vpop.f32.mrb[104].mxu1  ;;  %11814 = vrcp.f32 %v5555_v55  ;;  %v5558_v15 = vadd.f32 1.0, %v11805_v37 }
 0x672   : > { %v9995_v50 = vadd.f32 %v5169_v51, %v13990_v43  ;;  %v5171_v47 = vpop.f32.mrb[105].mxu0  ;;  %v5284_v32 = vpop.f32.mrb[105].mxu1  ;;  %11816 = vtanh.f32 %v10250_v29  ;;  %v10251_v25 = vadd.f32 %v5282_v31, %v13992_v44 }
 0x673   : > { %v9996_v27 = vadd.f32 %v5171_v47, %v13994_v52  ;;  %v5173_v22 = vpop.f32.mrb[106].mxu0  ;;  %v5286_v16 = vpop.f32.mrb[106].mxu1  ;;  %11818 = vrcp.f32 %v5556_v49  ;;  %v10252_v39 = vadd.f32 %v5284_v32, %v13999_v42 }
 0x674   : > { %v5175_v53 = vpop.f32.mrb[107].mxu0  ;;  %v11807_v38 = vpop.eup %11806  ;;  %v9546_v0 = vmul.f32 -1.442695, %v9995_v50  ;;  %v9997_v26 = vadd.f32 %v5173_v22, %v13990_v43  ;;  %11820 = vrcp.f32 %v5558_v15  ;;  %v10253_v21 = vadd.f32 %v5286_v16, %v13992_v44 }
 0x675   : > { %v5288_v4 = vpop.f32.mrb[107].mxu1  ;;  %v5559_v61 = vadd.f32 1.0, %v11807_v38  ;;  %v9547_v56 = vmul.f32 -1.442695, %v9996_v27  ;;  %v9998_v46 = vadd.f32 %v5175_v53, %v13994_v52  ;;  %v11809_v12 = vpop.eup %11808  ;;  %v9548_v7 = vmul.f32 -1.442695, %v10251_v25 }
 0x676   : > { %v9549_v13 = vmul.f32 -1.442695, %v9997_v26  ;;  %v11811_v58 = vpop.eup %11810  ;;  %v5557_v14 = vadd.f32 1.0, %v11809_v12  ;;  %v9551_v5 = vmul.f32 -1.442695, %v10253_v21 }
 0x677   : > { %11822 = vrcp.f32 %v5559_v61  ;;  %v9550_v48 = vmul.f32 -1.442695, %v9998_v46  ;;  %v11813_v28 = vpop.eup %11812  ;;  %v5560_v41 = vadd.f32 1.0, %v11811_v58 }
 0x678   : > { %11824 = vpow2.f32 %v9546_v0 }
 0x679   : > { %11826 = vpow2.f32 %v9547_v56 }
 0x67a   : > { %11828 = vpow2.f32 %v9549_v13 }
 0x67b   : > { %v11815_v54 = vpop.eup %11814  ;;  %11830 = vpow2.f32 %v9550_v48 }
 0x67c   : > { %v11817_v3 = vpop.eup %11816  ;;  %v5727_v6 = vmul.f32 %v11815_v54, %v11813_v28  ;;  %11832 = vrcp.f32 %v5557_v14 }
 0x67d   : > { %v11819_v40 = vpop.eup %11818  ;;  %11834 = vrcp.f32 %v5560_v41 }
 0x67e   : > { %v11821_v62 = vpop.eup %11820  ;;  %v5711_v59 = vmul.f32 %v11819_v40, %v14858_v33  ;;  %11836 = vpow2.f32 %v9548_v7  ;;  %v10254_v33 = vadd.f32 %v5288_v4, %v13999_v42 }
 0x67f   : > { %v5728_v2 = vmul.f32 %v11821_v62, %v11817_v3  ;;  %11838 = vtanh.f32 %v10252_v39 }
 0x680   : > { %v15106_v55 = vadd.f32 %v5727_v6, %v5711_v59  ;;  %11840 = vpow2.f32 %v9551_v5 }
 0x681   : > { %v11823_v29 = vpop.eup %11822 }
 0x682   : > { %v5179_v17 = vpop.f32.mrb[108].mxu0  ;;  %v5292_v23 = vpop.f32.mrb[108].mxu1  ;;  %v5712_v50 = vmul.f32 %v11823_v29, %v14863_v57  ;;  %11842 = vtanh.f32 %v15106_v55 }
 0x683   : > { %v5181_v51 = vpop.f32.mrb[109].mxu0  ;;  %v5294_v31 = vpop.f32.mrb[109].mxu1  ;;  %v9999_v16 = vadd.f32 %v5179_v17, %v13990_v43  ;;  %v10255_v56 = vadd.f32 %v5292_v23, %v13992_v44 }
 0x684   : > { %v11825_v35 = vpop.eup %11824  ;;  %v5183_v47 = vpop.f32.mrb[110].mxu0  ;;  %v15111_v22 = vadd.f32 %v5728_v2, %v5712_v50  ;;  %v10000_v57 = vadd.f32 %v5181_v51, %v13994_v52  ;;  %v10256_v7 = vadd.f32 %v5294_v31, %v13999_v42 }
 0x685   : > { %v5296_v32 = vpop.f32.mrb[110].mxu1  ;;  %v5561_v37 = vadd.f32 1.0, %v11825_v35  ;;  %v5185_v49 = vpop.f32.mrb[111].mxu0  ;;  %v10001_v26 = vadd.f32 %v5183_v47, %v13990_v43  ;;  %v9552_v61 = vmul.f32 -1.442695, %v9999_v16 }
 0x686   : > { %v11827_v27 = vpop.eup %11826  ;;  %v5298_v15 = vpop.f32.mrb[111].mxu1  ;;  %v10002_v13 = vadd.f32 %v5185_v49, %v13994_v52  ;;  %v9553_v25 = vmul.f32 -1.442695, %v10000_v57  ;;  %v9554_v21 = vmul.f32 -1.442695, %v10255_v56  ;;  %v10257_v54 = vadd.f32 %v5296_v32, %v13992_v44 }
 0x687   : > { %11844 = vrcp.f32 %v5561_v37  ;;  %v5562_v53 = vadd.f32 1.0, %v11827_v27  ;;  %v11829_v38 = vpop.eup %11828  ;;  %v9555_v28 = vmul.f32 -1.442695, %v10001_v26  ;;  %v10258_v49 = vadd.f32 %v5298_v15, %v13999_v42 }
 0x688   : > { %11846 = vtanh.f32 %v15111_v22  ;;  %v5564_v0 = vadd.f32 1.0, %v11829_v38  ;;  %v11831_v4 = vpop.eup %11830  ;;  %v9556_v3 = vmul.f32 -1.442695, %v10002_v13  ;;  %v9557_v5 = vmul.f32 -1.442695, %v10257_v54 }
 0x689   : > { %11848 = vtanh.f32 %v10254_v33  ;;  %v11833_v46 = vpop.eup %11832  ;;  %v5565_v12 = vadd.f32 1.0, %v11831_v4 }
 0x68a   : > { %11850 = vrcp.f32 %v5562_v53  ;;  %v11835_v58 = vpop.eup %11834 }
 0x68b   : > { %11852 = vrcp.f32 %v5564_v0  ;;  %v11837_v48 = vpop.eup %11836 }
 0x68c   : > { %11854 = vrcp.f32 %v5565_v12  ;;  %v11839_v14 = vpop.eup %11838  ;;  %v5563_v39 = vadd.f32 1.0, %v11837_v48 }
 0x68d   : > { %11856 = vpow2.f32 %v9552_v61  ;;  %v11841_v41 = vpop.eup %11840 }
 0x68e   : > { %v11843_v6 = vpop.eup %11842  ;;  %11858 = vpow2.f32 %v9553_v25  ;;  %v5566_v17 = vadd.f32 1.0, %v11841_v41 }
 0x68f   : > { %11860 = vpow2.f32 %v9555_v28  ;;  %v5775_v51 = vmul.f32 %v11843_v6, %v11833_v46 }
 0x690   : > { %11862 = vpow2.f32 %v9554_v21 }
 0x691   : > { %v11845_v40 = vpop.eup %11844  ;;  %11864 = vpow2.f32 %v9556_v3 }
 0x692   : > { %v11847_v62 = vpop.eup %11846  ;;  %v5729_v59 = vmul.f32 %v11845_v40, %v11839_v14  ;;  %11866 = vtanh.f32 %v10256_v7 }
 0x693   : > { %v11849_v2 = vpop.eup %11848  ;;  %v5189_v23 = vpop.f32.mrb[112].mxu0  ;;  %v5776_v35 = vmul.f32 %v11847_v62, %v11835_v58  ;;  %11868 = vrcp.f32 %v5563_v39 }
 0x694   : > { %v5302_v29 = vpop.f32.mrb[112].mxu1  ;;  %v11851_v50 = vpop.eup %11850  ;;  %v10003_v47 = vadd.f32 %v5189_v23, %v13990_v43  ;;  %11870 = vpow2.f32 %v9557_v5 }
 0x695   : > { %v5191_v32 = vpop.f32.mrb[113].mxu0  ;;  %v5304_v31 = vpop.f32.mrb[113].mxu1  ;;  %v5713_v33 = vmul.f32 %v11851_v50, %v14875_v63  ;;  %v5854_v53 = vpack.c.bf16 %v5776_v35, %v5775_v51  ;;  %11872 = vrcp.f32 %v5566_v17  ;;  %v10259_v15 = vadd.f32 %v5302_v29, %v13992_v44 }
 0x696   : > { %v11853_v37 = vpop.eup %11852  ;;  %v5193_v27 = vpop.f32.mrb[114].mxu0  ;;  %v9558_v57 = vmul.f32 -1.442695, %v10003_v47  ;;  %v10260_v12 = vadd.f32 %v5304_v31, %v13999_v42  ;;  %v10004_v25 = vadd.f32 %v5191_v32, %v13994_v52 }
 0x697   : > { %v5306_v16 = vpop.f32.mrb[114].mxu1  ;;  %v5730_v38 = vmul.f32 %v11853_v37, %v11849_v2  ;;  %v5195_v0 = vpop.f32.mrb[115].mxu0  ;;  %v15126_v61 = vadd.f32 %v5729_v59, %v5713_v33  ;;  %5904 = vmatmul.mubr.bf16.gmra.mrb[132].mxu0 %v5854_v53  ;;  %6017 = vmatmul.mubr.bf16.gmra.mrb[132].mxu1 %v5854_v53  ;;  %v10005_v28 = vadd.f32 %v5193_v27, %v13990_v43  ;;  %v9560_v54 = vmul.f32 -1.442695, %v10259_v15 }
 0x698   : > { %v15124_v26 = vpop.f32.mrb[115].mxu1  ;;  %v11855_v4 = vpop.eup %11854  ;;  %11874 = vpow2.f32 %v9558_v57  ;;  %5913 = vmatprep.mubr.bf16.mxu0 %v16055_v11  ;;  %6026 = vmatprep.mubr.bf16.mxu1 %v16055_v11  ;;  %v9559_v7 = vmul.f32 -1.442695, %v10004_v25  ;;  %v10006_v40 = vadd.f32 %v5195_v0, %v13994_v52  ;;  %v10261_v2 = vadd.f32 %v5306_v16, %v13992_v44 }
 0x699   : > { %v11857_v56 = vpop.eup %11856  ;;  %v5714_v63 = vmul.f32 %v11855_v4, %v14884_v60  ;;  %11876 = vtanh.f32 %v10258_v49  ;;  %v9561_v62 = vmul.f32 -1.442695, %v10005_v28 }
 0x69a   : > { %v5567_v46 = vadd.f32 1.0, %v11857_v56  ;;  %v11859_v13 = vpop.eup %11858  ;;  %11878 = vtanh.f32 %v15126_v61  ;;  %v9562_v29 = vmul.f32 -1.442695, %v10006_v40  ;;  %v9563_v37 = vmul.f32 -1.442695, %v10261_v2 }
 0x69b   : > { %v15134_v58 = vadd.f32 %v5730_v38, %v5714_v63  ;;  %v11861_v48 = vpop.eup %11860  ;;  %v5568_v60 = vadd.f32 1.0, %v11859_v13 }
 0x69c   : > { %11880 = vrcp.f32 %v5567_v46  ;;  %v11863_v14 = vpop.eup %11862  ;;  %v5570_v21 = vadd.f32 1.0, %v11861_v48  ;;  %v10262_v48 = vadd.f32 %v15124_v26, %v13999_v42 }
 0x69d   : > { %11882 = vtanh.f32 %v15134_v58  ;;  %v11865_v41 = vpop.eup %11864  ;;  %v5569_v5 = vadd.f32 1.0, %v11863_v14 }
 0x69e   : > { %11884 = vtanh.f32 %v10260_v12  ;;  %v11867_v3 = vpop.eup %11866  ;;  %v5571_v6 = vadd.f32 1.0, %v11865_v41 }
 0x69f   : > { %11886 = vrcp.f32 %v5568_v60  ;;  %v11869_v39 = vpop.eup %11868 }
 0x6a0   : > { %11888 = vrcp.f32 %v5570_v21  ;;  %v11871_v59 = vpop.eup %11870 }
 0x6a1   : > { %11890 = vpow2.f32 %v9560_v54  ;;  %v11873_v17 = vpop.eup %11872  ;;  %v5572_v35 = vadd.f32 1.0, %v11871_v59 }
 0x6a2   : > { %11892 = vrcp.f32 %v5571_v6  ;;  %v11875_v23 = vpop.eup %11874 }
 0x6a3   : > { %11894 = vpow2.f32 %v9559_v7  ;;  %v11877_v51 = vpop.eup %11876  ;;  %v5573_v50 = vadd.f32 1.0, %v11875_v23  ;;  %v5199_v47 = vpop.f32.mrb[116].mxu0 }
 0x6a4   : > { %11896 = vpow2.f32 %v9561_v62  ;;  %v5312_v32 = vpop.f32.mrb[116].mxu1  ;;  %v11879_v31 = vpop.eup %11878  ;;  %v10007_v33 = vadd.f32 %v5199_v47, %v13990_v43 }
 0x6a5   : > { %11898 = vrcp.f32 %v5569_v5  ;;  %v5201_v49 = vpop.f32.mrb[117].mxu0  ;;  %v5314_v27 = vpop.f32.mrb[117].mxu1  ;;  %v5777_v60 = vmul.f32 %v11879_v31, %v11869_v39 }
 0x6a6   : > { %v11881_v53 = vpop.eup %11880  ;;  %11900 = vrcp.f32 %v5573_v50  ;;  %v10008_v16 = vadd.f32 %v5201_v49, %v13994_v52  ;;  %v5203_v38 = vpop.f32.mrb[118].mxu0  ;;  %v9564_v56 = vmul.f32 -1.442695, %v10007_v33  ;;  %v10264_v50 = vadd.f32 %v5314_v27, %v13999_v42 }
 0x6a7   : > { %v15143_v57 = vpop.f32.mrb[118].mxu1  ;;  %v11883_v0 = vpop.eup %11882  ;;  %v5731_v4 = vmul.f32 %v11881_v53, %v11867_v3  ;;  %11902 = vpow2.f32 %v9562_v29  ;;  %v10009_v13 = vadd.f32 %v5203_v38, %v13990_v43  ;;  %v10263_v3 = vadd.f32 %v5312_v32, %v13992_v44 }
 0x6a8   : > { %v5205_v63 = vpop.f32.mrb[119].mxu0  ;;  %v5318_v15 = vpop.f32.mrb[119].mxu1  ;;  %11904 = vrcp.f32 %v5572_v35  ;;  %v9565_v12 = vmul.f32 -1.442695, %v10008_v16  ;;  %v5778_v28 = vmul.f32 %v11883_v0, %v11873_v17 }
 0x6a9   : > { %v11885_v46 = vpop.eup %11884  ;;  %11906 = vpow2.f32 %v9563_v37  ;;  %v9567_v6 = vmul.f32 -1.442695, %v10009_v13  ;;  %v10010_v39 = vadd.f32 %v5205_v63, %v13994_v52  ;;  %v9566_v29 = vmul.f32 -1.442695, %v10263_v3 }
 0x6aa   : > { %v11887_v25 = vpop.eup %11886  ;;  %11908 = vpow2.f32 %v9564_v56  ;;  %v5855_v7 = vpack.c.bf16 %v5778_v28, %v5777_v60  ;;  %v10266_v0 = vadd.f32 %v5318_v15, %v13999_v42 }
 0x6ab   : > { %v11889_v14 = vpop.eup %11888  ;;  %v5715_v21 = vmul.f32 %v11887_v25, %v14892_v19  ;;  %11910 = vpow2.f32 %v9565_v12  ;;  %v9568_v31 = vmul.f32 -1.442695, %v10010_v39  ;;  %v10265_v12 = vadd.f32 %v15143_v57, %v13992_v44 }
 0x6ac   : > { %v11891_v54 = vpop.eup %11890  ;;  %v5732_v41 = vmul.f32 %v11889_v14, %v11877_v51  ;;  %11912 = vtanh.f32 %v10262_v48  ;;  %5914 = vmatmul.mubr.bf16.gmra.mrb[136].mxu0 %v5855_v7  ;;  %6027 = vmatmul.mubr.bf16.gmra.mrb[136].mxu1 %v5855_v7 }
 0x6ad   : > { %v11893_v40 = vpop.eup %11892  ;;  %v15150_v62 = vadd.f32 %v5731_v4, %v5715_v21  ;;  %5923 = vmatprep.mubr.bf16.mxu0 %v16055_v11  ;;  %6036 = vmatprep.mubr.bf16.mxu1 %v16055_v11 }
 0x6ae   : > { %v11895_v59 = vpop.eup %11894  ;;  %v5716_v5 = vmul.f32 %v11893_v40, %v14906_v1 }
 0x6af   : > { %v11897_v26 = vpop.eup %11896  ;;  %11914 = vtanh.f32 %v15150_v62  ;;  %v5574_v19 = vadd.f32 1.0, %v11895_v59 }
 0x6b0   : > { %v11899_v2 = vpop.eup %11898  ;;  %v15157_v17 = vadd.f32 %v5732_v41, %v5716_v5  ;;  %v5576_v23 = vadd.f32 1.0, %v11897_v26  ;;  %11916 = vpow2.f32 %v9567_v6  ;;  %v5575_v41 = vadd.f32 1.0, %v11891_v54 }
 0x6b1   : > { %v11901_v1 = vpop.eup %11900  ;;  %11918 = vrcp.f32 %v5574_v19  ;;  %v9569_v5 = vmul.f32 -1.442695, %v10265_v12 }
 0x6b2   : > { %v11903_v51 = vpop.eup %11902  ;;  %11920 = vtanh.f32 %v15157_v17  ;;  %v5733_v35 = vmul.f32 %v11901_v1, %v11885_v46 }
 0x6b3   : > { %v11905_v47 = vpop.eup %11904  ;;  %11922 = vrcp.f32 %v5576_v23  ;;  %v5577_v32 = vadd.f32 1.0, %v11903_v51 }
 0x6b4   : > { %v11907_v37 = vpop.eup %11906  ;;  %11924 = vpow2.f32 %v9566_v29  ;;  %v5209_v53 = vpop.f32.mrb[120].mxu0 }
 0x6b5   : > { %v11909_v33 = vpop.eup %11908  ;;  %11926 = vrcp.f32 %v5577_v32  ;;  %v5322_v16 = vpop.f32.mrb[120].mxu1  ;;  %v10011_v4 = vadd.f32 %v5209_v53, %v13990_v43 }
 0x6b6   : > { %v5579_v49 = vadd.f32 1.0, %v11909_v33  ;;  %11928 = vtanh.f32 %v10264_v50  ;;  %v11911_v38 = vpop.eup %11910  ;;  %v5211_v56 = vpop.f32.mrb[121].mxu0  ;;  %v5578_v50 = vadd.f32 1.0, %v11907_v37 }
 0x6b7   : > { %11930 = vpow2.f32 %v9568_v31  ;;  %v15163_v27 = vpop.f32.mrb[121].mxu1  ;;  %v11913_v63 = vpop.eup %11912  ;;  %v5580_v46 = vadd.f32 1.0, %v11911_v38  ;;  %v10012_v13 = vadd.f32 %v5211_v56, %v13994_v52  ;;  %v9570_v28 = vmul.f32 -1.442695, %v10011_v4 }
 0x6b8   : > { %11932 = vrcp.f32 %v5579_v49  ;;  %v5213_v25 = vpop.f32.mrb[122].mxu0  ;;  %v5326_v48 = vpop.f32.mrb[122].mxu1  ;;  %v10267_v49 = vadd.f32 %v5322_v16, %v13992_v44 }
 0x6b9   : > { %v11915_v60 = vpop.eup %11914  ;;  %v5215_v14 = vpop.f32.mrb[123].mxu0  ;;  %11934 = vrcp.f32 %v5580_v46  ;;  %v10013_v3 = vadd.f32 %v5213_v25, %v13990_v43  ;;  %v9571_v40 = vmul.f32 -1.442695, %v10012_v13  ;;  %v10269_v38 = vadd.f32 %v5326_v48, %v13992_v44 }
 0x6ba   : > { %v15168_v21 = vpop.f32.mrb[123].mxu1  ;;  %v11917_v15 = vpop.eup %11916  ;;  %11936 = vtanh.f32 %v10266_v0  ;;  %v5779_v19 = vmul.f32 %v11915_v60, %v11899_v2  ;;  %v10014_v32 = vadd.f32 %v5215_v14, %v13994_v52  ;;  %v9572_v4 = vmul.f32 -1.442695, %v10267_v49 }
 0x6bb   : > { %v11919_v6 = vpop.eup %11918  ;;  %v5582_v7 = vadd.f32 1.0, %v11917_v15  ;;  %11938 = vpow2.f32 %v9570_v28  ;;  %v9573_v1 = vmul.f32 -1.442695, %v10013_v3  ;;  %v10268_v46 = vadd.f32 %v15163_v27, %v13999_v42 }
 0x6bc   : > { %v11921_v59 = vpop.eup %11920  ;;  %v5717_v57 = vmul.f32 %v11919_v6, %v14916_v34  ;;  %v9574_v16 = vmul.f32 -1.442695, %v10014_v32  ;;  %v9575_v28 = vmul.f32 -1.442695, %v10269_v38 }
 0x6bd   : > { %v11923_v26 = vpop.eup %11922  ;;  %11940 = vrcp.f32 %v5582_v7  ;;  %v5780_v39 = vmul.f32 %v11921_v59, %v11905_v47 }
 0x6be   : > { %v11925_v23 = vpop.eup %11924  ;;  %11942 = vrcp.f32 %v5575_v41  ;;  %v15172_v29 = vadd.f32 %v5733_v35, %v5717_v57  ;;  %v5734_v54 = vmul.f32 %v11923_v26, %v11913_v63  ;;  %v10270_v26 = vadd.f32 %v15168_v21, %v13999_v42 }
 0x6bf   : > { %v11927_v51 = vpop.eup %11926  ;;  %11944 = vpow2.f32 %v9571_v40  ;;  %v5856_v31 = vpack.c.bf16 %v5780_v39, %v5779_v19  ;;  %v5581_v53 = vadd.f32 1.0, %v11925_v23 }
 0x6c0   : > { %v11929_v33 = vpop.eup %11928  ;;  %v5718_v34 = vmul.f32 %v11927_v51, %v14925_v36  ;;  %11946 = vpow2.f32 %v9569_v5 }
 0x6c1   : > { %v11931_v2 = vpop.eup %11930  ;;  %11948 = vtanh.f32 %v15172_v29  ;;  %5924 = vmatmul.mubr.bf16.gmra.mrb[140].mxu0 %v5856_v31  ;;  %6037 = vmatmul.mubr.bf16.gmra.mrb[140].mxu1 %v5856_v31 }
 0x6c2   : > { %v11933_v35 = vpop.eup %11932  ;;  %v15178_v47 = vadd.f32 %v5734_v54, %v5718_v34  ;;  %v5583_v37 = vadd.f32 1.0, %v11931_v2  ;;  %11950 = vpow2.f32 %v9573_v1  ;;  %5933 = vmatprep.mubr.bf16.mxu0 %v16055_v11  ;;  %6046 = vmatprep.mubr.bf16.mxu1 %v16055_v11 }
 0x6c3   : > { %11952 = vrcp.f32 %v5578_v50  ;;  %v5735_v36 = vmul.f32 %v11933_v35, %v11929_v33  ;;  %v11935_v0 = vpop.eup %11934 }
 0x6c4   : > { %11954 = vtanh.f32 %v15178_v47  ;;  %v11937_v56 = vpop.eup %11936  ;;  %v5719_v63 = vmul.f32 %v11935_v0, %v14935_v10  ;;  %v5219_v48 = vpop.f32.mrb[124].mxu0 }
 0x6c5   : > { %11956 = vrcp.f32 %v5583_v37  ;;  %v11939_v12 = vpop.eup %11938  ;;  %v15189_v14 = vpop.f32.mrb[124].mxu1  ;;  %v10015_v10 = vadd.f32 %v5219_v48, %v13990_v43 }
 0x6c6   : > { %11958 = vrcp.f32 %v5581_v53  ;;  %v15187_v25 = vadd.f32 %v5735_v36, %v5719_v63  ;;  %v5585_v60 = vadd.f32 1.0, %v11939_v12  ;;  %v5221_v3 = vpop.f32.mrb[125].mxu0  ;;  %v5334_v6 = vpop.f32.mrb[125].mxu1 }
 0x6c7   : > { %v11941_v13 = vpop.eup %11940  ;;  %11960 = vpow2.f32 %v9574_v16  ;;  %v10016_v27 = vadd.f32 %v5221_v3, %v13994_v52  ;;  %v5223_v40 = vpop.f32.mrb[126].mxu0  ;;  %v9576_v19 = vmul.f32 -1.442695, %v10015_v10 }
 0x6c8   : > { %v11943_v15 = vpop.eup %11942  ;;  %v5736_v41 = vmul.f32 %v11941_v13, %v11937_v56  ;;  %11962 = vpow2.f32 %v9572_v4  ;;  %v5336_v59 = vpop.f32.mrb[126].mxu1  ;;  %v10017_v54 = vadd.f32 %v5223_v40, %v13990_v43 }
 0x6c9   : > { %v11945_v7 = vpop.eup %11944  ;;  %11964 = vtanh.f32 %v10268_v46  ;;  %v5225_v39 = vpop.f32.mrb[127].mxu0  ;;  %v9577_v50 = vmul.f32 -1.442695, %v10016_v27 }
 0x6ca   : > { %v11947_v57 = vpop.eup %11946  ;;  %11966 = vrcp.f32 %v5585_v60  ;;  %v5586_v5 = vadd.f32 1.0, %v11945_v7  ;;  %v5338_v1 = vpop.f32.mrb[127].mxu1  ;;  %v9579_v49 = vmul.f32 -1.442695, %v10017_v54  ;;  %v10018_v21 = vadd.f32 %v5225_v39, %v13994_v52 }
 0x6cb   : > { %v11949_v23 = vpop.eup %11948  ;;  %11968 = vpow2.f32 %v9575_v28  ;;  %v5584_v34 = vadd.f32 1.0, %v11947_v57  ;;  %v10272_v60 = vadd.f32 %v5334_v6, %v13999_v42  ;;  %v10271_v7 = vadd.f32 %v15189_v14, %v13992_v44 }
 0x6cc   : > { %v11951_v51 = vpop.eup %11950  ;;  %11970 = vrcp.f32 %v5586_v5  ;;  %v5781_v35 = vmul.f32 %v11949_v23, %v11943_v15  ;;  %v9580_v46 = vmul.f32 -1.442695, %v10018_v21  ;;  %v10273_v57 = vadd.f32 %v5336_v59, %v13992_v44 }
 0x6cd   : > { %v11953_v32 = vpop.eup %11952  ;;  %v5588_v31 = vadd.f32 1.0, %v11951_v51  ;;  %11972 = vpow2.f32 %v9576_v19  ;;  %v10274_v6 = vadd.f32 %v5338_v1, %v13999_v42  ;;  %v9578_v23 = vmul.f32 -1.442695, %v10271_v7 }
 0x6ce   : > { %v11955_v33 = vpop.eup %11954  ;;  %11974 = vtanh.f32 %v10270_v26  ;;  %v9581_v14 = vmul.f32 -1.442695, %v10273_v57 }
 0x6cf   : > { %v11957_v2 = vpop.eup %11956  ;;  %11976 = vrcp.f32 %v5588_v31  ;;  %v5782_v53 = vmul.f32 %v11955_v33, %v11953_v32 }
 0x6d0   : > { %v11959_v37 = vpop.eup %11958  ;;  %v5720_v36 = vmul.f32 %v11957_v2, %v14944_v24  ;;  %11978 = vpow2.f32 %v9577_v50 }
 0x6d1   : > { %v11961_v38 = vpop.eup %11960  ;;  %11980 = vtanh.f32 %v15187_v25  ;;  %v5857_v16 = vpack.c.bf16 %v5782_v53, %v5781_v35 }
 0x6d2   : > { %v11963_v0 = vpop.eup %11962  ;;  %v15199_v4 = vadd.f32 %v5736_v41, %v5720_v36  ;;  %v5589_v56 = vadd.f32 1.0, %v11961_v38  ;;  %11982 = vpow2.f32 %v9579_v49 }
 0x6d3   : > { %v11965_v63 = vpop.eup %11964  ;;  %11984 = vrcp.f32 %v5584_v34  ;;  %5934 = vmatmul.mubr.bf16.gmra.mrb[144].mxu0 %v5857_v16  ;;  %6047 = vmatmul.mubr.bf16.gmra.mrb[144].mxu1 %v5857_v16  ;;  %v5587_v10 = vadd.f32 1.0, %v11963_v0 }
 0x6d4   : > { %v11967_v12 = vpop.eup %11966  ;;  %11986 = vtanh.f32 %v15199_v4  ;;  %5943 = vmatprep.mubr.bf16.mxu0 %v16055_v11  ;;  %6056 = vmatprep.mubr.bf16.mxu1 %v16055_v11 }
 0x6d5   : > { %v11969_v24 = vpop.eup %11968  ;;  %v5737_v13 = vmul.f32 %v11967_v12, %v11965_v63  ;;  %11988 = vrcp.f32 %v5589_v56 }
 0x6d6   : > { %v11971_v28 = vpop.eup %11970  ;;  %11990 = vpow2.f32 %v9580_v46  ;;  %v5590_v31 = vadd.f32 1.0, %v11969_v24 }
 0x6d7   : > { %v11973_v48 = vpop.eup %11972  ;;  %v5721_v15 = vmul.f32 %v11971_v28, %v14953_v18  ;;  %11992 = vtanh.f32 %v10272_v60 }
 0x6d8   : > { %v11975_v41 = vpop.eup %11974  ;;  %v5591_v3 = vadd.f32 1.0, %v11973_v48 }
 0x6d9   : > { %v11977_v27 = vpop.eup %11976  ;;  %v15208_v40 = vadd.f32 %v5737_v13, %v5721_v15 }
 0x6da   : > { %v11979_v5 = vpop.eup %11978  ;;  %v5738_v26 = vmul.f32 %v11977_v27, %v11975_v41  ;;  %11994 = vrcp.f32 %v5591_v3 }
 0x6db   : > { %v11981_v19 = vpop.eup %11980  ;;  %v5592_v18 = vadd.f32 1.0, %v11979_v5  ;;  %11996 = vrcp.f32 %v5587_v10 }
 0x6dc   : > { %v11983_v39 = vpop.eup %11982  ;;  %v5783_v59 = vmul.f32 %v11981_v19, %v11959_v37 }
 0x6dd   : > { %v11985_v54 = vpop.eup %11984  ;;  %11998 = vrcp.f32 %v5592_v18  ;;  %v5594_v51 = vadd.f32 1.0, %v11983_v39 }
 0x6de   : > { %v11987_v50 = vpop.eup %11986  ;;  %12000 = vtanh.f32 %v10274_v6 }
 0x6df   : > { %v11989_v32 = vpop.eup %11988  ;;  %12002 = vrcp.f32 %v5594_v51  ;;  %v5784_v33 = vmul.f32 %v11987_v50, %v11985_v54 }
 0x6e0   : > { %v5722_v34 = vmul.f32 %v11989_v32, %v14959_v8  ;;  %12004 = vpow2.f32 %v9578_v23  ;;  %v11991_v1 = vpop.eup %11990 }
 0x6e1   : > { %12006 = vpow2.f32 %v9581_v14  ;;  %v5858_v49 = vpack.c.bf16 %v5784_v33, %v5783_v59  ;;  %v5595_v21 = vadd.f32 1.0, %v11991_v1  ;;  %v11993_v35 = vpop.eup %11992 }
 0x6e2   : > { %12008 = vtanh.f32 %v15208_v40  ;;  %v15214_v2 = vadd.f32 %v5738_v26, %v5722_v34 }
 0x6e3   : > { %12010 = vrcp.f32 %v5590_v31  ;;  %5944 = vmatmul.mubr.bf16.gmra.mrb[148].mxu0 %v5858_v49  ;;  %6057 = vmatmul.mubr.bf16.gmra.mrb[148].mxu1 %v5858_v49 }
 0x6e4   : > { %v11995_v53 = vpop.eup %11994  ;;  %12012 = vtanh.f32 %v15214_v2  ;;  %5953 = vmatprep.mubr.bf16.mxu0 %v16055_v11  ;;  %6066 = vmatprep.mubr.bf16.mxu1 %v16055_v11 }
 0x6e5   : > { %v5739_v8 = vmul.f32 %v11995_v53, %v11993_v35  ;;  %12014 = vrcp.f32 %v5595_v21  ;;  %v11997_v37 = vpop.eup %11996 }
 0x6e7   : > { %v11999_v36 = vpop.eup %11998 }
 0x6e8   : > { %v12001_v38 = vpop.eup %12000  ;;  %v5723_v16 = vmul.f32 %v11999_v36, %v14965_v20 }
 0x6e9   : > { %v12003_v0 = vpop.eup %12002 }
 0x6ea   : > { %v12005_v56 = vpop.eup %12004  ;;  %v15220_v63 = vadd.f32 %v5739_v8, %v5723_v16  ;;  %v5740_v46 = vmul.f32 %v12003_v0, %v12001_v38 }
 0x6eb   : > { %v12007_v12 = vpop.eup %12006  ;;  %v5593_v60 = vadd.f32 1.0, %v12005_v56 }
 0x6ec   : > { %v12009_v24 = vpop.eup %12008  ;;  %v5596_v15 = vadd.f32 1.0, %v12007_v12 }
 0x6ed   : > { %v12011_v13 = vpop.eup %12010  ;;  %v5785_v41 = vmul.f32 %v12009_v24, %v11997_v37  ;;  %12016 = vrcp.f32 %v5593_v60 }
 0x6ee   : > { %v12013_v28 = vpop.eup %12012  ;;  %12018 = vtanh.f32 %v15220_v63 }
 0x6ef   : > { %v12015_v48 = vpop.eup %12014  ;;  %v5786_v10 = vmul.f32 %v12013_v28, %v12011_v13  ;;  %12020 = vrcp.f32 %v5596_v15 }
 0x6f0   : > { %v5724_v3 = vmul.f32 %v12015_v48, %v14969_v45 }
 0x6f1   : > { %v5859_v7 = vpack.c.bf16 %v5786_v10, %v5785_v41 }
 0x6f2   : > { %v15224_v20 = vadd.f32 %v5740_v46, %v5724_v3 }
 0x6f3   : > { %5954 = vmatmul.mubr.bf16.gmra.mrb[152].mxu0 %v5859_v7  ;;  %6067 = vmatmul.mubr.bf16.gmra.mrb[152].mxu1 %v5859_v7 }
 0x6f4   : > { %12022 = vtanh.f32 %v15224_v20  ;;  %5963 = vmatprep.mubr.bf16.mxu0 %v16055_v11  ;;  %6076 = vmatprep.mubr.bf16.mxu1 %v16055_v11 }
 0x6f7   : > { %v12017_v27 = vpop.eup %12016 }
 0x6f8   : > { %v12019_v57 = vpop.eup %12018 }
 0x6f9   : > { %v12021_v5 = vpop.eup %12020  ;;  %v5787_v45 = vmul.f32 %v12019_v57, %v12017_v27 }
 0x6fe   : > { %v12023_v26 = vpop.eup %12022 }
 0x6ff   : > { %v5788_v6 = vmul.f32 %v12023_v26, %v12021_v5 }
 0x701   : > { %v5860_v19 = vpack.c.bf16 %v5788_v6, %v5787_v45 }
 0x703   : > { %5964 = vmatmul.mubr.bf16.gmra.mrb[156].mxu0 %v5860_v19  ;;  %6077 = vmatmul.mubr.bf16.gmra.mrb[156].mxu1 %v5860_v19 }
 0x704   : > { %6639 = vmatprep.mubr.bf16.mxu0 %v16055_v11  ;;  %6752 = vmatprep.mubr.bf16.mxu1 %v16055_v11 }
 0x70c   : > { %v5895_v18 = vpop.f32.mrb[128].mxu0  ;;  %v6008_v39 = vpop.f32.mrb[128].mxu1 }
 0x70d   : > { %v10019_v23 = vadd.f32 %v5895_v18, %v13990_v43  ;;  %v5897_v54 = vpop.f32.mrb[129].mxu0  ;;  %v6010_v51 = vpop.f32.mrb[129].mxu1  ;;  %v10275_v24 = vadd.f32 %v6008_v39, %v13992_v44 }
 0x70e   : > { %v10020_v14 = vadd.f32 %v5897_v54, %v13994_v52  ;;  %v5899_v50 = vpop.f32.mrb[130].mxu0  ;;  %v6012_v32 = vpop.f32.mrb[130].mxu1  ;;  %v10276_v53 = vadd.f32 %v6010_v51, %v13999_v42 }
 0x70f   : > { %v9582_v31 = vmul.f32 -1.442695, %v10019_v23  ;;  %v10021_v59 = vadd.f32 %v5899_v50, %v13990_v43  ;;  %v5901_v33 = vpop.f32.mrb[131].mxu0  ;;  %v6014_v34 = vpop.f32.mrb[131].mxu1  ;;  %v10277_v13 = vadd.f32 %v6012_v32, %v13992_v44  ;;  %v9584_v28 = vmul.f32 -1.442695, %v10275_v24 }
 0x710   : > { %v9583_v1 = vmul.f32 -1.442695, %v10020_v14  ;;  %v10022_v49 = vadd.f32 %v5901_v33, %v13994_v52  ;;  %v10278_v37 = vadd.f32 %v6014_v34, %v13999_v42  ;;  %v13158_v33 = vld [vmem:[%s16029_s2 + $0x24] ss:$16 sps:$4 sm:$0xff]   ;;  %v13159_v34 = vld [vmem:[%s16029_s2 + $0x2c] ss:$16 sps:$4 sm:$0xff]  }
 0x711   : > { %12024 = vpow2.f32 %v9582_v31  ;;  %v9585_v21 = vmul.f32 -1.442695, %v10021_v59  ;;  %v9587_v15 = vmul.f32 -1.442695, %v10277_v13  ;;  %v13157_v59 = vld [vmem:[%s16029_s2 + $0x8] ss:$16 sps:$4 sm:$0xff]  }
 0x712   : > { %v9586_v35 = vmul.f32 -1.442695, %v10022_v49  ;;  %12026 = vpow2.f32 %v9583_v1  ;;  %v13160_v1 = vld [vmem:[%s16029_s2 + $0x20] ss:$16 sps:$4 sm:$0xff]   ;;  %v13161_v49 = vld [vmem:[%s16029_s2 + $0x28] ss:$16 sps:$4 sm:$0xff]  }
 0x713   : > { %12028 = vpow2.f32 %v9585_v21  ;;  %v13162_v21 = vld [vmem:[%s16029_s2 + $0x44] ss:$16 sps:$4 sm:$0xff]   ;;  %v13175_v13 = vld [vmem:[%s16029_s2 + $0xac] ss:$16 sps:$4 sm:$0xff]  }
 0x714   : > { %12030 = vpow2.f32 %v9586_v35  ;;  %v13163_v35 = vld [vmem:[%s16029_s2 + $0x4c] ss:$16 sps:$4 sm:$0xff]   ;;  %v13174_v24 = vld [vmem:[%s16029_s2 + $0xa4] ss:$16 sps:$4 sm:$0xff]  }
 0x715   : > { %12032 = vtanh.f32 %v10276_v53  ;;  %v13164_v53 = vld [vmem:[%s16029_s2 + $0x40] ss:$16 sps:$4 sm:$0xff]  }
 0x71b   : > { %v12025_v8 = vpop.eup %12024 }
 0x71c   : > { %v6295_v36 = vadd.f32 1.0, %v12025_v8  ;;  %v12027_v38 = vpop.eup %12026  ;;  %v13165_v8 = vld [vmem:[%s16029_s2 + $0x48] ss:$16 sps:$4 sm:$0xff]  }
 0x71d   : > { %v12029_v16 = vpop.eup %12028  ;;  %v6296_v0 = vadd.f32 1.0, %v12027_v38  ;;  %v13168_v38 = vld [vmem:[%s16029_s2 + $0x60] ss:$16 sps:$4 sm:$0xff]  }
 0x71e   : > { %12034 = vrcp.f32 %v6295_v36  ;;  %v6298_v56 = vadd.f32 1.0, %v12029_v16  ;;  %v12031_v46 = vpop.eup %12030  ;;  %v13167_v36 = vld [vmem:[%s16029_s2 + $0x6c] ss:$16 sps:$4 sm:$0xff]   ;;  %v13169_v16 = vld [vmem:[%s16029_s2 + $0x68] ss:$16 sps:$4 sm:$0xff]  }
 0x71f   : > { %12036 = vtanh.f32 %v10278_v37  ;;  %v6299_v12 = vadd.f32 1.0, %v12031_v46  ;;  %v12033_v60 = vpop.eup %12032  ;;  %v13166_v37 = vld [vmem:[%s16029_s2 + $0x64] ss:$16 sps:$4 sm:$0xff]   ;;  %v13172_v46 = vld [vmem:[%s16029_s2 + $0x80] ss:$16 sps:$4 sm:$0xff]  }
 0x720   : > { %12038 = vrcp.f32 %v6296_v0  ;;  %v13170_v0 = vld [vmem:[%s16029_s2 + $0x84] ss:$16 sps:$4 sm:$0xff]  }
 0x721   : > { %12040 = vrcp.f32 %v6298_v56  ;;  %v13171_v56 = vld [vmem:[%s16029_s2 + $0x8c] ss:$16 sps:$4 sm:$0xff]  }
 0x722   : > { %12042 = vrcp.f32 %v6299_v12  ;;  %v13173_v12 = vld [vmem:[%s16029_s2 + $0x88] ss:$16 sps:$4 sm:$0xff]  }
 0x723   : > { %12044 = vpow2.f32 %v9584_v28 }
 0x724   : > { %12046 = vpow2.f32 %v9587_v15 }
 0x728   : > { %v12035_v48 = vpop.eup %12034 }
 0x729   : > { %v12037_v41 = vpop.eup %12036  ;;  %v6471_v10 = vmul.f32 %v12035_v48, %v12033_v60 }
 0x72a   : > { %v12039_v3 = vpop.eup %12038 }
 0x72b   : > { %v12041_v7 = vpop.eup %12040  ;;  %v6455_v27 = vmul.f32 %v12039_v3, %v14985_v9 }
 0x72c   : > { %v6472_v57 = vmul.f32 %v12041_v7, %v12037_v41  ;;  %v12043_v5 = vpop.eup %12042 }
 0x72d   : > { %v15240_v26 = vadd.f32 %v6471_v10, %v6455_v27  ;;  %v6456_v45 = vmul.f32 %v12043_v5, %v14989_v30  ;;  %v12045_v19 = vpop.eup %12044  ;;  %v13156_v30 = vld [vmem:[%s16029_s2] ss:$16 sps:$4 sm:$0xff]  }
 0x72e   : > { %v12047_v18 = vpop.eup %12046  ;;  %v6297_v39 = vadd.f32 1.0, %v12045_v19  ;;  %v13176_v27 = vld [vmem:[%s16029_s2 + $0xa0] ss:$16 sps:$4 sm:$0xff]  }
 0x72f   : > { %v15243_v6 = vadd.f32 %v6472_v57, %v6456_v45  ;;  %v6300_v23 = vadd.f32 1.0, %v12047_v18  ;;  %12048 = vtanh.f32 %v15240_v26  ;;  %v13177_v57 = vld [vmem:[%s16029_s2 + $0xa8] ss:$16 sps:$4 sm:$0xff]  }
 0x731   : > { %12050 = vtanh.f32 %v15243_v6 }
 0x732   : > { %12052 = vrcp.f32 %v6297_v39  ;;  %v13178_v39 = vld [vmem:[%s16029_s2 + $0xc4] ss:$16 sps:$4 sm:$0xff]  }
 0x733   : > { %12054 = vrcp.f32 %v6300_v23  ;;  %v13179_v23 = vld [vmem:[%s16029_s2 + $0xcc] ss:$16 sps:$4 sm:$0xff]  }
 0x739   : > { %v12049_v9 = vpop.eup %12048 }
 0x73b   : > { %v12051_v54 = vpop.eup %12050 }
 0x73c   : > { %v12053_v51 = vpop.eup %12052 }
 0x73d   : > { %v12055_v14 = vpop.eup %12054  ;;  %v6519_v50 = vmul.f32 %v12053_v51, %v12049_v9 }
 0x73e   : > { %v6520_v32 = vmul.f32 %v12055_v14, %v12051_v54 }
 0x740   : > { %v6599_v31 = vpack.c.bf16 %v6520_v32, %v6519_v50  ;;  %v13180_v50 = vld [vmem:[%s16029_s2 + $0xc0] ss:$16 sps:$4 sm:$0xff]   ;;  %v13181_v32 = vld [vmem:[%s16029_s2 + $0xc8] ss:$16 sps:$4 sm:$0xff]  }
 0x742   : > { %6640 = vmatmul.mubr.bf16.vlgmr.msra.gmra.mrb[160].mxu0 %v6599_v31  ;;  %6753 = vmatmul.mubr.bf16.vlgmr.msra.gmra.mrb[160].mxu1 %v6599_v31 }
 0x743   : > { %6649 = vmatprep.mubr.bf16.mxu0 %v16055_v11  ;;  %6762 = vmatprep.mubr.bf16.mxu1 %v16055_v11 }
 0x744   : > { %7354 = vmatpush1.bf16.msra.mxu0 %v13156_v30  ;;  %7467 = vmatpush1.bf16.msra.mxu1 %v13157_v59  ;;  %v13182_v30 = vld [vmem:[%s16029_s2 + $0xe4] ss:$16 sps:$4 sm:$0xff]   ;;  %v13183_v59 = vld [vmem:[%s16029_s2 + $0xec] ss:$16 sps:$4 sm:$0xff]  }
 0x745   : > { %7355 = vmatprep.subr.bf16.mxu0 %v13158_v33  ;;  %7468 = vmatprep.subr.bf16.mxu1 %v13159_v34  ;;  %v13184_v34 = vld [vmem:[%s16029_s2 + $0xe0] ss:$16 sps:$4 sm:$0xff]  }
 0x748   : > { %7356 = vmatpush1.bf16.msra.mxu0 %v13160_v1  ;;  %7469 = vmatpush1.bf16.msra.mxu1 %v13161_v49  ;;  %v13185_v1 = vld [vmem:[%s16029_s2 + $0xe8] ss:$16 sps:$4 sm:$0xff]  }
 0x749   : > { %7357 = vmatprep.subr.bf16.mxu0 %v13162_v21  ;;  %7470 = vmatprep.subr.bf16.mxu1 %v13163_v35  ;;  %v13186_v21 = vld [vmem:[%s16029_s2 + $0x4] ss:$16 sps:$4 sm:$0xff]   ;;  %v13187_v35 = vld [vmem:[%s16029_s2 + $0xc] ss:$16 sps:$4 sm:$0xff]  }
 0x74c   : > { %7358 = vmatpush1.bf16.msra.mxu0 %v13164_v53  ;;  %7471 = vmatpush1.bf16.msra.mxu1 %v13165_v8 }
 0x74d   : > { %7359 = vmatprep.subr.bf16.mxu0 %v13166_v37  ;;  %7472 = vmatprep.subr.bf16.mxu1 %v13167_v36 }
 0x750   : > { %7360 = vmatpush1.bf16.msra.mxu0 %v13168_v38  ;;  %7473 = vmatpush1.bf16.msra.mxu1 %v13169_v16 }
 0x751   : > { %7361 = vmatprep.subr.bf16.mxu0 %v13170_v0  ;;  %7474 = vmatprep.subr.bf16.mxu1 %v13171_v56 }
 0x754   : > { %7362 = vmatpush1.bf16.msra.mxu0 %v13172_v46  ;;  %7475 = vmatpush1.bf16.msra.mxu1 %v13173_v12 }
 0x755   : > { %7363 = vmatprep.subr.bf16.mxu0 %v13174_v24  ;;  %7476 = vmatprep.subr.bf16.mxu1 %v13175_v13 }
 0x758   : > { %7364 = vmatpush1.bf16.msra.mxu0 %v13176_v27  ;;  %7477 = vmatpush1.bf16.msra.mxu1 %v13177_v57 }
 0x759   : > { %7365 = vmatprep.subr.bf16.mxu0 %v13178_v39  ;;  %7478 = vmatprep.subr.bf16.mxu1 %v13179_v23 }
 0x75c   : > { %7366 = vmatpush1.bf16.msra.mxu0 %v13180_v50  ;;  %7479 = vmatpush1.bf16.msra.mxu1 %v13181_v32 }
 0x75d   : > { %7367 = vmatprep.subr.bf16.mxu0 %v13182_v30  ;;  %7480 = vmatprep.subr.bf16.mxu1 %v13183_v59 }
 0x760   : > { %7368 = vmatpush1.bf16.msra.mxu0 %v13184_v34  ;;  %7481 = vmatpush1.bf16.msra.mxu1 %v13185_v1 }
 0x761   : > { %8099 = vmatprep.subr.bf16.mxu0 %v13186_v21  ;;  %8212 = vmatprep.subr.bf16.mxu1 %v13187_v35 }
 0x76a   : > { %v5905_v60 = vpop.f32.mrb[132].mxu0  ;;  %v6018_v28 = vpop.f32.mrb[132].mxu1 }
 0x76b   : > { %v10023_v48 = vadd.f32 %v5905_v60, %v13990_v43  ;;  %v5907_v15 = vpop.f32.mrb[133].mxu0  ;;  %v6020_v41 = vpop.f32.mrb[133].mxu1  ;;  %v10279_v31 = vadd.f32 %v6018_v28, %v13992_v44 }
 0x76c   : > { %v10024_v10 = vadd.f32 %v5907_v15, %v13994_v52  ;;  %v5909_v3 = vpop.f32.mrb[134].mxu0  ;;  %v6022_v7 = vpop.f32.mrb[134].mxu1  ;;  %v10280_v8 = vadd.f32 %v6020_v41, %v13999_v42 }
 0x76d   : > { %v9588_v5 = vmul.f32 -1.442695, %v10023_v48  ;;  %v10025_v45 = vadd.f32 %v5909_v3, %v13990_v43  ;;  %v5911_v19 = vpop.f32.mrb[135].mxu0  ;;  %v6024_v18 = vpop.f32.mrb[135].mxu1  ;;  %v10281_v33 = vadd.f32 %v6022_v7, %v13992_v44  ;;  %v9590_v49 = vmul.f32 -1.442695, %v10279_v31 }
 0x76e   : > { %v9589_v9 = vmul.f32 -1.442695, %v10024_v10  ;;  %v10026_v54 = vadd.f32 %v5911_v19, %v13994_v52  ;;  %v10282_v36 = vadd.f32 %v6024_v18, %v13999_v42 }
 0x76f   : > { %12056 = vpow2.f32 %v9588_v5  ;;  %v9591_v51 = vmul.f32 -1.442695, %v10025_v45  ;;  %v9593_v53 = vmul.f32 -1.442695, %v10281_v33 }
 0x770   : > { %v9592_v14 = vmul.f32 -1.442695, %v10026_v54  ;;  %12058 = vpow2.f32 %v9589_v9 }
 0x771   : > { %12060 = vpow2.f32 %v9591_v51 }
 0x772   : > { %12062 = vpow2.f32 %v9592_v14 }
 0x773   : > { %12064 = vpow2.f32 %v9590_v49 }
 0x774   : > { %12066 = vpow2.f32 %v9593_v53 }
 0x775   : > { %12068 = vtanh.f32 %v10280_v8 }
 0x779   : > { %v12057_v37 = vpop.eup %12056 }
 0x77a   : > { %v6301_v38 = vadd.f32 1.0, %v12057_v37  ;;  %v12059_v16 = vpop.eup %12058 }
 0x77b   : > { %v12061_v0 = vpop.eup %12060  ;;  %v6302_v56 = vadd.f32 1.0, %v12059_v16 }
 0x77c   : > { %12070 = vrcp.f32 %v6301_v38  ;;  %v6304_v46 = vadd.f32 1.0, %v12061_v0  ;;  %v12063_v12 = vpop.eup %12062 }
 0x77d   : > { %12072 = vtanh.f32 %v10282_v36  ;;  %v6305_v24 = vadd.f32 1.0, %v12063_v12  ;;  %v12065_v45 = vpop.eup %12064 }
 0x77e   : > { %12074 = vrcp.f32 %v6302_v56  ;;  %v12067_v39 = vpop.eup %12066  ;;  %v6303_v32 = vadd.f32 1.0, %v12065_v45 }
 0x77f   : > { %12076 = vrcp.f32 %v6304_v46  ;;  %v5915_v13 = vpop.f32.mrb[136].mxu0  ;;  %v6028_v60 = vpop.f32.mrb[136].mxu1  ;;  %v6306_v59 = vadd.f32 1.0, %v12067_v39 }
 0x780   : > { %v10027_v28 = vadd.f32 %v5915_v13, %v13990_v43  ;;  %v5917_v48 = vpop.f32.mrb[137].mxu0  ;;  %v6030_v15 = vpop.f32.mrb[137].mxu1  ;;  %12078 = vrcp.f32 %v6305_v24  ;;  %v10283_v23 = vadd.f32 %v6028_v60, %v13992_v44 }
 0x781   : > { %v10028_v41 = vadd.f32 %v5917_v48, %v13994_v52  ;;  %v5919_v10 = vpop.f32.mrb[138].mxu0  ;;  %v6032_v3 = vpop.f32.mrb[138].mxu1  ;;  %v10284_v37 = vadd.f32 %v6030_v15, %v13999_v42 }
 0x782   : > { %v9594_v7 = vmul.f32 -1.442695, %v10027_v28  ;;  %v10029_v27 = vadd.f32 %v5919_v10, %v13990_v43  ;;  %v5921_v57 = vpop.f32.mrb[139].mxu0  ;;  %v6034_v5 = vpop.f32.mrb[139].mxu1  ;;  %v10285_v51 = vadd.f32 %v6032_v3, %v13992_v44  ;;  %v9596_v34 = vmul.f32 -1.442695, %v10283_v23 }
 0x783   : > { %v9595_v19 = vmul.f32 -1.442695, %v10028_v41  ;;  %v10030_v18 = vadd.f32 %v5921_v57, %v13994_v52  ;;  %v12069_v54 = vpop.eup %12068 }
 0x784   : > { %12080 = vpow2.f32 %v9594_v7  ;;  %v9597_v9 = vmul.f32 -1.442695, %v10029_v27  ;;  %v9599_v21 = vmul.f32 -1.442695, %v10285_v51 }
 0x785   : > { %v9598_v14 = vmul.f32 -1.442695, %v10030_v18  ;;  %12082 = vpow2.f32 %v9595_v19 }
 0x786   : > { %v12071_v50 = vpop.eup %12070  ;;  %12084 = vpow2.f32 %v9597_v9 }
 0x787   : > { %v12073_v31 = vpop.eup %12072  ;;  %v6473_v30 = vmul.f32 %v12071_v50, %v12069_v54  ;;  %12086 = vpow2.f32 %v9598_v14 }
 0x788   : > { %v12075_v33 = vpop.eup %12074  ;;  %12088 = vrcp.f32 %v6303_v32 }
 0x789   : > { %v12077_v1 = vpop.eup %12076  ;;  %v6457_v49 = vmul.f32 %v12075_v33, %v15106_v55  ;;  %12090 = vrcp.f32 %v6306_v59  ;;  %v10286_v55 = vadd.f32 %v6034_v5, %v13999_v42 }
 0x78a   : > { %v6474_v35 = vmul.f32 %v12077_v1, %v12073_v31  ;;  %v12079_v53 = vpop.eup %12078  ;;  %12092 = vpow2.f32 %v9596_v34 }
 0x78b   : > { %v15360_v8 = vadd.f32 %v6473_v30, %v6457_v49  ;;  %v6458_v36 = vmul.f32 %v12079_v53, %v15111_v22  ;;  %12094 = vpow2.f32 %v9599_v21 }
 0x78d   : > { %12096 = vtanh.f32 %v15360_v8  ;;  %v15365_v16 = vadd.f32 %v6474_v35, %v6458_v36 }
 0x78e   : > { %v12081_v38 = vpop.eup %12080  ;;  %12098 = vtanh.f32 %v10284_v37 }
 0x78f   : > { %v6307_v0 = vadd.f32 1.0, %v12081_v38  ;;  %v12083_v56 = vpop.eup %12082  ;;  %12100 = vtanh.f32 %v15365_v16 }
 0x790   : > { %v12085_v46 = vpop.eup %12084  ;;  %v6308_v12 = vadd.f32 1.0, %v12083_v56 }
 0x791   : > { %12102 = vrcp.f32 %v6307_v0  ;;  %v6310_v24 = vadd.f32 1.0, %v12085_v46  ;;  %v12087_v60 = vpop.eup %12086 }
 0x792   : > { %12104 = vtanh.f32 %v10286_v55  ;;  %v12089_v41 = vpop.eup %12088  ;;  %v6311_v10 = vadd.f32 1.0, %v12087_v60 }
 0x793   : > { %12106 = vrcp.f32 %v6308_v12  ;;  %v12091_v57 = vpop.eup %12090 }
 0x794   : > { %v5925_v22 = vpop.f32.mrb[140].mxu0  ;;  %v6038_v13 = vpop.f32.mrb[140].mxu1  ;;  %12108 = vrcp.f32 %v6310_v24 }
 0x795   : > { %v10031_v28 = vadd.f32 %v5925_v22, %v13990_v43  ;;  %v5927_v48 = vpop.f32.mrb[141].mxu0  ;;  %v6040_v15 = vpop.f32.mrb[141].mxu1  ;;  %12110 = vrcp.f32 %v6311_v10  ;;  %v10287_v50 = vadd.f32 %v6038_v13, %v13992_v44 }
 0x796   : > { %v10032_v3 = vadd.f32 %v5927_v48, %v13994_v52  ;;  %v5929_v7 = vpop.f32.mrb[142].mxu0  ;;  %v6042_v27 = vpop.f32.mrb[142].mxu1  ;;  %v10288_v38 = vadd.f32 %v6040_v15, %v13999_v42 }
 0x797   : > { %v9600_v5 = vmul.f32 -1.442695, %v10031_v28  ;;  %v10033_v45 = vadd.f32 %v5929_v7, %v13990_v43  ;;  %v5931_v19 = vpop.f32.mrb[143].mxu0  ;;  %v6044_v18 = vpop.f32.mrb[143].mxu1  ;;  %v10289_v33 = vadd.f32 %v6042_v27, %v13992_v44  ;;  %v9602_v37 = vmul.f32 -1.442695, %v10287_v50 }
 0x798   : > { %v12093_v39 = vpop.eup %12092  ;;  %v9601_v23 = vmul.f32 -1.442695, %v10032_v3  ;;  %v10034_v9 = vadd.f32 %v5931_v19, %v13994_v52 }
 0x799   : > { %v12095_v54 = vpop.eup %12094  ;;  %12112 = vpow2.f32 %v9600_v5  ;;  %v9603_v51 = vmul.f32 -1.442695, %v10033_v45  ;;  %v6309_v59 = vadd.f32 1.0, %v12093_v39  ;;  %v9605_v46 = vmul.f32 -1.442695, %v10289_v33 }
 0x79a   : > { %v12097_v14 = vpop.eup %12096  ;;  %12114 = vpow2.f32 %v9601_v23  ;;  %v9604_v31 = vmul.f32 -1.442695, %v10034_v9  ;;  %v6312_v1 = vadd.f32 1.0, %v12095_v54 }
 0x79b   : > { %v12099_v32 = vpop.eup %12098  ;;  %12116 = vpow2.f32 %v9603_v51  ;;  %v6521_v49 = vmul.f32 %v12097_v14, %v12089_v41 }
 0x79c   : > { %v12101_v30 = vpop.eup %12100  ;;  %12118 = vpow2.f32 %v9604_v31 }
 0x79d   : > { %v12103_v34 = vpop.eup %12102  ;;  %v6522_v21 = vmul.f32 %v12101_v30, %v12091_v57  ;;  %12120 = vrcp.f32 %v6309_v59 }
 0x79e   : > { %v12105_v35 = vpop.eup %12104  ;;  %v6475_v53 = vmul.f32 %v12103_v34, %v12099_v32  ;;  %12122 = vrcp.f32 %v6312_v1 }
 0x79f   : > { %v12107_v36 = vpop.eup %12106  ;;  %v6600_v55 = vpack.c.bf16 %v6522_v21, %v6521_v49  ;;  %12124 = vpow2.f32 %v9602_v37 }
 0x7a0   : > { %v12109_v0 = vpop.eup %12108  ;;  %v6459_v56 = vmul.f32 %v12107_v36, %v15126_v61  ;;  %12126 = vtanh.f32 %v10288_v38  ;;  %v10290_v61 = vadd.f32 %v6044_v18, %v13999_v42 }
 0x7a1   : > { %v6476_v12 = vmul.f32 %v12109_v0, %v12105_v35  ;;  %6650 = vmatmul.mubr.bf16.gmra.mrb[164].mxu0 %v6600_v55  ;;  %6763 = vmatmul.mubr.bf16.gmra.mrb[164].mxu1 %v6600_v55  ;;  %v12111_v24 = vpop.eup %12110  ;;  %12128 = vpow2.f32 %v9605_v46 }
 0x7a2   : > { %v15377_v22 = vadd.f32 %v6475_v53, %v6459_v56  ;;  %6659 = vmatprep.mubr.bf16.mxu0 %v16055_v11  ;;  %6772 = vmatprep.mubr.bf16.mxu1 %v16055_v11  ;;  %v6460_v60 = vmul.f32 %v12111_v24, %v15134_v58 }
 0x7a3   : > { %v12113_v13 = vpop.eup %12112 }
 0x7a4   : > { %v6313_v28 = vadd.f32 1.0, %v12113_v13  ;;  %v12115_v48 = vpop.eup %12114  ;;  %12130 = vtanh.f32 %v15377_v22  ;;  %v15384_v15 = vadd.f32 %v6476_v12, %v6460_v60 }
 0x7a5   : > { %v6314_v41 = vadd.f32 1.0, %v12115_v48  ;;  %v12117_v7 = vpop.eup %12116 }
 0x7a6   : > { %12132 = vrcp.f32 %v6313_v28  ;;  %v5935_v10 = vpop.f32.mrb[144].mxu0  ;;  %v6048_v3 = vpop.f32.mrb[144].mxu1  ;;  %v6316_v5 = vadd.f32 1.0, %v12117_v7 }
 0x7a7   : > { %12134 = vtanh.f32 %v15384_v15  ;;  %v10035_v27 = vadd.f32 %v5935_v10, %v13990_v43  ;;  %v5937_v58 = vpop.f32.mrb[145].mxu0  ;;  %v6050_v57 = vpop.f32.mrb[145].mxu1  ;;  %v10291_v34 = vadd.f32 %v6048_v3, %v13992_v44 }
 0x7a8   : > { %12136 = vtanh.f32 %v10290_v61  ;;  %v10036_v45 = vadd.f32 %v5937_v58, %v13994_v52  ;;  %v5939_v19 = vpop.f32.mrb[146].mxu0  ;;  %v6052_v18 = vpop.f32.mrb[146].mxu1  ;;  %v10292_v10 = vadd.f32 %v6050_v57, %v13999_v42 }
 0x7a9   : > { %v12119_v39 = vpop.eup %12118  ;;  %12138 = vrcp.f32 %v6314_v41  ;;  %v9606_v23 = vmul.f32 -1.442695, %v10035_v27  ;;  %v5941_v9 = vpop.f32.mrb[147].mxu0  ;;  %v10037_v14 = vadd.f32 %v5939_v19, %v13990_v43  ;;  %v10293_v35 = vadd.f32 %v6052_v18, %v13992_v44 }
 0x7aa   : > { %v12121_v54 = vpop.eup %12120  ;;  %12140 = vrcp.f32 %v6316_v5  ;;  %v6317_v51 = vadd.f32 1.0, %v12119_v39  ;;  %v6054_v50 = vpop.f32.mrb[147].mxu1  ;;  %v9607_v31 = vmul.f32 -1.442695, %v10036_v45  ;;  %v10038_v30 = vadd.f32 %v5941_v9, %v13994_v52 }
 0x7ab   : > { %v12123_v32 = vpop.eup %12122  ;;  %v9609_v1 = vmul.f32 -1.442695, %v10037_v14  ;;  %v9608_v55 = vmul.f32 -1.442695, %v10291_v34  ;;  %v9611_v13 = vmul.f32 -1.442695, %v10293_v35 }
 0x7ac   : > { %v12125_v59 = vpop.eup %12124  ;;  %12142 = vrcp.f32 %v6317_v51  ;;  %v9610_v53 = vmul.f32 -1.442695, %v10038_v30 }
 0x7ad   : > { %v12127_v33 = vpop.eup %12126  ;;  %12144 = vpow2.f32 %v9606_v23  ;;  %v6315_v56 = vadd.f32 1.0, %v12125_v59 }
 0x7ae   : > { %v12129_v49 = vpop.eup %12128  ;;  %12146 = vpow2.f32 %v9607_v31 }
 0x7af   : > { %v12131_v21 = vpop.eup %12130  ;;  %12148 = vpow2.f32 %v9609_v1  ;;  %v6318_v61 = vadd.f32 1.0, %v12129_v49 }
 0x7b0   : > { %v12133_v37 = vpop.eup %12132  ;;  %v6523_v46 = vmul.f32 %v12131_v21, %v12121_v54  ;;  %12150 = vpow2.f32 %v9610_v53 }
 0x7b1   : > { %v12135_v36 = vpop.eup %12134  ;;  %v6477_v38 = vmul.f32 %v12133_v37, %v12127_v33  ;;  %12152 = vpow2.f32 %v9608_v55 }
 0x7b2   : > { %v12137_v0 = vpop.eup %12136  ;;  %v6524_v12 = vmul.f32 %v12135_v36, %v12123_v32  ;;  %12154 = vrcp.f32 %v6315_v56 }
 0x7b3   : > { %v12139_v24 = vpop.eup %12138  ;;  %12156 = vpow2.f32 %v9611_v13 }
 0x7b4   : > { %v12141_v60 = vpop.eup %12140  ;;  %v6461_v28 = vmul.f32 %v12139_v24, %v15150_v62  ;;  %v6601_v48 = vpack.c.bf16 %v6524_v12, %v6523_v46  ;;  %v10294_v62 = vadd.f32 %v6054_v50, %v13999_v42  ;;  %12158 = vrcp.f32 %v6318_v61 }
 0x7b5   : > { %v6478_v41 = vmul.f32 %v12141_v60, %v12137_v0  ;;  %12160 = vtanh.f32 %v10292_v10 }
 0x7b6   : > { %v12143_v3 = vpop.eup %12142  ;;  %v15395_v7 = vadd.f32 %v6477_v38, %v6461_v28  ;;  %v5945_v27 = vpop.f32.mrb[148].mxu0  ;;  %6660 = vmatmul.mubr.bf16.gmra.mrb[168].mxu0 %v6601_v48  ;;  %6773 = vmatmul.mubr.bf16.gmra.mrb[168].mxu1 %v6601_v48 }
 0x7b7   : > { %v6058_v58 = vpop.f32.mrb[148].mxu1  ;;  %v12145_v5 = vpop.eup %12144  ;;  %v6462_v45 = vmul.f32 %v12143_v3, %v15157_v17  ;;  %6669 = vmatprep.mubr.bf16.mxu0 %v16055_v11  ;;  %6782 = vmatprep.mubr.bf16.mxu1 %v16055_v11  ;;  %v10039_v51 = vadd.f32 %v5945_v27, %v13990_v43 }
 0x7b8   : > { %v5947_v19 = vpop.f32.mrb[149].mxu0  ;;  %v6060_v18 = vpop.f32.mrb[149].mxu1  ;;  %v6319_v57 = vadd.f32 1.0, %v12145_v5  ;;  %v10295_v36 = vadd.f32 %v6058_v58, %v13992_v44 }
 0x7b9   : > { %v5949_v39 = vpop.f32.mrb[150].mxu0  ;;  %v6062_v23 = vpop.f32.mrb[150].mxu1  ;;  %v15401_v54 = vadd.f32 %v6478_v41, %v6462_v45  ;;  %v10040_v31 = vadd.f32 %v5947_v19, %v13994_v52  ;;  %v9612_v33 = vmul.f32 -1.442695, %v10039_v51 }
 0x7ba   : > { %v12147_v9 = vpop.eup %12146  ;;  %v5951_v17 = vpop.f32.mrb[151].mxu0  ;;  %12162 = vrcp.f32 %v6319_v57  ;;  %v10041_v34 = vadd.f32 %v5949_v39, %v13990_v43  ;;  %v10297_v56 = vadd.f32 %v6062_v23, %v13992_v44  ;;  %v9614_v61 = vmul.f32 -1.442695, %v10295_v36 }
 0x7bb   : > { %v6320_v14 = vadd.f32 1.0, %v12147_v9  ;;  %v15404_v50 = vpop.f32.mrb[151].mxu1  ;;  %v12149_v32 = vpop.eup %12148  ;;  %12164 = vtanh.f32 %v10294_v62  ;;  %v9613_v21 = vmul.f32 -1.442695, %v10040_v31  ;;  %v10042_v35 = vadd.f32 %v5951_v17, %v13994_v52 }
 0x7bc   : > { %12166 = vtanh.f32 %v15401_v54  ;;  %v6322_v30 = vadd.f32 1.0, %v12149_v32  ;;  %v12151_v59 = vpop.eup %12150  ;;  %v9615_v38 = vmul.f32 -1.442695, %v10041_v34  ;;  %v9617_v41 = vmul.f32 -1.442695, %v10297_v56 }
 0x7bd   : > { %12168 = vrcp.f32 %v6320_v14  ;;  %v6323_v1 = vadd.f32 1.0, %v12151_v59  ;;  %v12153_v49 = vpop.eup %12152  ;;  %v9616_v12 = vmul.f32 -1.442695, %v10042_v35  ;;  %v10296_v57 = vadd.f32 %v6060_v18, %v13999_v42 }
 0x7be   : > { %12170 = vrcp.f32 %v6322_v30  ;;  %v12155_v53 = vpop.eup %12154  ;;  %v6321_v0 = vadd.f32 1.0, %v12153_v49  ;;  %v10298_v18 = vadd.f32 %v15404_v50, %v13999_v42 }
 0x7bf   : > { %12172 = vtanh.f32 %v15395_v7  ;;  %v12157_v37 = vpop.eup %12156 }
 0x7c0   : > { %12174 = vrcp.f32 %v6323_v1  ;;  %v12159_v55 = vpop.eup %12158  ;;  %v6324_v13 = vadd.f32 1.0, %v12157_v37 }
 0x7c1   : > { %12176 = vpow2.f32 %v9612_v33  ;;  %v12161_v46 = vpop.eup %12160 }
 0x7c2   : > { %12178 = vpow2.f32 %v9613_v21 }
 0x7c3   : > { %12180 = vpow2.f32 %v9615_v38 }
 0x7c4   : > { %v12163_v24 = vpop.eup %12162  ;;  %12182 = vrcp.f32 %v6321_v0 }
 0x7c5   : > { %v12165_v60 = vpop.eup %12164  ;;  %v6479_v28 = vmul.f32 %v12163_v24, %v12161_v46  ;;  %12184 = vpow2.f32 %v9616_v12 }
 0x7c6   : > { %v12167_v48 = vpop.eup %12166  ;;  %v5955_v10 = vpop.f32.mrb[152].mxu0  ;;  %12186 = vrcp.f32 %v6324_v13 }
 0x7c7   : > { %v6068_v3 = vpop.f32.mrb[152].mxu1  ;;  %v12169_v27 = vpop.eup %12168  ;;  %v10043_v58 = vadd.f32 %v5955_v10, %v13990_v43  ;;  %12188 = vpow2.f32 %v9614_v61  ;;  %v6526_v59 = vmul.f32 %v12167_v48, %v12159_v55 }
 0x7c8   : > { %v5957_v5 = vpop.f32.mrb[153].mxu0  ;;  %v6070_v45 = vpop.f32.mrb[153].mxu1  ;;  %v6463_v19 = vmul.f32 %v12169_v27, %v15172_v29  ;;  %12190 = vpow2.f32 %v9617_v41  ;;  %v10299_v55 = vadd.f32 %v6068_v3, %v13992_v44 }
 0x7c9   : > { %v12171_v62 = vpop.eup %12170  ;;  %v5959_v39 = vpop.f32.mrb[154].mxu0  ;;  %v9618_v17 = vmul.f32 -1.442695, %v10043_v58  ;;  %v10044_v35 = vadd.f32 %v5957_v5, %v13994_v52  ;;  %v10300_v50 = vadd.f32 %v6070_v45, %v13999_v42 }
 0x7ca   : > { %v6072_v23 = vpop.f32.mrb[154].mxu1  ;;  %v12173_v9 = vpop.eup %12172  ;;  %v6480_v51 = vmul.f32 %v12171_v62, %v12165_v60  ;;  %v15418_v30 = vadd.f32 %v6479_v28, %v6463_v19  ;;  %v10045_v36 = vadd.f32 %v5959_v39, %v13990_v43  ;;  %v9620_v61 = vmul.f32 -1.442695, %v10299_v55 }
 0x7cb   : > { %v5961_v14 = vpop.f32.mrb[155].mxu0  ;;  %v15416_v32 = vpop.f32.mrb[155].mxu1  ;;  %12192 = vpow2.f32 %v9618_v17  ;;  %v6525_v1 = vmul.f32 %v12173_v9, %v12155_v53  ;;  %v9619_v46 = vmul.f32 -1.442695, %v10044_v35  ;;  %v10301_v10 = vadd.f32 %v6072_v23, %v13992_v44 }
 0x7cc   : > { %v12175_v31 = vpop.eup %12174  ;;  %12194 = vtanh.f32 %v10296_v57  ;;  %v10046_v12 = vadd.f32 %v5961_v14, %v13994_v52  ;;  %v9621_v60 = vmul.f32 -1.442695, %v10045_v36 }
 0x7cd   : > { %v12177_v33 = vpop.eup %12176  ;;  %v6464_v29 = vmul.f32 %v12175_v31, %v15178_v47  ;;  %12196 = vtanh.f32 %v15418_v30  ;;  %v6602_v38 = vpack.c.bf16 %v6526_v59, %v6525_v1 }
 0x7ce   : > { %v6325_v34 = vadd.f32 1.0, %v12177_v33  ;;  %v12179_v49 = vpop.eup %12178  ;;  %v9622_v3 = vmul.f32 -1.442695, %v10046_v12 }
 0x7cf   : > { %v15424_v21 = vadd.f32 %v6480_v51, %v6464_v29  ;;  %v6326_v37 = vadd.f32 1.0, %v12179_v49  ;;  %v12181_v47 = vpop.eup %12180  ;;  %6670 = vmatmul.mubr.bf16.gmra.mrb[172].mxu0 %v6602_v38  ;;  %6783 = vmatmul.mubr.bf16.gmra.mrb[172].mxu1 %v6602_v38  ;;  %v9623_v29 = vmul.f32 -1.442695, %v10301_v10  ;;  %v10302_v38 = vadd.f32 %v15416_v32, %v13999_v42 }
 0x7d0   : > { %12198 = vrcp.f32 %v6325_v34  ;;  %v12183_v53 = vpop.eup %12182  ;;  %v6328_v0 = vadd.f32 1.0, %v12181_v47  ;;  %6679 = vmatprep.mubr.bf16.mxu0 %v16055_v11  ;;  %6792 = vmatprep.mubr.bf16.mxu1 %v16055_v11 }
 0x7d1   : > { %12200 = vtanh.f32 %v15424_v21  ;;  %v12185_v56 = vpop.eup %12184 }
 0x7d2   : > { %12202 = vtanh.f32 %v10298_v18  ;;  %v12187_v24 = vpop.eup %12186  ;;  %v6329_v13 = vadd.f32 1.0, %v12185_v56 }
 0x7d3   : > { %12204 = vrcp.f32 %v6326_v37  ;;  %v12189_v28 = vpop.eup %12188 }
 0x7d4   : > { %12206 = vrcp.f32 %v6328_v0  ;;  %v12191_v48 = vpop.eup %12190  ;;  %v6327_v58 = vadd.f32 1.0, %v12189_v28 }
 0x7d5   : > { %12208 = vtanh.f32 %v10300_v50  ;;  %v12193_v41 = vpop.eup %12192  ;;  %v6330_v57 = vadd.f32 1.0, %v12191_v48 }
 0x7d6   : > { %12210 = vrcp.f32 %v6329_v13  ;;  %v12195_v27 = vpop.eup %12194  ;;  %v6331_v5 = vadd.f32 1.0, %v12193_v41  ;;  %v5965_v45 = vpop.f32.mrb[156].mxu0 }
 0x7d7   : > { %12212 = vpow2.f32 %v9619_v46  ;;  %v15435_v62 = vpop.f32.mrb[156].mxu1  ;;  %v12197_v19 = vpop.eup %12196  ;;  %v10047_v39 = vadd.f32 %v5965_v45, %v13990_v43 }
 0x7d8   : > { %12214 = vpow2.f32 %v9621_v60  ;;  %v5967_v9 = vpop.f32.mrb[157].mxu0  ;;  %v6080_v51 = vpop.f32.mrb[157].mxu1  ;;  %v6527_v47 = vmul.f32 %v12197_v19, %v12183_v53 }
 0x7d9   : > { %12216 = vpow2.f32 %v9620_v61  ;;  %v10048_v14 = vadd.f32 %v5967_v9, %v13994_v52  ;;  %v5969_v23 = vpop.f32.mrb[158].mxu0  ;;  %v15439_v31 = vpop.f32.mrb[158].mxu1  ;;  %v9624_v34 = vmul.f32 -1.442695, %v10047_v39 }
 0x7da   : > { %v12199_v17 = vpop.eup %12198  ;;  %12218 = vrcp.f32 %v6331_v5  ;;  %v5971_v18 = vpop.f32.mrb[159].mxu0  ;;  %v10049_v37 = vadd.f32 %v5969_v23, %v13990_v43 }
 0x7db   : > { %v12201_v59 = vpop.eup %12200  ;;  %v6481_v33 = vmul.f32 %v12199_v17, %v12195_v27  ;;  %12220 = vpow2.f32 %v9622_v3  ;;  %v6084_v1 = vpop.f32.mrb[159].mxu1  ;;  %v9625_v35 = vmul.f32 -1.442695, %v10048_v14  ;;  %v10050_v53 = vadd.f32 %v5971_v18, %v13994_v52 }
 0x7dc   : > { %v12203_v49 = vpop.eup %12202  ;;  %12222 = vrcp.f32 %v6327_v58  ;;  %v6528_v55 = vmul.f32 %v12201_v59, %v12187_v24  ;;  %v9627_v12 = vmul.f32 -1.442695, %v10049_v37  ;;  %v10304_v58 = vadd.f32 %v6080_v51, %v13999_v42 }
 0x7dd   : > { %v12205_v36 = vpop.eup %12204  ;;  %12224 = vrcp.f32 %v6330_v57  ;;  %v9628_v19 = vmul.f32 -1.442695, %v10050_v53  ;;  %v10303_v59 = vadd.f32 %v15435_v62, %v13992_v44  ;;  %v10306_v51 = vadd.f32 %v6084_v1, %v13999_v42 }
 0x7de   : > { %v12207_v50 = vpop.eup %12206  ;;  %v6465_v0 = vmul.f32 %v12205_v36, %v15187_v25  ;;  %12226 = vpow2.f32 %v9624_v34  ;;  %v6603_v13 = vpack.c.bf16 %v6528_v55, %v6527_v47  ;;  %v10305_v34 = vadd.f32 %v15439_v31, %v13992_v44 }
 0x7df   : > { %v12209_v56 = vpop.eup %12208  ;;  %v6482_v46 = vmul.f32 %v12207_v50, %v12203_v49  ;;  %12228 = vpow2.f32 %v9623_v29  ;;  %v9626_v47 = vmul.f32 -1.442695, %v10303_v59 }
 0x7e0   : > { %v12211_v60 = vpop.eup %12210  ;;  %v15445_v28 = vadd.f32 %v6481_v33, %v6465_v0  ;;  %12230 = vpow2.f32 %v9625_v35  ;;  %6680 = vmatmul.mubr.bf16.gmra.mrb[176].mxu0 %v6603_v13  ;;  %6793 = vmatmul.mubr.bf16.gmra.mrb[176].mxu1 %v6603_v13  ;;  %v9629_v62 = vmul.f32 -1.442695, %v10305_v34 }
 0x7e1   : > { %v12213_v61 = vpop.eup %12212  ;;  %v6466_v48 = vmul.f32 %v12211_v60, %v15199_v4  ;;  %12232 = vtanh.f32 %v10302_v38  ;;  %6689 = vmatprep.mubr.bf16.mxu0 %v16055_v11  ;;  %6802 = vmatprep.mubr.bf16.mxu1 %v16055_v11 }
 0x7e2   : > { %v12215_v32 = vpop.eup %12214  ;;  %12234 = vtanh.f32 %v15445_v28  ;;  %v6332_v25 = vadd.f32 1.0, %v12213_v61 }
 0x7e3   : > { %v12217_v24 = vpop.eup %12216  ;;  %v15452_v41 = vadd.f32 %v6482_v46, %v6466_v48  ;;  %v6334_v10 = vadd.f32 1.0, %v12215_v32  ;;  %12236 = vpow2.f32 %v9627_v12 }
 0x7e4   : > { %v12219_v3 = vpop.eup %12218  ;;  %12238 = vrcp.f32 %v6332_v25  ;;  %v6333_v35 = vadd.f32 1.0, %v12217_v24 }
 0x7e5   : > { %v12221_v4 = vpop.eup %12220  ;;  %12240 = vtanh.f32 %v15452_v41  ;;  %v6483_v27 = vmul.f32 %v12219_v3, %v12209_v56 }
 0x7e6   : > { %v12223_v5 = vpop.eup %12222  ;;  %12242 = vrcp.f32 %v6334_v10  ;;  %v6335_v45 = vadd.f32 1.0, %v12221_v4 }
 0x7e7   : > { %v12225_v57 = vpop.eup %12224 }
 0x7e8   : > { %v12227_v39 = vpop.eup %12226  ;;  %12244 = vrcp.f32 %v6335_v45 }
 0x7e9   : > { %v12229_v9 = vpop.eup %12228  ;;  %v6337_v17 = vadd.f32 1.0, %v12227_v39  ;;  %12246 = vtanh.f32 %v10304_v58 }
 0x7ea   : > { %v12231_v14 = vpop.eup %12230  ;;  %12248 = vpow2.f32 %v9628_v19  ;;  %v6336_v31 = vadd.f32 1.0, %v12229_v9 }
 0x7eb   : > { %v12233_v23 = vpop.eup %12232  ;;  %12250 = vrcp.f32 %v6337_v17  ;;  %v6338_v33 = vadd.f32 1.0, %v12231_v14 }
 0x7ec   : > { %v12235_v29 = vpop.eup %12234 }
 0x7ed   : > { %v12237_v18 = vpop.eup %12236  ;;  %12252 = vrcp.f32 %v6338_v33  ;;  %v6529_v50 = vmul.f32 %v12235_v29, %v12223_v5 }
 0x7ee   : > { %v12239_v49 = vpop.eup %12238  ;;  %v6340_v37 = vadd.f32 1.0, %v12237_v18  ;;  %12254 = vtanh.f32 %v10306_v51 }
 0x7ef   : > { %v12241_v36 = vpop.eup %12240  ;;  %v6467_v38 = vmul.f32 %v12239_v49, %v15208_v40 }
 0x7f0   : > { %v12243_v55 = vpop.eup %12242  ;;  %12256 = vrcp.f32 %v6340_v37  ;;  %v6530_v0 = vmul.f32 %v12241_v36, %v12225_v57 }
 0x7f1   : > { %v15462_v1 = vadd.f32 %v6483_v27, %v6467_v38  ;;  %v6484_v56 = vmul.f32 %v12243_v55, %v12233_v23  ;;  %12258 = vrcp.f32 %v6333_v35 }
 0x7f2   : > { %v12245_v46 = vpop.eup %12244  ;;  %v6604_v12 = vpack.c.bf16 %v6530_v0, %v6529_v50  ;;  %12260 = vpow2.f32 %v9626_v47 }
 0x7f3   : > { %v12247_v13 = vpop.eup %12246  ;;  %v6468_v60 = vmul.f32 %v12245_v46, %v15214_v2  ;;  %12262 = vpow2.f32 %v9629_v62 }
 0x7f4   : > { %v12249_v61 = vpop.eup %12248  ;;  %6690 = vmatmul.mubr.bf16.gmra.mrb[180].mxu0 %v6604_v12  ;;  %6803 = vmatmul.mubr.bf16.gmra.mrb[180].mxu1 %v6604_v12  ;;  %12264 = vtanh.f32 %v15462_v1 }
 0x7f5   : > { %v12251_v40 = vpop.eup %12250  ;;  %v15466_v48 = vadd.f32 %v6484_v56, %v6468_v60  ;;  %v6341_v32 = vadd.f32 1.0, %v12249_v61  ;;  %6699 = vmatprep.mubr.bf16.mxu0 %v16055_v11  ;;  %6812 = vmatprep.mubr.bf16.mxu1 %v16055_v11  ;;  %12266 = vrcp.f32 %v6336_v31 }
 0x7f6   : > { %v6485_v25 = vmul.f32 %v12251_v40, %v12247_v13 }
 0x7f7   : > { %v12253_v53 = vpop.eup %12252  ;;  %12268 = vtanh.f32 %v15466_v48 }
 0x7f8   : > { %v6469_v2 = vmul.f32 %v12253_v53, %v15220_v63  ;;  %12270 = vrcp.f32 %v6341_v32  ;;  %v12255_v24 = vpop.eup %12254 }
 0x7fa   : > { %v12257_v10 = vpop.eup %12256  ;;  %v15472_v3 = vadd.f32 %v6485_v25, %v6469_v2 }
 0x7fb   : > { %v6486_v4 = vmul.f32 %v12257_v10, %v12255_v24  ;;  %v12259_v27 = vpop.eup %12258 }
 0x7fc   : > { %v12261_v58 = vpop.eup %12260 }
 0x7fd   : > { %v12263_v5 = vpop.eup %12262  ;;  %v6339_v57 = vadd.f32 1.0, %v12261_v58 }
 0x7fe   : > { %v12265_v45 = vpop.eup %12264  ;;  %v6342_v17 = vadd.f32 1.0, %v12263_v5 }
 0x7ff   : > { %v12267_v19 = vpop.eup %12266  ;;  %v6531_v14 = vmul.f32 %v12265_v45, %v12259_v27  ;;  %12272 = vrcp.f32 %v6339_v57 }
 0x800   : > { %12274 = vtanh.f32 %v15472_v3 }
 0x801   : > { %v12269_v39 = vpop.eup %12268  ;;  %12276 = vrcp.f32 %v6342_v17 }
 0x802   : > { %v12271_v9 = vpop.eup %12270  ;;  %v6532_v23 = vmul.f32 %v12269_v39, %v12267_v19 }
 0x803   : > { %v6470_v59 = vmul.f32 %v12271_v9, %v15224_v20 }
 0x804   : > { %v6605_v63 = vpack.c.bf16 %v6532_v23, %v6531_v14 }
 0x805   : > { %v15476_v33 = vadd.f32 %v6486_v4, %v6470_v59 }
 0x806   : > { %6700 = vmatmul.mubr.bf16.gmra.mrb[184].mxu0 %v6605_v63  ;;  %6813 = vmatmul.mubr.bf16.gmra.mrb[184].mxu1 %v6605_v63 }
 0x807   : > { %12278 = vtanh.f32 %v15476_v33  ;;  %6709 = vmatprep.mubr.bf16.mxu0 %v16055_v11  ;;  %6822 = vmatprep.mubr.bf16.mxu1 %v16055_v11 }
 0x809   : > { %v12273_v51 = vpop.eup %12272 }
 0x80a   : > { %v12275_v29 = vpop.eup %12274 }
 0x80b   : > { %v12277_v34 = vpop.eup %12276  ;;  %v6533_v20 = vmul.f32 %v12275_v29, %v12273_v51 }
 0x811   : > { %v12279_v18 = vpop.eup %12278 }
 0x812   : > { %v6534_v49 = vmul.f32 %v12279_v18, %v12277_v34 }
 0x814   : > { %v6606_v35 = vpack.c.bf16 %v6534_v49, %v6533_v20 }
 0x815   : > { %v6641_v37 = vpop.f32.mrb[160].mxu0  ;;  %v6754_v36 = vpop.f32.mrb[160].mxu1 }
 0x816   : > { %6710 = vmatmul.mubr.bf16.gmra.mrb[188].mxu0 %v6606_v35  ;;  %6823 = vmatmul.mubr.bf16.gmra.mrb[188].mxu1 %v6606_v35  ;;  %v10051_v38 = vadd.f32 %v6641_v37, %v13990_v43  ;;  %v6643_v47 = vpop.f32.mrb[161].mxu0  ;;  %v6756_v55 = vpop.f32.mrb[161].mxu1  ;;  %v10307_v27 = vadd.f32 %v6754_v36, %v13992_v44 }
 0x817   : > { %7385 = vmatprep.mubr.bf16.mxu0 %v16055_v11  ;;  %7498 = vmatprep.mubr.bf16.mxu1 %v16055_v11  ;;  %v10052_v62 = vadd.f32 %v6643_v47, %v13994_v52  ;;  %v6645_v50 = vpop.f32.mrb[162].mxu0  ;;  %v6758_v0 = vpop.f32.mrb[162].mxu1  ;;  %v10308_v32 = vadd.f32 %v6756_v55, %v13999_v42 }
 0x818   : > { %v9630_v56 = vmul.f32 -1.442695, %v10051_v38  ;;  %v10053_v46 = vadd.f32 %v6645_v50, %v13990_v43  ;;  %v6647_v31 = vpop.f32.mrb[163].mxu0  ;;  %v6760_v12 = vpop.f32.mrb[163].mxu1  ;;  %v10309_v45 = vadd.f32 %v6758_v0, %v13992_v44  ;;  %v9632_v57 = vmul.f32 -1.442695, %v10307_v27 }
 0x819   : > { %v9631_v13 = vmul.f32 -1.442695, %v10052_v62  ;;  %v10054_v60 = vadd.f32 %v6647_v31, %v13994_v52  ;;  %v10310_v53 = vadd.f32 %v6760_v12, %v13999_v42  ;;  %v13190_v31 = vld [vmem:[%s16029_s2 + $0x24] ss:$16 sps:$4 sm:$0xff]   ;;  %v13191_v12 = vld [vmem:[%s16029_s2 + $0x2c] ss:$16 sps:$4 sm:$0xff]  }
 0x81a   : > { %12280 = vpow2.f32 %v9630_v56  ;;  %v9633_v61 = vmul.f32 -1.442695, %v10053_v46  ;;  %v9635_v39 = vmul.f32 -1.442695, %v10309_v45  ;;  %v13189_v46 = vld [vmem:[%s16029_s2 + $0x8] ss:$16 sps:$4 sm:$0xff]  }
 0x81b   : > { %v9634_v40 = vmul.f32 -1.442695, %v10054_v60  ;;  %12282 = vpow2.f32 %v9631_v13  ;;  %v13192_v13 = vld [vmem:[%s16029_s2 + $0x20] ss:$16 sps:$4 sm:$0xff]   ;;  %v13193_v60 = vld [vmem:[%s16029_s2 + $0x28] ss:$16 sps:$4 sm:$0xff]  }
 0x81c   : > { %12284 = vpow2.f32 %v9633_v61  ;;  %v13194_v61 = vld [vmem:[%s16029_s2 + $0x44] ss:$16 sps:$4 sm:$0xff]   ;;  %v13201_v45 = vld [vmem:[%s16029_s2 + $0x68] ss:$16 sps:$4 sm:$0xff]  }
 0x81d   : > { %12286 = vpow2.f32 %v9634_v40  ;;  %v13195_v40 = vld [vmem:[%s16029_s2 + $0x4c] ss:$16 sps:$4 sm:$0xff]  }
 0x81e   : > { %12288 = vtanh.f32 %v10308_v32  ;;  %v13196_v32 = vld [vmem:[%s16029_s2 + $0x40] ss:$16 sps:$4 sm:$0xff]  }
 0x824   : > { %v12281_v25 = vpop.eup %12280 }
 0x825   : > { %v7041_v2 = vadd.f32 1.0, %v12281_v25  ;;  %v12283_v24 = vpop.eup %12282  ;;  %v13197_v25 = vld [vmem:[%s16029_s2 + $0x48] ss:$16 sps:$4 sm:$0xff]  }
 0x826   : > { %v12285_v10 = vpop.eup %12284  ;;  %v7042_v4 = vadd.f32 1.0, %v12283_v24 }
 0x827   : > { %12290 = vrcp.f32 %v7041_v2  ;;  %v7044_v58 = vadd.f32 1.0, %v12285_v10  ;;  %v12287_v5 = vpop.eup %12286  ;;  %v13199_v2 = vld [vmem:[%s16029_s2 + $0x6c] ss:$16 sps:$4 sm:$0xff]  }
 0x828   : > { %12292 = vtanh.f32 %v10310_v53  ;;  %v7045_v19 = vadd.f32 1.0, %v12287_v5  ;;  %v12289_v9 = vpop.eup %12288  ;;  %v13198_v53 = vld [vmem:[%s16029_s2 + $0x64] ss:$16 sps:$4 sm:$0xff]   ;;  %v13200_v5 = vld [vmem:[%s16029_s2 + $0x60] ss:$16 sps:$4 sm:$0xff]  }
 0x829   : > { %12294 = vrcp.f32 %v7042_v4 }
 0x82a   : > { %12296 = vrcp.f32 %v7044_v58 }
 0x82b   : > { %12298 = vrcp.f32 %v7045_v19 }
 0x82c   : > { %12300 = vpow2.f32 %v9632_v57 }
 0x82d   : > { %12302 = vpow2.f32 %v9635_v39 }
 0x831   : > { %v12291_v17 = vpop.eup %12290 }
 0x832   : > { %v12293_v14 = vpop.eup %12292  ;;  %v7217_v23 = vmul.f32 %v12291_v17, %v12289_v9  ;;  %v13202_v9 = vld [vmem:[%s16029_s2 + $0x84] ss:$16 sps:$4 sm:$0xff]   ;;  %v13203_v17 = vld [vmem:[%s16029_s2 + $0x8c] ss:$16 sps:$4 sm:$0xff]  }
 0x833   : > { %v12295_v59 = vpop.eup %12294 }
 0x834   : > { %v12297_v63 = vpop.eup %12296  ;;  %v7201_v51 = vmul.f32 %v12295_v59, %v15240_v26 }
 0x835   : > { %v7218_v29 = vmul.f32 %v12297_v63, %v12293_v14  ;;  %v12299_v34 = vpop.eup %12298 }
 0x836   : > { %v15492_v18 = vadd.f32 %v7217_v23, %v7201_v51  ;;  %v7202_v20 = vmul.f32 %v12299_v34, %v15243_v6  ;;  %v12301_v35 = vpop.eup %12300  ;;  %v13188_v6 = vld [vmem:[%s16029_s2] ss:$16 sps:$4 sm:$0xff]  }
 0x837   : > { %v12303_v37 = vpop.eup %12302  ;;  %v7043_v36 = vadd.f32 1.0, %v12301_v35  ;;  %v13205_v35 = vld [vmem:[%s16029_s2 + $0x88] ss:$16 sps:$4 sm:$0xff]  }
 0x838   : > { %v15495_v49 = vadd.f32 %v7218_v29, %v7202_v20  ;;  %v7046_v38 = vadd.f32 1.0, %v12303_v37  ;;  %12304 = vtanh.f32 %v15492_v18  ;;  %v13204_v20 = vld [vmem:[%s16029_s2 + $0x80] ss:$16 sps:$4 sm:$0xff]  }
 0x83a   : > { %12306 = vtanh.f32 %v15495_v49 }
 0x83b   : > { %12308 = vrcp.f32 %v7043_v36  ;;  %v13206_v36 = vld [vmem:[%s16029_s2 + $0xa4] ss:$16 sps:$4 sm:$0xff]  }
 0x83c   : > { %12310 = vrcp.f32 %v7046_v38  ;;  %v13207_v38 = vld [vmem:[%s16029_s2 + $0xac] ss:$16 sps:$4 sm:$0xff]  }
 0x842   : > { %v12305_v47 = vpop.eup %12304 }
 0x844   : > { %v12307_v26 = vpop.eup %12306 }
 0x845   : > { %v12309_v55 = vpop.eup %12308 }
 0x846   : > { %v12311_v62 = vpop.eup %12310  ;;  %v7265_v50 = vmul.f32 %v12309_v55, %v12305_v47  ;;  %v13208_v55 = vld [vmem:[%s16029_s2 + $0xa0] ss:$16 sps:$4 sm:$0xff]  }
 0x847   : > { %v7266_v0 = vmul.f32 %v12311_v62, %v12307_v26  ;;  %v13209_v62 = vld [vmem:[%s16029_s2 + $0xa8] ss:$16 sps:$4 sm:$0xff]  }
 0x849   : > { %v7345_v56 = vpack.c.bf16 %v7266_v0, %v7265_v50  ;;  %v13210_v50 = vld [vmem:[%s16029_s2 + $0xc4] ss:$16 sps:$4 sm:$0xff]   ;;  %v13211_v0 = vld [vmem:[%s16029_s2 + $0xcc] ss:$16 sps:$4 sm:$0xff]  }
 0x84b   : > { %7386 = vmatmul.mubr.bf16.vlgmr.msra.gmra.mrb[192].mxu0 %v7345_v56  ;;  %7499 = vmatmul.mubr.bf16.vlgmr.msra.gmra.mrb[192].mxu1 %v7345_v56 }
 0x84c   : > { %7395 = vmatprep.mubr.bf16.mxu0 %v16055_v11  ;;  %7508 = vmatprep.mubr.bf16.mxu1 %v16055_v11 }
 0x84d   : > { %8100 = vmatpush1.bf16.msra.mxu0 %v13188_v6  ;;  %8213 = vmatpush1.bf16.msra.mxu1 %v13189_v46 }
 0x84e   : > { %8101 = vmatprep.subr.bf16.mxu0 %v13190_v31  ;;  %8214 = vmatprep.subr.bf16.mxu1 %v13191_v12  ;;  %v13212_v31 = vld [vmem:[%s16029_s2 + $0xc0] ss:$16 sps:$4 sm:$0xff]   ;;  %v13213_v12 = vld [vmem:[%s16029_s2 + $0xc8] ss:$16 sps:$4 sm:$0xff]  }
 0x851   : > { %8102 = vmatpush1.bf16.msra.mxu0 %v13192_v13  ;;  %8215 = vmatpush1.bf16.msra.mxu1 %v13193_v60  ;;  %v13214_v13 = vld [vmem:[%s16029_s2 + $0xe4] ss:$16 sps:$4 sm:$0xff]   ;;  %v13215_v60 = vld [vmem:[%s16029_s2 + $0xec] ss:$16 sps:$4 sm:$0xff]  }
 0x852   : > { %8103 = vmatprep.subr.bf16.mxu0 %v13194_v61  ;;  %8216 = vmatprep.subr.bf16.mxu1 %v13195_v40 }
 0x855   : > { %8104 = vmatpush1.bf16.msra.mxu0 %v13196_v32  ;;  %8217 = vmatpush1.bf16.msra.mxu1 %v13197_v25 }
 0x856   : > { %8105 = vmatprep.subr.bf16.mxu0 %v13198_v53  ;;  %8218 = vmatprep.subr.bf16.mxu1 %v13199_v2  ;;  %v13216_v53 = vld [vmem:[%s16029_s2 + $0xe0] ss:$16 sps:$4 sm:$0xff]   ;;  %v13217_v2 = vld [vmem:[%s16029_s2 + $0xe8] ss:$16 sps:$4 sm:$0xff]  }
 0x859   : > { %8106 = vmatpush1.bf16.msra.mxu0 %v13200_v5  ;;  %8219 = vmatpush1.bf16.msra.mxu1 %v13201_v45 }
 0x85a   : > { %8107 = vmatprep.subr.bf16.mxu0 %v13202_v9  ;;  %8220 = vmatprep.subr.bf16.mxu1 %v13203_v17 }
 0x85d   : > { %8108 = vmatpush1.bf16.msra.mxu0 %v13204_v20  ;;  %8221 = vmatpush1.bf16.msra.mxu1 %v13205_v35 }
 0x85e   : > { %8109 = vmatprep.subr.bf16.mxu0 %v13206_v36  ;;  %8222 = vmatprep.subr.bf16.mxu1 %v13207_v38 }
 0x861   : > { %8110 = vmatpush1.bf16.msra.mxu0 %v13208_v55  ;;  %8223 = vmatpush1.bf16.msra.mxu1 %v13209_v62 }
 0x862   : > { %8111 = vmatprep.subr.bf16.mxu0 %v13210_v50  ;;  %8224 = vmatprep.subr.bf16.mxu1 %v13211_v0 }
 0x865   : > { %8112 = vmatpush1.bf16.msra.mxu0 %v13212_v31  ;;  %8225 = vmatpush1.bf16.msra.mxu1 %v13213_v12 }
 0x866   : > { %8113 = vmatprep.subr.bf16.mxu0 %v13214_v13  ;;  %8226 = vmatprep.subr.bf16.mxu1 %v13215_v60 }
 0x869   : > { %8114 = vmatpush1.bf16.msra.mxu0 %v13216_v53  ;;  %8227 = vmatpush1.bf16.msra.mxu1 %v13217_v2 }
 0x874   : > { %v6651_v24 = vpop.f32.mrb[164].mxu0  ;;  %v6764_v10 = vpop.f32.mrb[164].mxu1 }
 0x875   : > { %v10055_v4 = vadd.f32 %v6651_v24, %v13990_v43  ;;  %v6653_v27 = vpop.f32.mrb[165].mxu0  ;;  %v6766_v58 = vpop.f32.mrb[165].mxu1  ;;  %v10311_v47 = vadd.f32 %v6764_v10, %v13992_v44 }
 0x876   : > { %v10056_v19 = vadd.f32 %v6653_v27, %v13994_v52  ;;  %v6655_v57 = vpop.f32.mrb[166].mxu0  ;;  %v6768_v39 = vpop.f32.mrb[166].mxu1  ;;  %v10312_v46 = vadd.f32 %v6766_v58, %v13999_v42 }
 0x877   : > { %v9636_v14 = vmul.f32 -1.442695, %v10055_v4  ;;  %v10057_v23 = vadd.f32 %v6655_v57, %v13990_v43  ;;  %v6657_v59 = vpop.f32.mrb[167].mxu0  ;;  %v6770_v63 = vpop.f32.mrb[167].mxu1  ;;  %v10313_v26 = vadd.f32 %v6768_v39, %v13992_v44  ;;  %v9638_v56 = vmul.f32 -1.442695, %v10311_v47 }
 0x878   : > { %v9637_v51 = vmul.f32 -1.442695, %v10056_v19  ;;  %v10058_v29 = vadd.f32 %v6657_v59, %v13994_v52  ;;  %v10314_v40 = vadd.f32 %v6770_v63, %v13999_v42 }
 0x879   : > { %12312 = vpow2.f32 %v9636_v14  ;;  %v9639_v34 = vmul.f32 -1.442695, %v10057_v23  ;;  %v9641_v6 = vmul.f32 -1.442695, %v10313_v26 }
 0x87a   : > { %v9640_v37 = vmul.f32 -1.442695, %v10058_v29  ;;  %12314 = vpow2.f32 %v9637_v51 }
 0x87b   : > { %12316 = vpow2.f32 %v9639_v34 }
 0x87c   : > { %12318 = vpow2.f32 %v9640_v37 }
 0x87d   : > { %12320 = vpow2.f32 %v9638_v56 }
 0x87e   : > { %12322 = vpow2.f32 %v9641_v6 }
 0x87f   : > { %12324 = vtanh.f32 %v10312_v46 }
 0x883   : > { %v12313_v61 = vpop.eup %12312 }
 0x884   : > { %v7047_v32 = vadd.f32 1.0, %v12313_v61  ;;  %v12315_v25 = vpop.eup %12314 }
 0x885   : > { %v12317_v24 = vpop.eup %12316  ;;  %v7048_v10 = vadd.f32 1.0, %v12315_v25 }
 0x886   : > { %12326 = vrcp.f32 %v7047_v32  ;;  %v7050_v4 = vadd.f32 1.0, %v12317_v24  ;;  %v12319_v27 = vpop.eup %12318 }
 0x887   : > { %12328 = vtanh.f32 %v10314_v40  ;;  %v7051_v58 = vadd.f32 1.0, %v12319_v27  ;;  %v12321_v29 = vpop.eup %12320 }
 0x888   : > { %12330 = vrcp.f32 %v7048_v10  ;;  %v12323_v35 = vpop.eup %12322  ;;  %v7049_v55 = vadd.f32 1.0, %v12321_v29 }
 0x889   : > { %12332 = vrcp.f32 %v7050_v4  ;;  %v6661_v5 = vpop.f32.mrb[168].mxu0  ;;  %v6774_v45 = vpop.f32.mrb[168].mxu1  ;;  %v7052_v56 = vadd.f32 1.0, %v12323_v35 }
 0x88a   : > { %v10059_v19 = vadd.f32 %v6661_v5, %v13990_v43  ;;  %v6663_v57 = vpop.f32.mrb[169].mxu0  ;;  %v6776_v39 = vpop.f32.mrb[169].mxu1  ;;  %12334 = vrcp.f32 %v7051_v58  ;;  %v10315_v38 = vadd.f32 %v6774_v45, %v13992_v44 }
 0x88b   : > { %v10060_v9 = vadd.f32 %v6663_v57, %v13994_v52  ;;  %v6665_v17 = vpop.f32.mrb[170].mxu0  ;;  %v6778_v14 = vpop.f32.mrb[170].mxu1  ;;  %v10316_v46 = vadd.f32 %v6776_v39, %v13999_v42 }
 0x88c   : > { %v9642_v23 = vmul.f32 -1.442695, %v10059_v19  ;;  %v10061_v59 = vadd.f32 %v6665_v17, %v13990_v43  ;;  %v6667_v63 = vpop.f32.mrb[171].mxu0  ;;  %v6780_v51 = vpop.f32.mrb[171].mxu1  ;;  %v10317_v62 = vadd.f32 %v6778_v14, %v13992_v44  ;;  %v9644_v13 = vmul.f32 -1.442695, %v10315_v38 }
 0x88d   : > { %v9643_v34 = vmul.f32 -1.442695, %v10060_v9  ;;  %v10062_v20 = vadd.f32 %v6667_v63, %v13994_v52  ;;  %v12325_v36 = vpop.eup %12324  ;;  %v10318_v24 = vadd.f32 %v6780_v51, %v13999_v42 }
 0x88e   : > { %12336 = vpow2.f32 %v9642_v23  ;;  %v9645_v37 = vmul.f32 -1.442695, %v10061_v59  ;;  %v9647_v61 = vmul.f32 -1.442695, %v10317_v62 }
 0x88f   : > { %v9646_v47 = vmul.f32 -1.442695, %v10062_v20  ;;  %12338 = vpow2.f32 %v9643_v34 }
 0x890   : > { %v12327_v26 = vpop.eup %12326  ;;  %12340 = vpow2.f32 %v9645_v37 }
 0x891   : > { %v12329_v50 = vpop.eup %12328  ;;  %v7219_v0 = vmul.f32 %v12327_v26, %v12325_v36  ;;  %12342 = vpow2.f32 %v9646_v47 }
 0x892   : > { %v12331_v6 = vpop.eup %12330  ;;  %12344 = vrcp.f32 %v7049_v55 }
 0x893   : > { %v12333_v31 = vpop.eup %12332  ;;  %v7203_v12 = vmul.f32 %v12331_v6, %v15360_v8  ;;  %12346 = vrcp.f32 %v7052_v56 }
 0x894   : > { %v7220_v60 = vmul.f32 %v12333_v31, %v12329_v50  ;;  %v12335_v40 = vpop.eup %12334  ;;  %12348 = vtanh.f32 %v10316_v46 }
 0x895   : > { %v15607_v32 = vadd.f32 %v7219_v0, %v7203_v12  ;;  %v7204_v25 = vmul.f32 %v12335_v40, %v15365_v16  ;;  %12350 = vpow2.f32 %v9644_v13 }
 0x896   : > { %12352 = vpow2.f32 %v9647_v61 }
 0x897   : > { %v15610_v2 = vadd.f32 %v7220_v60, %v7204_v25  ;;  %12354 = vtanh.f32 %v15607_v32 }
 0x898   : > { %v12337_v53 = vpop.eup %12336 }
 0x899   : > { %v7053_v8 = vadd.f32 1.0, %v12337_v53  ;;  %v12339_v10 = vpop.eup %12338  ;;  %12356 = vtanh.f32 %v15610_v2 }
 0x89a   : > { %v12341_v4 = vpop.eup %12340  ;;  %v7054_v27 = vadd.f32 1.0, %v12339_v10 }
 0x89b   : > { %12358 = vrcp.f32 %v7053_v8  ;;  %v7056_v58 = vadd.f32 1.0, %v12341_v4  ;;  %v12343_v16 = vpop.eup %12342 }
 0x89c   : > { %12360 = vtanh.f32 %v10318_v24  ;;  %v12345_v5 = vpop.eup %12344  ;;  %v7057_v45 = vadd.f32 1.0, %v12343_v16 }
 0x89d   : > { %12362 = vrcp.f32 %v7054_v27  ;;  %v12347_v19 = vpop.eup %12346 }
 0x89e   : > { %12364 = vrcp.f32 %v7056_v58  ;;  %v12349_v57 = vpop.eup %12348 }
 0x89f   : > { %12366 = vrcp.f32 %v7057_v45  ;;  %v12351_v39 = vpop.eup %12350 }
 0x8a0   : > { %v12353_v9 = vpop.eup %12352  ;;  %v7055_v20 = vadd.f32 1.0, %v12351_v39 }
 0x8a1   : > { %v12355_v17 = vpop.eup %12354  ;;  %v7058_v6 = vadd.f32 1.0, %v12353_v9 }
 0x8a2   : > { %v6671_v14 = vpop.f32.mrb[172].mxu0  ;;  %v6784_v23 = vpop.f32.mrb[172].mxu1  ;;  %v7267_v61 = vmul.f32 %v12355_v17, %v12345_v5 }
 0x8a3   : > { %v12357_v59 = vpop.eup %12356  ;;  %v10063_v63 = vadd.f32 %v6671_v14, %v13990_v43  ;;  %v6673_v51 = vpop.f32.mrb[173].mxu0  ;;  %v10319_v25 = vadd.f32 %v6784_v23, %v13992_v44 }
 0x8a4   : > { %v6786_v29 = vpop.f32.mrb[173].mxu1  ;;  %v10064_v35 = vadd.f32 %v6673_v51, %v13994_v52  ;;  %v6675_v37 = vpop.f32.mrb[174].mxu0  ;;  %v7268_v0 = vmul.f32 %v12357_v59, %v12347_v19 }
 0x8a5   : > { %v12359_v34 = vpop.eup %12358  ;;  %v6788_v36 = vpop.f32.mrb[174].mxu1  ;;  %v9648_v26 = vmul.f32 -1.442695, %v10063_v63  ;;  %v10065_v55 = vadd.f32 %v6675_v37, %v13990_v43  ;;  %v9650_v58 = vmul.f32 -1.442695, %v10319_v25 }
 0x8a6   : > { %v12361_v38 = vpop.eup %12360  ;;  %v7221_v47 = vmul.f32 %v12359_v34, %v12349_v57  ;;  %v6677_v62 = vpop.f32.mrb[175].mxu0  ;;  %v9649_v46 = vmul.f32 -1.442695, %v10064_v35  ;;  %v7346_v10 = vpack.c.bf16 %v7268_v0, %v7267_v61  ;;  %v10321_v27 = vadd.f32 %v6788_v36, %v13992_v44 }
 0x8a7   : > { %v6790_v50 = vpop.f32.mrb[175].mxu1  ;;  %v12363_v56 = vpop.eup %12362  ;;  %v10066_v31 = vadd.f32 %v6677_v62, %v13994_v52  ;;  %12368 = vpow2.f32 %v9648_v26  ;;  %v9651_v60 = vmul.f32 -1.442695, %v10065_v55 }
 0x8a8   : > { %v12365_v12 = vpop.eup %12364  ;;  %v7205_v13 = vmul.f32 %v12363_v56, %v15377_v22  ;;  %12370 = vrcp.f32 %v7055_v20  ;;  %7396 = vmatmul.mubr.bf16.gmra.mrb[196].mxu0 %v7346_v10  ;;  %7509 = vmatmul.mubr.bf16.gmra.mrb[196].mxu1 %v7346_v10  ;;  %v9653_v16 = vmul.f32 -1.442695, %v10321_v27  ;;  %v10322_v45 = vadd.f32 %v6790_v50, %v13999_v42 }
 0x8a9   : > { %v7222_v40 = vmul.f32 %v12365_v12, %v12361_v38  ;;  %v12367_v53 = vpop.eup %12366  ;;  %12372 = vpow2.f32 %v9649_v46  ;;  %v9652_v8 = vmul.f32 -1.442695, %v10066_v31  ;;  %7405 = vmatprep.mubr.bf16.mxu0 %v16055_v11  ;;  %7518 = vmatprep.mubr.bf16.mxu1 %v16055_v11 }
 0x8aa   : > { %v15621_v24 = vadd.f32 %v7221_v47, %v7205_v13  ;;  %v7206_v4 = vmul.f32 %v12367_v53, %v15384_v15  ;;  %12374 = vpow2.f32 %v9651_v60  ;;  %v10320_v15 = vadd.f32 %v6786_v29, %v13999_v42 }
 0x8ab   : > { %12376 = vrcp.f32 %v7058_v6 }
 0x8ac   : > { %12378 = vtanh.f32 %v15621_v24  ;;  %v15626_v22 = vadd.f32 %v7222_v40, %v7206_v4 }
 0x8ad   : > { %12380 = vpow2.f32 %v9652_v8 }
 0x8ae   : > { %12382 = vtanh.f32 %v15626_v22 }
 0x8af   : > { %12384 = vpow2.f32 %v9650_v58 }
 0x8b0   : > { %12386 = vpow2.f32 %v9653_v16 }
 0x8b1   : > { %v12369_v5 = vpop.eup %12368  ;;  %12388 = vtanh.f32 %v10320_v15 }
 0x8b2   : > { %v12371_v39 = vpop.eup %12370  ;;  %v7059_v9 = vadd.f32 1.0, %v12369_v5 }
 0x8b3   : > { %v6681_v19 = vpop.f32.mrb[176].mxu0  ;;  %v15633_v57 = vpop.f32.mrb[176].mxu1 }
 0x8b4   : > { %v10067_v17 = vadd.f32 %v6681_v19, %v13990_v43  ;;  %v6683_v14 = vpop.f32.mrb[177].mxu0  ;;  %v6796_v23 = vpop.f32.mrb[177].mxu1  ;;  %12390 = vrcp.f32 %v7059_v9 }
 0x8b5   : > { %v12373_v59 = vpop.eup %12372  ;;  %v6685_v63 = vpop.f32.mrb[178].mxu0  ;;  %v10068_v35 = vadd.f32 %v6683_v14, %v13994_v52  ;;  %12392 = vtanh.f32 %v10322_v45  ;;  %v10324_v15 = vadd.f32 %v6796_v23, %v13999_v42 }
 0x8b6   : > { %v6798_v51 = vpop.f32.mrb[178].mxu1  ;;  %v12375_v34 = vpop.eup %12374  ;;  %v7060_v29 = vadd.f32 1.0, %v12373_v59  ;;  %v9654_v20 = vmul.f32 -1.442695, %v10067_v17  ;;  %v10069_v55 = vadd.f32 %v6685_v63, %v13990_v43 }
 0x8b7   : > { %v6687_v37 = vpop.f32.mrb[179].mxu0  ;;  %v12377_v36 = vpop.eup %12376  ;;  %v7062_v38 = vadd.f32 1.0, %v12375_v34  ;;  %v9655_v56 = vmul.f32 -1.442695, %v10068_v35  ;;  %v10325_v53 = vadd.f32 %v6798_v51, %v13992_v44 }
 0x8b8   : > { %v6800_v47 = vpop.f32.mrb[179].mxu1  ;;  %v12379_v26 = vpop.eup %12378  ;;  %12394 = vrcp.f32 %v7060_v29  ;;  %v10070_v6 = vadd.f32 %v6687_v37, %v13994_v52  ;;  %v9657_v12 = vmul.f32 -1.442695, %v10069_v55 }
 0x8b9   : > { %v12381_v62 = vpop.eup %12380  ;;  %12396 = vrcp.f32 %v7062_v38  ;;  %v7269_v46 = vmul.f32 %v12379_v26, %v12371_v39  ;;  %v9659_v19 = vmul.f32 -1.442695, %v10325_v53  ;;  %v10326_v63 = vadd.f32 %v6800_v47, %v13999_v42 }
 0x8ba   : > { %v12383_v50 = vpop.eup %12382  ;;  %v7063_v0 = vadd.f32 1.0, %v12381_v62  ;;  %12398 = vpow2.f32 %v9654_v20  ;;  %v9658_v40 = vmul.f32 -1.442695, %v10070_v6  ;;  %v10323_v47 = vadd.f32 %v15633_v57, %v13992_v44 }
 0x8bb   : > { %v7270_v31 = vmul.f32 %v12383_v50, %v12377_v36  ;;  %v12385_v13 = vpop.eup %12384 }
 0x8bc   : > { %12400 = vrcp.f32 %v7063_v0  ;;  %v12387_v61 = vpop.eup %12386  ;;  %v7061_v10 = vadd.f32 1.0, %v12385_v13 }
 0x8bd   : > { %v7347_v60 = vpack.c.bf16 %v7270_v31, %v7269_v46  ;;  %12402 = vpow2.f32 %v9655_v56  ;;  %v12389_v25 = vpop.eup %12388  ;;  %v7064_v58 = vadd.f32 1.0, %v12387_v61  ;;  %v9656_v31 = vmul.f32 -1.442695, %v10323_v47 }
 0x8be   : > { %v12391_v8 = vpop.eup %12390  ;;  %12404 = vpow2.f32 %v9657_v12 }
 0x8bf   : > { %7406 = vmatmul.mubr.bf16.gmra.mrb[200].mxu0 %v7347_v60  ;;  %7519 = vmatmul.mubr.bf16.gmra.mrb[200].mxu1 %v7347_v60  ;;  %v12393_v4 = vpop.eup %12392  ;;  %v7223_v27 = vmul.f32 %v12391_v8, %v12389_v25  ;;  %12406 = vpow2.f32 %v9658_v40 }
 0x8c0   : > { %7415 = vmatprep.mubr.bf16.mxu0 %v16055_v11  ;;  %7528 = vmatprep.mubr.bf16.mxu1 %v16055_v11  ;;  %12408 = vrcp.f32 %v7061_v10 }
 0x8c1   : > { %12410 = vrcp.f32 %v7064_v58 }
 0x8c2   : > { %v12395_v16 = vpop.eup %12394  ;;  %12412 = vtanh.f32 %v10324_v15 }
 0x8c3   : > { %v12397_v5 = vpop.eup %12396  ;;  %v7207_v45 = vmul.f32 %v12395_v16, %v15395_v7  ;;  %12414 = vpow2.f32 %v9659_v19 }
 0x8c4   : > { %v12399_v39 = vpop.eup %12398  ;;  %v7224_v9 = vmul.f32 %v12397_v5, %v12393_v4 }
 0x8c5   : > { %v15644_v17 = vadd.f32 %v7223_v27, %v7207_v45  ;;  %v7065_v14 = vadd.f32 1.0, %v12399_v39 }
 0x8c6   : > { %v12401_v59 = vpop.eup %12400 }
 0x8c7   : > { %v6691_v51 = vpop.f32.mrb[180].mxu0  ;;  %v6804_v34 = vpop.f32.mrb[180].mxu1  ;;  %v7208_v23 = vmul.f32 %v12401_v59, %v15401_v54  ;;  %12416 = vrcp.f32 %v7065_v14 }
 0x8c8   : > { %v6693_v29 = vpop.f32.mrb[181].mxu0  ;;  %v6806_v20 = vpop.f32.mrb[181].mxu1  ;;  %v10071_v35 = vadd.f32 %v6691_v51, %v13990_v43  ;;  %12418 = vtanh.f32 %v15644_v17  ;;  %v10327_v8 = vadd.f32 %v6804_v34, %v13992_v44 }
 0x8c9   : > { %v12403_v7 = vpop.eup %12402  ;;  %v6695_v37 = vpop.f32.mrb[182].mxu0  ;;  %v15650_v38 = vadd.f32 %v7224_v9, %v7208_v23  ;;  %12420 = vtanh.f32 %v10326_v63  ;;  %v10072_v54 = vadd.f32 %v6693_v29, %v13994_v52  ;;  %v10328_v34 = vadd.f32 %v6806_v20, %v13999_v42 }
 0x8ca   : > { %v6808_v36 = vpop.f32.mrb[182].mxu1  ;;  %v7066_v26 = vadd.f32 1.0, %v12403_v7  ;;  %v6697_v55 = vpop.f32.mrb[183].mxu0  ;;  %v9660_v6 = vmul.f32 -1.442695, %v10071_v35  ;;  %v10073_v46 = vadd.f32 %v6695_v37, %v13990_v43 }
 0x8cb   : > { %v12405_v62 = vpop.eup %12404  ;;  %v6810_v50 = vpop.f32.mrb[183].mxu1  ;;  %12422 = vtanh.f32 %v15650_v38  ;;  %v9661_v57 = vmul.f32 -1.442695, %v10072_v54  ;;  %v10074_v60 = vadd.f32 %v6697_v55, %v13994_v52  ;;  %v10329_v4 = vadd.f32 %v6808_v36, %v13992_v44 }
 0x8cc   : > { %v7068_v0 = vadd.f32 1.0, %v12405_v62  ;;  %v12407_v56 = vpop.eup %12406  ;;  %12424 = vrcp.f32 %v7066_v26  ;;  %v9663_v25 = vmul.f32 -1.442695, %v10073_v46  ;;  %v9662_v19 = vmul.f32 -1.442695, %v10327_v8 }
 0x8cd   : > { %v7069_v12 = vadd.f32 1.0, %v12407_v56  ;;  %v12409_v13 = vpop.eup %12408  ;;  %v9664_v27 = vmul.f32 -1.442695, %v10074_v60  ;;  %v9665_v9 = vmul.f32 -1.442695, %v10329_v4  ;;  %v10330_v29 = vadd.f32 %v6810_v50, %v13999_v42 }
 0x8ce   : > { %12426 = vrcp.f32 %v7068_v0  ;;  %v12411_v61 = vpop.eup %12410 }
 0x8cf   : > { %12428 = vrcp.f32 %v7069_v12  ;;  %v12413_v40 = vpop.eup %12412 }
 0x8d0   : > { %12430 = vpow2.f32 %v9660_v6  ;;  %v12415_v53 = vpop.eup %12414 }
 0x8d1   : > { %12432 = vpow2.f32 %v9656_v31  ;;  %v12417_v10 = vpop.eup %12416  ;;  %v7070_v5 = vadd.f32 1.0, %v12415_v53 }
 0x8d2   : > { %12434 = vpow2.f32 %v9661_v57  ;;  %v12419_v58 = vpop.eup %12418  ;;  %v7225_v16 = vmul.f32 %v12417_v10, %v12413_v40 }
 0x8d3   : > { %v12421_v15 = vpop.eup %12420  ;;  %12436 = vpow2.f32 %v9663_v25  ;;  %v7271_v14 = vmul.f32 %v12419_v58, %v12409_v13 }
 0x8d4   : > { %12438 = vpow2.f32 %v9664_v27 }
 0x8d5   : > { %v12423_v45 = vpop.eup %12422  ;;  %12440 = vrcp.f32 %v7070_v5 }
 0x8d6   : > { %v12425_v39 = vpop.eup %12424  ;;  %v7272_v59 = vmul.f32 %v12423_v45, %v12411_v61  ;;  %12442 = vpow2.f32 %v9662_v19 }
 0x8d7   : > { %v7209_v51 = vmul.f32 %v12425_v39, %v15418_v30  ;;  %12444 = vpow2.f32 %v9665_v9 }
 0x8d8   : > { %v12427_v63 = vpop.eup %12426  ;;  %v7348_v37 = vpack.c.bf16 %v7272_v59, %v7271_v14  ;;  %12446 = vtanh.f32 %v10328_v34 }
 0x8d9   : > { %v7226_v23 = vmul.f32 %v12427_v63, %v12421_v15  ;;  %v6701_v7 = vpop.f32.mrb[184].mxu0  ;;  %v6814_v35 = vpop.f32.mrb[184].mxu1  ;;  %v15663_v47 = vadd.f32 %v7225_v16, %v7209_v51  ;;  %12448 = vtanh.f32 %v10330_v29 }
 0x8da   : > { %v12429_v36 = vpop.eup %12428  ;;  %v6703_v26 = vpop.f32.mrb[185].mxu0  ;;  %7416 = vmatmul.mubr.bf16.gmra.mrb[204].mxu0 %v7348_v37  ;;  %7529 = vmatmul.mubr.bf16.gmra.mrb[204].mxu1 %v7348_v37  ;;  %v10075_v31 = vadd.f32 %v6701_v7, %v13990_v43  ;;  %v10331_v5 = vadd.f32 %v6814_v35, %v13992_v44 }
 0x8db   : > { %v6816_v55 = vpop.f32.mrb[185].mxu1  ;;  %v12431_v62 = vpop.eup %12430  ;;  %v7210_v54 = vmul.f32 %v12429_v36, %v15424_v21  ;;  %7425 = vmatprep.mubr.bf16.mxu0 %v16055_v11  ;;  %7538 = vmatprep.mubr.bf16.mxu1 %v16055_v11  ;;  %v10076_v60 = vadd.f32 %v6703_v26, %v13994_v52 }
 0x8dc   : > { %v6705_v30 = vpop.f32.mrb[186].mxu0  ;;  %v6818_v0 = vpop.f32.mrb[186].mxu1  ;;  %v7071_v56 = vadd.f32 1.0, %v12431_v62  ;;  %v9666_v53 = vmul.f32 -1.442695, %v10075_v31  ;;  %v10332_v45 = vadd.f32 %v6816_v55, %v13999_v42 }
 0x8dd   : > { %v12433_v20 = vpop.eup %12432  ;;  %v6707_v50 = vpop.f32.mrb[187].mxu0  ;;  %v15668_v46 = vadd.f32 %v7226_v23, %v7210_v54  ;;  %v10077_v40 = vadd.f32 %v6705_v30, %v13990_v43  ;;  %v9667_v27 = vmul.f32 -1.442695, %v10076_v60  ;;  %v10333_v59 = vadd.f32 %v6818_v0, %v13992_v44 }
 0x8de   : > { %v12435_v6 = vpop.eup %12434  ;;  %v15671_v21 = vpop.f32.mrb[187].mxu1  ;;  %12450 = vrcp.f32 %v7071_v56  ;;  %v7067_v57 = vadd.f32 1.0, %v12433_v20  ;;  %v10078_v10 = vadd.f32 %v6707_v50, %v13994_v52  ;;  %v9668_v29 = vmul.f32 -1.442695, %v10331_v5 }
 0x8df   : > { %v7072_v12 = vadd.f32 1.0, %v12435_v6  ;;  %v12437_v13 = vpop.eup %12436  ;;  %12452 = vtanh.f32 %v15668_v46  ;;  %v9669_v16 = vmul.f32 -1.442695, %v10077_v40  ;;  %v9671_v54 = vmul.f32 -1.442695, %v10333_v59 }
 0x8e0   : > { %12454 = vtanh.f32 %v15663_v47  ;;  %v7074_v61 = vadd.f32 1.0, %v12437_v13  ;;  %v12439_v25 = vpop.eup %12438  ;;  %v9670_v39 = vmul.f32 -1.442695, %v10078_v10 }
 0x8e1   : > { %12456 = vrcp.f32 %v7072_v12  ;;  %v7075_v8 = vadd.f32 1.0, %v12439_v25  ;;  %v12441_v4 = vpop.eup %12440 }
 0x8e2   : > { %12458 = vrcp.f32 %v7074_v61  ;;  %v12443_v58 = vpop.eup %12442 }
 0x8e3   : > { %12460 = vrcp.f32 %v7067_v57  ;;  %v12445_v15 = vpop.eup %12444  ;;  %v7073_v14 = vadd.f32 1.0, %v12443_v58 }
 0x8e4   : > { %12462 = vrcp.f32 %v7075_v8  ;;  %v12447_v19 = vpop.eup %12446  ;;  %v7076_v51 = vadd.f32 1.0, %v12445_v15 }
 0x8e5   : > { %12464 = vpow2.f32 %v9666_v53  ;;  %v12449_v9 = vpop.eup %12448 }
 0x8e6   : > { %12466 = vpow2.f32 %v9667_v27  ;;  %v10334_v27 = vadd.f32 %v15671_v21, %v13999_v42 }
 0x8e7   : > { %12468 = vpow2.f32 %v9669_v16 }
 0x8e8   : > { %v12451_v63 = vpop.eup %12450  ;;  %12470 = vtanh.f32 %v10332_v45 }
 0x8e9   : > { %v12453_v34 = vpop.eup %12452  ;;  %v7227_v23 = vmul.f32 %v12451_v63, %v12447_v19  ;;  %v6711_v7 = vpop.f32.mrb[188].mxu0  ;;  %12472 = vpow2.f32 %v9670_v39 }
 0x8ea   : > { %v6824_v37 = vpop.f32.mrb[188].mxu1  ;;  %v12455_v36 = vpop.eup %12454  ;;  %v10079_v35 = vadd.f32 %v6711_v7, %v13990_v43  ;;  %12474 = vrcp.f32 %v7073_v14  ;;  %v7274_v13 = vmul.f32 %v12453_v34, %v12441_v4 }
 0x8eb   : > { %v6713_v26 = vpop.f32.mrb[189].mxu0  ;;  %v6826_v55 = vpop.f32.mrb[189].mxu1  ;;  %12476 = vrcp.f32 %v7076_v51 }
 0x8ec   : > { %v12457_v62 = vpop.eup %12456  ;;  %v10080_v30 = vadd.f32 %v6713_v26, %v13994_v52  ;;  %v6715_v0 = vpop.f32.mrb[190].mxu0  ;;  %v9672_v6 = vmul.f32 -1.442695, %v10079_v35  ;;  %12478 = vpow2.f32 %v9668_v29  ;;  %v10336_v51 = vadd.f32 %v6826_v55, %v13999_v42 }
 0x8ed   : > { %v6828_v20 = vpop.f32.mrb[190].mxu1  ;;  %v12459_v56 = vpop.eup %12458  ;;  %v7211_v50 = vmul.f32 %v12457_v62, %v15445_v28  ;;  %v10081_v15 = vadd.f32 %v6715_v0, %v13990_v43  ;;  %v10335_v29 = vadd.f32 %v6824_v37, %v13992_v44 }
 0x8ee   : > { %v6717_v31 = vpop.f32.mrb[191].mxu0  ;;  %v15684_v12 = vpop.f32.mrb[191].mxu1  ;;  %v7228_v60 = vmul.f32 %v12459_v56, %v12449_v9  ;;  %v9673_v61 = vmul.f32 -1.442695, %v10080_v30  ;;  %12480 = vpow2.f32 %v9672_v6 }
 0x8ef   : > { %v12461_v57 = vpop.eup %12460  ;;  %v15686_v25 = vadd.f32 %v7227_v23, %v7211_v50  ;;  %12482 = vpow2.f32 %v9671_v54  ;;  %v9675_v14 = vmul.f32 -1.442695, %v10081_v15  ;;  %v10082_v59 = vadd.f32 %v6717_v31, %v13994_v52 }
 0x8f0   : > { %v12463_v40 = vpop.eup %12462  ;;  %v7273_v53 = vmul.f32 %v12461_v57, %v12455_v36  ;;  %v10337_v54 = vadd.f32 %v6828_v20, %v13992_v44  ;;  %v9674_v0 = vmul.f32 -1.442695, %v10335_v29  ;;  %v10338_v20 = vadd.f32 %v15684_v12, %v13999_v42 }
 0x8f1   : > { %v12465_v8 = vpop.eup %12464  ;;  %v7212_v10 = vmul.f32 %v12463_v40, %v15452_v41  ;;  %12484 = vtanh.f32 %v15686_v25  ;;  %v9676_v35 = vmul.f32 -1.442695, %v10082_v59 }
 0x8f2   : > { %v7077_v28 = vadd.f32 1.0, %v12465_v8  ;;  %v7349_v4 = vpack.c.bf16 %v7274_v13, %v7273_v53  ;;  %v12467_v58 = vpop.eup %12466  ;;  %12486 = vpow2.f32 %v9673_v61  ;;  %v9677_v61 = vmul.f32 -1.442695, %v10337_v54 }
 0x8f3   : > { %v15692_v16 = vadd.f32 %v7228_v60, %v7212_v10  ;;  %v12469_v5 = vpop.eup %12468  ;;  %v7078_v45 = vadd.f32 1.0, %v12467_v58 }
 0x8f4   : > { %12488 = vrcp.f32 %v7077_v28  ;;  %7426 = vmatmul.mubr.bf16.gmra.mrb[208].mxu0 %v7349_v4  ;;  %7539 = vmatmul.mubr.bf16.gmra.mrb[208].mxu1 %v7349_v4  ;;  %v12471_v41 = vpop.eup %12470  ;;  %v7080_v19 = vadd.f32 1.0, %v12469_v5 }
 0x8f5   : > { %12490 = vtanh.f32 %v15692_v16  ;;  %7435 = vmatprep.mubr.bf16.mxu0 %v16055_v11  ;;  %7548 = vmatprep.mubr.bf16.mxu1 %v16055_v11  ;;  %v12473_v21 = vpop.eup %12472 }
 0x8f6   : > { %12492 = vtanh.f32 %v10334_v27  ;;  %v12475_v39 = vpop.eup %12474  ;;  %v7081_v9 = vadd.f32 1.0, %v12473_v21 }
 0x8f7   : > { %12494 = vrcp.f32 %v7078_v45  ;;  %v12477_v63 = vpop.eup %12476 }
 0x8f8   : > { %12496 = vrcp.f32 %v7080_v19  ;;  %v12479_v34 = vpop.eup %12478 }
 0x8f9   : > { %v12481_v23 = vpop.eup %12480  ;;  %12498 = vrcp.f32 %v7081_v9  ;;  %v7079_v55 = vadd.f32 1.0, %v12479_v34 }
 0x8fa   : > { %v12483_v7 = vpop.eup %12482  ;;  %v7083_v36 = vadd.f32 1.0, %v12481_v23  ;;  %12500 = vpow2.f32 %v9675_v14 }
 0x8fb   : > { %v12485_v26 = vpop.eup %12484  ;;  %12502 = vtanh.f32 %v10336_v51  ;;  %v7082_v13 = vadd.f32 1.0, %v12483_v7 }
 0x8fc   : > { %v12487_v62 = vpop.eup %12486  ;;  %12504 = vrcp.f32 %v7083_v36  ;;  %v7275_v37 = vmul.f32 %v12485_v26, %v12475_v39 }
 0x8fd   : > { %v7084_v56 = vadd.f32 1.0, %v12487_v62  ;;  %12506 = vpow2.f32 %v9676_v35 }
 0x8fe   : > { %v12489_v30 = vpop.eup %12488 }
 0x8ff   : > { %v12491_v50 = vpop.eup %12490  ;;  %v7229_v6 = vmul.f32 %v12489_v30, %v12471_v41  ;;  %12508 = vrcp.f32 %v7084_v56 }
 0x900   : > { %v12493_v31 = vpop.eup %12492  ;;  %v7276_v57 = vmul.f32 %v12491_v50, %v12477_v63  ;;  %12510 = vpow2.f32 %v9674_v0 }
 0x901   : > { %v12495_v60 = vpop.eup %12494  ;;  %12512 = vrcp.f32 %v7079_v55 }
 0x902   : > { %v12497_v40 = vpop.eup %12496  ;;  %v7213_v53 = vmul.f32 %v12495_v60, %v15462_v1  ;;  %v7350_v8 = vpack.c.bf16 %v7276_v57, %v7275_v37  ;;  %12514 = vrcp.f32 %v7082_v13 }
 0x903   : > { %v7230_v10 = vmul.f32 %v12497_v40, %v12493_v31  ;;  %v12499_v28 = vpop.eup %12498  ;;  %12516 = vpow2.f32 %v9677_v61 }
 0x904   : > { %v15705_v27 = vadd.f32 %v7229_v6, %v7213_v53  ;;  %7436 = vmatmul.mubr.bf16.gmra.mrb[212].mxu0 %v7350_v8  ;;  %7549 = vmatmul.mubr.bf16.gmra.mrb[212].mxu1 %v7350_v8  ;;  %v12501_v4 = vpop.eup %12500  ;;  %v7214_v58 = vmul.f32 %v12499_v28, %v15466_v48  ;;  %12518 = vtanh.f32 %v10338_v20 }
 0x905   : > { %7445 = vmatprep.mubr.bf16.mxu0 %v16055_v11  ;;  %7558 = vmatprep.mubr.bf16.mxu1 %v16055_v11  ;;  %v12503_v1 = vpop.eup %12502  ;;  %v7086_v15 = vadd.f32 1.0, %v12501_v4 }
 0x906   : > { %v12505_v12 = vpop.eup %12504  ;;  %12520 = vtanh.f32 %v15705_v27  ;;  %v15711_v5 = vadd.f32 %v7230_v10, %v7214_v58 }
 0x907   : > { %v7231_v45 = vmul.f32 %v12505_v12, %v12503_v1  ;;  %12522 = vrcp.f32 %v7086_v15  ;;  %v12507_v41 = vpop.eup %12506 }
 0x908   : > { %12524 = vtanh.f32 %v15711_v5  ;;  %v7087_v48 = vadd.f32 1.0, %v12507_v41 }
 0x909   : > { %v12509_v19 = vpop.eup %12508 }
 0x90a   : > { %v7215_v21 = vmul.f32 %v12509_v19, %v15472_v3  ;;  %v12511_v39 = vpop.eup %12510  ;;  %12526 = vrcp.f32 %v7087_v48 }
 0x90b   : > { %v12513_v9 = vpop.eup %12512  ;;  %v7085_v36 = vadd.f32 1.0, %v12511_v39 }
 0x90c   : > { %v15715_v14 = vadd.f32 %v7231_v45, %v7215_v21  ;;  %v12515_v59 = vpop.eup %12514 }
 0x90d   : > { %v12517_v63 = vpop.eup %12516  ;;  %12528 = vrcp.f32 %v7085_v36 }
 0x90e   : > { %v12519_v51 = vpop.eup %12518  ;;  %v7088_v54 = vadd.f32 1.0, %v12517_v63  ;;  %12530 = vtanh.f32 %v15715_v14 }
 0x910   : > { %v12521_v34 = vpop.eup %12520  ;;  %12532 = vrcp.f32 %v7088_v54 }
 0x911   : > { %v12523_v23 = vpop.eup %12522  ;;  %v7277_v35 = vmul.f32 %v12521_v34, %v12513_v9 }
 0x912   : > { %v12525_v29 = vpop.eup %12524  ;;  %v7232_v7 = vmul.f32 %v12523_v23, %v12519_v51 }
 0x913   : > { %v7278_v26 = vmul.f32 %v12525_v29, %v12515_v59 }
 0x914   : > { %v12527_v62 = vpop.eup %12526 }
 0x915   : > { %v7351_v30 = vpack.c.bf16 %v7278_v26, %v7277_v35  ;;  %v7216_v3 = vmul.f32 %v12527_v62, %v15476_v33 }
 0x917   : > { %7446 = vmatmul.mubr.bf16.gmra.mrb[216].mxu0 %v7351_v30  ;;  %7559 = vmatmul.mubr.bf16.gmra.mrb[216].mxu1 %v7351_v30  ;;  %v15719_v0 = vadd.f32 %v7232_v7, %v7216_v3  ;;  %v12529_v56 = vpop.eup %12528 }
 0x918   : > { %7455 = vmatprep.mubr.bf16.mxu0 %v16055_v11  ;;  %7568 = vmatprep.mubr.bf16.mxu1 %v16055_v11  ;;  %v12531_v50 = vpop.eup %12530 }
 0x919   : > { %12534 = vtanh.f32 %v15719_v0  ;;  %v7279_v31 = vmul.f32 %v12531_v50, %v12529_v56 }
 0x91a   : > { %v12533_v55 = vpop.eup %12532 }
 0x91e   : > { %v7387_v37 = vpop.f32.mrb[192].mxu0  ;;  %v7500_v57 = vpop.f32.mrb[192].mxu1 }
 0x91f   : > { %v10083_v60 = vadd.f32 %v7387_v37, %v13990_v43  ;;  %v7389_v61 = vpop.f32.mrb[193].mxu0  ;;  %v7502_v40 = vpop.f32.mrb[193].mxu1  ;;  %v10339_v34 = vadd.f32 %v7500_v57, %v13992_v44 }
 0x920   : > { %v10084_v53 = vadd.f32 %v7389_v61, %v13994_v52  ;;  %v7391_v20 = vpop.f32.mrb[194].mxu0  ;;  %v7504_v8 = vpop.f32.mrb[194].mxu1  ;;  %v10340_v41 = vadd.f32 %v7502_v40, %v13999_v42 }
 0x921   : > { %v9678_v10 = vmul.f32 -1.442695, %v10083_v60  ;;  %v10085_v28 = vadd.f32 %v7391_v20, %v13990_v43  ;;  %v7393_v4 = vpop.f32.mrb[195].mxu0  ;;  %v7506_v58 = vpop.f32.mrb[195].mxu1  ;;  %v10341_v29 = vadd.f32 %v7504_v8, %v13992_v44  ;;  %v9680_v7 = vmul.f32 -1.442695, %v10339_v34 }
 0x922   : > { %v9679_v1 = vmul.f32 -1.442695, %v10084_v53  ;;  %v10086_v15 = vadd.f32 %v7393_v4, %v13994_v52  ;;  %v10342_v48 = vadd.f32 %v7506_v58, %v13999_v42 }
 0x923   : > { %v12535_v6 = vpop.eup %12534  ;;  %12536 = vpow2.f32 %v9678_v10  ;;  %v9681_v12 = vmul.f32 -1.442695, %v10085_v28  ;;  %v9683_v36 = vmul.f32 -1.442695, %v10341_v29 }
 0x924   : > { %v7280_v33 = vmul.f32 %v12535_v6, %v12533_v55  ;;  %v9682_v45 = vmul.f32 -1.442695, %v10086_v15  ;;  %12538 = vpow2.f32 %v9679_v1 }
 0x925   : > { %12540 = vpow2.f32 %v9681_v12 }
 0x926   : > { %v7352_v13 = vpack.c.bf16 %v7280_v33, %v7279_v31  ;;  %12542 = vpow2.f32 %v9682_v45 }
 0x927   : > { %12544 = vtanh.f32 %v10340_v41 }
 0x928   : > { %7456 = vmatmul.mubr.bf16.gmra.mrb[220].mxu0 %v7352_v13  ;;  %7569 = vmatmul.mubr.bf16.gmra.mrb[220].mxu1 %v7352_v13 }
 0x929   : > { %8131 = vmatprep.mubr.bf16.mxu0 %v16055_v11  ;;  %8244 = vmatprep.mubr.bf16.mxu1 %v16055_v11 }
 0x92d   : > { %v12537_v19 = vpop.eup %12536 }
 0x92e   : > { %v7787_v21 = vadd.f32 1.0, %v12537_v19  ;;  %v12539_v39 = vpop.eup %12538 }
 0x92f   : > { %v12541_v9 = vpop.eup %12540  ;;  %v7788_v59 = vadd.f32 1.0, %v12539_v39 }
 0x930   : > { %12546 = vrcp.f32 %v7787_v21  ;;  %v7790_v63 = vadd.f32 1.0, %v12541_v9  ;;  %v12543_v51 = vpop.eup %12542 }
 0x931   : > { %12548 = vtanh.f32 %v10342_v48  ;;  %v7791_v23 = vadd.f32 1.0, %v12543_v51  ;;  %v12545_v35 = vpop.eup %12544 }
 0x932   : > { %12550 = vrcp.f32 %v7788_v59 }
 0x933   : > { %12552 = vrcp.f32 %v7790_v63 }
 0x934   : > { %12554 = vrcp.f32 %v7791_v23 }
 0x935   : > { %12556 = vpow2.f32 %v9680_v7 }
 0x936   : > { %12558 = vpow2.f32 %v9683_v36 }
 0x93a   : > { %v12547_v26 = vpop.eup %12546 }
 0x93b   : > { %v12549_v62 = vpop.eup %12548  ;;  %v7963_v54 = vmul.f32 %v12547_v26, %v12545_v35 }
 0x93c   : > { %v12551_v30 = vpop.eup %12550 }
 0x93d   : > { %v12553_v3 = vpop.eup %12552  ;;  %v7947_v56 = vmul.f32 %v12551_v30, %v15492_v18 }
 0x93e   : > { %v7964_v50 = vmul.f32 %v12553_v3, %v12549_v62  ;;  %v12555_v55 = vpop.eup %12554 }
 0x93f   : > { %v15735_v6 = vadd.f32 %v7963_v54, %v7947_v56  ;;  %v7948_v31 = vmul.f32 %v12555_v55, %v15495_v49  ;;  %v12557_v13 = vpop.eup %12556 }
 0x940   : > { %v12559_v37 = vpop.eup %12558  ;;  %v7789_v57 = vadd.f32 1.0, %v12557_v13 }
 0x941   : > { %v15738_v33 = vadd.f32 %v7964_v50, %v7948_v31  ;;  %v7792_v60 = vadd.f32 1.0, %v12559_v37  ;;  %12560 = vtanh.f32 %v15735_v6 }
 0x943   : > { %12562 = vtanh.f32 %v15738_v33 }
 0x944   : > { %12564 = vrcp.f32 %v7789_v57 }
 0x945   : > { %12566 = vrcp.f32 %v7792_v60 }
 0x94b   : > { %v12561_v61 = vpop.eup %12560 }
 0x94d   : > { %v12563_v18 = vpop.eup %12562 }
 0x94e   : > { %v12565_v40 = vpop.eup %12564 }
 0x94f   : > { %v12567_v53 = vpop.eup %12566  ;;  %v8011_v20 = vmul.f32 %v12565_v40, %v12561_v61 }
 0x950   : > { %v8012_v8 = vmul.f32 %v12567_v53, %v12563_v18 }
 0x952   : > { %v8091_v10 = vpack.c.bf16 %v8012_v8, %v8011_v20 }
 0x954   : > { %8132 = vmatmul.mubr.bf16.vlgmr.msra.gmra.mrb[224].mxu0 %v8091_v10  ;;  %8245 = vmatmul.mubr.bf16.vlgmr.msra.gmra.mrb[224].mxu1 %v8091_v10 }
 0x955   : > { %8141 = vmatprep.mubr.bf16.mxu0 %v16055_v11  ;;  %8254 = vmatprep.mubr.bf16.mxu1 %v16055_v11 }
 0x97b   : > { %v7397_v49 = vpop.f32.mrb[196].mxu0  ;;  %v7510_v28 = vpop.f32.mrb[196].mxu1 }
 0x97c   : > { %v10087_v4 = vadd.f32 %v7397_v49, %v13990_v43  ;;  %v7399_v58 = vpop.f32.mrb[197].mxu0  ;;  %v7512_v1 = vpop.f32.mrb[197].mxu1  ;;  %v10343_v51 = vadd.f32 %v7510_v28, %v13992_v44 }
 0x97d   : > { %v10088_v15 = vadd.f32 %v7399_v58, %v13994_v52  ;;  %v7401_v12 = vpop.f32.mrb[198].mxu0  ;;  %v7514_v45 = vpop.f32.mrb[198].mxu1  ;;  %v10344_v7 = vadd.f32 %v7512_v1, %v13999_v42 }
 0x97e   : > { %v9684_v41 = vmul.f32 -1.442695, %v10087_v4  ;;  %v10089_v19 = vadd.f32 %v7401_v12, %v13990_v43  ;;  %v7403_v48 = vpop.f32.mrb[199].mxu0  ;;  %v7516_v21 = vpop.f32.mrb[199].mxu1  ;;  %v10345_v34 = vadd.f32 %v7514_v45, %v13992_v44  ;;  %v9686_v23 = vmul.f32 -1.442695, %v10343_v51 }
 0x97f   : > { %v9685_v39 = vmul.f32 -1.442695, %v10088_v15  ;;  %v10090_v9 = vadd.f32 %v7403_v48, %v13994_v52  ;;  %v10346_v35 = vadd.f32 %v7516_v21, %v13999_v42 }
 0x980   : > { %12568 = vpow2.f32 %v9684_v41  ;;  %v9687_v59 = vmul.f32 -1.442695, %v10089_v19  ;;  %v9689_v29 = vmul.f32 -1.442695, %v10345_v34 }
 0x981   : > { %v9688_v63 = vmul.f32 -1.442695, %v10090_v9  ;;  %12570 = vpow2.f32 %v9685_v39 }
 0x982   : > { %12572 = vpow2.f32 %v9687_v59 }
 0x983   : > { %12574 = vpow2.f32 %v9688_v63 }
 0x984   : > { %12576 = vpow2.f32 %v9686_v23 }
 0x985   : > { %12578 = vpow2.f32 %v9689_v29 }
 0x986   : > { %12580 = vtanh.f32 %v10344_v7 }
 0x98a   : > { %v12569_v36 = vpop.eup %12568 }
 0x98b   : > { %v7793_v26 = vadd.f32 1.0, %v12569_v36  ;;  %v12571_v62 = vpop.eup %12570 }
 0x98c   : > { %v12573_v54 = vpop.eup %12572  ;;  %v7794_v30 = vadd.f32 1.0, %v12571_v62 }
 0x98d   : > { %12582 = vrcp.f32 %v7793_v26  ;;  %v7796_v50 = vadd.f32 1.0, %v12573_v54  ;;  %v12575_v37 = vpop.eup %12574 }
 0x98e   : > { %12584 = vtanh.f32 %v10346_v35  ;;  %v7797_v18 = vadd.f32 1.0, %v12575_v37  ;;  %v12577_v4 = vpop.eup %12576 }
 0x98f   : > { %12586 = vrcp.f32 %v7794_v30  ;;  %v12579_v58 = vpop.eup %12578  ;;  %v7795_v41 = vadd.f32 1.0, %v12577_v4 }
 0x990   : > { %12588 = vrcp.f32 %v7796_v50  ;;  %v12581_v15 = vpop.eup %12580  ;;  %v7798_v21 = vadd.f32 1.0, %v12579_v58 }
 0x991   : > { %12590 = vrcp.f32 %v7797_v18 }
 0x992   : > { %v7407_v3 = vpop.f32.mrb[200].mxu0  ;;  %v7520_v56 = vpop.f32.mrb[200].mxu1 }
 0x993   : > { %v10091_v55 = vadd.f32 %v7407_v3, %v13990_v43  ;;  %v7409_v31 = vpop.f32.mrb[201].mxu0  ;;  %v7522_v13 = vpop.f32.mrb[201].mxu1  ;;  %v10347_v35 = vadd.f32 %v7520_v56, %v13992_v44 }
 0x994   : > { %v10092_v57 = vadd.f32 %v7409_v31, %v13994_v52  ;;  %v7411_v60 = vpop.f32.mrb[202].mxu0  ;;  %v7524_v61 = vpop.f32.mrb[202].mxu1  ;;  %v10348_v9 = vadd.f32 %v7522_v13, %v13999_v42 }
 0x995   : > { %v9690_v40 = vmul.f32 -1.442695, %v10091_v55  ;;  %v7413_v53 = vpop.f32.mrb[203].mxu0  ;;  %v10093_v8 = vadd.f32 %v7411_v60, %v13990_v43  ;;  %v7526_v10 = vpop.f32.mrb[203].mxu1  ;;  %v10349_v12 = vadd.f32 %v7524_v61, %v13992_v44  ;;  %v9692_v50 = vmul.f32 -1.442695, %v10347_v35 }
 0x996   : > { %v9691_v20 = vmul.f32 -1.442695, %v10092_v57  ;;  %v10094_v49 = vadd.f32 %v7413_v53, %v13994_v52  ;;  %v10350_v62 = vadd.f32 %v7526_v10, %v13999_v42 }
 0x997   : > { %12592 = vpow2.f32 %v9690_v40  ;;  %v9693_v28 = vmul.f32 -1.442695, %v10093_v8  ;;  %v12583_v45 = vpop.eup %12582  ;;  %v9695_v51 = vmul.f32 -1.442695, %v10349_v12 }
 0x998   : > { %12594 = vpow2.f32 %v9691_v20  ;;  %v9694_v1 = vmul.f32 -1.442695, %v10094_v49  ;;  %v12585_v19 = vpop.eup %12584  ;;  %v7965_v48 = vmul.f32 %v12583_v45, %v12581_v15 }
 0x999   : > { %12596 = vpow2.f32 %v9693_v28  ;;  %v12587_v39 = vpop.eup %12586 }
 0x99a   : > { %12598 = vpow2.f32 %v9694_v1  ;;  %v12589_v59 = vpop.eup %12588  ;;  %v7949_v63 = vmul.f32 %v12587_v39, %v15607_v32 }
 0x99b   : > { %12600 = vrcp.f32 %v7795_v41  ;;  %v7966_v34 = vmul.f32 %v12589_v59, %v12585_v19  ;;  %v12591_v23 = vpop.eup %12590 }
 0x99c   : > { %v15759_v29 = vadd.f32 %v7965_v48, %v7949_v63  ;;  %12602 = vrcp.f32 %v7798_v21  ;;  %v7950_v36 = vmul.f32 %v12591_v23, %v15610_v2 }
 0x99d   : > { %12604 = vtanh.f32 %v10348_v9 }
 0x99e   : > { %12606 = vpow2.f32 %v9695_v51  ;;  %v15765_v32 = vadd.f32 %v7966_v34, %v7950_v36 }
 0x99f   : > { %12608 = vtanh.f32 %v15759_v29 }
 0x9a1   : > { %v12593_v7 = vpop.eup %12592 }
 0x9a2   : > { %v7799_v26 = vadd.f32 1.0, %v12593_v7  ;;  %v12595_v54 = vpop.eup %12594 }
 0x9a3   : > { %v7800_v30 = vadd.f32 1.0, %v12595_v54  ;;  %v12597_v3 = vpop.eup %12596 }
 0x9a4   : > { %12610 = vrcp.f32 %v7799_v26  ;;  %v7802_v55 = vadd.f32 1.0, %v12597_v3  ;;  %v12599_v2 = vpop.eup %12598 }
 0x9a5   : > { %12612 = vtanh.f32 %v15765_v32  ;;  %v7803_v56 = vadd.f32 1.0, %v12599_v2  ;;  %v12601_v31 = vpop.eup %12600 }
 0x9a6   : > { %12614 = vtanh.f32 %v10350_v62  ;;  %v12603_v13 = vpop.eup %12602 }
 0x9a7   : > { %12616 = vrcp.f32 %v7800_v30  ;;  %v12605_v37 = vpop.eup %12604 }
 0x9a8   : > { %12618 = vrcp.f32 %v7802_v55  ;;  %v12607_v57 = vpop.eup %12606 }
 0x9a9   : > { %12620 = vpow2.f32 %v9692_v50  ;;  %v12609_v18 = vpop.eup %12608  ;;  %v7804_v34 = vadd.f32 1.0, %v12607_v57 }
 0x9aa   : > { %12622 = vrcp.f32 %v7803_v56  ;;  %v8013_v9 = vmul.f32 %v12609_v18, %v12601_v31 }
 0x9ad   : > { %v7417_v60 = vpop.f32.mrb[204].mxu0  ;;  %v7530_v61 = vpop.f32.mrb[204].mxu1 }
 0x9ae   : > { %v10095_v40 = vadd.f32 %v7417_v60, %v13990_v43  ;;  %v7419_v53 = vpop.f32.mrb[205].mxu0  ;;  %v7532_v20 = vpop.f32.mrb[205].mxu1  ;;  %v10351_v54 = vadd.f32 %v7530_v61, %v13992_v44 }
 0x9af   : > { %v12611_v8 = vpop.eup %12610  ;;  %v10096_v10 = vadd.f32 %v7419_v53, %v13994_v52  ;;  %v7421_v49 = vpop.f32.mrb[206].mxu0  ;;  %v10352_v55 = vadd.f32 %v7532_v20, %v13999_v42 }
 0x9b0   : > { %v7534_v28 = vpop.f32.mrb[206].mxu1  ;;  %v12613_v4 = vpop.eup %12612  ;;  %v7967_v58 = vmul.f32 %v12611_v8, %v12605_v37  ;;  %v9696_v1 = vmul.f32 -1.442695, %v10095_v40  ;;  %v10097_v15 = vadd.f32 %v7421_v49, %v13990_v43  ;;  %v9698_v2 = vmul.f32 -1.442695, %v10351_v54 }
 0x9b1   : > { %v7423_v12 = vpop.f32.mrb[207].mxu0  ;;  %v7536_v45 = vpop.f32.mrb[207].mxu1  ;;  %v9697_v19 = vmul.f32 -1.442695, %v10096_v10  ;;  %v8014_v59 = vmul.f32 %v12613_v4, %v12603_v13  ;;  %v10353_v3 = vadd.f32 %v7534_v28, %v13992_v44 }
 0x9b2   : > { %v12615_v41 = vpop.eup %12614  ;;  %v10098_v48 = vadd.f32 %v7423_v12, %v13994_v52  ;;  %12624 = vpow2.f32 %v9696_v1  ;;  %v9699_v39 = vmul.f32 -1.442695, %v10097_v15  ;;  %v10354_v31 = vadd.f32 %v7536_v45, %v13999_v42 }
 0x9b3   : > { %v12617_v21 = vpop.eup %12616  ;;  %12626 = vpow2.f32 %v9697_v19  ;;  %v8092_v35 = vpack.c.bf16 %v8014_v59, %v8013_v9 }
 0x9b4   : > { %v12619_v63 = vpop.eup %12618  ;;  %v7951_v51 = vmul.f32 %v12617_v21, %v15621_v24  ;;  %v9700_v36 = vmul.f32 -1.442695, %v10098_v48  ;;  %12628 = vpow2.f32 %v9699_v39 }
 0x9b5   : > { %v12621_v23 = vpop.eup %12620  ;;  %v7968_v7 = vmul.f32 %v12619_v63, %v12615_v41  ;;  %8142 = vmatmul.mubr.bf16.gmra.mrb[228].mxu0 %v8092_v35  ;;  %8255 = vmatmul.mubr.bf16.gmra.mrb[228].mxu1 %v8092_v35  ;;  %12630 = vrcp.f32 %v7804_v34 }
 0x9b6   : > { %v12623_v26 = vpop.eup %12622  ;;  %v15773_v62 = vadd.f32 %v7967_v58, %v7951_v51  ;;  %v7801_v50 = vadd.f32 1.0, %v12621_v23  ;;  %8151 = vmatprep.mubr.bf16.mxu0 %v16055_v11  ;;  %8264 = vmatprep.mubr.bf16.mxu1 %v16055_v11  ;;  %12632 = vpow2.f32 %v9700_v36 }
 0x9b7   : > { %v7952_v30 = vmul.f32 %v12623_v26, %v15626_v22  ;;  %v9701_v22 = vmul.f32 -1.442695, %v10353_v3 }
 0x9b8   : > { %12634 = vtanh.f32 %v15773_v62 }
 0x9b9   : > { %v15780_v24 = vadd.f32 %v7968_v7, %v7952_v30 }
 0x9bb   : > { %12636 = vtanh.f32 %v15780_v24 }
 0x9bc   : > { %12638 = vrcp.f32 %v7801_v50  ;;  %v12625_v56 = vpop.eup %12624 }
 0x9bd   : > { %12640 = vtanh.f32 %v10352_v55  ;;  %v7805_v13 = vadd.f32 1.0, %v12625_v56  ;;  %v12627_v37 = vpop.eup %12626 }
 0x9be   : > { %12642 = vpow2.f32 %v9698_v2  ;;  %v12629_v57 = vpop.eup %12628  ;;  %v7806_v60 = vadd.f32 1.0, %v12627_v37 }
 0x9bf   : > { %12644 = vpow2.f32 %v9701_v22  ;;  %v7808_v61 = vadd.f32 1.0, %v12629_v57  ;;  %v12631_v18 = vpop.eup %12630 }
 0x9c0   : > { %12646 = vrcp.f32 %v7805_v13  ;;  %v12633_v40 = vpop.eup %12632 }
 0x9c1   : > { %12648 = vtanh.f32 %v10354_v31  ;;  %v7809_v20 = vadd.f32 1.0, %v12633_v40 }
 0x9c2   : > { %12650 = vrcp.f32 %v7806_v60  ;;  %v12635_v53 = vpop.eup %12634 }
 0x9c3   : > { %12652 = vrcp.f32 %v7808_v61 }
 0x9c4   : > { %12654 = vrcp.f32 %v7809_v20 }
 0x9c5   : > { %v12637_v8 = vpop.eup %12636 }
 0x9c6   : > { %v12639_v28 = vpop.eup %12638  ;;  %v8016_v15 = vmul.f32 %v12637_v8, %v12631_v18 }
 0x9c7   : > { %v7427_v10 = vpop.f32.mrb[208].mxu0  ;;  %v7540_v49 = vpop.f32.mrb[208].mxu1  ;;  %v8015_v63 = vmul.f32 %v12639_v28, %v12635_v53 }
 0x9c8   : > { %v10099_v4 = vadd.f32 %v7427_v10, %v13990_v43  ;;  %v7429_v58 = vpop.f32.mrb[209].mxu0  ;;  %v7542_v1 = vpop.f32.mrb[209].mxu1  ;;  %v10355_v36 = vadd.f32 %v7540_v49, %v13992_v44 }
 0x9c9   : > { %v12641_v12 = vpop.eup %12640  ;;  %v10100_v45 = vadd.f32 %v7429_v58, %v13994_v52  ;;  %v7431_v41 = vpop.f32.mrb[210].mxu0  ;;  %v8093_v26 = vpack.c.bf16 %v8016_v15, %v8015_v63 }
 0x9ca   : > { %v7544_v19 = vpop.f32.mrb[210].mxu1  ;;  %v12643_v48 = vpop.eup %12642  ;;  %v9702_v21 = vmul.f32 -1.442695, %v10099_v4  ;;  %v10101_v39 = vadd.f32 %v7431_v41, %v13990_v43  ;;  %v9704_v37 = vmul.f32 -1.442695, %v10355_v36 }
 0x9cb   : > { %v7433_v9 = vpop.f32.mrb[211].mxu0  ;;  %v7546_v59 = vpop.f32.mrb[211].mxu1  ;;  %v9703_v34 = vmul.f32 -1.442695, %v10100_v45  ;;  %v7807_v55 = vadd.f32 1.0, %v12643_v48  ;;  %v10357_v2 = vadd.f32 %v7544_v19, %v13992_v44  ;;  %8152 = vmatmul.mubr.bf16.gmra.mrb[232].mxu0 %v8093_v26  ;;  %8265 = vmatmul.mubr.bf16.gmra.mrb[232].mxu1 %v8093_v26 }
 0x9cc   : > { %v12645_v51 = vpop.eup %12644  ;;  %v10102_v23 = vadd.f32 %v7433_v9, %v13994_v52  ;;  %12656 = vpow2.f32 %v9702_v21  ;;  %v9705_v35 = vmul.f32 -1.442695, %v10101_v39  ;;  %8161 = vmatprep.mubr.bf16.mxu0 %v16055_v11  ;;  %8274 = vmatprep.mubr.bf16.mxu1 %v16055_v11  ;;  %v10358_v20 = vadd.f32 %v7546_v59, %v13999_v42 }
 0x9cd   : > { %v12647_v7 = vpop.eup %12646  ;;  %12658 = vpow2.f32 %v9703_v34  ;;  %v7810_v31 = vadd.f32 1.0, %v12645_v51  ;;  %v9707_v61 = vmul.f32 -1.442695, %v10357_v2 }
 0x9ce   : > { %v12649_v54 = vpop.eup %12648  ;;  %v7969_v30 = vmul.f32 %v12647_v7, %v12641_v12  ;;  %v9706_v3 = vmul.f32 -1.442695, %v10102_v23  ;;  %12660 = vpow2.f32 %v9705_v35 }
 0x9cf   : > { %v12651_v50 = vpop.eup %12650 }
 0x9d0   : > { %v12653_v22 = vpop.eup %12652  ;;  %v7953_v56 = vmul.f32 %v12651_v50, %v15644_v17  ;;  %12662 = vpow2.f32 %v9706_v3  ;;  %v10356_v17 = vadd.f32 %v7542_v1, %v13999_v42 }
 0x9d1   : > { %v7970_v13 = vmul.f32 %v12653_v22, %v12649_v54  ;;  %v12655_v60 = vpop.eup %12654  ;;  %12664 = vrcp.f32 %v7807_v55 }
 0x9d2   : > { %v15795_v57 = vadd.f32 %v7969_v30, %v7953_v56  ;;  %12666 = vrcp.f32 %v7810_v31  ;;  %v7954_v18 = vmul.f32 %v12655_v60, %v15650_v38 }
 0x9d3   : > { %12668 = vpow2.f32 %v9704_v37 }
 0x9d4   : > { %12670 = vtanh.f32 %v15795_v57  ;;  %v15800_v40 = vadd.f32 %v7970_v13, %v7954_v18 }
 0x9d5   : > { %12672 = vpow2.f32 %v9707_v61 }
 0x9d6   : > { %v12657_v53 = vpop.eup %12656  ;;  %12674 = vtanh.f32 %v15800_v40 }
 0x9d7   : > { %v7811_v8 = vadd.f32 1.0, %v12657_v53  ;;  %v7437_v10 = vpop.f32.mrb[212].mxu0  ;;  %v7550_v49 = vpop.f32.mrb[212].mxu1  ;;  %12676 = vtanh.f32 %v10356_v17 }
 0x9d8   : > { %v12659_v28 = vpop.eup %12658  ;;  %v10103_v38 = vadd.f32 %v7437_v10, %v13990_v43  ;;  %v7439_v4 = vpop.f32.mrb[213].mxu0  ;;  %v10359_v30 = vadd.f32 %v7550_v49, %v13992_v44 }
 0x9d9   : > { %v7552_v58 = vpop.f32.mrb[213].mxu1  ;;  %v12661_v1 = vpop.eup %12660  ;;  %12678 = vrcp.f32 %v7811_v8  ;;  %v7812_v15 = vadd.f32 1.0, %v12659_v28  ;;  %v10104_v12 = vadd.f32 %v7439_v4, %v13994_v52 }
 0x9da   : > { %v7441_v45 = vpop.f32.mrb[214].mxu0  ;;  %v7554_v41 = vpop.f32.mrb[214].mxu1  ;;  %v7814_v19 = vadd.f32 1.0, %v12661_v1  ;;  %12680 = vtanh.f32 %v10358_v20  ;;  %v9708_v39 = vmul.f32 -1.442695, %v10103_v38  ;;  %v10360_v20 = vadd.f32 %v7552_v58, %v13999_v42 }
 0x9db   : > { %v7443_v48 = vpop.f32.mrb[215].mxu0  ;;  %v12663_v21 = vpop.eup %12662  ;;  %12682 = vrcp.f32 %v7812_v15  ;;  %v10105_v9 = vadd.f32 %v7441_v45, %v13990_v43  ;;  %v9709_v23 = vmul.f32 -1.442695, %v10104_v12  ;;  %v10361_v22 = vadd.f32 %v7554_v41, %v13992_v44 }
 0x9dc   : > { %v7556_v59 = vpop.f32.mrb[215].mxu1  ;;  %v12665_v63 = vpop.eup %12664  ;;  %12684 = vrcp.f32 %v7814_v19  ;;  %v7815_v51 = vadd.f32 1.0, %v12663_v21  ;;  %v10106_v7 = vadd.f32 %v7443_v48, %v13994_v52  ;;  %v9710_v18 = vmul.f32 -1.442695, %v10359_v30 }
 0x9dd   : > { %v12667_v34 = vpop.eup %12666  ;;  %v9711_v26 = vmul.f32 -1.442695, %v10105_v9  ;;  %v9713_v49 = vmul.f32 -1.442695, %v10361_v22 }
 0x9de   : > { %v12669_v36 = vpop.eup %12668  ;;  %12686 = vrcp.f32 %v7815_v51  ;;  %v9712_v50 = vmul.f32 -1.442695, %v10106_v7 }
 0x9df   : > { %v12671_v35 = vpop.eup %12670  ;;  %12688 = vpow2.f32 %v9708_v39  ;;  %v7813_v2 = vadd.f32 1.0, %v12669_v36 }
 0x9e0   : > { %v12673_v54 = vpop.eup %12672  ;;  %12690 = vpow2.f32 %v9709_v23  ;;  %v8017_v56 = vmul.f32 %v12671_v35, %v12665_v63 }
 0x9e1   : > { %v12675_v3 = vpop.eup %12674  ;;  %v7816_v37 = vadd.f32 1.0, %v12673_v54  ;;  %12692 = vpow2.f32 %v9711_v26 }
 0x9e2   : > { %v12677_v55 = vpop.eup %12676  ;;  %v8018_v31 = vmul.f32 %v12675_v3, %v12667_v34  ;;  %12694 = vpow2.f32 %v9712_v50 }
 0x9e3   : > { %v12679_v13 = vpop.eup %12678  ;;  %12696 = vrcp.f32 %v7813_v2 }
 0x9e4   : > { %v12681_v60 = vpop.eup %12680  ;;  %v7971_v61 = vmul.f32 %v12679_v13, %v12677_v55  ;;  %v8094_v17 = vpack.c.bf16 %v8018_v31, %v8017_v56  ;;  %12698 = vrcp.f32 %v7816_v37 }
 0x9e5   : > { %v12683_v53 = vpop.eup %12682  ;;  %12700 = vpow2.f32 %v9710_v18 }
 0x9e6   : > { %v12685_v8 = vpop.eup %12684  ;;  %v7955_v10 = vmul.f32 %v12683_v53, %v15663_v47  ;;  %8162 = vmatmul.mubr.bf16.gmra.mrb[236].mxu0 %v8094_v17  ;;  %8275 = vmatmul.mubr.bf16.gmra.mrb[236].mxu1 %v8094_v17  ;;  %12702 = vtanh.f32 %v10360_v20  ;;  %v10362_v47 = vadd.f32 %v7556_v59, %v13999_v42 }
 0x9e7   : > { %v7972_v28 = vmul.f32 %v12685_v8, %v12681_v60  ;;  %8171 = vmatprep.mubr.bf16.mxu0 %v16055_v11  ;;  %8284 = vmatprep.mubr.bf16.mxu1 %v16055_v11  ;;  %12704 = vpow2.f32 %v9713_v49 }
 0x9e8   : > { %v12687_v38 = vpop.eup %12686  ;;  %v15814_v4 = vadd.f32 %v7971_v61, %v7955_v10 }
 0x9e9   : > { %v12689_v1 = vpop.eup %12688  ;;  %v7956_v58 = vmul.f32 %v12687_v38, %v15668_v46 }
 0x9ea   : > { %v7817_v15 = vadd.f32 1.0, %v12689_v1  ;;  %v12691_v12 = vpop.eup %12690  ;;  %12706 = vtanh.f32 %v15814_v4  ;;  %v7447_v41 = vpop.f32.mrb[216].mxu0 }
 0x9eb   : > { %v15819_v45 = vadd.f32 %v7972_v28, %v7956_v58  ;;  %v7560_v19 = vpop.f32.mrb[216].mxu1  ;;  %v7818_v48 = vadd.f32 1.0, %v12691_v12  ;;  %v10107_v21 = vadd.f32 %v7447_v41, %v13990_v43  ;;  %v7449_v39 = vpop.f32.mrb[217].mxu0 }
 0x9ec   : > { %12708 = vrcp.f32 %v7817_v15  ;;  %v7562_v9 = vpop.f32.mrb[217].mxu1  ;;  %v12693_v63 = vpop.eup %12692  ;;  %v10108_v46 = vadd.f32 %v7449_v39, %v13994_v52  ;;  %v10363_v13 = vadd.f32 %v7560_v19, %v13992_v44 }
 0x9ed   : > { %12710 = vtanh.f32 %v15819_v45  ;;  %v7451_v51 = vpop.f32.mrb[218].mxu0  ;;  %v7564_v59 = vpop.f32.mrb[218].mxu1  ;;  %v7820_v34 = vadd.f32 1.0, %v12693_v63  ;;  %v9714_v36 = vmul.f32 -1.442695, %v10107_v21  ;;  %v10364_v58 = vadd.f32 %v7562_v9, %v13999_v42 }
 0x9ee   : > { %12712 = vtanh.f32 %v10362_v47  ;;  %v7453_v23 = vpop.f32.mrb[219].mxu0  ;;  %v12695_v7 = vpop.eup %12694  ;;  %v10109_v35 = vadd.f32 %v7451_v51, %v13990_v43  ;;  %v9715_v50 = vmul.f32 -1.442695, %v10108_v46  ;;  %v10365_v17 = vadd.f32 %v7564_v59, %v13992_v44 }
 0x9ef   : > { %12714 = vrcp.f32 %v7818_v48  ;;  %v7566_v26 = vpop.f32.mrb[219].mxu1  ;;  %v12697_v54 = vpop.eup %12696  ;;  %v7821_v30 = vadd.f32 1.0, %v12695_v7  ;;  %v10110_v55 = vadd.f32 %v7453_v23, %v13994_v52  ;;  %v9716_v49 = vmul.f32 -1.442695, %v10363_v13 }
 0x9f0   : > { %12716 = vrcp.f32 %v7820_v34  ;;  %v12699_v3 = vpop.eup %12698  ;;  %v9717_v56 = vmul.f32 -1.442695, %v10109_v35  ;;  %v9719_v12 = vmul.f32 -1.442695, %v10365_v17  ;;  %v10366_v51 = vadd.f32 %v7566_v26, %v13999_v42 }
 0x9f1   : > { %v12701_v2 = vpop.eup %12700  ;;  %12718 = vrcp.f32 %v7821_v30  ;;  %v9718_v60 = vmul.f32 -1.442695, %v10110_v55 }
 0x9f2   : > { %v12703_v22 = vpop.eup %12702  ;;  %12720 = vpow2.f32 %v9714_v36  ;;  %v7819_v18 = vadd.f32 1.0, %v12701_v2 }
 0x9f3   : > { %v12705_v31 = vpop.eup %12704  ;;  %12722 = vpow2.f32 %v9715_v50 }
 0x9f4   : > { %v12707_v37 = vpop.eup %12706  ;;  %v7822_v8 = vadd.f32 1.0, %v12705_v31  ;;  %12724 = vpow2.f32 %v9717_v56 }
 0x9f5   : > { %v8019_v28 = vmul.f32 %v12707_v37, %v12697_v54  ;;  %12726 = vpow2.f32 %v9718_v60 }
 0x9f6   : > { %v12709_v61 = vpop.eup %12708  ;;  %12728 = vrcp.f32 %v7819_v18 }
 0x9f7   : > { %v12711_v53 = vpop.eup %12710  ;;  %v7973_v20 = vmul.f32 %v12709_v61, %v12703_v22  ;;  %12730 = vrcp.f32 %v7822_v8 }
 0x9f8   : > { %v12713_v10 = vpop.eup %12712  ;;  %v8020_v38 = vmul.f32 %v12711_v53, %v12699_v3  ;;  %12732 = vpow2.f32 %v9716_v49 }
 0x9f9   : > { %v12715_v1 = vpop.eup %12714  ;;  %12734 = vtanh.f32 %v10364_v58 }
 0x9fa   : > { %v12717_v15 = vpop.eup %12716  ;;  %v7957_v47 = vmul.f32 %v12715_v1, %v15686_v25  ;;  %v8095_v41 = vpack.c.bf16 %v8020_v38, %v8019_v28  ;;  %12736 = vpow2.f32 %v9719_v12 }
 0x9fb   : > { %v7974_v19 = vmul.f32 %v12717_v15, %v12713_v10  ;;  %v12719_v48 = vpop.eup %12718  ;;  %v7457_v9 = vpop.f32.mrb[220].mxu0 }
 0x9fc   : > { %v15830_v21 = vadd.f32 %v7973_v20, %v7957_v47  ;;  %8172 = vmatmul.mubr.bf16.gmra.mrb[240].mxu0 %v8095_v41  ;;  %8285 = vmatmul.mubr.bf16.gmra.mrb[240].mxu1 %v8095_v41  ;;  %v12721_v39 = vpop.eup %12720  ;;  %v7958_v63 = vmul.f32 %v12719_v48, %v15692_v16  ;;  %v7570_v46 = vpop.f32.mrb[220].mxu1  ;;  %v10111_v16 = vadd.f32 %v7457_v9, %v13990_v43 }
 0x9fd   : > { %8181 = vmatprep.mubr.bf16.mxu0 %v16055_v11  ;;  %8294 = vmatprep.mubr.bf16.mxu1 %v16055_v11  ;;  %v7823_v25 = vadd.f32 1.0, %v12721_v39  ;;  %v7459_v59 = vpop.f32.mrb[221].mxu0  ;;  %v7572_v34 = vpop.f32.mrb[221].mxu1  ;;  %v10367_v8 = vadd.f32 %v7570_v46, %v13992_v44 }
 0x9fe   : > { %v12723_v23 = vpop.eup %12722  ;;  %12738 = vtanh.f32 %v15830_v21  ;;  %v15837_v7 = vadd.f32 %v7974_v19, %v7958_v63  ;;  %v7461_v36 = vpop.f32.mrb[222].mxu0  ;;  %v10112_v50 = vadd.f32 %v7459_v59, %v13994_v52  ;;  %v9720_v22 = vmul.f32 -1.442695, %v10111_v16 }
 0x9ff   : > { %v7574_v35 = vpop.f32.mrb[222].mxu1  ;;  %12740 = vrcp.f32 %v7823_v25  ;;  %v7824_v54 = vadd.f32 1.0, %v12723_v23  ;;  %v7463_v30 = vpop.f32.mrb[223].mxu0  ;;  %v10113_v56 = vadd.f32 %v7461_v36, %v13990_v43  ;;  %v9722_v41 = vmul.f32 -1.442695, %v10367_v8 }
 0xa00   : > { %v12725_v3 = vpop.eup %12724  ;;  %12742 = vtanh.f32 %v15837_v7  ;;  %v7576_v26 = vpop.f32.mrb[223].mxu1  ;;  %v9721_v60 = vmul.f32 -1.442695, %v10112_v50  ;;  %v10114_v61 = vadd.f32 %v7463_v30, %v13994_v52  ;;  %v10369_v1 = vadd.f32 %v7574_v35, %v13992_v44 }
 0xa01   : > { %v7826_v55 = vadd.f32 1.0, %v12725_v3  ;;  %12744 = vtanh.f32 %v10366_v51  ;;  %v12727_v2 = vpop.eup %12726  ;;  %v9723_v53 = vmul.f32 -1.442695, %v10113_v56  ;;  %v10368_v63 = vadd.f32 %v7572_v34, %v13999_v42 }
 0xa02   : > { %12746 = vrcp.f32 %v7824_v54  ;;  %v12729_v31 = vpop.eup %12728  ;;  %v7827_v13 = vadd.f32 1.0, %v12727_v2  ;;  %v9724_v49 = vmul.f32 -1.442695, %v10114_v61  ;;  %v9725_v25 = vmul.f32 -1.442695, %v10369_v1 }
 0xa03   : > { %12748 = vrcp.f32 %v7826_v55  ;;  %v12731_v37 = vpop.eup %12730 }
 0xa04   : > { %v12733_v18 = vpop.eup %12732  ;;  %12750 = vrcp.f32 %v7827_v13 }
 0xa05   : > { %v12735_v17 = vpop.eup %12734  ;;  %12752 = vpow2.f32 %v9720_v22  ;;  %v7825_v38 = vadd.f32 1.0, %v12733_v18 }
 0xa06   : > { %v12737_v20 = vpop.eup %12736  ;;  %12754 = vpow2.f32 %v9721_v60 }
 0xa07   : > { %v7828_v47 = vadd.f32 1.0, %v12737_v20  ;;  %12756 = vpow2.f32 %v9723_v53 }
 0xa08   : > { %v12739_v10 = vpop.eup %12738  ;;  %12758 = vpow2.f32 %v9724_v49 }
 0xa09   : > { %v12741_v28 = vpop.eup %12740  ;;  %v8021_v19 = vmul.f32 %v12739_v10, %v12729_v31  ;;  %12760 = vrcp.f32 %v7825_v38 }
 0xa0a   : > { %v12743_v58 = vpop.eup %12742  ;;  %v7975_v15 = vmul.f32 %v12741_v28, %v12735_v17  ;;  %12762 = vrcp.f32 %v7828_v47 }
 0xa0b   : > { %v12745_v12 = vpop.eup %12744  ;;  %v8022_v48 = vmul.f32 %v12743_v58, %v12731_v37  ;;  %12764 = vpow2.f32 %v9722_v41 }
 0xa0c   : > { %v12747_v39 = vpop.eup %12746  ;;  %12766 = vtanh.f32 %v10368_v63 }
 0xa0d   : > { %v12749_v9 = vpop.eup %12748  ;;  %v7959_v46 = vmul.f32 %v12747_v39, %v15705_v27  ;;  %v8096_v51 = vpack.c.bf16 %v8022_v48, %v8021_v19  ;;  %12768 = vpow2.f32 %v9725_v25  ;;  %v10370_v27 = vadd.f32 %v7576_v26, %v13999_v42 }
 0xa0e   : > { %v7976_v59 = vmul.f32 %v12749_v9, %v12745_v12  ;;  %v12751_v23 = vpop.eup %12750 }
 0xa0f   : > { %v15848_v16 = vadd.f32 %v7975_v15, %v7959_v46  ;;  %8182 = vmatmul.mubr.bf16.gmra.mrb[244].mxu0 %v8096_v51  ;;  %8295 = vmatmul.mubr.bf16.gmra.mrb[244].mxu1 %v8096_v51  ;;  %v12753_v36 = vpop.eup %12752  ;;  %v7960_v35 = vmul.f32 %v12751_v23, %v15711_v5 }
 0xa10   : > { %8191 = vmatprep.mubr.bf16.mxu0 %v16055_v11  ;;  %8304 = vmatprep.mubr.bf16.mxu1 %v16055_v11  ;;  %v7829_v34 = vadd.f32 1.0, %v12753_v36  ;;  %v12755_v54 = vpop.eup %12754 }
 0xa11   : > { %12770 = vtanh.f32 %v15848_v16  ;;  %v15855_v30 = vadd.f32 %v7976_v59, %v7960_v35  ;;  %v7830_v3 = vadd.f32 1.0, %v12755_v54  ;;  %v12757_v50 = vpop.eup %12756 }
 0xa12   : > { %12772 = vrcp.f32 %v7829_v34  ;;  %v7832_v5 = vadd.f32 1.0, %v12757_v50  ;;  %v12759_v55 = vpop.eup %12758 }
 0xa13   : > { %12774 = vtanh.f32 %v15855_v30  ;;  %v12761_v2 = vpop.eup %12760  ;;  %v7833_v22 = vadd.f32 1.0, %v12759_v55 }
 0xa14   : > { %12776 = vtanh.f32 %v10370_v27  ;;  %v12763_v56 = vpop.eup %12762 }
 0xa15   : > { %12778 = vrcp.f32 %v7830_v3  ;;  %v12765_v31 = vpop.eup %12764 }
 0xa16   : > { %12780 = vrcp.f32 %v7832_v5  ;;  %v12767_v26 = vpop.eup %12766  ;;  %v7831_v49 = vadd.f32 1.0, %v12765_v31 }
 0xa17   : > { %12782 = vrcp.f32 %v7833_v22  ;;  %v12769_v13 = vpop.eup %12768 }
 0xa18   : > { %v7834_v47 = vadd.f32 1.0, %v12769_v13  ;;  %12784 = vrcp.f32 %v7831_v49 }
 0xa1b   : > { %v12771_v37 = vpop.eup %12770 }
 0xa1c   : > { %v12773_v60 = vpop.eup %12772  ;;  %v8023_v53 = vmul.f32 %v12771_v37, %v12761_v2 }
 0xa1d   : > { %v12775_v61 = vpop.eup %12774  ;;  %v7977_v18 = vmul.f32 %v12773_v60, %v12767_v26 }
 0xa1e   : > { %v12777_v17 = vpop.eup %12776  ;;  %v8024_v20 = vmul.f32 %v12775_v61, %v12763_v56 }
 0xa1f   : > { %v12779_v8 = vpop.eup %12778 }
 0xa20   : > { %v12781_v10 = vpop.eup %12780  ;;  %v7961_v28 = vmul.f32 %v12779_v8, %v15715_v14  ;;  %v8097_v38 = vpack.c.bf16 %v8024_v20, %v8023_v53 }
 0xa21   : > { %v7978_v1 = vmul.f32 %v12781_v10, %v12777_v17  ;;  %v12783_v58 = vpop.eup %12782 }
 0xa22   : > { %v15859_v15 = vadd.f32 %v7977_v18, %v7961_v28  ;;  %8192 = vmatmul.mubr.bf16.gmra.mrb[248].mxu0 %v8097_v38  ;;  %8305 = vmatmul.mubr.bf16.gmra.mrb[248].mxu1 %v8097_v38  ;;  %v7962_v12 = vmul.f32 %v12783_v58, %v15719_v0  ;;  %v12785_v14 = vpop.eup %12784  ;;  %v10985_v38 = vld [vmem:[%s16031_s4 + $0x8] sm:$0xff]  }
 0xa23   : > { %8201 = vmatprep.mubr.bf16.mxu0 %v16055_v11  ;;  %8314 = vmatprep.mubr.bf16.mxu1 %v16055_v11  ;;  %v10984_v11 = vld [vmem:[%s16031_s4] sm:$0xff]  }
 0xa24   : > { %12786 = vtanh.f32 %v15859_v15  ;;  %v15865_v41 = vadd.f32 %v7978_v1, %v7962_v12  ;;  %9827 = vmatprep.subr.bf16.mxu0 %v10984_v11 }
 0xa25   : > { %12788 = vrcp.f32 %v7834_v47  ;;  %9828 = vmatpush3.bf16.msra.mxu0 %v10984_v11 }
 0xa26   : > { %12790 = vtanh.f32 %v15865_v41  ;;  %9829 = vmatprep.subr.bf16.mxu0 %v10985_v38 }
 0xa27   : > { %v8133_v0 = vpop.f32.mrb[224].mxu0  ;;  %v8246_v25 = vpop.f32.mrb[224].mxu1 }
 0xa28   : > { %v10115_v51 = vadd.f32 %v8133_v0, %v13990_v43  ;;  %v8135_v59 = vpop.f32.mrb[225].mxu0  ;;  %v8248_v23 = vpop.f32.mrb[225].mxu1  ;;  %v10371_v31 = vadd.f32 %v8246_v25, %v13992_v44 }
 0xa29   : > { %v10116_v36 = vadd.f32 %v8135_v59, %v13994_v52  ;;  %v8137_v35 = vpop.f32.mrb[226].mxu0  ;;  %v8250_v34 = vpop.f32.mrb[226].mxu1  ;;  %v10372_v56 = vadd.f32 %v8248_v23, %v13999_v42  ;;  %9830 = vmatpush3.bf16.msra.mxu0 %v10985_v38  ;;  %v10987_v59 = vld [vmem:[%s16031_s4 + $0x18] sm:$0xff]  }
 0xa2a   : > { %v9726_v27 = vmul.f32 -1.442695, %v10115_v51  ;;  %v10117_v54 = vadd.f32 %v8137_v35, %v13990_v43  ;;  %v8139_v3 = vpop.f32.mrb[227].mxu0  ;;  %v8252_v50 = vpop.f32.mrb[227].mxu1  ;;  %v9728_v18 = vmul.f32 -1.442695, %v10371_v31  ;;  %v10373_v53 = vadd.f32 %v8250_v34, %v13992_v44 }
 0xa2b   : > { %v9727_v5 = vmul.f32 -1.442695, %v10116_v36  ;;  %v10118_v55 = vadd.f32 %v8139_v3, %v13994_v52  ;;  %v10374_v13 = vadd.f32 %v8252_v50, %v13999_v42  ;;  %v10986_v51 = vld [vmem:[%s16031_s4 + $0x10] sm:$0xff]   ;;  %v10989_v34 = vld [vmem:[%s16031_s4 + $0x28] sm:$0xff]  }
 0xa2c   : > { %12792 = vpow2.f32 %v9726_v27  ;;  %v9729_v2 = vmul.f32 -1.442695, %v10117_v54  ;;  %v9731_v49 = vmul.f32 -1.442695, %v10373_v53  ;;  %9831 = vmatprep.subr.bf16.mxu0 %v10986_v51  ;;  %v10990_v50 = vld [vmem:[%s16031_s4 + $0x30] sm:$0xff]  }
 0xa2d   : > { %v9730_v22 = vmul.f32 -1.442695, %v10118_v55  ;;  %12794 = vpow2.f32 %v9727_v5  ;;  %9832 = vmatpush3.bf16.msra.mxu0 %v10986_v51  ;;  %v10991_v55 = vld [vmem:[%s16031_s4 + $0x38] sm:$0xff]  }
 0xa2e   : > { %v12787_v19 = vpop.eup %12786  ;;  %12796 = vpow2.f32 %v9729_v2  ;;  %9833 = vmatprep.subr.bf16.mxu0 %v10987_v59 }
 0xa2f   : > { %v12789_v48 = vpop.eup %12788  ;;  %v8025_v63 = vmul.f32 %v12787_v19, %v12785_v14  ;;  %12798 = vpow2.f32 %v9730_v22 }
 0xa30   : > { %v12791_v39 = vpop.eup %12790  ;;  %12800 = vtanh.f32 %v10372_v56 }
 0xa31   : > { %v8026_v9 = vmul.f32 %v12791_v39, %v12789_v48  ;;  %9834 = vmatpush3.bf16.msra.mxu0 %v10987_v59 }
 0xa33   : > { %v8098_v46 = vpack.c.bf16 %v8026_v9, %v8025_v63 }
 0xa35   : > { %8202 = vmatmul.mubr.bf16.gmra.mrb[252].mxu0 %v8098_v46  ;;  %8315 = vmatmul.mubr.bf16.gmra.mrb[252].mxu1 %v8098_v46 }
 0xa36   : > { %v12793_v26 = vpop.eup %12792 }
 0xa37   : > { %v8533_v37 = vadd.f32 1.0, %v12793_v26  ;;  %v12795_v60 = vpop.eup %12794 }
 0xa38   : > { %v12797_v61 = vpop.eup %12796  ;;  %v8534_v17 = vadd.f32 1.0, %v12795_v60 }
 0xa39   : > { %12802 = vrcp.f32 %v8533_v37  ;;  %v8536_v20 = vadd.f32 1.0, %v12797_v61  ;;  %v12799_v8 = vpop.eup %12798 }
 0xa3a   : > { %12804 = vtanh.f32 %v10374_v13  ;;  %v8537_v10 = vadd.f32 1.0, %v12799_v8  ;;  %v12801_v28 = vpop.eup %12800 }
 0xa3b   : > { %12806 = vrcp.f32 %v8534_v17 }
 0xa3c   : > { %12808 = vrcp.f32 %v8536_v20 }
 0xa3d   : > { %12810 = vpow2.f32 %v9728_v18 }
 0xa3e   : > { %12812 = vrcp.f32 %v8537_v10 }
 0xa3f   : > { %12814 = vpow2.f32 %v9731_v49 }
 0xa43   : > { %v12803_v1 = vpop.eup %12802 }
 0xa44   : > { %v12805_v58 = vpop.eup %12804  ;;  %v8709_v47 = vmul.f32 %v12803_v1, %v12801_v28 }
 0xa45   : > { %v12807_v12 = vpop.eup %12806 }
 0xa46   : > { %v12809_v14 = vpop.eup %12808  ;;  %v8693_v19 = vmul.f32 %v12807_v12, %v15735_v6  ;;  %v10988_v6 = vld [vmem:[%s16031_s4 + $0x20] sm:$0xff]  }
 0xa47   : > { %v12811_v48 = vpop.eup %12810  ;;  %v8710_v39 = vmul.f32 %v12809_v14, %v12805_v58  ;;  %9835 = vmatprep.subr.bf16.mxu0 %v10988_v6 }
 0xa48   : > { %v12813_v63 = vpop.eup %12812  ;;  %v8725_v9 = vadd.f32 %v8709_v47, %v8693_v19  ;;  %v8535_v0 = vadd.f32 1.0, %v12811_v48  ;;  %9836 = vmatpush3.bf16.msra.mxu0 %v10988_v6 }
 0xa49   : > { %v8694_v46 = vmul.f32 %v12813_v63, %v15738_v33  ;;  %v12815_v11 = vpop.eup %12814  ;;  %9837 = vmatprep.subr.bf16.mxu0 %v10989_v34 }
 0xa4a   : > { %12816 = vtanh.f32 %v8725_v9  ;;  %v8538_v23 = vadd.f32 1.0, %v12815_v11 }
 0xa4b   : > { %v8726_v25 = vadd.f32 %v8710_v39, %v8694_v46  ;;  %12818 = vrcp.f32 %v8535_v0 }
 0xa4c   : > { %9838 = vmatpush3.bf16.msra.mxu0 %v10989_v34 }
 0xa4d   : > { %12820 = vtanh.f32 %v8726_v25  ;;  %9839 = vmatprep.subr.bf16.mxu0 %v10990_v50 }
 0xa4e   : > { %12822 = vrcp.f32 %v8538_v23 }
 0xa50   : > { %9840 = vmatpush3.bf16.msra.mxu0 %v10990_v50 }
 0xa51   : > { %9841 = vmatprep.subr.bf16.mxu0 %v10991_v55 }
 0xa54   : > { %v12817_v33 = vpop.eup %12816  ;;  %9842 = vmatpush3.bf16.msra.mxu0 %v10991_v55 }
 0xa55   : > { %v12819_v36 = vpop.eup %12818 }
 0xa56   : > { %v8757_v27 = vmul.f32 %v12819_v36, %v12817_v33 }
 0xa57   : > { %v12821_v35 = vpop.eup %12820 }
 0xa58   : > { %v12823_v54 = vpop.eup %12822 }
 0xa59   : > { %v8758_v3 = vmul.f32 %v12823_v54, %v12821_v35 }
 0xa5b   : > { %v8773_v5 = vpack.c.bf16 %v8758_v3, %v8757_v27 }
 0xa5d   : > { %9843 = vmatprep.mubr.bf16.mxu0 %v8773_v5 }
 0xa88   : > { %v8143_v2 = vpop.f32.mrb[228].mxu0  ;;  %v8256_v22 = vpop.f32.mrb[228].mxu1 }
 0xa89   : > { %v10119_v56 = vadd.f32 %v8143_v2, %v13990_v43  ;;  %v8145_v31 = vpop.f32.mrb[229].mxu0  ;;  %v8258_v26 = vpop.f32.mrb[229].mxu1  ;;  %v10375_v28 = vadd.f32 %v8256_v22, %v13992_v44 }
 0xa8a   : > { %v10120_v13 = vadd.f32 %v8145_v31, %v13994_v52  ;;  %v8147_v37 = vpop.f32.mrb[230].mxu0  ;;  %v8260_v60 = vpop.f32.mrb[230].mxu1  ;;  %v10376_v47 = vadd.f32 %v8258_v26, %v13999_v42 }
 0xa8b   : > { %v9732_v61 = vmul.f32 -1.442695, %v10119_v56  ;;  %v10121_v18 = vadd.f32 %v8147_v37, %v13990_v43  ;;  %v8149_v17 = vpop.f32.mrb[231].mxu0  ;;  %v8262_v53 = vpop.f32.mrb[231].mxu1  ;;  %v10377_v38 = vadd.f32 %v8260_v60, %v13992_v44  ;;  %v9734_v1 = vmul.f32 -1.442695, %v10375_v28 }
 0xa8c   : > { %v9733_v20 = vmul.f32 -1.442695, %v10120_v13  ;;  %v10122_v8 = vadd.f32 %v8149_v17, %v13994_v52  ;;  %v10378_v14 = vadd.f32 %v8262_v53, %v13999_v42 }
 0xa8d   : > { %12824 = vpow2.f32 %v9732_v61  ;;  %v9735_v10 = vmul.f32 -1.442695, %v10121_v18  ;;  %v9737_v58 = vmul.f32 -1.442695, %v10377_v38 }
 0xa8e   : > { %v9736_v49 = vmul.f32 -1.442695, %v10122_v8  ;;  %12826 = vpow2.f32 %v9733_v20 }
 0xa8f   : > { %12828 = vpow2.f32 %v9735_v10 }
 0xa90   : > { %12830 = vpow2.f32 %v9736_v49 }
 0xa91   : > { %12832 = vpow2.f32 %v9734_v1 }
 0xa92   : > { %12834 = vpow2.f32 %v9737_v58 }
 0xa93   : > { %12836 = vtanh.f32 %v10376_v47 }
 0xa97   : > { %v12825_v12 = vpop.eup %12824 }
 0xa98   : > { %v8539_v19 = vadd.f32 1.0, %v12825_v12  ;;  %v12827_v48 = vpop.eup %12826 }
 0xa99   : > { %v12829_v39 = vpop.eup %12828  ;;  %v8540_v63 = vadd.f32 1.0, %v12827_v48 }
 0xa9a   : > { %12838 = vrcp.f32 %v8539_v19  ;;  %v8542_v9 = vadd.f32 1.0, %v12829_v39  ;;  %v12831_v46 = vpop.eup %12830 }
 0xa9b   : > { %12840 = vtanh.f32 %v10378_v14  ;;  %v8543_v11 = vadd.f32 1.0, %v12831_v46  ;;  %v12833_v3 = vpop.eup %12832 }
 0xa9c   : > { %12842 = vrcp.f32 %v8540_v63  ;;  %v12835_v55 = vpop.eup %12834  ;;  %v8541_v26 = vadd.f32 1.0, %v12833_v3 }
 0xa9d   : > { %12844 = vrcp.f32 %v8542_v9  ;;  %v12837_v22 = vpop.eup %12836  ;;  %v8544_v61 = vadd.f32 1.0, %v12835_v55 }
 0xa9e   : > { %v8153_v0 = vpop.f32.mrb[232].mxu0  ;;  %v8266_v25 = vpop.f32.mrb[232].mxu1  ;;  %12846 = vrcp.f32 %v8543_v11 }
 0xa9f   : > { %v10123_v51 = vadd.f32 %v8153_v0, %v13990_v43  ;;  %v8155_v59 = vpop.f32.mrb[233].mxu0  ;;  %v8268_v23 = vpop.f32.mrb[233].mxu1  ;;  %v10379_v13 = vadd.f32 %v8266_v25, %v13992_v44 }
 0xaa0   : > { %v10124_v6 = vadd.f32 %v8155_v59, %v13994_v52  ;;  %v8157_v33 = vpop.f32.mrb[234].mxu0  ;;  %v8270_v36 = vpop.f32.mrb[234].mxu1  ;;  %v10380_v53 = vadd.f32 %v8268_v23, %v13999_v42 }
 0xaa1   : > { %v9738_v35 = vmul.f32 -1.442695, %v10123_v51  ;;  %v10125_v34 = vadd.f32 %v8157_v33, %v13990_v43  ;;  %v8159_v27 = vpop.f32.mrb[235].mxu0  ;;  %v8272_v54 = vpop.f32.mrb[235].mxu1  ;;  %v10381_v18 = vadd.f32 %v8270_v36, %v13992_v44  ;;  %v9740_v49 = vmul.f32 -1.442695, %v10379_v13 }
 0xaa2   : > { %v9739_v50 = vmul.f32 -1.442695, %v10124_v6  ;;  %v10126_v5 = vadd.f32 %v8159_v27, %v13994_v52  ;;  %v10382_v14 = vadd.f32 %v8272_v54, %v13999_v42 }
 0xaa3   : > { %12848 = vpow2.f32 %v9738_v35  ;;  %v9741_v2 = vmul.f32 -1.442695, %v10125_v34  ;;  %v9743_v1 = vmul.f32 -1.442695, %v10381_v18 }
 0xaa4   : > { %v9742_v56 = vmul.f32 -1.442695, %v10126_v5  ;;  %v12839_v31 = vpop.eup %12838  ;;  %12850 = vpow2.f32 %v9739_v50 }
 0xaa5   : > { %v12841_v37 = vpop.eup %12840  ;;  %v8711_v60 = vmul.f32 %v12839_v31, %v12837_v22  ;;  %12852 = vpow2.f32 %v9741_v2 }
 0xaa6   : > { %v12843_v17 = vpop.eup %12842  ;;  %12854 = vpow2.f32 %v9742_v56 }
 0xaa7   : > { %v12845_v20 = vpop.eup %12844  ;;  %v8695_v8 = vmul.f32 %v12843_v17, %v15759_v29  ;;  %12856 = vrcp.f32 %v8541_v26 }
 0xaa8   : > { %v8712_v10 = vmul.f32 %v12845_v20, %v12841_v37  ;;  %v12847_v28 = vpop.eup %12846  ;;  %12858 = vrcp.f32 %v8544_v61 }
 0xaa9   : > { %v8727_v38 = vadd.f32 %v8711_v60, %v8695_v8  ;;  %v8696_v58 = vmul.f32 %v12847_v28, %v15765_v32  ;;  %12860 = vtanh.f32 %v10380_v53 }
 0xaab   : > { %12862 = vtanh.f32 %v8727_v38  ;;  %v8728_v12 = vadd.f32 %v8712_v10, %v8696_v58  ;;  %v10992_v38 = vld [vmem:[%s16033_s6] sm:$0xff]  }
 0xaac   : > { %12864 = vpow2.f32 %v9740_v49  ;;  %9859 = vmatprep.subr.bf16.mxu1 %v10992_v38 }
 0xaad   : > { %v12849_v47 = vpop.eup %12848  ;;  %12866 = vpow2.f32 %v9743_v1  ;;  %v10993_v1 = vld [vmem:[%s16033_s6 + $0x8] sm:$0xff]   ;;  %9860 = vmatpush3.bf16.msra.mxu1 %v10992_v38 }
 0xaae   : > { %v8545_v19 = vadd.f32 1.0, %v12849_v47  ;;  %v12851_v29 = vpop.eup %12850  ;;  %12868 = vtanh.f32 %v8728_v12  ;;  %9861 = vmatprep.subr.bf16.mxu1 %v10993_v1 }
 0xaaf   : > { %v12853_v48 = vpop.eup %12852  ;;  %v8546_v39 = vadd.f32 1.0, %v12851_v29 }
 0xab0   : > { %12870 = vrcp.f32 %v8545_v19  ;;  %v8548_v63 = vadd.f32 1.0, %v12853_v48  ;;  %v12855_v9 = vpop.eup %12854 }
 0xab1   : > { %12872 = vtanh.f32 %v10382_v14  ;;  %v12857_v46 = vpop.eup %12856  ;;  %v8549_v32 = vadd.f32 1.0, %v12855_v9  ;;  %9862 = vmatpush3.bf16.msra.mxu1 %v10993_v1 }
 0xab2   : > { %12874 = vrcp.f32 %v8546_v39  ;;  %v12859_v11 = vpop.eup %12858  ;;  %v10994_v39 = vld [vmem:[%s16033_s6 + $0x10] sm:$0xff]  }
 0xab3   : > { %12876 = vrcp.f32 %v8548_v63  ;;  %v12861_v0 = vpop.eup %12860  ;;  %9863 = vmatprep.subr.bf16.mxu1 %v10994_v39 }
 0xab4   : > { %12878 = vrcp.f32 %v8549_v32  ;;  %v10995_v32 = vld [vmem:[%s16033_s6 + $0x18] sm:$0xff]  }
 0xab5   : > { %v12863_v25 = vpop.eup %12862  ;;  %9864 = vmatpush3.bf16.msra.mxu1 %v10994_v39 }
 0xab6   : > { %v12865_v23 = vpop.eup %12864  ;;  %v8759_v6 = vmul.f32 %v12863_v25, %v12857_v46  ;;  %9865 = vmatprep.subr.bf16.mxu1 %v10995_v32 }
 0xab7   : > { %v12867_v34 = vpop.eup %12866  ;;  %v8547_v60 = vadd.f32 1.0, %v12865_v23 }
 0xab8   : > { %v12869_v50 = vpop.eup %12868  ;;  %v8550_v12 = vadd.f32 1.0, %v12867_v34 }
 0xab9   : > { %v8163_v51 = vpop.f32.mrb[236].mxu0  ;;  %v8276_v59 = vpop.f32.mrb[236].mxu1  ;;  %v8760_v31 = vmul.f32 %v12869_v50, %v12859_v11  ;;  %9866 = vmatpush3.bf16.msra.mxu1 %v10995_v32 }
 0xaba   : > { %v10127_v33 = vadd.f32 %v8163_v51, %v13990_v43  ;;  %v8165_v36 = vpop.f32.mrb[237].mxu0  ;;  %v8278_v35 = vpop.f32.mrb[237].mxu1  ;;  %v10383_v49 = vadd.f32 %v8276_v59, %v13992_v44 }
 0xabb   : > { %v10128_v27 = vadd.f32 %v8165_v36, %v13994_v52  ;;  %v8167_v54 = vpop.f32.mrb[238].mxu0  ;;  %v8280_v3 = vpop.f32.mrb[238].mxu1  ;;  %v8774_v53 = vpack.c.bf16 %v8760_v31, %v8759_v6  ;;  %v10384_v48 = vadd.f32 %v8278_v35, %v13999_v42  ;;  %v10996_v6 = vld [vmem:[%s16033_s6 + $0x20] sm:$0xff]   ;;  %v10997_v31 = vld [vmem:[%s16033_s6 + $0x28] sm:$0xff]  }
 0xabc   : > { %v9744_v5 = vmul.f32 -1.442695, %v10127_v33  ;;  %v10129_v55 = vadd.f32 %v8167_v54, %v13990_v43  ;;  %v8169_v2 = vpop.f32.mrb[239].mxu0  ;;  %v8282_v22 = vpop.f32.mrb[239].mxu1  ;;  %v9746_v19 = vmul.f32 -1.442695, %v10383_v49  ;;  %9867 = vmatprep.subr.bf16.mxu1 %v10996_v6 }
 0xabd   : > { %v12871_v56 = vpop.eup %12870  ;;  %v9745_v26 = vmul.f32 -1.442695, %v10128_v27  ;;  %v10130_v13 = vadd.f32 %v8169_v2, %v13994_v52  ;;  %9844 = vmatmul.mubr.bf16.vlgmr.msra.gmra.mrb[0].mxu0 %v8774_v53  ;;  %9868 = vmatpush3.bf16.msra.mxu1 %v10996_v6 }
 0xabe   : > { %v12873_v37 = vpop.eup %12872  ;;  %v8713_v61 = vmul.f32 %v12871_v56, %v12861_v0  ;;  %12880 = vpow2.f32 %v9744_v5  ;;  %v9747_v18 = vmul.f32 -1.442695, %v10129_v55  ;;  %9869 = vmatprep.subr.bf16.mxu1 %v10997_v31 }
 0xabf   : > { %v12875_v17 = vpop.eup %12874  ;;  %v9748_v20 = vmul.f32 -1.442695, %v10130_v13  ;;  %12882 = vpow2.f32 %v9745_v26 }
 0xac0   : > { %v12877_v8 = vpop.eup %12876  ;;  %v8697_v10 = vmul.f32 %v12875_v17, %v15773_v62  ;;  %12884 = vpow2.f32 %v9747_v18  ;;  %v10385_v62 = vadd.f32 %v8280_v3, %v13992_v44 }
 0xac1   : > { %v8714_v28 = vmul.f32 %v12877_v8, %v12873_v37  ;;  %v12879_v58 = vpop.eup %12878  ;;  %12886 = vrcp.f32 %v8547_v60  ;;  %9870 = vmatpush3.bf16.msra.mxu1 %v10997_v31 }
 0xac2   : > { %v8729_v47 = vadd.f32 %v8713_v61, %v8697_v10  ;;  %v8698_v14 = vmul.f32 %v12879_v58, %v15780_v24  ;;  %12888 = vpow2.f32 %v9748_v20  ;;  %v9749_v63 = vmul.f32 -1.442695, %v10385_v62 }
 0xac3   : > { %v10386_v24 = vadd.f32 %v8282_v22, %v13999_v42 }
 0xac4   : > { %12890 = vtanh.f32 %v8729_v47  ;;  %v8730_v29 = vadd.f32 %v8714_v28, %v8698_v14 }
 0xac5   : > { %12892 = vrcp.f32 %v8550_v12 }
 0xac6   : > { %12894 = vtanh.f32 %v8730_v29 }
 0xac7   : > { %12896 = vpow2.f32 %v9746_v19 }
 0xac8   : > { %v12881_v9 = vpop.eup %12880  ;;  %12898 = vtanh.f32 %v10384_v48 }
 0xac9   : > { %v8551_v46 = vadd.f32 1.0, %v12881_v9  ;;  %v12883_v11 = vpop.eup %12882  ;;  %12900 = vpow2.f32 %v9749_v63 }
 0xaca   : > { %v12885_v0 = vpop.eup %12884  ;;  %v8552_v25 = vadd.f32 1.0, %v12883_v11 }
 0xacb   : > { %12902 = vrcp.f32 %v8551_v46  ;;  %v12887_v51 = vpop.eup %12886  ;;  %v8554_v59 = vadd.f32 1.0, %v12885_v0 }
 0xacc   : > { %12904 = vtanh.f32 %v10386_v24  ;;  %v12889_v23 = vpop.eup %12888 }
 0xacd   : > { %12906 = vrcp.f32 %v8552_v25  ;;  %v8555_v36 = vadd.f32 1.0, %v12889_v23 }
 0xace   : > { %v12891_v33 = vpop.eup %12890  ;;  %12908 = vrcp.f32 %v8554_v59 }
 0xacf   : > { %v8173_v35 = vpop.f32.mrb[240].mxu0  ;;  %v8286_v34 = vpop.f32.mrb[240].mxu1  ;;  %v8761_v27 = vmul.f32 %v12891_v33, %v12887_v51  ;;  %12910 = vrcp.f32 %v8555_v36 }
 0xad0   : > { %v12893_v54 = vpop.eup %12892  ;;  %v10131_v3 = vadd.f32 %v8173_v35, %v13990_v43  ;;  %v8175_v50 = vpop.f32.mrb[241].mxu0  ;;  %v10387_v38 = vadd.f32 %v8286_v34, %v13992_v44 }
 0xad1   : > { %v8288_v5 = vpop.f32.mrb[241].mxu1  ;;  %v12895_v55 = vpop.eup %12894  ;;  %v10132_v2 = vadd.f32 %v8175_v50, %v13994_v52 }
 0xad2   : > { %v8177_v22 = vpop.f32.mrb[242].mxu0  ;;  %v8290_v56 = vpop.f32.mrb[242].mxu1  ;;  %v9750_v13 = vmul.f32 -1.442695, %v10131_v3  ;;  %v8762_v10 = vmul.f32 %v12895_v55, %v12893_v54  ;;  %v9752_v63 = vmul.f32 -1.442695, %v10387_v38  ;;  %v10388_v11 = vadd.f32 %v8288_v5, %v13999_v42 }
 0xad3   : > { %v12897_v26 = vpop.eup %12896  ;;  %v10133_v37 = vadd.f32 %v8177_v22, %v13990_v43  ;;  %v8179_v60 = vpop.f32.mrb[243].mxu0  ;;  %v9751_v17 = vmul.f32 -1.442695, %v10132_v2  ;;  %v10389_v12 = vadd.f32 %v8290_v56, %v13992_v44 }
 0xad4   : > { %v8292_v61 = vpop.f32.mrb[243].mxu1  ;;  %v12899_v18 = vpop.eup %12898  ;;  %v10134_v53 = vadd.f32 %v8179_v60, %v13994_v52  ;;  %12912 = vpow2.f32 %v9750_v13  ;;  %v8553_v28 = vadd.f32 1.0, %v12897_v26  ;;  %v8775_v62 = vpack.c.bf16 %v8762_v10, %v8761_v27 }
 0xad5   : > { %v12901_v20 = vpop.eup %12900  ;;  %v9753_v8 = vmul.f32 -1.442695, %v10133_v37  ;;  %12914 = vpow2.f32 %v9751_v17  ;;  %v9755_v46 = vmul.f32 -1.442695, %v10389_v12 }
 0xad6   : > { %v12903_v49 = vpop.eup %12902  ;;  %v9754_v1 = vmul.f32 -1.442695, %v10134_v53  ;;  %v8556_v19 = vadd.f32 1.0, %v12901_v20  ;;  %9847 = vmatprep.mubr.bf16.mxu0 %v8775_v62 }
 0xad7   : > { %v12905_v58 = vpop.eup %12904  ;;  %v8715_v47 = vmul.f32 %v12903_v49, %v12899_v18  ;;  %12916 = vpow2.f32 %v9753_v8 }
 0xad8   : > { %v12907_v14 = vpop.eup %12906  ;;  %12918 = vpow2.f32 %v9754_v1 }
 0xad9   : > { %v12909_v29 = vpop.eup %12908  ;;  %v8699_v48 = vmul.f32 %v12907_v14, %v15795_v57  ;;  %12920 = vrcp.f32 %v8553_v28  ;;  %v10390_v57 = vadd.f32 %v8292_v61, %v13999_v42 }
 0xada   : > { %v8716_v39 = vmul.f32 %v12909_v29, %v12905_v58  ;;  %v12911_v9 = vpop.eup %12910  ;;  %12922 = vrcp.f32 %v8556_v19 }
 0xadb   : > { %v8731_v24 = vadd.f32 %v8715_v47, %v8699_v48  ;;  %v8700_v32 = vmul.f32 %v12911_v9, %v15800_v40 }
 0xadd   : > { %12924 = vtanh.f32 %v8731_v24  ;;  %v8732_v0 = vadd.f32 %v8716_v39, %v8700_v32 }
 0xade   : > { %12926 = vpow2.f32 %v9752_v63  ;;  %v12913_v25 = vpop.eup %12912 }
 0xadf   : > { %12928 = vpow2.f32 %v9755_v46  ;;  %v8557_v51 = vadd.f32 1.0, %v12913_v25  ;;  %v12915_v59 = vpop.eup %12914 }
 0xae0   : > { %12930 = vtanh.f32 %v8732_v0  ;;  %v8558_v6 = vadd.f32 1.0, %v12915_v59 }
 0xae1   : > { %12932 = vtanh.f32 %v10388_v11  ;;  %v12917_v23 = vpop.eup %12916 }
 0xae2   : > { %12934 = vrcp.f32 %v8557_v51  ;;  %v8560_v33 = vadd.f32 1.0, %v12917_v23  ;;  %v12919_v36 = vpop.eup %12918  ;;  %v8183_v40 = vpop.f32.mrb[244].mxu0 }
 0xae3   : > { %12936 = vtanh.f32 %v10390_v57  ;;  %v8296_v35 = vpop.f32.mrb[244].mxu1  ;;  %v12921_v34 = vpop.eup %12920  ;;  %v8561_v27 = vadd.f32 1.0, %v12919_v36  ;;  %v10135_v54 = vadd.f32 %v8183_v40, %v13990_v43 }
 0xae4   : > { %12938 = vrcp.f32 %v8558_v6  ;;  %v8185_v3 = vpop.f32.mrb[245].mxu0  ;;  %v8298_v50 = vpop.f32.mrb[245].mxu1  ;;  %v10391_v10 = vadd.f32 %v8296_v35, %v13992_v44 }
 0xae5   : > { %12940 = vrcp.f32 %v8560_v33  ;;  %v12923_v5 = vpop.eup %12922  ;;  %v10136_v55 = vadd.f32 %v8185_v3, %v13994_v52  ;;  %v8187_v2 = vpop.f32.mrb[246].mxu0  ;;  %v9756_v31 = vmul.f32 -1.442695, %v10135_v54  ;;  %v10392_v11 = vadd.f32 %v8298_v50, %v13999_v42 }
 0xae6   : > { %v8300_v22 = vpop.f32.mrb[246].mxu1  ;;  %12942 = vrcp.f32 %v8561_v27  ;;  %v10137_v26 = vadd.f32 %v8187_v2, %v13990_v43  ;;  %v8189_v13 = vpop.f32.mrb[247].mxu0  ;;  %v9758_v48 = vmul.f32 -1.442695, %v10391_v10 }
 0xae7   : > { %v12925_v56 = vpop.eup %12924  ;;  %v8302_v37 = vpop.f32.mrb[247].mxu1  ;;  %v9757_v18 = vmul.f32 -1.442695, %v10136_v55  ;;  %12944 = vpow2.f32 %v9756_v31  ;;  %v10138_v20 = vadd.f32 %v8189_v13, %v13994_v52  ;;  %v10393_v47 = vadd.f32 %v8300_v22, %v13992_v44 }
 0xae8   : > { %v12927_v60 = vpop.eup %12926  ;;  %v8763_v61 = vmul.f32 %v12925_v56, %v12921_v34  ;;  %v9759_v53 = vmul.f32 -1.442695, %v10137_v26  ;;  %v10394_v59 = vadd.f32 %v8302_v37, %v13999_v42 }
 0xae9   : > { %v12929_v17 = vpop.eup %12928  ;;  %12946 = vpow2.f32 %v9757_v18  ;;  %v9760_v38 = vmul.f32 -1.442695, %v10138_v20  ;;  %v8559_v58 = vadd.f32 1.0, %v12927_v60  ;;  %v9761_v24 = vmul.f32 -1.442695, %v10393_v47 }
 0xaea   : > { %v12931_v8 = vpop.eup %12930  ;;  %12948 = vpow2.f32 %v9759_v53  ;;  %v8562_v14 = vadd.f32 1.0, %v12929_v17 }
 0xaeb   : > { %v12933_v49 = vpop.eup %12932  ;;  %v8764_v28 = vmul.f32 %v12931_v8, %v12923_v5  ;;  %12950 = vpow2.f32 %v9760_v38 }
 0xaec   : > { %v12935_v1 = vpop.eup %12934  ;;  %12952 = vrcp.f32 %v8559_v58 }
 0xaed   : > { %v12937_v12 = vpop.eup %12936  ;;  %v8717_v62 = vmul.f32 %v12935_v1, %v12933_v49  ;;  %v8776_v19 = vpack.c.bf16 %v8764_v28, %v8763_v61  ;;  %12954 = vrcp.f32 %v8562_v14 }
 0xaee   : > { %v12939_v29 = vpop.eup %12938  ;;  %12956 = vpow2.f32 %v9758_v48 }
 0xaef   : > { %v12941_v39 = vpop.eup %12940  ;;  %v8701_v63 = vmul.f32 %v12939_v29, %v15814_v4  ;;  %9848 = vmatmul.mubr.bf16.gmra.mrb[4].mxu0 %v8776_v19 }
 0xaf0   : > { %v8718_v9 = vmul.f32 %v12941_v39, %v12937_v12  ;;  %v12943_v46 = vpop.eup %12942 }
 0xaf1   : > { %v8733_v32 = vadd.f32 %v8717_v62, %v8701_v63  ;;  %v8702_v0 = vmul.f32 %v12943_v46, %v15819_v45  ;;  %v12945_v25 = vpop.eup %12944 }
 0xaf2   : > { %v8563_v51 = vadd.f32 1.0, %v12945_v25 }
 0xaf3   : > { %12958 = vtanh.f32 %v8733_v32  ;;  %v8734_v57 = vadd.f32 %v8718_v9, %v8702_v0  ;;  %v12947_v4 = vpop.eup %12946 }
 0xaf4   : > { %12960 = vpow2.f32 %v9761_v24  ;;  %v12949_v23 = vpop.eup %12948  ;;  %v8564_v6 = vadd.f32 1.0, %v12947_v4 }
 0xaf5   : > { %12962 = vtanh.f32 %v10392_v11  ;;  %v8566_v33 = vadd.f32 1.0, %v12949_v23  ;;  %v12951_v36 = vpop.eup %12950  ;;  %v8193_v40 = vpop.f32.mrb[248].mxu0 }
 0xaf6   : > { %12964 = vtanh.f32 %v8734_v57  ;;  %v8306_v35 = vpop.f32.mrb[248].mxu1  ;;  %v8567_v45 = vadd.f32 1.0, %v12951_v36  ;;  %v10139_v34 = vadd.f32 %v8193_v40, %v13990_v43  ;;  %v8195_v27 = vpop.f32.mrb[249].mxu0 }
 0xaf7   : > { %12966 = vrcp.f32 %v8563_v51  ;;  %v8308_v54 = vpop.f32.mrb[249].mxu1  ;;  %v12953_v3 = vpop.eup %12952  ;;  %v10140_v50 = vadd.f32 %v8195_v27, %v13994_v52  ;;  %v10395_v53 = vadd.f32 %v8306_v35, %v13992_v44 }
 0xaf8   : > { %12968 = vtanh.f32 %v10394_v59  ;;  %v8197_v5 = vpop.f32.mrb[250].mxu0  ;;  %v8310_v55 = vpop.f32.mrb[250].mxu1  ;;  %v9762_v22 = vmul.f32 -1.442695, %v10139_v34  ;;  %v10396_v24 = vadd.f32 %v8308_v54, %v13999_v42 }
 0xaf9   : > { %12970 = vrcp.f32 %v8564_v6  ;;  %v12955_v2 = vpop.eup %12954  ;;  %v10141_v56 = vadd.f32 %v8197_v5, %v13990_v43  ;;  %v8199_v31 = vpop.f32.mrb[251].mxu0  ;;  %v9763_v37 = vmul.f32 -1.442695, %v10140_v50  ;;  %v10397_v10 = vadd.f32 %v8310_v55, %v13992_v44 }
 0xafa   : > { %12972 = vrcp.f32 %v8566_v33  ;;  %v8312_v26 = vpop.f32.mrb[251].mxu1  ;;  %v12957_v13 = vpop.eup %12956  ;;  %v10142_v60 = vadd.f32 %v8199_v31, %v13994_v52  ;;  %v9764_v14 = vmul.f32 -1.442695, %v10395_v53 }
 0xafb   : > { %12974 = vrcp.f32 %v8567_v45  ;;  %v9765_v18 = vmul.f32 -1.442695, %v10141_v56  ;;  %v8565_v38 = vadd.f32 1.0, %v12957_v13  ;;  %v9767_v29 = vmul.f32 -1.442695, %v10397_v10 }
 0xafc   : > { %12976 = vpow2.f32 %v9762_v22  ;;  %v9766_v49 = vmul.f32 -1.442695, %v10142_v60  ;;  %v10398_v57 = vadd.f32 %v8312_v26, %v13999_v42 }
 0xafd   : > { %v12959_v61 = vpop.eup %12958  ;;  %12978 = vpow2.f32 %v9763_v37 }
 0xafe   : > { %v12961_v17 = vpop.eup %12960  ;;  %v8765_v20 = vmul.f32 %v12959_v61, %v12953_v3  ;;  %12980 = vpow2.f32 %v9765_v18 }
 0xaff   : > { %v12963_v8 = vpop.eup %12962  ;;  %v8568_v58 = vadd.f32 1.0, %v12961_v17  ;;  %12982 = vpow2.f32 %v9766_v49 }
 0xb00   : > { %v12965_v28 = vpop.eup %12964  ;;  %12984 = vrcp.f32 %v8565_v38 }
 0xb01   : > { %v12967_v1 = vpop.eup %12966  ;;  %v8766_v47 = vmul.f32 %v12965_v28, %v12955_v2  ;;  %12986 = vrcp.f32 %v8568_v58 }
 0xb02   : > { %v12969_v12 = vpop.eup %12968  ;;  %v8719_v62 = vmul.f32 %v12967_v1, %v12963_v8  ;;  %12988 = vpow2.f32 %v9764_v14 }
 0xb03   : > { %v12971_v19 = vpop.eup %12970  ;;  %v8777_v48 = vpack.c.bf16 %v8766_v47, %v8765_v20  ;;  %12990 = vpow2.f32 %v9767_v29 }
 0xb04   : > { %v12973_v39 = vpop.eup %12972  ;;  %v8703_v63 = vmul.f32 %v12971_v19, %v15830_v21 }
 0xb05   : > { %v8720_v9 = vmul.f32 %v12973_v39, %v12969_v12  ;;  %9851 = vmatprep.mubr.bf16.mxu0 %v8777_v48  ;;  %v12975_v46 = vpop.eup %12974 }
 0xb06   : > { %v8735_v32 = vadd.f32 %v8719_v62, %v8703_v63  ;;  %v12977_v11 = vpop.eup %12976  ;;  %v8704_v0 = vmul.f32 %v12975_v46, %v15837_v7 }
 0xb07   : > { %v8569_v25 = vadd.f32 1.0, %v12977_v11  ;;  %v12979_v51 = vpop.eup %12978  ;;  %v10999_v11 = vld [vmem:[%s16033_s6 + $0x38] sm:$0xff]  }
 0xb08   : > { %12992 = vtanh.f32 %v8735_v32  ;;  %v8736_v59 = vadd.f32 %v8720_v9, %v8704_v0  ;;  %v8570_v21 = vadd.f32 1.0, %v12979_v51  ;;  %v12981_v4 = vpop.eup %12980  ;;  %v8203_v6 = vpop.f32.mrb[252].mxu0 }
 0xb09   : > { %12994 = vtanh.f32 %v10396_v24  ;;  %v8572_v23 = vadd.f32 1.0, %v12981_v4  ;;  %v8316_v33 = vpop.f32.mrb[252].mxu1  ;;  %v12983_v36 = vpop.eup %12982  ;;  %v10143_v7 = vadd.f32 %v8203_v6, %v13990_v43 }
 0xb0a   : > { %12996 = vrcp.f32 %v8569_v25  ;;  %v8205_v40 = vpop.f32.mrb[253].mxu0  ;;  %v8318_v35 = vpop.f32.mrb[253].mxu1  ;;  %v8573_v34 = vadd.f32 1.0, %v12983_v36  ;;  %v10399_v61 = vadd.f32 %v8316_v33, %v13992_v44 }
 0xb0b   : > { %12998 = vtanh.f32 %v8736_v59  ;;  %v12985_v45 = vpop.eup %12984  ;;  %v10144_v27 = vadd.f32 %v8205_v40, %v13994_v52  ;;  %v8207_v54 = vpop.f32.mrb[254].mxu0  ;;  %v9768_v5 = vmul.f32 -1.442695, %v10143_v7  ;;  %v10400_v47 = vadd.f32 %v8318_v35, %v13999_v42 }
 0xb0c   : > { %13000 = vtanh.f32 %v10398_v57  ;;  %v8320_v3 = vpop.f32.mrb[254].mxu1  ;;  %v12987_v50 = vpop.eup %12986  ;;  %v10145_v55 = vadd.f32 %v8207_v54, %v13990_v43  ;;  %v9770_v1 = vmul.f32 -1.442695, %v10399_v61 }
 0xb0d   : > { %13002 = vrcp.f32 %v8570_v21  ;;  %v8209_v2 = vpop.f32.mrb[255].mxu0  ;;  %v8322_v22 = vpop.f32.mrb[255].mxu1  ;;  %v9769_v31 = vmul.f32 -1.442695, %v10144_v27  ;;  %v10401_v28 = vadd.f32 %v8320_v3, %v13992_v44 }
 0xb0e   : > { %13004 = vrcp.f32 %v8572_v23  ;;  %v12989_v56 = vpop.eup %12988  ;;  %v10146_v26 = vadd.f32 %v8209_v2, %v13994_v52  ;;  %v9771_v37 = vmul.f32 -1.442695, %v10145_v55  ;;  %v10402_v24 = vadd.f32 %v8322_v22, %v13999_v42 }
 0xb0f   : > { %13006 = vrcp.f32 %v8573_v34  ;;  %v12991_v13 = vpop.eup %12990  ;;  %v8571_v8 = vadd.f32 1.0, %v12989_v56  ;;  %v9773_v29 = vmul.f32 -1.442695, %v10401_v28 }
 0xb10   : > { %13008 = vpow2.f32 %v9768_v5  ;;  %v9772_v53 = vmul.f32 -1.442695, %v10146_v26  ;;  %v8574_v49 = vadd.f32 1.0, %v12991_v13 }
 0xb11   : > { %13010 = vpow2.f32 %v9769_v31 }
 0xb12   : > { %v12993_v60 = vpop.eup %12992  ;;  %13012 = vpow2.f32 %v9771_v37 }
 0xb13   : > { %v12995_v18 = vpop.eup %12994  ;;  %v8767_v17 = vmul.f32 %v12993_v60, %v12985_v45  ;;  %13014 = vpow2.f32 %v9772_v53 }
 0xb14   : > { %v12997_v20 = vpop.eup %12996  ;;  %13016 = vrcp.f32 %v8571_v8 }
 0xb15   : > { %v12999_v43 = vpop.eup %12998  ;;  %v8721_v10 = vmul.f32 %v12997_v20, %v12995_v18  ;;  %13018 = vrcp.f32 %v8574_v49 }
 0xb16   : > { %v13001_v38 = vpop.eup %13000  ;;  %v8768_v52 = vmul.f32 %v12999_v43, %v12987_v50  ;;  %13020 = vpow2.f32 %v9770_v1 }
 0xb17   : > { %v13003_v58 = vpop.eup %13002  ;;  %13022 = vtanh.f32 %v10400_v47 }
 0xb18   : > { %v13005_v12 = vpop.eup %13004  ;;  %v8705_v62 = vmul.f32 %v13003_v58, %v15848_v16  ;;  %v8778_v14 = vpack.c.bf16 %v8768_v52, %v8767_v17  ;;  %v10998_v16 = vld [vmem:[%s16033_s6 + $0x30] sm:$0xff]   ;;  %v9774_v17 = vld [vmem:[%s16032_s5] ss:$0 sm:$0xff] }
 0xb19   : > { %v8722_v19 = vmul.f32 %v13005_v12, %v13001_v38  ;;  %v13007_v48 = vpop.eup %13006  ;;  %9871 = vmatprep.subr.bf16.mxu1 %v10998_v16 }
 0xb1a   : > { %v8737_v39 = vadd.f32 %v8721_v10, %v8705_v62  ;;  %9852 = vmatmul.mubr.bf16.gmra.mrb[8].mxu0 %v8778_v14  ;;  %v13009_v44 = vpop.eup %13008  ;;  %v8706_v63 = vmul.f32 %v13007_v48, %v15855_v30  ;;  %9872 = vmatpush3.bf16.msra.mxu1 %v10998_v16 }
 0xb1b   : > { %v8575_v9 = vadd.f32 1.0, %v13009_v44  ;;  %v13011_v46 = vpop.eup %13010  ;;  %9873 = vmatprep.subr.bf16.mxu1 %v10999_v11 }
 0xb1c   : > { %13024 = vtanh.f32 %v8737_v39  ;;  %v8738_v32 = vadd.f32 %v8722_v19, %v8706_v63  ;;  %v8576_v0 = vadd.f32 1.0, %v13011_v46  ;;  %v13013_v25 = vpop.eup %13012 }
 0xb1d   : > { %13026 = vpow2.f32 %v9773_v29  ;;  %v8578_v30 = vadd.f32 1.0, %v13013_v25  ;;  %v13015_v42 = vpop.eup %13014 }
 0xb1e   : > { %13028 = vrcp.f32 %v8575_v9  ;;  %v13017_v57 = vpop.eup %13016  ;;  %v8579_v51 = vadd.f32 1.0, %v13015_v42  ;;  %9874 = vmatpush3.bf16.msra.mxu1 %v10999_v11 }
 0xb1f   : > { %13030 = vtanh.f32 %v8738_v32  ;;  %v13019_v59 = vpop.eup %13018 }
 0xb20   : > { %13032 = vtanh.f32 %v10402_v24  ;;  %v13021_v21 = vpop.eup %13020 }
 0xb21   : > { %13034 = vrcp.f32 %v8576_v0  ;;  %v13023_v4 = vpop.eup %13022  ;;  %v8577_v27 = vadd.f32 1.0, %v13021_v21 }
 0xb22   : > { %13036 = vrcp.f32 %v8578_v30 }
 0xb23   : > { %13038 = vrcp.f32 %v8579_v51 }
 0xb24   : > { %13040 = vrcp.f32 %v8577_v27 }
 0xb26   : > { %v13025_v23 = vpop.eup %13024 }
 0xb27   : > { %v13027_v6 = vpop.eup %13026  ;;  %v8769_v33 = vmul.f32 %v13025_v23, %v13017_v57 }
 0xb28   : > { %v13029_v36 = vpop.eup %13028  ;;  %v8580_v22 = vadd.f32 1.0, %v13027_v6 }
 0xb29   : > { %v13031_v7 = vpop.eup %13030  ;;  %v8723_v40 = vmul.f32 %v13029_v36, %v13023_v4 }
 0xb2a   : > { %v13033_v35 = vpop.eup %13032  ;;  %v8770_v45 = vmul.f32 %v13031_v7, %v13019_v59 }
 0xb2b   : > { %v13035_v34 = vpop.eup %13034 }
 0xb2c   : > { %v13037_v54 = vpop.eup %13036  ;;  %v8707_v3 = vmul.f32 %v13035_v34, %v15859_v15  ;;  %v8779_v50 = vpack.c.bf16 %v8770_v45, %v8769_v33 }
 0xb2d   : > { %v8724_v5 = vmul.f32 %v13037_v54, %v13033_v35  ;;  %v13039_v55 = vpop.eup %13038 }
 0xb2e   : > { %v8739_v2 = vadd.f32 %v8723_v40, %v8707_v3  ;;  %9855 = vmatprep.mubr.bf16.mxu0 %v8779_v50  ;;  %v8708_v56 = vmul.f32 %v13039_v55, %v15865_v41  ;;  %v13041_v26 = vpop.eup %13040 }
 0xb30   : > { %13042 = vtanh.f32 %v8739_v2  ;;  %v8740_v31 = vadd.f32 %v8724_v5, %v8708_v56 }
 0xb31   : > { %13044 = vrcp.f32 %v8580_v22 }
 0xb32   : > { %13046 = vtanh.f32 %v8740_v31 }
 0xb3a   : > { %v13043_v13 = vpop.eup %13042 }
 0xb3b   : > { %v8771_v37 = vmul.f32 %v13043_v13, %v13041_v26  ;;  %v13045_v60 = vpop.eup %13044  ;;  %v9783_v26 = vld [vmem:[%s16034_s7] ss:$0 sm:$0xff] }
 0xb3c   : > { %v13047_v61 = vpop.eup %13046 }
 0xb3d   : > { %v8772_v18 = vmul.f32 %v13047_v61, %v13045_v60 }
 0xb3f   : > { %v8780_v15 = vpack.c.bf16 %v8772_v18, %v8771_v37 }
 0xb41   : > { %9856 = vmatmul.mubr.bf16.gmra.mrb[12].mxu0 %v8780_v15 }
 0xb90   : > { %v9845_v53 = vpop.f32.mrb[0].mxu0 }
 0xb91   : > { %v8895_v20 = vadd.f32 %v9845_v53, %v9774_v17  ;;  %v8886_v8 = vpop.f32.mrb[1].mxu0 }
 0xb92   : > { %v8887_v41 = vadd.f32 %v9774_v17, %v8886_v8  ;;  %v9846_v43 = vpop.f32.mrb[2].mxu0 }
 0xb93   : > { %v8898_v10 = vadd.f32 %v9846_v43, %v9774_v17  ;;  %v8889_v49 = vpop.f32.mrb[3].mxu0  ;;  %v8951_v38 = vmax.f32 %v8895_v20, 0.0 }
 0xb94   : > { %v8890_v28 = vadd.f32 %v9774_v17, %v8889_v49  ;;  %v8949_v1 = vmax.f32 %v8887_v41, 0.0 }
 0xb95   : > { %v8952_v52 = vmax.f32 %v8898_v10, 0.0 }
 0xb96   : > { %v8950_v58 = vmax.f32 %v8890_v28, 0.0 }
 0xb97   : > { %v8966_v47 = vpack.c.bf16 %v8952_v52, %v8951_v38 }
 0xb98   : > { %v8965_v12 = vpack.c.bf16 %v8950_v58, %v8949_v1 }
 0xb9a   : > { %9875 = vmatprep.mubr.bf16.mxu1 %v8965_v12 }
 0xb9b   : > { %9876 = vmatmul.mubr.bf16.vlgmr.msra.gmra.mrb[0].mxu1 %v8966_v47 }
 0xbc2   : > { %v9849_v62 = vpop.f32.mrb[4].mxu0 }
 0xbc3   : > { %v8911_v14 = vadd.f32 %v9849_v62, %v9774_v17  ;;  %v8902_v19 = vpop.f32.mrb[5].mxu0 }
 0xbc4   : > { %v8903_v29 = vadd.f32 %v9774_v17, %v8902_v19  ;;  %v9850_v48 = vpop.f32.mrb[6].mxu0 }
 0xbc5   : > { %v8914_v39 = vadd.f32 %v9850_v48, %v9774_v17  ;;  %v8905_v44 = vpop.f32.mrb[7].mxu0  ;;  %v8955_v9 = vmax.f32 %v8911_v14, 0.0 }
 0xbc6   : > { %v8906_v63 = vadd.f32 %v9774_v17, %v8905_v44  ;;  %v8953_v46 = vmax.f32 %v8903_v29, 0.0 }
 0xbc7   : > { %v8956_v24 = vmax.f32 %v8914_v39, 0.0 }
 0xbc8   : > { %v8954_v32 = vmax.f32 %v8906_v63, 0.0 }
 0xbc9   : > { %v8968_v16 = vpack.c.bf16 %v8956_v24, %v8955_v9 }
 0xbca   : > { %v8967_v11 = vpack.c.bf16 %v8954_v32, %v8953_v46 }
 0xbcc   : > { %9879 = vmatprep.mubr.bf16.mxu1 %v8967_v11 }
 0xbcd   : > { %9880 = vmatmul.mubr.bf16.gmra.mrb[4].mxu1 %v8968_v16 }
 0xbed   : > { %v9853_v0 = vpop.f32.mrb[8].mxu0 }
 0xbee   : > { %v8927_v25 = vadd.f32 %v9853_v0, %v9774_v17  ;;  %v8918_v30 = vpop.f32.mrb[9].mxu0 }
 0xbef   : > { %v8919_v42 = vadd.f32 %v9774_v17, %v8918_v30  ;;  %v9854_v57 = vpop.f32.mrb[10].mxu0 }
 0xbf0   : > { %v8930_v51 = vadd.f32 %v9854_v57, %v9774_v17  ;;  %v8921_v59 = vpop.f32.mrb[11].mxu0  ;;  %v8959_v4 = vmax.f32 %v8927_v25, 0.0 }
 0xbf1   : > { %v8922_v21 = vadd.f32 %v9774_v17, %v8921_v59  ;;  %v8957_v6 = vmax.f32 %v8919_v42, 0.0 }
 0xbf2   : > { %v8960_v23 = vmax.f32 %v8930_v51, 0.0 }
 0xbf3   : > { %v8958_v33 = vmax.f32 %v8922_v21, 0.0 }
 0xbf4   : > { %v8970_v36 = vpack.c.bf16 %v8960_v23, %v8959_v4 }
 0xbf5   : > { %v8969_v7 = vpack.c.bf16 %v8958_v33, %v8957_v6 }
 0xbf7   : > { %9883 = vmatprep.mubr.bf16.mxu1 %v8969_v7 }
 0xbf8   : > { %9884 = vmatmul.mubr.bf16.gmra.mrb[8].mxu1 %v8970_v36 }
 0xc14   : > { %v9857_v40 = vpop.f32.mrb[12].mxu0 }
 0xc15   : > { %v8943_v35 = vadd.f32 %v9857_v40, %v9774_v17  ;;  %v8934_v45 = vpop.f32.mrb[13].mxu0 }
 0xc16   : > { %v8935_v34 = vadd.f32 %v9774_v17, %v8934_v45  ;;  %v9858_v27 = vpop.f32.mrb[14].mxu0 }
 0xc17   : > { %v8946_v54 = vadd.f32 %v9858_v27, %v9774_v17  ;;  %v8937_v3 = vpop.f32.mrb[15].mxu0  ;;  %v8963_v5 = vmax.f32 %v8943_v35, 0.0 }
 0xc18   : > { %v8938_v50 = vadd.f32 %v9774_v17, %v8937_v3  ;;  %v8961_v2 = vmax.f32 %v8935_v34, 0.0 }
 0xc19   : > { %v8964_v55 = vmax.f32 %v8946_v54, 0.0 }
 0xc1a   : > { %v8962_v22 = vmax.f32 %v8938_v50, 0.0 }
 0xc1b   : > { %v8972_v56 = vpack.c.bf16 %v8964_v55, %v8963_v5 }
 0xc1c   : > { %v8971_v31 = vpack.c.bf16 %v8962_v22, %v8961_v2 }
 0xc1e   : > { %9887 = vmatprep.mubr.bf16.mxu1 %v8971_v31 }
 0xc1f   : > { %9888 = vmatmul.mubr.bf16.gmra.mrb[12].mxu1 %v8972_v56 }
 0xc6e   : > { %v9877_v13 = vpop.f32.mrb[0].mxu1 }
 0xc6f   : > { %v9087_v37 = vadd.f32 %v9877_v13, %v9783_v26  ;;  %v9078_v60 = vpop.f32.mrb[1].mxu1 }
 0xc70   : > { %v9079_v61 = vadd.f32 %v9783_v26, %v9078_v60  ;;  %v9878_v18 = vpop.f32.mrb[2].mxu1 }
 0xc71   : > { %9143 = vst [vmem:[%s16006_s29 + $0x10] sm:$0xff] %v9087_v37  ;;  %v9090_v15 = vadd.f32 %v9878_v18, %v9783_v26  ;;  %v9081_v17 = vpop.f32.mrb[3].mxu1 }
 0xc72   : > { %9141 = vst [vmem:[%s16006_s29] sm:$0xff] %v9079_v61  ;;  %v9082_v53 = vadd.f32 %v9783_v26, %v9081_v17 }
 0xc73   : > { %9144 = vst [vmem:[%s16006_s29 + $0x18] sm:$0xff] %v9090_v15 }
 0xc74   : > { %9142 = vst [vmem:[%s16006_s29 + $0x8] sm:$0xff] %v9082_v53 }
 0xca0   : > { %v9881_v20 = vpop.f32.mrb[4].mxu1 }
 0xca1   : > { %v9103_v8 = vadd.f32 %v9881_v20, %v9783_v26  ;;  %v9094_v41 = vpop.f32.mrb[5].mxu1 }
 0xca2   : > { %v9095_v43 = vadd.f32 %v9783_v26, %v9094_v41  ;;  %v9882_v10 = vpop.f32.mrb[6].mxu1 }
 0xca3   : > { %9147 = vst [vmem:[%s16006_s29 + $0x30] sm:$0xff] %v9103_v8  ;;  %v9106_v49 = vadd.f32 %v9882_v10, %v9783_v26  ;;  %v9097_v28 = vpop.f32.mrb[7].mxu1 }
 0xca4   : > { %9145 = vst [vmem:[%s16006_s29 + $0x20] sm:$0xff] %v9095_v43  ;;  %v9098_v38 = vadd.f32 %v9783_v26, %v9097_v28 }
 0xca5   : > { %9148 = vst [vmem:[%s16006_s29 + $0x38] sm:$0xff] %v9106_v49 }
 0xca6   : > { %9146 = vst [vmem:[%s16006_s29 + $0x28] sm:$0xff] %v9098_v38 }
 0xccb   : > { %v9885_v52 = vpop.f32.mrb[8].mxu1 }
 0xccc   : > { %v9119_v1 = vadd.f32 %v9885_v52, %v9783_v26  ;;  %v9110_v58 = vpop.f32.mrb[9].mxu1 }
 0xccd   : > { %v9111_v47 = vadd.f32 %v9783_v26, %v9110_v58  ;;  %v9886_v12 = vpop.f32.mrb[10].mxu1 }
 0xcce   : > { %9151 = vst [vmem:[%s16006_s29 + $0x50] sm:$0xff] %v9119_v1  ;;  %v9122_v62 = vadd.f32 %v9886_v12, %v9783_v26  ;;  %v9113_v14 = vpop.f32.mrb[11].mxu1 }
 0xccf   : > { %9149 = vst [vmem:[%s16006_s29 + $0x40] sm:$0xff] %v9111_v47  ;;  %v9114_v19 = vadd.f32 %v9783_v26, %v9113_v14 }
 0xcd0   : > { %9152 = vst [vmem:[%s16006_s29 + $0x58] sm:$0xff] %v9122_v62 }
 0xcd1   : > { %9150 = vst [vmem:[%s16006_s29 + $0x48] sm:$0xff] %v9114_v19 }
 0xcf2   : > { %v9889_v29 = vpop.f32.mrb[12].mxu1 }
 0xcf3   : > { %v9135_v48 = vadd.f32 %v9889_v29, %v9783_v26  ;;  %v9126_v39 = vpop.f32.mrb[13].mxu1 }
 0xcf4   : > { %v9127_v44 = vadd.f32 %v9783_v26, %v9126_v39  ;;  %v9890_v63 = vpop.f32.mrb[14].mxu1 }
 0xcf5   : > { %9155 = vst [vmem:[%s16006_s29 + $0x70] sm:$0xff] %v9135_v48  ;;  %v9138_v9 = vadd.f32 %v9890_v63, %v9783_v26  ;;  %v9129_v24 = vpop.f32.mrb[15].mxu1 }
 0xcf6   : > { %9153 = vst [vmem:[%s16006_s29 + $0x60] sm:$0xff] %v9127_v44  ;;  %v9130_v46 = vadd.f32 %v9783_v26, %v9129_v24 }
 0xcf7   : > { %9156 = vst [vmem:[%s16006_s29 + $0x78] sm:$0xff] %v9138_v9 }
 0xcf8   : > { %9154 = vst [vmem:[%s16006_s29 + $0x68] sm:$0xff] %v9130_v46 }
 0xcf9 PF: > { %s18_s27 = sadd.s32 1, %s13224_s27  }
 0xcfa   : > { %p15_p5 = scmp.ge.s32.totalorder %s18_s27, 4  }
 0xcfc   :  { %17 = sbr.rel (!%p15_p5) target bundleno = 1 (0x1), region = 82 }

</bundles_post_ra>
